<compile_context>
chip_gen: v5e
topology: v5e:2x2
jax: 0.10.0
libtpu: 0.0.40
codegen_flags: <defaults>
</compile_context>

<pallas_src>
import jax
import jax.numpy as jnp
from jax.experimental import pallas as pl
from jax.experimental.pallas import tpu as pltpu


def cnn_kernel(ids_ref, emb_ref, wp_ref, bp_ref, mask_ref, fcw_ref, fcb_ref,
               out_ref):
    """One batch tile.

    ids_ref : (tb*t_out_pad, fs_max) int32  windowed token ids (im2col on ids)
    emb_ref : (V, E)                 bf16   VMEM-resident embedding table
    wp_ref  : (fs_max*E, 2*nf)       bf16   both conv branches, tap-major
    bp_ref  : (1, 2*nf)              f32    conv biases
    mask_ref: (t_out_pad, 2*nf)      f32    0 / -inf branch-validity + pad mask
    fcw_ref : (1, 2*nf)              f32    fc weight (row)
    fcb_ref : (1, 1)                 f32    fc bias
    out_ref : (1, tb)                f32    sigmoid(logits), lane-dense
    """
    m2, fs_max = ids_ref.shape
    v, e = emb_ref.shape
    n2 = wp_ref.shape[1]
    t_out_pad = mask_ref.shape[0]
    tb = out_ref.shape[1]

    emb = emb_ref[...]
    # Hoisted out of the tap loop (JAX does not CSE broadcasts/iotas).
    vocab_iota = jax.lax.broadcasted_iota(jnp.int32, (m2, v), 1)

    # Fused embedding gather (one-hot MXU matmul) + conv matmul per tap,
    # accumulated in f32.  Tall 2-D matmuls: M = tb * t_out_pad rows, so the
    # MXU sees full sublane rows instead of per-sample 6-row pushes, and no
    # fs_max-wide im2col activation temp is ever materialized.
    acc = None
    for k in range(fs_max):                       # static unroll, fs_max small
        onehot = jnp.where(ids_ref[:, k:k + 1] == vocab_iota,
                           1.0, 0.0).astype(jnp.bfloat16)           # (M, V)
        xk = jnp.dot(onehot, emb,
                     preferred_element_type=jnp.float32
                     ).astype(jnp.bfloat16)                          # (M, E)
        contrib = jnp.dot(xk, wp_ref[k * e:(k + 1) * e, :],
                          preferred_element_type=jnp.float32)        # (M, 2nf)
        acc = contrib if acc is None else acc + contrib

    # Mask invalid time positions (per-branch conv range + t_out_pad pad rows),
    # max-pool over time; conv bias + ReLU applied after the pool (bias is
    # constant over time, so the numerics are identical).
    acc3 = acc.reshape(tb, t_out_pad, n2) + mask_ref[...]
    pooled = jnp.max(acc3, axis=1)                                    # (tb, 2nf)
    feat = jnp.maximum(pooled + bp_ref[...], 0.0)

    # fc(2*nf -> 1), emitted directly in lane-dense (1, tb) layout.
    logits = jax.lax.dot_general(fcw_ref[...], feat,
                                 (((1,), (1,)), ((), ())),
                                 preferred_element_type=jnp.float32)  # (1, tb)
    out_ref[...] = jax.nn.sigmoid(logits + fcb_ref[...])


def cnn_forward(token_ids, emb_table, w1, b1, w2, b2, fcw, fcb,
                *, fs1, fs2, batch_tile=128):
    """token_ids: (S, B) int32 (seq-first, like torchtext)."""
    S, B = token_ids.shape
    V, E = emb_table.shape
    nf = w1.shape[-1]
    fs_max, fs_min = max(fs1, fs2), min(fs1, fs2)
    assert S >= fs_max, "sequence shorter than a filter -> empty conv output"
    assert fcw.shape[0] == 2 * nf, "module requires emb_dim == 2 * n_filters"

    t_out = S - fs_min + 1
    t_out_pad = pl.cdiv(t_out, 8) * 8             # sublane-align matmul rows
    s_req = t_out_pad + fs_max - 1                # ids needed per sample

    tb = batch_tile
    assert tb % 8 == 0, "batch tile must be sublane-aligned (x8)"
    b_pad = pl.cdiv(B, tb) * tb
    n_tiles = b_pad // tb
    if n_tiles > 1:
        assert tb % 128 == 0, "multi-step grid needs a lane-aligned output tile"

    # Only tiny int32 token ids go through HBM; they are pre-windowed so the
    # kernel's matmuls are plain tall 2-D ops.  Pad token id 0 is harmless:
    # taps beyond a branch's width hit zero weights and times past the valid
    # conv range are -inf masked before the max-pool.
    ids = jnp.pad(token_ids.T.astype(jnp.int32),
                  ((0, b_pad - B), (0, s_req - S)))                # (b_pad, s_req)
    ids_win = jnp.stack([ids[:, k:k + t_out_pad] for k in range(fs_max)],
                        axis=-1)                                   # (b_pad, t_out_pad, fs_max)
    ids_win = ids_win.reshape(b_pad * t_out_pad, fs_max)

    # TODO(synk): for vocab tables too large for VMEM, keep emb_table at
    # memory_space=pl.ANY and DMA row-gather instead of the one-hot matmul.
    emb_bf = emb_table.astype(jnp.bfloat16)

    def pack(w, fs):   # zero-pad taps so both branches share fs_max
        return jnp.pad(w, ((0, fs_max - fs), (0, 0), (0, 0))).reshape(fs_max * E, nf)
    wp = jnp.concatenate([pack(w1, fs1), pack(w2, fs2)], axis=1).astype(jnp.bfloat16)

    bp = jnp.concatenate([b1, b2], axis=1).astype(jnp.float32)     # (1, 2nf)

    # 0 / -inf mask covering per-branch valid conv range AND t_out_pad pad rows.
    t_idx = jnp.arange(t_out_pad)[:, None]
    limits = jnp.concatenate([jnp.full((nf,), S - fs1),
                              jnp.full((nf,), S - fs2)])[None, :]
    mask = jnp.where(t_idx <= limits, 0.0, -jnp.inf).astype(jnp.float32)

    fcw_row = fcw.T.astype(jnp.float32)            # (1, 2nf)
    fcb = fcb.astype(jnp.float32)                  # (1, 1)

    out = pl.pallas_call(
        cnn_kernel,
        out_shape=jax.ShapeDtypeStruct((1, b_pad), jnp.float32),
        grid=(n_tiles,),
        in_specs=[
            pl.BlockSpec((tb * t_out_pad, fs_max), lambda i: (i, 0)),
            pl.BlockSpec((V, E), lambda i: (0, 0)),
            pl.BlockSpec((fs_max * E, 2 * nf), lambda i: (0, 0)),
            pl.BlockSpec((1, 2 * nf), lambda i: (0, 0)),
            pl.BlockSpec((t_out_pad, 2 * nf), lambda i: (0, 0)),
            pl.BlockSpec((1, 2 * nf), lambda i: (0, 0)),
            pl.BlockSpec((1, 1), lambda i: (0, 0)),
        ],
        out_specs=pl.BlockSpec((1, tb), lambda i: (0, i)),
        compiler_params=pltpu.CompilerParams(
            dimension_semantics=("parallel",),
            # Re-derive for very large tiles on v7x (64 MiB physical VMEM).
            vmem_limit_bytes=64 * 1024 * 1024),
    )(ids_win, emb_bf, wp, bp, mask, fcw_row, fcb)
    return out[0, :B]                               # .squeeze() -> (B,)


def cnn_reference(token_ids, emb_table, w1, b1, w2, b2, fcw, fcb, *, fs1, fs2):
    """Pure-JAX f32 reference of the PyTorch module's math."""
    x = jnp.transpose(emb_table[token_ids], (1, 0, 2)).astype(jnp.float32)
    B, S, E = x.shape

    def branch(w, b, fs):
        t_out = S - fs + 1
        acc = sum(jnp.einsum("bte,ef->btf", x[:, k:k + t_out, :], w[k])
                  for k in range(fs)) + b
        return jnp.maximum(jnp.max(acc, axis=1), 0.0)

    feat = jnp.concatenate([branch(w1, b1, fs1), branch(w2, b2, fs2)], axis=1)
    return jax.nn.sigmoid(feat @ fcw + fcb)[:, 0]


if __name__ == "__main__":
    # Module constraint: fc = Linear(emb_dim, 1) is applied to the concat of
    # two n_filters branches => emb_dim == 2 * n_filters.
    V = 64            # vocab size
    E = 32            # embedding_dim
    NF = 16           # n_filters (2 * NF == E)
    FS = (3, 4)       # filter_sizes
    S, B = 8, 200     # seq len, batch
    TB = 128          # batch tile -> b_pad = 256, 2 pipelined/parallel steps

    key = jax.random.PRNGKey(0)
    k_emb, k_w1, k_b1, k_w2, k_b2, k_fcw, k_fcb, k_tok = jax.random.split(key, 8)

    emb_table = jax.random.normal(k_emb, (V, E), jnp.float32)
    w1 = 0.1 * jax.random.normal(k_w1, (FS[0], E, NF), jnp.float32)
    b1 = 0.1 * jax.random.normal(k_b1, (1, NF), jnp.float32)
    w2 = 0.1 * jax.random.normal(k_w2, (FS[1], E, NF), jnp.float32)
    b2 = 0.1 * jax.random.normal(k_b2, (1, NF), jnp.float32)
    fcw = 0.1 * jax.random.normal(k_fcw, (E, 1), jnp.float32)      # fc.weight.T
    fcb = 0.1 * jax.random.normal(k_fcb, (1, 1), jnp.float32)

    token_ids = jax.random.randint(k_tok, (S, B), 0, V, dtype=jnp.int32)

    out = cnn_forward(token_ids, emb_table, w1, b1, w2, b2, fcw, fcb,
                      fs1=FS[0], fs2=FS[1], batch_tile=TB)
    out = jax.block_until_ready(out)

    ref = cnn_reference(token_ids, emb_table, w1, b1, w2, b2, fcw, fcb,
                        fs1=FS[0], fs2=FS[1])
    assert out.shape == (B,)
    # bf16 MXU inputs (f32 accumulation) -> slightly looser tolerance.
    assert jnp.allclose(out, ref, atol=2e-2, rtol=2e-2), (out, ref)

    print("KERNEL_OK")
</pallas_src>

<mosaic_0001>
module attributes {stable_mosaic.version = 11 : i64} {
  func.func @cnn_kernel(%arg0: i32, %arg1: memref<1024x4xi32, #tpu.memory_space<vmem>>, %arg2: memref<64x32xbf16, #tpu.memory_space<vmem>>, %arg3: memref<128x32xbf16, #tpu.memory_space<vmem>>, %arg4: memref<1x32xf32, #tpu.memory_space<vmem>>, %arg5: memref<8x32xf32, #tpu.memory_space<vmem>>, %arg6: memref<1x32xf32, #tpu.memory_space<vmem>>, %arg7: memref<1x1xf32, #tpu.memory_space<vmem>>, %arg8: memref<1x128xf32, #tpu.memory_space<vmem>>) attributes {dimension_semantics = [#tpu.dimension_semantics<parallel>], iteration_bounds = array<i64: 2>, scalar_prefetch = 0 : i64, scratch_operands = 0 : i64, tpu.core_type = #tpu.core_type<tc>, window_params = [{transform_indices = @transform_0, window_bounds = array<i64: 1024, 4>}, {pipeline_mode = #tpu.pipeline_mode<synchronous>, transform_indices = @transform_1, window_bounds = array<i64: 64, 32>}, {pipeline_mode = #tpu.pipeline_mode<synchronous>, transform_indices = @transform_2, window_bounds = array<i64: 128, 32>}, {pipeline_mode = #tpu.pipeline_mode<synchronous>, transform_indices = @transform_3, window_bounds = array<i64: 1, 32>}, {pipeline_mode = #tpu.pipeline_mode<synchronous>, transform_indices = @transform_4, window_bounds = array<i64: 8, 32>}, {pipeline_mode = #tpu.pipeline_mode<synchronous>, transform_indices = @transform_5, window_bounds = array<i64: 1, 32>}, {pipeline_mode = #tpu.pipeline_mode<synchronous>, transform_indices = @transform_6, window_bounds = array<i64: 1, 1>}, {transform_indices = @transform_7, window_bounds = array<i64: 1, 128>}]} {
    %c0 = arith.constant 0 : index
    %c0_0 = arith.constant 0 : index
    %0 = vector.load %arg2[%c0, %c0_0] : memref<64x32xbf16, #tpu.memory_space<vmem>>, vector<64x32xbf16>
    %1 = tpu.iota {dimensions = array<i32: 1>} : vector<1024x64xi32>
    %c0_1 = arith.constant 0 : index
    %c0_2 = arith.constant 0 : index
    %2 = vector.load %arg1[%c0_1, %c0_2] : memref<1024x4xi32, #tpu.memory_space<vmem>>, vector<1024x1xi32>
    %3 = vector.broadcast %2 : vector<1024x1xi32> to vector<1024x64xi32>
    %4 = arith.cmpi eq, %3, %1 : vector<1024x64xi32>
    %cst = arith.constant 1.000000e+00 : f32
    %cst_3 = arith.constant 0.000000e+00 : f32
    %5 = vector.broadcast %cst : f32 to vector<1024x64xf32>
    %6 = vector.broadcast %cst_3 : f32 to vector<1024x64xf32>
    %7 = arith.select %4, %5, %6 : vector<1024x64xi1>, vector<1024x64xf32>
    %8 = arith.truncf %7 : vector<1024x64xf32> to vector<1024x64xbf16>
    %cst_4 = arith.constant dense<0.000000e+00> : vector<1024x32xf32>
    %9 = tpu.matmul %8, %0, %cst_4 {dimension_numbers = #tpu.dot_dimension_numbers<[1], [0], [0], [1], [0, 0, 1, 1], [], []>} : vector<1024x64xbf16>, vector<64x32xbf16>, vector<1024x32xf32> -> vector<1024x32xf32>
    %10 = arith.truncf %9 : vector<1024x32xf32> to vector<1024x32xbf16>
    %c0_5 = arith.constant 0 : index
    %c0_6 = arith.constant 0 : index
    %11 = vector.load %arg3[%c0_5, %c0_6] : memref<128x32xbf16, #tpu.memory_space<vmem>>, vector<32x32xbf16>
    %cst_7 = arith.constant dense<0.000000e+00> : vector<1024x32xf32>
    %12 = tpu.matmul %10, %11, %cst_7 {dimension_numbers = #tpu.dot_dimension_numbers<[1], [0], [0], [1], [0, 0, 1, 1], [], []>} : vector<1024x32xbf16>, vector<32x32xbf16>, vector<1024x32xf32> -> vector<1024x32xf32>
    %c0_8 = arith.constant 0 : index
    %c1 = arith.constant 1 : index
    %13 = vector.load %arg1[%c0_8, %c1] : memref<1024x4xi32, #tpu.memory_space<vmem>>, vector<1024x1xi32>
    %14 = vector.broadcast %13 : vector<1024x1xi32> to vector<1024x64xi32>
    %15 = arith.cmpi eq, %14, %1 : vector<1024x64xi32>
    %cst_9 = arith.constant 1.000000e+00 : f32
    %cst_10 = arith.constant 0.000000e+00 : f32
    %16 = vector.broadcast %cst_9 : f32 to vector<1024x64xf32>
    %17 = vector.broadcast %cst_10 : f32 to vector<1024x64xf32>
    %18 = arith.select %15, %16, %17 : vector<1024x64xi1>, vector<1024x64xf32>
    %19 = arith.truncf %18 : vector<1024x64xf32> to vector<1024x64xbf16>
    %cst_11 = arith.constant dense<0.000000e+00> : vector<1024x32xf32>
    %20 = tpu.matmul %19, %0, %cst_11 {dimension_numbers = #tpu.dot_dimension_numbers<[1], [0], [0], [1], [0, 0, 1, 1], [], []>} : vector<1024x64xbf16>, vector<64x32xbf16>, vector<1024x32xf32> -> vector<1024x32xf32>
    %21 = arith.truncf %20 : vector<1024x32xf32> to vector<1024x32xbf16>
    %c32 = arith.constant 32 : index
    %c0_12 = arith.constant 0 : index
    %22 = vector.load %arg3[%c32, %c0_12] : memref<128x32xbf16, #tpu.memory_space<vmem>>, vector<32x32xbf16>
    %cst_13 = arith.constant dense<0.000000e+00> : vector<1024x32xf32>
    %23 = tpu.matmul %21, %22, %cst_13 {dimension_numbers = #tpu.dot_dimension_numbers<[1], [0], [0], [1], [0, 0, 1, 1], [], []>} : vector<1024x32xbf16>, vector<32x32xbf16>, vector<1024x32xf32> -> vector<1024x32xf32>
    %24 = arith.addf %12, %23 : vector<1024x32xf32>
    %c0_14 = arith.constant 0 : index
    %c2 = arith.constant 2 : index
    %25 = vector.load %arg1[%c0_14, %c2] : memref<1024x4xi32, #tpu.memory_space<vmem>>, vector<1024x1xi32>
    %26 = vector.broadcast %25 : vector<1024x1xi32> to vector<1024x64xi32>
    %27 = arith.cmpi eq, %26, %1 : vector<1024x64xi32>
    %cst_15 = arith.constant 1.000000e+00 : f32
    %cst_16 = arith.constant 0.000000e+00 : f32
    %28 = vector.broadcast %cst_15 : f32 to vector<1024x64xf32>
    %29 = vector.broadcast %cst_16 : f32 to vector<1024x64xf32>
    %30 = arith.select %27, %28, %29 : vector<1024x64xi1>, vector<1024x64xf32>
    %31 = arith.truncf %30 : vector<1024x64xf32> to vector<1024x64xbf16>
    %cst_17 = arith.constant dense<0.000000e+00> : vector<1024x32xf32>
    %32 = tpu.matmul %31, %0, %cst_17 {dimension_numbers = #tpu.dot_dimension_numbers<[1], [0], [0], [1], [0, 0, 1, 1], [], []>} : vector<1024x64xbf16>, vector<64x32xbf16>, vector<1024x32xf32> -> vector<1024x32xf32>
    %33 = arith.truncf %32 : vector<1024x32xf32> to vector<1024x32xbf16>
    %c64 = arith.constant 64 : index
    %c0_18 = arith.constant 0 : index
    %34 = vector.load %arg3[%c64, %c0_18] : memref<128x32xbf16, #tpu.memory_space<vmem>>, vector<32x32xbf16>
    %cst_19 = arith.constant dense<0.000000e+00> : vector<1024x32xf32>
    %35 = tpu.matmul %33, %34, %cst_19 {dimension_numbers = #tpu.dot_dimension_numbers<[1], [0], [0], [1], [0, 0, 1, 1], [], []>} : vector<1024x32xbf16>, vector<32x32xbf16>, vector<1024x32xf32> -> vector<1024x32xf32>
    %36 = arith.addf %24, %35 : vector<1024x32xf32>
    %c0_20 = arith.constant 0 : index
    %c3 = arith.constant 3 : index
    %37 = vector.load %arg1[%c0_20, %c3] : memref<1024x4xi32, #tpu.memory_space<vmem>>, vector<1024x1xi32>
    %38 = vector.broadcast %37 : vector<1024x1xi32> to vector<1024x64xi32>
    %39 = arith.cmpi eq, %38, %1 : vector<1024x64xi32>
    %cst_21 = arith.constant 1.000000e+00 : f32
    %cst_22 = arith.constant 0.000000e+00 : f32
    %40 = vector.broadcast %cst_21 : f32 to vector<1024x64xf32>
    %41 = vector.broadcast %cst_22 : f32 to vector<1024x64xf32>
    %42 = arith.select %39, %40, %41 : vector<1024x64xi1>, vector<1024x64xf32>
    %43 = arith.truncf %42 : vector<1024x64xf32> to vector<1024x64xbf16>
    %cst_23 = arith.constant dense<0.000000e+00> : vector<1024x32xf32>
    %44 = tpu.matmul %43, %0, %cst_23 {dimension_numbers = #tpu.dot_dimension_numbers<[1], [0], [0], [1], [0, 0, 1, 1], [], []>} : vector<1024x64xbf16>, vector<64x32xbf16>, vector<1024x32xf32> -> vector<1024x32xf32>
    %45 = arith.truncf %44 : vector<1024x32xf32> to vector<1024x32xbf16>
    %c96 = arith.constant 96 : index
    %c0_24 = arith.constant 0 : index
    %46 = vector.load %arg3[%c96, %c0_24] : memref<128x32xbf16, #tpu.memory_space<vmem>>, vector<32x32xbf16>
    %cst_25 = arith.constant dense<0.000000e+00> : vector<1024x32xf32>
    %47 = tpu.matmul %45, %46, %cst_25 {dimension_numbers = #tpu.dot_dimension_numbers<[1], [0], [0], [1], [0, 0, 1, 1], [], []>} : vector<1024x32xbf16>, vector<32x32xbf16>, vector<1024x32xf32> -> vector<1024x32xf32>
    %48 = arith.addf %36, %47 : vector<1024x32xf32>
    %49 = vector.shape_cast %48 : vector<1024x32xf32> to vector<128x8x32xf32>
    %c0_26 = arith.constant 0 : index
    %c0_27 = arith.constant 0 : index
    %50 = vector.load %arg5[%c0_26, %c0_27] : memref<8x32xf32, #tpu.memory_space<vmem>>, vector<8x32xf32>
    %51 = vector.shape_cast %50 : vector<8x32xf32> to vector<1x8x32xf32>
    %52 = vector.broadcast %51 : vector<1x8x32xf32> to vector<128x8x32xf32>
    %53 = arith.addf %49, %52 : vector<128x8x32xf32>
    %cst_28 = arith.constant dense<0xFF800000> : vector<128x32xf32>
    %54 = vector.multi_reduction <maximumf>, %53, %cst_28 [1] : vector<128x8x32xf32> to vector<128x32xf32>
    %c0_29 = arith.constant 0 : index
    %c0_30 = arith.constant 0 : index
    %55 = vector.load %arg4[%c0_29, %c0_30] : memref<1x32xf32, #tpu.memory_space<vmem>>, vector<1x32xf32>
    %56 = vector.broadcast %55 : vector<1x32xf32> to vector<128x32xf32>
    %57 = arith.addf %54, %56 : vector<128x32xf32>
    %cst_31 = arith.constant 0.000000e+00 : f32
    %58 = vector.broadcast %cst_31 : f32 to vector<128x32xf32>
    %59 = arith.maximumf %57, %58 : vector<128x32xf32>
    %c0_32 = arith.constant 0 : index
    %c0_33 = arith.constant 0 : index
    %60 = vector.load %arg6[%c0_32, %c0_33] : memref<1x32xf32, #tpu.memory_space<vmem>>, vector<1x32xf32>
    %cst_34 = arith.constant dense<0.000000e+00> : vector<1x128xf32>
    %61 = tpu.matmul %60, %59, %cst_34 {dimension_numbers = #tpu.dot_dimension_numbers<[1], [1], [0], [0], [0, 0, 1, 0], [], []>} : vector<1x32xf32>, vector<128x32xf32>, vector<1x128xf32> -> vector<1x128xf32>
    %c0_35 = arith.constant 0 : index
    %c0_36 = arith.constant 0 : index
    %62 = vector.load %arg7[%c0_35, %c0_36] : memref<1x1xf32, #tpu.memory_space<vmem>>, vector<1x1xf32>
    %63 = vector.broadcast %62 : vector<1x1xf32> to vector<1x128xf32>
    %64 = arith.addf %61, %63 : vector<1x128xf32>
    %65 = arith.negf %64 : vector<1x128xf32>
    %66 = math.exp %65 : vector<1x128xf32>
    %cst_37 = arith.constant 1.000000e+00 : f32
    %67 = vector.broadcast %cst_37 : f32 to vector<1x128xf32>
    %68 = arith.addf %67, %66 : vector<1x128xf32>
    %69 = arith.divf %67, %68 : vector<1x128xf32>
    %c0_38 = arith.constant 0 : index
    %c0_39 = arith.constant 0 : index
    %70 = vector.load %arg8[%c0_38, %c0_39] : memref<1x128xf32, #tpu.memory_space<vmem>>, vector<1x128xf32>
    tpu.vector_store %arg8[%c0_38, %c0_39], %69 {strides = array<i32>} : memref<1x128xf32, #tpu.memory_space<vmem>>, vector<1x128xf32>,
    return
  }
  func.func @transform_0(%arg0: i32) -> (i32, i32) {
    %c0_i32 = arith.constant 0 : i32
    %c0_i32_0 = arith.constant 0 : i32
    return %arg0, %c0_i32 : i32, i32
  }
  func.func @transform_1(%arg0: i32) -> (i32, i32) {
    %c0_i32 = arith.constant 0 : i32
    %c0_i32_0 = arith.constant 0 : i32
    %c0_i32_1 = arith.constant 0 : i32
    return %c0_i32, %c0_i32_0 : i32, i32
  }
  func.func @transform_2(%arg0: i32) -> (i32, i32) {
    %c0_i32 = arith.constant 0 : i32
    %c0_i32_0 = arith.constant 0 : i32
    %c0_i32_1 = arith.constant 0 : i32
    return %c0_i32, %c0_i32_0 : i32, i32
  }
  func.func @transform_3(%arg0: i32) -> (i32, i32) {
    %c0_i32 = arith.constant 0 : i32
    %c0_i32_0 = arith.constant 0 : i32
    %c0_i32_1 = arith.constant 0 : i32
    return %c0_i32, %c0_i32_0 : i32, i32
  }
  func.func @transform_4(%arg0: i32) -> (i32, i32) {
    %c0_i32 = arith.constant 0 : i32
    %c0_i32_0 = arith.constant 0 : i32
    %c0_i32_1 = arith.constant 0 : i32
    return %c0_i32, %c0_i32_0 : i32, i32
  }
  func.func @transform_5(%arg0: i32) -> (i32, i32) {
    %c0_i32 = arith.constant 0 : i32
    %c0_i32_0 = arith.constant 0 : i32
    %c0_i32_1 = arith.constant 0 : i32
    return %c0_i32, %c0_i32_0 : i32, i32
  }
  func.func @transform_6(%arg0: i32) -> (i32, i32) {
    %c0_i32 = arith.constant 0 : i32
    %c0_i32_0 = arith.constant 0 : i32
    %c0_i32_1 = arith.constant 0 : i32
    return %c0_i32, %c0_i32_0 : i32, i32
  }
  func.func @transform_7(%arg0: i32) -> (i32, i32) {
    %c0_i32 = arith.constant 0 : i32
    %c0_i32_0 = arith.constant 0 : i32
    return %c0_i32, %arg0 : i32, i32
  }
}

</mosaic_0001>

<bundles_post_ra>
// kernel: tpu_custom_call.1
= control target key start
LH: loop header
LB: loop body
LE: loop exit
PB: predicated region body
PF: predicated region fallthrough
CT: control target
= control target key end

     0   :  { %s16315_s0 = inlined_call_operand.vmem [shape: s32[2048,4], index: 0, kind: input, shape index: {}]   ;;  %s16316_s1 = inlined_call_operand.vmem [shape: bf16[64,32], index: 1, kind: input, shape index: {}]   ;;  %s16317_s2 = inlined_call_operand.vmem [shape: bf16[128,32], index: 2, kind: input, shape index: {}]   ;;  %s16318_s3 = inlined_call_operand.vmem [shape: f32[1,32], index: 3, kind: input, shape index: {}]   ;;  %s16319_s4 = inlined_call_operand.vmem [shape: f32[8,32], index: 4, kind: input, shape index: {}]   ;;  %s16320_s5 = inlined_call_operand.vmem [shape: f32[1,32], index: 5, kind: input, shape index: {}]   ;;  %s16321_s6 = inlined_call_operand.<no memory space> [shape: f32[1,1], index: 6, kind: input, shape index: {}]   ;;  %s16322_s7 = inlined_call_operand.hbm [shape: f32[1,256], index: 7, kind: output, shape index: {}]  }
   0x1   :  { %v12_v0 = vstv %s16321_s6 }
   0x2   :  { %13 = vst [vmem:[#allocation2] sm:$0x1] %v12_v0 }
   0x3   :  { %14 = vsyncpa [#allocation4], 0 }
   0x4   :  { %16 = vsyncpa [#allocation4 + $0x1], 0  ;;  %s10970_s26 = smov 0   ;;  %s10972_s27 = smov 0  }
   0x5   :  { %s10974_s28 = smov 0   ;;  %s10976_s29 = smov 0  }
   0x6 LB: > { %s10991_s6 = sadd.s32 4294967295, %s10920_s29   ;;  %s9800_s30 = sadd.s32 4294967294, %s10920_s29   ;;  %s10920_s29 = sphi %s10976_s29, %s16778_s29   ;;  %s10916_s28 = sphi %s10974_s28, %s16777_s28   ;;  %s10912_s27 = sphi %s10972_s27, %s16776_s27   ;;  %s10908_s26 = sphi %s10970_s26, %s16775_s26  }
   0x7   : > { %s10995_s8 = sadd.s32 1, %s10920_s29   ;;  %s181_s9 = sadd.s32 1, %s10916_s28 }
   0x8   : > { %s178_s10 = ssub.s32 %s10920_s29, %s10995_s8  ;;  %p191_p0 = scmp.ne.s32.totalorder %s10916_s28, %s10912_s27 }
   0x9   : > { %p179_p1 = scmp.eq.s32.totalorder %s178_s10, 0  ;;  %p192_p2 = scmp.eq.s32.totalorder %s10991_s6, 1 }
   0xa   : > { %p197_p3 = scmp.ne.s32.totalorder %s10912_s27, %s10908_s26  ;;  %p198_p4 = scmp.eq.s32.totalorder %s9800_s30, 1 }
   0xb   : > { %s11006_s11 = scalar_select %p179_p1, %s10916_s28, %s181_s9  }
   0xc   : > { %p11008_p5 = por %p192_p2, %p191_p0  ;;  %p11012_p6 = por %p198_p4, %p197_p3 }
   0xd   : > { %p9803_p7 = scmp.ge.s32.totalorder %s10920_s29, 1  ;;  %p243_p8 = scmp.lt.s32.totalorder %s10920_s29, 3 }
   0xf   : > { %p244_p9 = pnand %p9803_p7, %p243_p8 }
  0x11   : > { %247 = sbr.rel (%p244_p9) target bundleno = 2998 (0xbb6), region = 48 }
  0x16   : > { %s9804_s14 = sshll.u32 %s10991_s6, 7  ;;  %v16323_v1 = vmov 0   ;;  %v11147_v32 = vld [vmem:[%s16316_s1 + $0x18] sm:$0xff]  ;;  %v16325_v35 = vmov 1   ;;  %v11163_v36 = vld [vmem:[%s16316_s1 + $0x10] sm:$0xff]  ;;  %v11175_v39 = vld [vmem:[%s16316_s1 + $0x8] sm:$0xff]  ;;  %v289_v50 = vlaneseq  ;;  %s9741_s17 = scalar_lea.hbm %s16322_s7, %s10991_s6 }
  0x17   : > { %10444 = vset.pattern.permute.xlu2 %v16323_v1  ;;  %10443 = vset.pattern.permute.xlu1 %v16323_v1  ;;  %p275_p10 = scmp.lt.s32.totalorder %s9804_s14, 255  ;;  %16342 = vst [vmem:[#allocation6_spill] sm:$0xff] %v11163_v36  ;;  %v11188_v41 = vld [vmem:[%s16316_s1] sm:$0xff]  ;;  %v16329_v59 = vmov 0.0   ;;  %vm1147_vm2 = vcmask 523264   ;;  %s9745_s21 = sshll.u32 %s9741_s17, 4  ;;  %s9746_s21 = int_to_ptr.hbm [resolvable:$true] %s9745_s21 }
  0x18   : > { %10442 = vset.pattern.permute.xlu0 %v16323_v1  ;;  %1344 = vmatpush.bf16.msra.mxu0 %v11147_v32  ;;  %16343 = vst [vmem:[#allocation7_spill] sm:$0xff] %v11175_v39  ;;  %v11235_v56 = vand.u32 127, %v289_v50  ;;  %s10872_s6 = sshra.s32 %s9746_s21, 4  ;;  %s10878_s30 = scalar_lea.hbm %s16322_s7, 2  ;;  %s10873_s6 = int_to_ptr.hbm [resolvable:$true] %s10872_s6 }
  0x19   : > { %s16780_s14 = smov (!%p275_p10, %s9804_s14), 255  ;;  %2637 = vmatpush.bf16.msra.mxu1 %v11147_v32  ;;  %16344 = vst [vmem:[#allocation8_spill] sm:$0xff] %v11188_v41  ;;  %s10874_s23 = scalar_lea.hbm %s10873_s6, 1 }
  0x1a   : > { %s9805_s15 = sshll.u32 %s16780_s14, 3  ;;  %s272_s14 = sand.u32 1, %s10912_s27  }
  0x1b   : > { %s11025_s18 = scalar_lea.vmem %s16315_s0, %s9805_s15  ;;  %s273_s19 = scalar_lea.vmem [#allocation3], %s272_s14 }
  0x1c   : > { %v11028_v2 = vld [vmem:[%s11025_s18 + $0x20] sm:$0xff]  ;;  %v11031_v3 = vld [vmem:[%s11025_s18 + $0x10] sm:$0xff]  ;;  %v11040_v5 = vld [vmem:[%s11025_s18 + $0x28] sm:$0xff]  ;;  %1345 = vmatpush.bf16.msra.mxu0 %v11163_v36  ;;  %s9743_s20 = sshll.u32 %s273_s19, 4  ;;  %s9733_s22 = scalar_lea.sflag [#allocation4], %s272_s14  ;;  %s9744_s20 = int_to_ptr.vmem [resolvable:$true] %s9743_s20 }
  0x1d   : > { %v11034_v4 = vld [vmem:[%s11025_s18] sm:$0xff]  ;;  %432 = vperm.xlu2 %10444, %v11028_v2   ;;  %426 = vperm.xlu1 %10443, %v11031_v3   ;;  %v11043_v6 = vld [vmem:[%s11025_s18 + $0x18] sm:$0xff]  ;;  %v292_v7 = vld [vmem:[%s11025_s18 + $0x8] sm:$0xff]  ;;  %p10875_p11 = scmp.ne.s32.totalorder %s10873_s6, %s10874_s23  ;;  %p10879_p0 = scmp.lt.s32.totalorder %s10873_s6, %s16322_s7 }
  0x1e   : > { %420 = vperm.xlu0 %10442, %v11034_v4   ;;  %v11049_v8 = vld [vmem:[%s11025_s18 + $0x40] sm:$0xff]  ;;  %v11052_v9 = vld [vmem:[%s11025_s18 + $0x38] sm:$0xff]  ;;  %v11055_v10 = vld [vmem:[%s11025_s18 + $0x30] sm:$0xff]  ;;  %2638 = vmatpush.bf16.msra.mxu1 %v11163_v36  ;;  %p10880_p1 = scmp.lt.s32.totalorder %s10878_s30, %s10874_s23 }
  0x1f   : > { %v11061_v11 = vld [vmem:[%s11025_s18 + $0x58] sm:$0xff]  ;;  %v11064_v12 = vld [vmem:[%s11025_s18 + $0x50] sm:$0xff]  ;;  %v11067_v13 = vld [vmem:[%s11025_s18 + $0x48] sm:$0xff]  ;;  %p10876_p12 = pnand %p10875_p11, %p11008_p5 }
  0x20   : > { %v11073_v14 = vld [vmem:[%s11025_s18 + $0x70] sm:$0xff]  ;;  %v11076_v15 = vld [vmem:[%s11025_s18 + $0x68] sm:$0xff]  ;;  %v11079_v16 = vld [vmem:[%s11025_s18 + $0x60] sm:$0xff]  ;;  %1346 = vmatpush.bf16.msra.mxu0 %v11175_v39  ;;  %p10881_p2 = por %p10880_p1, %p10879_p0 }
  0x21   : > { %v11085_v17 = vld [vmem:[%s11025_s18 + $0x88] sm:$0xff]  ;;  %v11088_v18 = vld [vmem:[%s11025_s18 + $0x80] sm:$0xff]  ;;  %v11091_v19 = vld [vmem:[%s11025_s18 + $0x78] sm:$0xff]  ;;  %p10877_p13 = pneg %p10876_p12 }
  0x22   : > { %v11097_v20 = vld [vmem:[%s11025_s18 + $0xa0] sm:$0xff]  ;;  %v11100_v21 = vld [vmem:[%s11025_s18 + $0x98] sm:$0xff]  ;;  %v11103_v22 = vld [vmem:[%s11025_s18 + $0x90] sm:$0xff]  ;;  %2639 = vmatpush.bf16.msra.mxu1 %v11175_v39 }
  0x23   : > { %v11109_v23 = vld [vmem:[%s11025_s18 + $0xb8] sm:$0xff]  ;;  %v11112_v24 = vld [vmem:[%s11025_s18 + $0xb0] sm:$0xff]  ;;  %v11115_v25 = vld [vmem:[%s11025_s18 + $0xa8] sm:$0xff]  ;;  %p10882_p3 = pnand %p10881_p2, %p10877_p13 }
  0x24   : > { %v11121_v26 = vld [vmem:[%s11025_s18 + $0xd0] sm:$0xff]  ;;  %v11124_v27 = vld [vmem:[%s11025_s18 + $0xc8] sm:$0xff]  ;;  %v11127_v28 = vld [vmem:[%s11025_s18 + $0xc0] sm:$0xff]  ;;  %1347 = vmatpush.bf16.msra.mxu0 %v11188_v41 }
  0x25   : > { %435 = vperm.xlu2 %10444, %v11040_v5   ;;  %429 = vperm.xlu1 %10443, %v11043_v6   ;;  %v11133_v29 = vld [vmem:[%s11025_s18 + $0xe8] sm:$0xff]  ;;  %v11136_v30 = vld [vmem:[%s11025_s18 + $0xe0] sm:$0xff]  ;;  %v11139_v31 = vld [vmem:[%s11025_s18 + $0xd8] sm:$0xff] }
  0x26   : > { %423 = vperm.xlu0 %10442, %v292_v7   ;;  %v11150_v33 = vld [vmem:[%s11025_s18 + $0x100] sm:$0xff]  ;;  %v11153_v34 = vld [vmem:[%s11025_s18 + $0xf8] sm:$0xff]  ;;  %v11169_v38 = vld [vmem:[%s11025_s18 + $0x110] sm:$0xff]  ;;  %2640 = vmatpush.bf16.msra.mxu1 %v11188_v41 }
  0x27   : > { %v11166_v37 = vld [vmem:[%s11025_s18 + $0x118] sm:$0xff]  ;;  %v11191_v42 = vld [vmem:[%s11025_s18 + $0x130] sm:$0xff]  ;;  %v11194_v43 = vld [vmem:[%s11025_s18 + $0x128] sm:$0xff] }
  0x28   : > { %6951 = vmatpush.bf16.msrb.mxu0 %v11147_v32  ;;  %v11206_v45 = vld [vmem:[%s11025_s18 + $0x148] sm:$0xff]  ;;  %v11209_v46 = vld [vmem:[%s11025_s18 + $0x140] sm:$0xff]  ;;  %v11222_v49 = vld [vmem:[%s11025_s18 + $0x158] sm:$0xff] }
  0x29   : > { %v11219_v48 = vld [vmem:[%s11025_s18 + $0x160] sm:$0xff]  ;;  %v11230_v54 = vld [vmem:[%s11025_s18 + $0x178] sm:$0xff]  ;;  %v11233_v55 = vld [vmem:[%s11025_s18 + $0x170] sm:$0xff] }
  0x2a   : > { %v11247_v63 = vld [vmem:[%s11025_s18 + $0x190] sm:$0xff] }
  0x2c   : > { %6952 = vmatpush.bf16.msrb.mxu0 %v11163_v36 }
  0x2d   : > { %444 = vperm.xlu2 %10444, %v11049_v8   ;;  %441 = vperm.xlu1 %10443, %v11052_v9  }
  0x2e   : > { %438 = vperm.xlu0 %10442, %v11055_v10  }
  0x30   : > { %6953 = vmatpush.bf16.msrb.mxu0 %v11175_v39  ;;  %v11341_v39 = vld [vmem:[%s11025_s18 + $0x168] sm:$0xff] }
  0x34   : > { %6954 = vmatpush.bf16.msrb.mxu0 %v11188_v41 }
  0x35   : > { %453 = vperm.xlu2 %10444, %v11061_v11   ;;  %450 = vperm.xlu1 %10443, %v11064_v12  }
  0x36   : > { %447 = vperm.xlu0 %10442, %v11067_v13  }
  0x3d   : > { %462 = vperm.xlu2 %10444, %v11073_v14   ;;  %459 = vperm.xlu1 %10443, %v11076_v15  }
  0x3e   : > { %456 = vperm.xlu0 %10442, %v11079_v16  }
  0x45   : > { %471 = vperm.xlu2 %10444, %v11085_v17   ;;  %468 = vperm.xlu1 %10443, %v11088_v18  }
  0x46   : > { %465 = vperm.xlu0 %10442, %v11091_v19  }
  0x4d   : > { %480 = vperm.xlu2 %10444, %v11097_v20   ;;  %477 = vperm.xlu1 %10443, %v11100_v21  }
  0x4e   : > { %474 = vperm.xlu0 %10442, %v11103_v22  }
  0x55   : > { %489 = vperm.xlu2 %10444, %v11109_v23   ;;  %486 = vperm.xlu1 %10443, %v11112_v24  }
  0x56   : > { %483 = vperm.xlu0 %10442, %v11115_v25  }
  0x5d   : > { %498 = vperm.xlu2 %10444, %v11121_v26   ;;  %495 = vperm.xlu1 %10443, %v11124_v27  }
  0x5e   : > { %492 = vperm.xlu0 %10442, %v11127_v28  }
  0x65   : > { %507 = vperm.xlu2 %10444, %v11133_v29   ;;  %504 = vperm.xlu1 %10443, %v11136_v30  }
  0x66   : > { %501 = vperm.xlu0 %10442, %v11139_v31  }
  0x6d   : > { %516 = vperm.xlu2 %10444, %v11150_v33   ;;  %513 = vperm.xlu1 %10443, %v11153_v34  }
  0x6e   : > { %10446 = vset.pattern.permute.xlu0 %v16325_v35 }
  0x6f   : > { %1741 = vperm.xlu0 %10446, %v292_v7  }
  0x75   : > { %525 = vperm.xlu2 %10444, %v11166_v37   ;;  %522 = vperm.xlu1 %10443, %v11169_v38  }
  0x77   : > { %1753 = vperm.xlu0 %10446, %v11040_v5   ;;  %v11183_v40 = vpop.permute.xlu2 %432  ;;  %v11250_v5 = vld [vmem:[%s11025_s18 + $0x188] sm:$0xff] }
  0x78   : > { %vm807_vm5 = vcmp.eq.s32.totalorder %v11183_v40, %v11235_v56 }
  0x7d   : > { %534 = vperm.xlu2 %10444, %v11191_v42   ;;  %531 = vperm.xlu1 %10443, %v11194_v43  }
  0x7f   : > { %1759 = vperm.xlu0 %10446, %v11052_v9   ;;  %v11202_v44 = vpop.permute.xlu2 %435 }
  0x80   : > { %vm808_vm6 = vcmp.eq.s32.totalorder %v11202_v44, %v11235_v56  ;;  %v16348_v44 = vmov 1  }
  0x81   : > { %v936_v1 = vsel %vm808_vm6, 1.0, %v16329_v59  ;;  %vm3042_vm6 = vcmask 261120  }
  0x85   : > { %543 = vperm.xlu2 %10444, %v11206_v45   ;;  %540 = vperm.xlu1 %10443, %v11209_v46  }
  0x87   : > { %1765 = vperm.xlu0 %10446, %v11067_v13   ;;  %v11215_v47 = vpop.permute.xlu2 %444 }
  0x88   : > { %vm811_vm10 = vcmp.eq.s32.totalorder %v11215_v47, %v11235_v56 }
  0x8d   : > { %552 = vperm.xlu2 %10444, %v11219_v48   ;;  %549 = vperm.xlu1 %10443, %v11222_v49  }
  0x8f   : > { %1783 = vperm.xlu0 %10446, %v11091_v19   ;;  %v11227_v51 = vpop.permute.xlu2 %453  ;;  %v427_v52 = vpop.permute.xlu1 %426  ;;  %v11259_v19 = vld [vmem:[%s11025_s18 + $0x1a8] sm:$0xff] }
  0x90   : > { %v421_v53 = vpop.permute.xlu0 %420  ;;  %16345 = vst [vmem:[#allocation9_spill] sm:$0xff] %v11259_v19  ;;  %vm805_vm4 = vcmp.eq.s32.totalorder %v427_v52, %v11235_v56  ;;  %vm814_vm12 = vcmp.eq.s32.totalorder %v11227_v51, %v11235_v56  ;;  %v11403_v51 = vld [vmem:[%s11025_s18 + $0xf0] sm:$0xff] }
  0x91   : > { %vm803_vm0 = vcmp.eq.s32.totalorder %v421_v53, %v11235_v56 }
  0x92   : > { %v931_v60 = vsel %vm803_vm0, 1.0, %v16329_v59 }
  0x95   : > { %561 = vperm.xlu2 %10444, %v11230_v54   ;;  %558 = vperm.xlu1 %10443, %v11233_v55  }
  0x97   : > { %1795 = vperm.xlu0 %10446, %v11100_v21   ;;  %v11241_v57 = vpop.permute.xlu2 %462  ;;  %v430_v58 = vpop.permute.xlu1 %429  ;;  %v11262_v21 = vld [vmem:[%s11025_s18 + $0x1a0] sm:$0xff] }
  0x98   : > { %v424_v61 = vpop.permute.xlu0 %423  ;;  %16346 = vst [vmem:[#allocation10_spill] sm:$0xff] %v11262_v21  ;;  %vm806_vm3 = vcmp.eq.s32.totalorder %v430_v58, %v11235_v56  ;;  %v933_v58 = vsel %vm805_vm4, 1.0, %v16329_v59 }
  0x99   : > { %vm804_vm1 = vcmp.eq.s32.totalorder %v424_v61, %v11235_v56  ;;  %v934_v53 = vsel %vm806_vm3, 1.0, %v16329_v59 }
  0x9a   : > { %v932_v62 = vsel %vm804_vm1, 1.0, %v16329_v59  ;;  %v1060_v61 = vpack.c.bf16 %v934_v53, %v933_v58  ;;  %v11292_v53 = vld [vmem:[%s11025_s18 + $0x1c0] sm:$0xff]  ;;  %v11295_v58 = vld [vmem:[%s11025_s18 + $0x108] sm:$0xff]  ;;  %vm817_vm1 = vcmp.eq.s32.totalorder %v11241_v57, %v11235_v56  ;;  %v11475_v57 = vld [vmem:[%s11025_s18 + $0x150] sm:$0xff] }
  0x9b   : > { %v1059_v0 = vpack.c.bf16 %v932_v62, %v931_v60  ;;  %v11278_v62 = vld [vmem:[%s11025_s18 + $0x1b8] sm:$0xff]  ;;  %16347 = vst [vmem:[#allocation11_spill] sm:$0xff] %v11292_v53 }
  0x9d   : > { %9822 = vmatmul.msk.bf16.vlgmr.msra.gmra.mxu0 %vm1147_vm2, %v1059_v0  ;;  %570 = vperm.xlu2 %10444, %v11247_v63  }
  0x9e   : > { %567 = vperm.xlu1 %10443, %v11250_v5  }
  0x9f   : > { %1801 = vperm.xlu0 %10446, %v11115_v25   ;;  %v11256_v7 = vpop.permute.xlu2 %471  ;;  %v442_v9 = vpop.permute.xlu1 %441 }
  0xa0   : > { %v439_v13 = vpop.permute.xlu0 %438  ;;  %vm810_vm7 = vcmp.eq.s32.totalorder %v442_v9, %v11235_v56 }
  0xa1   : > { %vm809_vm8 = vcmp.eq.s32.totalorder %v439_v13, %v11235_v56 }
  0xa5   : > { %579 = vperm.xlu2 %10444, %v11259_v19  }
  0xa6   : > { %576 = vperm.xlu1 %10443, %v11262_v21   ;;  %v11313_v21 = vld [vmem:[%s11025_s18 + $0x138] sm:$0xff] }
  0xa7   : > { %1819 = vperm.xlu0 %10446, %v11139_v31   ;;  %v11269_v25 = vpop.permute.xlu2 %480  ;;  %v11271_v50 = vpop.permute.xlu1 %450 }
  0xa8   : > { %v11274_v60 = vpop.permute.xlu0 %447  ;;  %vm813_vm11 = vcmp.eq.s32.totalorder %v11271_v50, %v11235_v56 }
  0xa9   : > { %vm812_vm9 = vcmp.eq.s32.totalorder %v11274_v60, %v11235_v56 }
  0xad   : > { %9823 = vmatmul.msk.bf16.gmra.mxu0 %vm1147_vm2, %v1060_v61  ;;  %10445 = vset.pattern.permute.xlu2 %v16325_v35  ;;  %v935_v61 = vsel %vm807_vm5, 1.0, %v16329_v59  ;;  %vm820_vm5 = vcmp.eq.s32.totalorder %v11256_v7, %v11235_v56 }
  0xae   : > { %585 = vperm.xlu1 %10443, %v11278_v62   ;;  %1738 = vperm.xlu2 %10445, %v11034_v4   ;;  %v1061_v40 = vpack.c.bf16 %v936_v1, %v935_v61  ;;  %v348_v1 = vld [vmem:[%s11025_s18 + $0x1c8] sm:$0xff] }
  0xaf   : > { %1831 = vperm.xlu0 %10446, %v11153_v34   ;;  %v11285_v31 = vpop.permute.xlu2 %489  ;;  %v11287_v52 = vpop.permute.xlu1 %459 }
  0xb0   : > { %v11289_v0 = vpop.permute.xlu0 %456  ;;  %vm816_vm13 = vcmp.eq.s32.totalorder %v11287_v52, %v11235_v56 }
  0xb1   : > { %vm815_vm14 = vcmp.eq.s32.totalorder %v11289_v0, %v11235_v56  ;;  %v11438_v0 = vld [vmem:[%s11025_s18 + $0x120] sm:$0xff] }
  0xb6   : > { %588 = vperm.xlu1 %10443, %v11292_v53   ;;  %1744 = vperm.xlu2 %10445, %v11031_v3  }
  0xb7   : > { %1837 = vperm.xlu0 %10446, %v11295_v58   ;;  %v11304_v4 = vpop.permute.xlu2 %498  ;;  %v11306_v34 = vpop.permute.xlu1 %468 }
  0xb8   : > { %v11310_v35 = vpop.permute.xlu0 %465  ;;  %vm819_vm4 = vcmp.eq.s32.totalorder %v11306_v34, %v11235_v56 }
  0xb9   : > { %vm818_vm15 = vcmp.eq.s32.totalorder %v11310_v35, %v11235_v56 }
  0xbd   : > { %9824 = vmatmul.msk.bf16.gmra.mxu0 %vm1147_vm2, %v1061_v40  ;;  %v16352_v40 = vmov 0.0  }
  0xbe   : > { %10447 = vset.pattern.permute.xlu1 %v16348_v44  ;;  %1750 = vperm.xlu2 %10445, %v11028_v2   ;;  %v16350_v2 = vmov 0   ;;  %v938_v41 = vsel %vm810_vm7, 1.0, %v16352_v40  ;;  %v937_v19 = vsel %vm809_vm8, 1.0, %v16352_v40  ;;  %v945_v35 = vsel %vm817_vm1, 1.0, %v16352_v40 }
  0xbf   : > { %1747 = vperm.xlu1 %10447, %v11043_v6   ;;  %1855 = vperm.xlu0 %10446, %v11313_v21   ;;  %v11320_v3 = vpop.permute.xlu2 %507  ;;  %v11322_v53 = vpop.permute.xlu1 %477  ;;  %v1062_v13 = vpack.c.bf16 %v938_v41, %v937_v19  ;;  %v940_v19 = vsel %vm812_vm9, 1.0, %v16352_v40 }
  0xc0   : > { %16349 = vst [vmem:[#allocation12_spill] sm:$0xff] %v11320_v3  ;;  %v11324_v59 = vpop.permute.xlu0 %474  ;;  %v11357_v3 = vld [vmem:[%s11025_s18 + $0x198] sm:$0xff]  ;;  %vm822_vm7 = vcmp.eq.s32.totalorder %v11322_v53, %v11235_v56 }
  0xc1   : > { %vm821_vm8 = vcmp.eq.s32.totalorder %v11324_v59, %v11235_v56 }
  0xc6   : > { %1756 = vperm.xlu2 %10445, %v11055_v10   ;;  %v11345_v10 = vld [vmem:[%s11025_s18 + $0x1d0] sm:$0xff] }
  0xc7   : > { %10448 = vset.pattern.permute.xlu1 %v16350_v2  ;;  %1867 = vperm.xlu0 %10446, %v11222_v49   ;;  %v11332_v6 = vpop.permute.xlu2 %516  ;;  %v11334_v61 = vpop.permute.xlu1 %486  ;;  %16353 = vst [vmem:[#allocation14_spill] sm:$0xff] %v11345_v10 }
  0xc8   : > { %16351 = vst [vmem:[#allocation13_spill] sm:$0xff] %v11332_v6  ;;  %591 = vperm.xlu1 %10448, %v348_v1   ;;  %v11338_v9 = vpop.permute.xlu0 %483 }
  0xcd   : > { %9825 = vmatmul.msk.bf16.gmra.mxu0 %vm1147_vm2, %v1062_v13 }
  0xce   : > { %1762 = vperm.xlu2 %10445, %v11049_v8  }
  0xcf   : > { %1873 = vperm.xlu0 %10446, %v11341_v39   ;;  %v11349_v49 = vpop.permute.xlu2 %525  ;;  %v11351_v6 = vpop.permute.xlu1 %495 }
  0xd0   : > { %594 = vperm.xlu1 %10448, %v11345_v10   ;;  %v11354_v36 = vpop.permute.xlu0 %492 }
  0xd6   : > { %1771 = vperm.xlu2 %10445, %v11061_v11   ;;  %v939_v11 = vsel %vm811_vm10, 1.0, %v16352_v40 }
  0xd7   : > { %1891 = vperm.xlu0 %10446, %v11357_v3   ;;  %v11365_v8 = vpop.permute.xlu2 %534  ;;  %v11367_v41 = vpop.permute.xlu1 %504  ;;  %v1063_v60 = vpack.c.bf16 %v940_v19, %v939_v11  ;;  %v941_v19 = vsel %vm813_vm11, 1.0, %v16352_v40  ;;  %vm824_vm11 = vcmp.eq.s32.totalorder %v11338_v9, %v11235_v56 }
  0xd8   : > { %16354 = vst [vmem:[#allocation15_spill] sm:$0xff] %v11365_v8  ;;  %10449 = vset.pattern.permute.xlu1 %v16348_v44  ;;  %v11371_v13 = vpop.permute.xlu0 %501 }
  0xd9   : > { %1768 = vperm.xlu1 %10449, %v11064_v12  }
  0xdd   : > { %9826 = vmatmul.msk.bf16.gmra.mxu0 %vm1147_vm2, %v1063_v60 }
  0xde   : > { %1777 = vperm.xlu2 %10445, %v11076_v15  }
  0xdf   : > { %1903 = vperm.xlu0 %10446, %v11278_v62   ;;  %v11378_v47 = vpop.permute.xlu2 %543  ;;  %v11380_v8 = vpop.permute.xlu1 %513  ;;  %v11393_v62 = vld [vmem:[%s11025_s18 + $0x1e0] sm:$0xff] }
  0xe1   : > { %1774 = vperm.xlu1 %10449, %v11079_v16   ;;  %v1742_v10 = vpop.permute.xlu0 %1741  ;;  %v942_v16 = vsel %vm814_vm12, 1.0, %v16352_v40  ;;  %vm823_vm12 = vcmp.eq.s32.totalorder %v11269_v25, %v11235_v56 }
  0xe2   : > { %v1064_v50 = vpack.c.bf16 %v942_v16, %v941_v19  ;;  %v944_v16 = vsel %vm816_vm13, 1.0, %v16352_v40  ;;  %vm2122_vm0 = vcmp.eq.s32.totalorder %v1742_v10, %v11235_v56  ;;  %v951_v9 = vsel %vm823_vm12, 1.0, %v16352_v40 }
  0xe6   : > { %1780 = vperm.xlu2 %10445, %v11073_v14  }
  0xe7   : > { %1909 = vperm.xlu0 %10446, %v348_v1   ;;  %v11388_v12 = vpop.permute.xlu2 %552  ;;  %v11390_v15 = vpop.permute.xlu1 %522 }
  0xe8   : > { %16355 = vst [vmem:[#allocation16_spill] sm:$0xff] %v11388_v12 }
  0xe9   : > { %10450 = vset.pattern.permute.xlu1 %v16350_v2  ;;  %v11399_v14 = vpop.permute.xlu0 %1753 }
  0xea   : > { %600 = vperm.xlu1 %10450, %v11393_v62   ;;  %vm2126_vm13 = vcmp.eq.s32.totalorder %v11399_v14, %v11235_v56 }
  0xed   : > { %9827 = vmatmul.msk.bf16.gmra.mxu0 %vm1147_vm2, %v1064_v50  ;;  %v943_v50 = vsel %vm815_vm14, 1.0, %v16352_v40 }
  0xee   : > { %1789 = vperm.xlu2 %10445, %v11085_v17   ;;  %v1065_v52 = vpack.c.bf16 %v944_v16, %v943_v50  ;;  %v10390_v50 = vld [vmem:[%s16317_s2] sm:$0xff] }
  0xef   : > { %10465 = vset.pattern.permute.xlu0 %v16350_v2  ;;  %v11407_v1 = vpop.permute.xlu2 %561  ;;  %v11409_v11 = vpop.permute.xlu1 %531 }
  0xf0   : > { %16356 = vst [vmem:[#allocation17_spill] sm:$0xff] %v11407_v1  ;;  %510 = vperm.xlu0 %10465, %v11403_v51   ;;  %v11452_v1 = vld [vmem:[%s11025_s18 + $0x1f0] sm:$0xff] }
  0xf1   : > { %v11418_v17 = vpop.permute.xlu0 %1759 }
  0xf2   : > { %10451 = vset.pattern.permute.xlu1 %v16348_v44  ;;  %vm2128_vm1 = vcmp.eq.s32.totalorder %v11418_v17, %v11235_v56 }
  0xf3   : > { %1786 = vperm.xlu1 %10451, %v11088_v18   ;;  %v11429_v18 = vld [vmem:[%s11025_s18 + $0x1e8] sm:$0xff] }
  0xf6   : > { %1792 = vperm.xlu2 %10445, %v11103_v22   ;;  %v10391_v22 = vld [vmem:[%s16317_s2 + $0x8] sm:$0xff] }
  0xf7   : > { %v11421_v60 = vpop.permute.xlu2 %570  ;;  %v11423_v19 = vpop.permute.xlu1 %540  ;;  %3774 = vmatpush.bf16.msra.mxu3 %v10391_v22  ;;  %v2250_v22 = vsel %vm2122_vm0, 1.0, %v16352_v40  ;;  %vm826_vm0 = vcmp.eq.s32.totalorder %v11285_v31, %v11235_v56 }
  0xf8   : > { %16357 = vst [vmem:[#allocation18_spill] sm:$0xff] %v11421_v60  ;;  %519 = vperm.xlu0 %10465, %v11295_v58   ;;  %v954_v14 = vsel %vm826_vm0, 1.0, %v16352_v40 }
  0xf9   : > { %v11445_v16 = vpop.permute.xlu0 %1765 }
  0xfb   : > { %10452 = vset.pattern.permute.xlu1 %v16350_v2  ;;  %3775 = vmatpush.bf16.msra.mxu3 %v10390_v50 }
  0xfc   : > { %603 = vperm.xlu1 %10452, %v11429_v18  }
  0xfd   : > { %9828 = vmatmul.msk.bf16.gmra.mxu0 %vm1147_vm2, %v1065_v52  ;;  %v946_v52 = vsel %vm818_vm15, 1.0, %v16352_v40  ;;  %vm825_vm15 = vcmp.eq.s32.totalorder %v11334_v61, %v11235_v56 }
  0xfe   : > { %1798 = vperm.xlu2 %10445, %v11097_v20  }
  0xff   : > { %v11441_v60 = vpop.permute.xlu2 %579  ;;  %v11443_v58 = vpop.permute.xlu1 %549 }
 0x100   : > { %16358 = vst [vmem:[#allocation19_spill] sm:$0xff] %v11441_v60  ;;  %528 = vperm.xlu0 %10465, %v11438_v0   ;;  %v1066_v60 = vpack.c.bf16 %v946_v52, %v945_v35  ;;  %v949_v35 = vsel %vm821_vm8, 1.0, %v16352_v40  ;;  %vm2130_vm8 = vcmp.eq.s32.totalorder %v11445_v16, %v11235_v56 }
 0x101   : > { %v11468_v10 = vpop.permute.xlu0 %1783 }
 0x104   : > { %606 = vperm.xlu1 %10452, %v11452_v1  }
 0x106   : > { %1807 = vperm.xlu2 %10445, %v11109_v23  }
 0x107   : > { %v11461_v20 = vpop.permute.xlu1 %558 }
 0x108   : > { %537 = vperm.xlu0 %10465, %v11313_v21   ;;  %v1739_v50 = vpop.permute.xlu2 %1738 }
 0x109   : > { %vm2121_vm3 = vcmp.eq.s32.totalorder %v1739_v50, %v11235_v56  ;;  %v11482_v52 = vpop.permute.xlu0 %1795  ;;  %v11496_v50 = vld [vmem:[%s11025_s18 + $0x200] sm:$0xff] }
 0x10a   : > { %v2249_v23 = vsel %vm2121_vm3, 1.0, %v16352_v40 }
 0x10b   : > { %v2377_v12 = vpack.c.bf16 %v2250_v22, %v2249_v23 }
 0x10c   : > { %10453 = vset.pattern.permute.xlu1 %v16348_v44 }
 0x10d   : > { %1804 = vperm.xlu1 %10453, %v11112_v24   ;;  %9829 = vmatmul.msk.bf16.gmra.mxu0 %vm1147_vm2, %v1066_v60  ;;  %v947_v24 = vsel %vm819_vm4, 1.0, %v16352_v40  ;;  %vm828_vm4 = vcmp.eq.s32.totalorder %v11351_v6, %v11235_v56 }
 0x10e   : > { %9886 = vmatmul.msk.bf16.vlgmr.msra.gmra.mxu1 %vm1147_vm2, %v2377_v12  ;;  %1813 = vperm.xlu2 %10445, %v11124_v27   ;;  %v948_v12 = vsel %vm820_vm5, 1.0, %v16352_v40  ;;  %vm827_vm5 = vcmp.eq.s32.totalorder %v11354_v36, %v11235_v56 }
 0x10f   : > { %v1067_v22 = vpack.c.bf16 %v948_v12, %v947_v24  ;;  %v11527_v12 = vld [vmem:[%s11025_s18 + $0x208] sm:$0xff]  ;;  %v955_v6 = vsel %vm827_vm5, 1.0, %v16352_v40  ;;  %vm2136_vm5 = vcmp.eq.s32.totalorder %v11468_v10, %v11235_v56  ;;  %v16366_v10 = vld [vmem:[#allocation13_spill] sm:$0xff] }
 0x110   : > { %v11479_v21 = vpop.permute.xlu1 %567  ;;  %546 = vperm.xlu0 %10465, %v11475_v57  }
 0x115   : > { %1810 = vperm.xlu1 %10453, %v11127_v28   ;;  %v11503_v28 = vpop.permute.xlu0 %1801 }
 0x116   : > { %1816 = vperm.xlu2 %10445, %v11121_v26   ;;  %v11501_v26 = vld [vmem:[%s11025_s18 + $0x180] sm:$0xff] }
 0x118   : > { %v11491_v27 = vpop.permute.xlu1 %576  ;;  %555 = vperm.xlu0 %10465, %v11341_v39  }
 0x11a   : > { %v1349_v60 = vpop.f32.mrf.mxu0 }
 0x11d   : > { %10454 = vset.pattern.permute.xlu1 %v16350_v2  ;;  %9830 = vmatmul.msk.bf16.gmra.mxu0 %vm1147_vm2, %v1067_v22  ;;  %v11520_v23 = vpop.permute.xlu0 %1819 }
 0x11e   : > { %612 = vperm.xlu1 %10454, %v11496_v50   ;;  %1825 = vperm.xlu2 %10445, %v11133_v29   ;;  %v950_v29 = vsel %vm822_vm7, 1.0, %v16352_v40 }
 0x11f   : > { %v1068_v59 = vpack.c.bf16 %v950_v29, %v949_v35  ;;  %v11546_v35 = vld [vmem:[%s11025_s18 + $0x210] sm:$0xff] }
 0x120   : > { %v11507_v7 = vpop.permute.xlu1 %585  ;;  %564 = vperm.xlu0 %10465, %v11501_v26  }
 0x122   : > { %v1351_v39 = vpop.f32.mrf.mxu0 }
 0x123   : > { %v1669_v34 = vpack.c.bf16 %v1351_v39, %v1349_v60  ;;  %v11530_v60 = vld [vmem:[%s11025_s18 + $0x1b0] sm:$0xff] }
 0x125   : > { %10030 = vmatmul.msk.bf16.vlgmr.msra.gmra.mxu3 %vm3042_vm6, %v1669_v34 }
 0x126   : > { %10455 = vset.pattern.permute.xlu1 %v16348_v44  ;;  %1828 = vperm.xlu2 %10445, %v11403_v51   ;;  %v11537_v51 = vpop.permute.xlu0 %1831 }
 0x127   : > { %1822 = vperm.xlu1 %10455, %v11136_v30   ;;  %v1745_v30 = vpop.permute.xlu2 %1744 }
 0x128   : > { %v11522_v24 = vpop.permute.xlu1 %588  ;;  %573 = vperm.xlu0 %10465, %v11357_v3   ;;  %vm2123_vm9 = vcmp.eq.s32.totalorder %v1745_v30, %v11235_v56 }
 0x129   : > { %v2251_v39 = vsel %vm2123_vm9, 1.0, %v16352_v40  ;;  %vm830_vm9 = vcmp.eq.s32.totalorder %v11371_v13, %v11235_v56 }
 0x12a   : > { %v1354_v53 = vpop.f32.mrf.mxu0  ;;  %v958_v16 = vsel %vm830_vm9, 1.0, %v16352_v40 }
 0x12d   : > { %9831 = vmatmul.msk.bf16.gmra.mxu0 %vm1147_vm2, %v1068_v59  ;;  %v11549_v59 = vld [vmem:[%s11025_s18 + $0x1d8] sm:$0xff] }
 0x12e   : > { %1834 = vperm.xlu2 %10445, %v11150_v33  }
 0x12f   : > { %10456 = vset.pattern.permute.xlu1 %v16350_v2 }
 0x130   : > { %615 = vperm.xlu1 %10456, %v11527_v12   ;;  %582 = vperm.xlu0 %10465, %v11530_v60  }
 0x131   : > { %v1748_v3 = vpop.permute.xlu1 %1747 }
 0x132   : > { %vm2124_vm10 = vcmp.eq.s32.totalorder %v1748_v3, %v11235_v56  ;;  %v1356_v22 = vpop.f32.mrf.mxu0 }
 0x133   : > { %v2252_v33 = vsel %vm2124_vm10, 1.0, %v16352_v40  ;;  %v1670_v34 = vpack.c.bf16 %v1356_v22, %v1354_v53  ;;  %v952_v53 = vsel %vm824_vm11, 1.0, %v16352_v40  ;;  %v11559_v22 = vpop.permute.xlu0 %1837  ;;  %vm829_vm10 = vcmp.eq.s32.totalorder %v11304_v4, %v11235_v56 }
 0x134   : > { %v2378_v29 = vpack.c.bf16 %v2252_v33, %v2251_v39  ;;  %v1069_v3 = vpack.c.bf16 %v952_v53, %v951_v9  ;;  %v1751_v39 = vpop.permute.xlu2 %1750  ;;  %v11563_v33 = vld [vmem:[%s11025_s18 + $0x1f8] sm:$0xff] }
 0x135   : > { %10031 = vmatmul.msk.bf16.gmra.mxu3 %vm3042_vm6, %v1670_v34  ;;  %vm2125_vm14 = vcmp.eq.s32.totalorder %v1751_v39, %v11235_v56 }
 0x136   : > { %9887 = vmatmul.msk.bf16.gmra.mxu1 %vm1147_vm2, %v2378_v29  ;;  %1843 = vperm.xlu2 %10445, %v11166_v37   ;;  %v2254_v37 = vsel %vm2126_vm13, 1.0, %v16352_v40  ;;  %v2253_v25 = vsel %vm2125_vm14, 1.0, %v16352_v40  ;;  %vm831_vm13 = vcmp.eq.s32.totalorder %v11367_v41, %v11235_v56 }
 0x137   : > { %v2379_v53 = vpack.c.bf16 %v2254_v37, %v2253_v25 }
 0x138   : > { %618 = vperm.xlu1 %10456, %v11546_v35   ;;  %597 = vperm.xlu0 %10465, %v11549_v59  }
 0x13a   : > { %v1359_v30 = vpop.f32.mrf.mxu0  ;;  %v11610_v17 = vpop.permute.xlu1 %591 }
 0x13d   : > { %9832 = vmatmul.msk.bf16.gmra.mxu0 %vm1147_vm2, %v1069_v3 }
 0x13e   : > { %1849 = vperm.xlu2 %10445, %v11194_v43   ;;  %v11577_v43 = vpop.permute.xlu0 %1855 }
 0x140   : > { %10457 = vset.pattern.permute.xlu1 %v16348_v44  ;;  %609 = vperm.xlu0 %10465, %v11563_v33  }
 0x141   : > { %1840 = vperm.xlu1 %10457, %v11169_v38   ;;  %v953_v38 = vsel %vm825_vm15, 1.0, %v16352_v40 }
 0x142   : > { %v1361_v34 = vpop.f32.mrf.mxu0  ;;  %v1070_v61 = vpack.c.bf16 %v954_v14, %v953_v38 }
 0x143   : > { %v1671_v29 = vpack.c.bf16 %v1361_v34, %v1359_v30  ;;  %v1757_v30 = vpop.permute.xlu2 %1756  ;;  %v956_v34 = vsel %vm828_vm4, 1.0, %v16352_v40 }
 0x144   : > { %vm2127_vm3 = vcmp.eq.s32.totalorder %v1757_v30, %v11235_v56  ;;  %v2258_v30 = vsel %vm2130_vm8, 1.0, %v16352_v40  ;;  %vm835_vm8 = vcmp.eq.s32.totalorder %v16366_v10, %v11235_v56 }
 0x145   : > { %10032 = vmatmul.msk.bf16.gmra.mxu3 %vm3042_vm6, %v1671_v29  ;;  %v2255_v3 = vsel %vm2127_vm3, 1.0, %v16352_v40  ;;  %vm834_vm3 = vcmp.eq.s32.totalorder %v11380_v8, %v11235_v56  ;;  %v16364_v8 = vld [vmem:[#allocation10_spill] sm:$0xff] }
 0x146   : > { %9888 = vmatmul.msk.bf16.gmra.mxu1 %vm1147_vm2, %v2379_v53  ;;  %1852 = vperm.xlu2 %10445, %v11191_v42   ;;  %v11592_v42 = vld [vmem:[%s11025_s18 + $0x220] sm:$0xff]  ;;  %v11594_v31 = vpop.permute.xlu0 %1867  ;;  %v1071_v53 = vpack.c.bf16 %v956_v34, %v955_v6 }
 0x149   : > { %1846 = vperm.xlu1 %10457, %v11438_v0   ;;  %v2256_v0 = vsel %vm2128_vm1, 1.0, %v16352_v40 }
 0x14a   : > { %v1364_v9 = vpop.f32.mrf.mxu0  ;;  %v2380_v25 = vpack.c.bf16 %v2256_v0, %v2255_v3 }
 0x14b   : > { %v1763_v38 = vpop.permute.xlu2 %1762 }
 0x14c   : > { %vm2129_vm7 = vcmp.eq.s32.totalorder %v1763_v38, %v11235_v56  ;;  %v10392_v38 = vld [vmem:[%s16317_s2 + $0x10] sm:$0xff] }
 0x14d   : > { %9833 = vmatmul.msk.bf16.gmra.mxu0 %vm1147_vm2, %v1070_v61  ;;  %v2257_v14 = vsel %vm2129_vm7, 1.0, %v16352_v40  ;;  %v360_v61 = vld [vmem:[%s11025_s18 + $0x228] sm:$0xff] }
 0x14e   : > { %1861 = vperm.xlu2 %10445, %v11206_v45   ;;  %v11606_v45 = vld [vmem:[%s11025_s18 + $0x218] sm:$0xff]  ;;  %v11615_v29 = vpop.permute.xlu0 %1873  ;;  %v2381_v3 = vpack.c.bf16 %v2258_v30, %v2257_v14 }
 0x14f   : > { %621 = vperm.xlu0 %10465, %v11606_v45  }
 0x151   : > { %10458 = vset.pattern.permute.xlu1 %v16350_v2 }
 0x152   : > { %624 = vperm.xlu1 %10458, %v11592_v42   ;;  %v1366_v39 = vpop.f32.mrf.mxu0 }
 0x153   : > { %v1672_v37 = vpack.c.bf16 %v1366_v39, %v1364_v9  ;;  %v11629_v9 = vpop.permute.xlu1 %594 }
 0x155   : > { %10033 = vmatmul.msk.bf16.gmra.mxu3 %vm3042_vm6, %v1672_v37  ;;  %v11649_v37 = vld [vmem:[%s11025_s18 + $0x230] sm:$0xff] }
 0x156   : > { %9889 = vmatmul.msk.bf16.gmra.mxu1 %vm1147_vm2, %v2380_v25  ;;  %1864 = vperm.xlu2 %10445, %v11475_v57   ;;  %v11621_v57 = vld [vmem:[%s11025_s18 + $0x238] sm:$0xff]  ;;  %v11634_v39 = vpop.permute.xlu0 %1891  ;;  %v957_v25 = vsel %vm829_vm10, 1.0, %v16352_v40 }
 0x157   : > { %633 = vperm.xlu0 %10465, %v11621_v57   ;;  %v1072_v34 = vpack.c.bf16 %v958_v16, %v957_v25 }
 0x15a   : > { %10459 = vset.pattern.permute.xlu1 %v16348_v44  ;;  %v1369_v36 = vpop.f32.mrf.mxu0 }
 0x15b   : > { %1858 = vperm.xlu1 %10459, %v11209_v46   ;;  %v1769_v6 = vpop.permute.xlu1 %1768 }
 0x15c   : > { %vm2131_vm11 = vcmp.eq.s32.totalorder %v1769_v6, %v11235_v56 }
 0x15d   : > { %9834 = vmatmul.msk.bf16.gmra.mxu0 %vm1147_vm2, %v1071_v53  ;;  %v2259_v53 = vsel %vm2131_vm11, 1.0, %v16352_v40  ;;  %vm837_vm11 = vcmp.eq.s32.totalorder %v11390_v15, %v11235_v56 }
 0x15e   : > { %1870 = vperm.xlu2 %10445, %v11219_v48   ;;  %v11640_v48 = vld [vmem:[%s11025_s18 + $0x258] sm:$0xff]  ;;  %v11658_v4 = vpop.permute.xlu0 %1903 }
 0x15f   : > { %645 = vperm.xlu0 %10465, %v11640_v48  }
 0x162   : > { %v1371_v46 = vpop.f32.mrf.mxu0 }
 0x163   : > { %v1673_v0 = vpack.c.bf16 %v1371_v46, %v1369_v36  ;;  %10460 = vset.pattern.permute.xlu1 %v16350_v2  ;;  %v1772_v36 = vpop.permute.xlu2 %1771  ;;  %v1775_v25 = vpop.permute.xlu1 %1774 }
 0x164   : > { %627 = vperm.xlu1 %10460, %v360_v61   ;;  %vm2132_vm12 = vcmp.eq.s32.totalorder %v1772_v36, %v11235_v56  ;;  %vm2133_vm15 = vcmp.eq.s32.totalorder %v1775_v25, %v11235_v56 }
 0x165   : > { %10034 = vmatmul.msk.bf16.gmra.mxu3 %vm3042_vm6, %v1673_v0  ;;  %v2260_v46 = vsel %vm2132_vm12, 1.0, %v16352_v40  ;;  %v2261_v6 = vsel %vm2133_vm15, 1.0, %v16352_v40  ;;  %vm838_vm12 = vcmp.eq.s32.totalorder %v11349_v49, %v11235_v56  ;;  %v11759_v49 = vld [vmem:[%s11025_s18 + $0x278] sm:$0xff] }
 0x166   : > { %9890 = vmatmul.msk.bf16.gmra.mxu1 %vm1147_vm2, %v2381_v3  ;;  %1879 = vperm.xlu2 %10445, %v11230_v54   ;;  %v10393_v54 = vld [vmem:[%s16317_s2 + $0x18] sm:$0xff]  ;;  %v2382_v0 = vpack.c.bf16 %v2260_v46, %v2259_v53  ;;  %v11680_v3 = vpop.permute.xlu0 %1909  ;;  %v962_v46 = vsel %vm834_vm3, 1.0, %v16352_v40  ;;  %vm2142_vm3 = vcmp.eq.s32.totalorder %v11503_v28, %v11235_v56  ;;  %v16368_v28 = vld [vmem:[#allocation15_spill] sm:$0xff] }
 0x167   : > { %10468 = vset.pattern.permute.xlu0 %v16348_v44  ;;  %3241 = vmatpush.bf16.msra.mxu2 %v10393_v54 }
 0x168   : > { %1927 = vperm.xlu0 %10468, %v11563_v33   ;;  %v959_v33 = vsel %vm831_vm13, 1.0, %v16352_v40 }
 0x16a   : > { %v1374_v13 = vpop.f32.mrf.mxu0 }
 0x16b   : > { %3242 = vmatpush.bf16.msra.mxu2 %v10392_v38 }
 0x16c   : > { %630 = vperm.xlu1 %10460, %v11649_v37  }
 0x16d   : > { %9835 = vmatmul.msk.bf16.gmra.mxu0 %vm1147_vm2, %v1072_v34  ;;  %v16362_v34 = vld [vmem:[#allocation9_spill] sm:$0xff] }
 0x16e   : > { %1885 = vperm.xlu2 %10445, %v11250_v5   ;;  %v16359_v5 = vld [vmem:[#allocation12_spill] sm:$0xff]  ;;  %v511_v36 = vpop.permute.xlu0 %510 }
 0x16f   : > { %4997 = vmatpush.bf16.msrb.mxu2 %v11147_v32  ;;  %vm832_vm14 = vcmp.eq.s32.totalorder %v16359_v5, %v11235_v56  ;;  %v16360_v32 = vld [vmem:[#allocation6_spill] sm:$0xff]  ;;  %vm833_vm1 = vcmp.eq.s32.totalorder %v511_v36, %v11235_v56  ;;  %v963_v36 = vsel %vm835_vm8, 1.0, %v16352_v40 }
 0x170   : > { %1939 = vperm.xlu0 %10468, %v11606_v45   ;;  %v960_v41 = vsel %vm832_vm14, 1.0, %v16352_v40  ;;  %v16363_v45 = vld [vmem:[#allocation8_spill] sm:$0xff]  ;;  %vm2140_vm14 = vcmp.eq.s32.totalorder %v11482_v52, %v11235_v56  ;;  %v11774_v52 = vld [vmem:[%s11025_s18 + $0x288] sm:$0xff] }
 0x171   : > { %v1073_v16 = vpack.c.bf16 %v960_v41, %v959_v33 }
 0x172   : > { %v1376_v14 = vpop.f32.mrf.mxu0 }
 0x173   : > { %v1674_v30 = vpack.c.bf16 %v1376_v14, %v1374_v13  ;;  %4998 = vmatpush.bf16.msrb.mxu2 %v16360_v32  ;;  %v16361_v13 = vld [vmem:[#allocation7_spill] sm:$0xff]  ;;  %v11695_v14 = vld [vmem:[%s11025_s18 + $0x240] sm:$0xff]  ;;  %v11716_v32 = vpop.permute.xlu1 %600 }
 0x174   : > { %10461 = vset.pattern.permute.xlu1 %v16348_v44 }
 0x175   : > { %1876 = vperm.xlu1 %10461, %v11233_v55   ;;  %10035 = vmatmul.msk.bf16.gmra.mxu3 %vm3042_vm6, %v1674_v30 }
 0x176   : > { %9891 = vmatmul.msk.bf16.gmra.mxu1 %vm1147_vm2, %v2382_v0  ;;  %1888 = vperm.xlu2 %10445, %v11247_v63   ;;  %v1778_v63 = vpop.permute.xlu2 %1777  ;;  %v520_v41 = vpop.permute.xlu0 %519 }
 0x177   : > { %4999 = vmatpush.bf16.msrb.mxu2 %v16361_v13  ;;  %vm2134_vm0 = vcmp.eq.s32.totalorder %v1778_v63, %v11235_v56  ;;  %vm836_vm7 = vcmp.eq.s32.totalorder %v520_v41, %v11235_v56 }
 0x178   : > { %1945 = vperm.xlu0 %10468, %v360_v61   ;;  %v2262_v53 = vsel %vm2134_vm0, 1.0, %v16352_v40  ;;  %v961_v61 = vsel %vm833_vm1, 1.0, %v16352_v40  ;;  %vm840_vm0 = vcmp.eq.s32.totalorder %v11409_v11, %v11235_v56 }
 0x179   : > { %v1074_v5 = vpack.c.bf16 %v962_v46, %v961_v61  ;;  %v11735_v61 = vld [vmem:[%s11025_s18 + $0x250] sm:$0xff] }
 0x17a   : > { %v1379_v55 = vpop.f32.mrf.mxu0 }
 0x17b   : > { %5000 = vmatpush.bf16.msrb.mxu2 %v16363_v45  ;;  %v11722_v45 = vld [vmem:[%s11025_s18 + $0x248] sm:$0xff] }
 0x17d   : > { %1882 = vperm.xlu1 %10461, %v11501_v26   ;;  %9836 = vmatmul.msk.bf16.gmra.mxu0 %vm1147_vm2, %v1073_v16  ;;  %v2383_v26 = vpack.c.bf16 %v2262_v53, %v2261_v6  ;;  %v2264_v16 = vsel %vm2136_vm5, 1.0, %v16352_v40  ;;  %v964_v6 = vsel %vm836_vm7, 1.0, %v16352_v40  ;;  %v1787_v53 = vpop.permute.xlu1 %1786  ;;  %vm841_vm5 = vcmp.eq.s32.totalorder %v16368_v28, %v11235_v56  ;;  %v11848_v28 = vld [vmem:[%s11025_s18 + $0x2e8] sm:$0xff] }
 0x17e   : > { %1897 = vperm.xlu2 %10445, %v16362_v34   ;;  %v1781_v0 = vpop.permute.xlu2 %1780  ;;  %vm2137_vm9 = vcmp.eq.s32.totalorder %v1787_v53, %v11235_v56 }
 0x17f   : > { %vm2135_vm4 = vcmp.eq.s32.totalorder %v1781_v0, %v11235_v56 }
 0x180   : > { %1963 = vperm.xlu0 %10468, %v11640_v48   ;;  %v2263_v48 = vsel %vm2135_vm4, 1.0, %v16352_v40 }
 0x181   : > { %v2384_v63 = vpack.c.bf16 %v2264_v16, %v2263_v48  ;;  %v529_v16 = vpop.permute.xlu0 %528 }
 0x182   : > { %v1381_v54 = vpop.f32.mrf.mxu0  ;;  %vm839_vm15 = vcmp.eq.s32.totalorder %v529_v16, %v11235_v56 }
 0x183   : > { %v1675_v38 = vpack.c.bf16 %v1381_v54, %v1379_v55 }
 0x185   : > { %10462 = vset.pattern.permute.xlu1 %v16350_v2  ;;  %10036 = vmatmul.msk.bf16.gmra.mxu3 %vm3042_vm6, %v1675_v38  ;;  %v1075_v38 = vpack.c.bf16 %v964_v6, %v963_v36  ;;  %v967_v6 = vsel %vm839_vm15, 1.0, %v16352_v40 }
 0x186   : > { %636 = vperm.xlu1 %10462, %v11695_v14   ;;  %9892 = vmatmul.msk.bf16.gmra.mxu1 %vm1147_vm2, %v2383_v26  ;;  %v1790_v26 = vpop.permute.xlu2 %1789 }
 0x187   : > { %1900 = vperm.xlu2 %10445, %v11530_v60   ;;  %v16365_v60 = vld [vmem:[#allocation11_spill] sm:$0xff]  ;;  %vm2138_vm10 = vcmp.eq.s32.totalorder %v1790_v26, %v11235_v56 }
 0x188   : > { %1975 = vperm.xlu0 %10468, %v11759_v49  }
 0x18a   : > { %v1384_v30 = vpop.f32.mrf.mxu0 }
 0x18b   : > { %v2642_v33 = vpop.f32.mrf.mxu1 }
 0x18d   : > { %9837 = vmatmul.msk.bf16.gmra.mxu0 %vm1147_vm2, %v1074_v5 }
 0x18e   : > { %10463 = vset.pattern.permute.xlu1 %v16348_v44  ;;  %v1793_v41 = vpop.permute.xlu2 %1792 }
 0x18f   : > { %1894 = vperm.xlu1 %10463, %v16364_v8   ;;  %1906 = vperm.xlu2 %10445, %v16365_v60   ;;  %v16367_v8 = vld [vmem:[#allocation14_spill] sm:$0xff]  ;;  %v966_v60 = vsel %vm838_vm12, 1.0, %v16352_v40  ;;  %vm2139_vm13 = vcmp.eq.s32.totalorder %v1793_v41, %v11235_v56 }
 0x190   : > { %1981 = vperm.xlu0 %10468, %v11774_v52   ;;  %v368_v41 = vld [vmem:[%s11025_s18 + $0x268] sm:$0xff] }
 0x192   : > { %v1386_v55 = vpop.f32.mrf.mxu0 }
 0x193   : > { %v1676_v25 = vpack.c.bf16 %v1386_v55, %v1384_v30  ;;  %v2644_v13 = vpop.f32.mrf.mxu1  ;;  %v2266_v30 = vsel %vm2138_vm10, 1.0, %v16352_v40  ;;  %v2267_v55 = vsel %vm2139_vm13, 1.0, %v16352_v40  ;;  %vm844_vm10 = vcmp.eq.s32.totalorder %v11378_v47, %v11235_v56 }
 0x194   : > { %v2962_v34 = vpack.c.bf16 %v2644_v13, %v2642_v33  ;;  %v2268_v13 = vsel %vm2140_vm14, 1.0, %v16352_v40  ;;  %vm846_vm14 = vcmp.eq.s32.totalorder %v11443_v58, %v11235_v56  ;;  %v374_v58 = vld [vmem:[%s11025_s18 + $0x298] sm:$0xff] }
 0x195   : > { %10037 = vmatmul.msk.bf16.gmra.mxu3 %vm3042_vm6, %v1676_v25  ;;  %v2386_v10 = vpack.c.bf16 %v2268_v13, %v2267_v55 }
 0x196   : > { %9893 = vmatmul.msk.bf16.gmra.mxu1 %vm1147_vm2, %v2384_v63  ;;  %9958 = vmatmul.msk.bf16.vlgmr.msra.gmra.mxu2 %vm3042_vm6, %v2962_v34  ;;  %v1799_v11 = vpop.permute.xlu2 %1798 }
 0x197   : > { %10464 = vset.pattern.permute.xlu1 %v16350_v2  ;;  %1915 = vperm.xlu2 %10445, %v11549_v59   ;;  %v2265_v59 = vsel %vm2137_vm9, 1.0, %v16352_v40  ;;  %vm2141_vm1 = vcmp.eq.s32.totalorder %v1799_v11, %v11235_v56  ;;  %vm843_vm9 = vcmp.eq.s32.totalorder %v11423_v19, %v11235_v56 }
 0x198   : > { %639 = vperm.xlu1 %10464, %v11722_v45   ;;  %v2385_v5 = vpack.c.bf16 %v2266_v30, %v2265_v59 }
 0x19a   : > { %v1389_v54 = vpop.f32.mrf.mxu0 }
 0x19d   : > { %9838 = vmatmul.msk.bf16.gmra.mxu0 %vm1147_vm2, %v1075_v38 }
 0x19f   : > { %1921 = vperm.xlu2 %10445, %v11429_v18   ;;  %v965_v18 = vsel %vm837_vm11, 1.0, %v16352_v40 }
 0x1a0   : > { %642 = vperm.xlu1 %10464, %v11735_v61   ;;  %v1076_v48 = vpack.c.bf16 %v966_v60, %v965_v18  ;;  %v2270_v18 = vsel %vm2142_vm3, 1.0, %v16352_v40 }
 0x1a2   : > { %v1391_v46 = vpop.f32.mrf.mxu0 }
 0x1a3   : > { %v1677_v0 = vpack.c.bf16 %v1391_v46, %v1389_v54  ;;  %v968_v54 = vsel %vm840_vm0, 1.0, %v16352_v40  ;;  %v2269_v46 = vsel %vm2141_vm1, 1.0, %v16352_v40  ;;  %vm2148_vm0 = vcmp.eq.s32.totalorder %v11520_v23, %v11235_v56  ;;  %v16374_v23 = vld [vmem:[#allocation16_spill] sm:$0xff] }
 0x1a4   : > { %v1077_v38 = vpack.c.bf16 %v968_v54, %v967_v6  ;;  %v2387_v60 = vpack.c.bf16 %v2270_v18, %v2269_v46  ;;  %v369_v54 = vld [vmem:[%s11025_s18 + $0x270] sm:$0xff]  ;;  %vm847_vm3 = vcmp.eq.s32.totalorder %v16374_v23, %v11235_v56 }
 0x1a5   : > { %10038 = vmatmul.msk.bf16.gmra.mxu3 %vm3042_vm6, %v1677_v0  ;;  %v538_v0 = vpop.permute.xlu0 %537 }
 0x1a6   : > { %9894 = vmatmul.msk.bf16.gmra.mxu1 %vm1147_vm2, %v2385_v5  ;;  %vm842_vm4 = vcmp.eq.s32.totalorder %v538_v0, %v11235_v56 }
 0x1a7   : > { %1924 = vperm.xlu2 %10445, %v11452_v1  }
 0x1a8   : > { %10466 = vset.pattern.permute.xlu1 %v16348_v44  ;;  %v11752_v33 = vpop.f32.mrf.mxu3 }
 0x1a9   : > { %1912 = vperm.xlu1 %10466, %v16367_v8  }
 0x1aa   : > { %v1394_v15 = vpop.f32.mrf.mxu0 }
 0x1ad   : > { %9839 = vmatmul.msk.bf16.gmra.mxu0 %vm1147_vm2, %v1076_v48 }
 0x1af   : > { %1933 = vperm.xlu2 %10445, %v11527_v12   ;;  %v11778_v12 = vpop.permute.xlu1 %603 }
 0x1b0   : > { %v11765_v1 = vpop.f32.mrf.mxu3 }
 0x1b1   : > { %1918 = vperm.xlu1 %10466, %v11393_v62   ;;  %v11782_v62 = vld [vmem:[%s11025_s18 + $0x260] sm:$0xff] }
 0x1b2   : > { %v1396_v25 = vpop.f32.mrf.mxu0 }
 0x1b3   : > { %v1678_v63 = vpack.c.bf16 %v1396_v25, %v1394_v15  ;;  %v2647_v34 = vpop.f32.mrf.mxu1  ;;  %v970_v15 = vsel %vm842_vm4, 1.0, %v16352_v40 }
 0x1b5   : > { %10039 = vmatmul.msk.bf16.gmra.mxu3 %vm3042_vm6, %v1678_v63 }
 0x1b6   : > { %9895 = vmatmul.msk.bf16.gmra.mxu1 %vm1147_vm2, %v2386_v10 }
 0x1b7   : > { %1936 = vperm.xlu2 %10445, %v11546_v35   ;;  %v11800_v30 = vpop.permute.xlu1 %606 }
 0x1b8   : > { %v11786_v36 = vpop.f32.mrf.mxu3 }
 0x1b9   : > { %10467 = vset.pattern.permute.xlu1 %v16350_v2 }
 0x1ba   : > { %648 = vperm.xlu1 %10467, %v11782_v62   ;;  %v1399_v53 = vpop.f32.mrf.mxu0 }
 0x1bb   : > { %v2649_v26 = vpop.f32.mrf.mxu1 }
 0x1bc   : > { %v2963_v59 = vpack.c.bf16 %v2649_v26, %v2647_v34  ;;  %v11818_v34 = vld [vmem:[%s11025_s18 + $0x2b8] sm:$0xff] }
 0x1bd   : > { %9840 = vmatmul.msk.bf16.gmra.mxu0 %vm1147_vm2, %v1077_v38  ;;  %1999 = vperm.xlu0 %10468, %v11818_v34  }
 0x1be   : > { %9959 = vmatmul.msk.bf16.gmra.mxu2 %vm3042_vm6, %v2963_v59  ;;  %v11832_v59 = vld [vmem:[%s11025_s18 + $0x2d8] sm:$0xff] }
 0x1bf   : > { %1942 = vperm.xlu2 %10445, %v11592_v42   ;;  %v1805_v25 = vpop.permute.xlu1 %1804 }
 0x1c0   : > { %v11797_v35 = vpop.f32.mrf.mxu3  ;;  %vm2143_vm7 = vcmp.eq.s32.totalorder %v1805_v25, %v11235_v56 }
 0x1c1   : > { %v2271_v6 = vsel %vm2143_vm7, 1.0, %v16352_v40  ;;  %vm849_vm7 = vcmp.eq.s32.totalorder %v11461_v20, %v11235_v56 }
 0x1c2   : > { %10469 = vset.pattern.permute.xlu1 %v16348_v44  ;;  %v1401_v5 = vpop.f32.mrf.mxu0 }
 0x1c3   : > { %v1679_v8 = vpack.c.bf16 %v1401_v5, %v1399_v53  ;;  %1930 = vperm.xlu1 %10469, %v11496_v50   ;;  %v2652_v42 = vpop.f32.mrf.mxu1  ;;  %v969_v50 = vsel %vm841_vm5, 1.0, %v16352_v40  ;;  %v972_v5 = vsel %vm844_vm10, 1.0, %v16352_v40  ;;  %vm2152_vm10 = vcmp.eq.s32.totalorder %v11537_v51, %v11235_v56 }
 0x1c4   : > { %v1078_v16 = vpack.c.bf16 %v970_v15, %v969_v50  ;;  %v547_v50 = vpop.permute.xlu0 %546 }
 0x1c5   : > { %10040 = vmatmul.msk.bf16.gmra.mxu3 %vm3042_vm6, %v1679_v8  ;;  %2011 = vperm.xlu0 %10468, %v11832_v59   ;;  %vm845_vm13 = vcmp.eq.s32.totalorder %v547_v50, %v11235_v56  ;;  %v975_v50 = vsel %vm847_vm3, 1.0, %v16352_v40 }
 0x1c6   : > { %9896 = vmatmul.msk.bf16.gmra.mxu1 %vm1147_vm2, %v2387_v60 }
 0x1c7   : > { %1951 = vperm.xlu2 %10445, %v11621_v57   ;;  %v1808_v57 = vpop.permute.xlu2 %1807  ;;  %v1811_v19 = vpop.permute.xlu1 %1810 }
 0x1c8   : > { %v11812_v48 = vpop.f32.mrf.mxu3  ;;  %vm2144_vm8 = vcmp.eq.s32.totalorder %v1808_v57, %v11235_v56  ;;  %vm2145_vm11 = vcmp.eq.s32.totalorder %v1811_v19, %v11235_v56  ;;  %v974_v57 = vsel %vm846_vm14, 1.0, %v16352_v40  ;;  %vm2154_vm14 = vcmp.eq.s32.totalorder %v11559_v22, %v11235_v56  ;;  %v16382_v22 = vld [vmem:[#allocation18_spill] sm:$0xff] }
 0x1c9   : > { %v2272_v11 = vsel %vm2144_vm8, 1.0, %v16352_v40 }
 0x1ca   : > { %v1404_v55 = vpop.f32.mrf.mxu0  ;;  %v2388_v46 = vpack.c.bf16 %v2272_v11, %v2271_v6 }
 0x1cb   : > { %10470 = vset.pattern.permute.xlu1 %v16350_v2  ;;  %v2654_v13 = vpop.f32.mrf.mxu1 }
 0x1cc   : > { %v2964_v63 = vpack.c.bf16 %v2654_v13, %v2652_v42  ;;  %651 = vperm.xlu1 %10470, %v368_v41  }
 0x1cd   : > { %9841 = vmatmul.msk.bf16.gmra.mxu0 %vm1147_vm2, %v1078_v16  ;;  %2017 = vperm.xlu0 %10468, %v11848_v28  }
 0x1ce   : > { %9960 = vmatmul.msk.bf16.gmra.mxu2 %vm3042_vm6, %v2964_v63 }
 0x1cf   : > { %1957 = vperm.xlu2 %10445, %v11722_v45   ;;  %v971_v45 = vsel %vm843_vm9, 1.0, %v16352_v40  ;;  %v1814_v15 = vpop.permute.xlu2 %1813 }
 0x1d0   : > { %v11826_v10 = vpop.f32.mrf.mxu3  ;;  %v1079_v8 = vpack.c.bf16 %v972_v5, %v971_v45  ;;  %vm2146_vm12 = vcmp.eq.s32.totalorder %v1814_v15, %v11235_v56  ;;  %v556_v45 = vpop.permute.xlu0 %555 }
 0x1d1   : > { %16369 = vst [vmem:[#allocation12_spill] sm:$0xff] %v11826_v10  ;;  %v2274_v16 = vsel %vm2146_vm12, 1.0, %v16352_v40  ;;  %vm848_vm1 = vcmp.eq.s32.totalorder %v556_v45, %v11235_v56  ;;  %v977_v45 = vsel %vm849_vm7, 1.0, %v16352_v40  ;;  %vm852_vm12 = vcmp.eq.s32.totalorder %v11479_v21, %v11235_v56 }
 0x1d2   : > { %v1406_v53 = vpop.f32.mrf.mxu0 }
 0x1d3   : > { %v1680_v38 = vpack.c.bf16 %v1406_v53, %v1404_v55  ;;  %v2657_v26 = vpop.f32.mrf.mxu1 }
 0x1d4   : > { %654 = vperm.xlu1 %10470, %v369_v54  }
 0x1d5   : > { %10041 = vmatmul.msk.bf16.gmra.mxu3 %vm3042_vm6, %v1680_v38  ;;  %10479 = vset.pattern.permute.xlu0 %v16350_v2  ;;  %v371_v38 = vld [vmem:[%s11025_s18 + $0x280] sm:$0xff] }
 0x1d6   : > { %9897 = vmatmul.msk.bf16.gmra.mxu1 %vm1147_vm2, %v2388_v46  ;;  %657 = vperm.xlu0 %10479, %v11759_v49   ;;  %v11878_v49 = vpop.permute.xlu1 %612 }
 0x1d7   : > { %1960 = vperm.xlu2 %10445, %v11735_v61   ;;  %v2273_v61 = vsel %vm2145_vm11, 1.0, %v16352_v40  ;;  %v1817_v6 = vpop.permute.xlu2 %1816 }
 0x1d8   : > { %v11843_v0 = vpop.f32.mrf.mxu3  ;;  %v2389_v13 = vpack.c.bf16 %v2274_v16, %v2273_v61  ;;  %vm2147_vm15 = vcmp.eq.s32.totalorder %v1817_v6, %v11235_v56 }
 0x1d9   : > { %16370 = vst [vmem:[#allocation6_spill] sm:$0xff] %v11843_v0  ;;  %v2275_v46 = vsel %vm2147_vm15, 1.0, %v16352_v40 }
 0x1da   : > { %v1409_v18 = vpop.f32.mrf.mxu0 }
 0x1db   : > { %v2659_v42 = vpop.f32.mrf.mxu1 }
 0x1dc   : > { %v2965_v60 = vpack.c.bf16 %v2659_v42, %v2657_v26  ;;  %10471 = vset.pattern.permute.xlu1 %v16348_v44 }
 0x1dd   : > { %1948 = vperm.xlu1 %10471, %v11649_v37   ;;  %9842 = vmatmul.msk.bf16.gmra.mxu0 %vm1147_vm2, %v1079_v8 }
 0x1de   : > { %9961 = vmatmul.msk.bf16.gmra.mxu2 %vm3042_vm6, %v2965_v60  ;;  %669 = vperm.xlu0 %10479, %v374_v58   ;;  %v976_v60 = vsel %vm848_vm1, 1.0, %v16352_v40  ;;  %v1823_v61 = vpop.permute.xlu1 %1822 }
 0x1df   : > { %1969 = vperm.xlu2 %10445, %v368_v41   ;;  %v973_v41 = vsel %vm845_vm13, 1.0, %v16352_v40  ;;  %v1081_v16 = vpack.c.bf16 %v976_v60, %v975_v50  ;;  %vm2149_vm4 = vcmp.eq.s32.totalorder %v1823_v61, %v11235_v56  ;;  %v11934_v61 = vld [vmem:[%s11025_s18 + $0x2c8] sm:$0xff]  ;;  %v394_v50 = vld [vmem:[%s11025_s18 + $0x338] sm:$0xff] }
 0x1e0   : > { %v11856_v47 = vpop.f32.mrf.mxu3  ;;  %v1080_v53 = vpack.c.bf16 %v974_v57, %v973_v41  ;;  %v1826_v41 = vpop.permute.xlu2 %1825  ;;  %v2277_v57 = vsel %vm2149_vm4, 1.0, %v16352_v40  ;;  %vm855_vm4 = vcmp.eq.s32.totalorder %v11491_v27, %v11235_v56 }
 0x1e1   : > { %16371 = vst [vmem:[#allocation7_spill] sm:$0xff] %v11856_v47  ;;  %vm2150_vm5 = vcmp.eq.s32.totalorder %v1826_v41, %v11235_v56  ;;  %v2280_v41 = vsel %vm2152_vm10, 1.0, %v16352_v40  ;;  %vm858_vm10 = vcmp.eq.s32.totalorder %v11507_v7, %v11235_v56 }
 0x1e2   : > { %v1411_v55 = vpop.f32.mrf.mxu0 }
 0x1e3   : > { %v1681_v37 = vpack.c.bf16 %v1411_v55, %v1409_v18  ;;  %v2662_v25 = vpop.f32.mrf.mxu1  ;;  %v2276_v18 = vsel %vm2148_vm0, 1.0, %v16352_v40  ;;  %vm853_vm0 = vcmp.eq.s32.totalorder %v16382_v22, %v11235_v56 }
 0x1e4   : > { %v2390_v42 = vpack.c.bf16 %v2276_v18, %v2275_v46  ;;  %v16377_v46 = vld [vmem:[#allocation17_spill] sm:$0xff] }
 0x1e5   : > { %1954 = vperm.xlu1 %10471, %v11695_v14   ;;  %10042 = vmatmul.msk.bf16.gmra.mxu3 %vm3042_vm6, %v1681_v37  ;;  %vm850_vm8 = vcmp.eq.s32.totalorder %v16377_v46, %v11235_v56  ;;  %v980_v46 = vsel %vm852_vm12, 1.0, %v16352_v40  ;;  %vm2160_vm12 = vcmp.eq.s32.totalorder %v11577_v43, %v11235_v56 }
 0x1e6   : > { %9898 = vmatmul.msk.bf16.gmra.mxu1 %vm1147_vm2, %v2389_v13  ;;  %681 = vperm.xlu0 %10479, %v11818_v34   ;;  %v11899_v13 = vld [vmem:[%s11025_s18 + $0x2a8] sm:$0xff]  ;;  %v978_v18 = vsel %vm850_vm8, 1.0, %v16352_v40 }
 0x1e7   : > { %1972 = vperm.xlu2 %10445, %v369_v54  }
 0x1e8   : > { %v11869_v63 = vpop.f32.mrf.mxu3  ;;  %v1829_v20 = vpop.permute.xlu2 %1828 }
 0x1e9   : > { %16372 = vst [vmem:[#allocation9_spill] sm:$0xff] %v11869_v63  ;;  %vm2151_vm9 = vcmp.eq.s32.totalorder %v1829_v20, %v11235_v56 }
 0x1ea   : > { %v1414_v14 = vpop.f32.mrf.mxu0 }
 0x1eb   : > { %v2664_v11 = vpop.f32.mrf.mxu1 }
 0x1ec   : > { %v2966_v26 = vpack.c.bf16 %v2664_v11, %v2662_v25 }
 0x1ed   : > { %10472 = vset.pattern.permute.xlu1 %v16350_v2  ;;  %9843 = vmatmul.msk.bf16.gmra.mxu0 %vm1147_vm2, %v1080_v53  ;;  %v2278_v53 = vsel %vm2150_vm5, 1.0, %v16352_v40 }
 0x1ee   : > { %660 = vperm.xlu1 %10472, %v371_v38   ;;  %9962 = vmatmul.msk.bf16.gmra.mxu2 %vm3042_vm6, %v2966_v26  ;;  %v2391_v26 = vpack.c.bf16 %v2278_v53, %v2277_v57  ;;  %v11949_v53 = vld [vmem:[%s11025_s18 + $0x2d0] sm:$0xff] }
 0x1ef   : > { %1978 = vperm.xlu2 %10445, %v371_v38   ;;  %10482 = vset.pattern.permute.xlu0 %v16348_v44 }
 0x1f0   : > { %v11882_v54 = vpop.f32.mrf.mxu3 }
 0x1f1   : > { %16373 = vst [vmem:[#allocation8_spill] sm:$0xff] %v11882_v54 }
 0x1f2   : > { %v1416_v5 = vpop.f32.mrf.mxu0 }
 0x1f3   : > { %v1682_v8 = vpack.c.bf16 %v1416_v5, %v1414_v14  ;;  %v2667_v19 = vpop.f32.mrf.mxu1  ;;  %v11913_v14 = vpop.permute.xlu1 %615 }
 0x1f5   : > { %10043 = vmatmul.msk.bf16.gmra.mxu3 %vm3042_vm6, %v1682_v8 }
 0x1f6   : > { %10473 = vset.pattern.permute.xlu1 %v16348_v44  ;;  %9899 = vmatmul.msk.bf16.gmra.mxu1 %vm1147_vm2, %v2390_v42 }
 0x1f7   : > { %1966 = vperm.xlu1 %10473, %v11782_v62   ;;  %1987 = vperm.xlu2 %10445, %v374_v58   ;;  %v390_v62 = vld [vmem:[%s11025_s18 + $0x318] sm:$0xff]  ;;  %v11917_v58 = vld [vmem:[%s11025_s18 + $0x2b0] sm:$0xff] }
 0x1f8   : > { %v11894_v15 = vpop.f32.mrf.mxu3  ;;  %2035 = vperm.xlu0 %10482, %v390_v62  }
 0x1f9   : > { %16375 = vst [vmem:[#allocation10_spill] sm:$0xff] %v11894_v15 }
 0x1fa   : > { %v1419_v55 = vpop.f32.mrf.mxu0 }
 0x1fb   : > { %v2669_v37 = vpop.f32.mrf.mxu1  ;;  %v11931_v42 = vpop.permute.xlu1 %618 }
 0x1fc   : > { %v2967_v25 = vpack.c.bf16 %v2669_v37, %v2667_v19  ;;  %v1082_v19 = vpack.c.bf16 %v978_v18, %v977_v45  ;;  %v565_v37 = vpop.permute.xlu0 %564  ;;  %v1835_v18 = vpop.permute.xlu2 %1834 }
 0x1fd   : > { %9844 = vmatmul.msk.bf16.gmra.mxu0 %vm1147_vm2, %v1081_v16  ;;  %v2279_v16 = vsel %vm2151_vm9, 1.0, %v16352_v40  ;;  %vm851_vm11 = vcmp.eq.s32.totalorder %v565_v37, %v11235_v56  ;;  %vm2153_vm13 = vcmp.eq.s32.totalorder %v1835_v18, %v11235_v56 }
 0x1fe   : > { %9963 = vmatmul.msk.bf16.gmra.mxu2 %vm3042_vm6, %v2967_v25 }
 0x1ff   : > { %10474 = vset.pattern.permute.xlu1 %v16350_v2  ;;  %1993 = vperm.xlu2 %10445, %v11899_v13  }
 0x200   : > { %663 = vperm.xlu1 %10474, %v11774_v52   ;;  %v11909_v34 = vpop.f32.mrf.mxu3  ;;  %v373_v52 = vld [vmem:[%s11025_s18 + $0x290] sm:$0xff]  ;;  %2047 = vperm.xlu0 %10482, %v394_v50   ;;  %v2281_v50 = vsel %vm2153_vm13, 1.0, %v16352_v40  ;;  %vm860_vm13 = vcmp.eq.s32.totalorder %v11610_v17, %v11235_v56 }
 0x201   : > { %16376 = vst [vmem:[#allocation11_spill] sm:$0xff] %v11909_v34 }
 0x202   : > { %v1421_v6 = vpop.f32.mrf.mxu0 }
 0x203   : > { %v1683_v11 = vpack.c.bf16 %v1421_v6, %v1419_v55  ;;  %v2672_v38 = vpop.f32.mrf.mxu1  ;;  %v2392_v6 = vpack.c.bf16 %v2280_v41, %v2279_v16  ;;  %v11952_v51 = vpop.permute.xlu1 %1840 }
 0x204   : > { %v574_v16 = vpop.permute.xlu0 %573  ;;  %vm2155_vm1 = vcmp.eq.s32.totalorder %v11952_v51, %v11235_v56 }
 0x205   : > { %10044 = vmatmul.msk.bf16.gmra.mxu3 %vm3042_vm6, %v1683_v11  ;;  %v375_v11 = vld [vmem:[%s11025_s18 + $0x2a0] sm:$0xff]  ;;  %vm854_vm15 = vcmp.eq.s32.totalorder %v574_v16, %v11235_v56 }
 0x206   : > { %9900 = vmatmul.msk.bf16.gmra.mxu1 %vm1147_vm2, %v2391_v26  ;;  %v979_v26 = vsel %vm851_vm11, 1.0, %v16352_v40 }
 0x207   : > { %1996 = vperm.xlu2 %10445, %v11917_v58   ;;  %v1083_v20 = vpack.c.bf16 %v980_v46, %v979_v26  ;;  %v11995_v26 = vld [vmem:[%s11025_s18 + $0x2c0] sm:$0xff]  ;;  %v981_v46 = vsel %vm853_vm0, 1.0, %v16352_v40 }
 0x208   : > { %666 = vperm.xlu1 %10474, %v373_v52   ;;  %v11928_v5 = vpop.f32.mrf.mxu3 }
 0x209   : > { %16378 = vst [vmem:[#allocation13_spill] sm:$0xff] %v11928_v5 }
 0x20a   : > { %v1424_v8 = vpop.f32.mrf.mxu0 }
 0x20b   : > { %v2674_v23 = vpop.f32.mrf.mxu1  ;;  %v11971_v21 = vpop.permute.xlu1 %1846 }
 0x20c   : > { %v2968_v60 = vpack.c.bf16 %v2674_v23, %v2672_v38  ;;  %v396_v38 = vld [vmem:[%s11025_s18 + $0x348] sm:$0xff]  ;;  %v11966_v23 = vld [vmem:[%s11025_s18 + $0x2e0] sm:$0xff]  ;;  %vm2157_vm7 = vcmp.eq.s32.totalorder %v11971_v21, %v11235_v56 }
 0x20d   : > { %9845 = vmatmul.msk.bf16.gmra.mxu0 %vm1147_vm2, %v1082_v19  ;;  %2053 = vperm.xlu0 %10482, %v396_v38  }
 0x20e   : > { %9964 = vmatmul.msk.bf16.gmra.mxu2 %vm3042_vm6, %v2968_v60 }
 0x20f   : > { %2005 = vperm.xlu2 %10445, %v11934_v61  }
 0x210   : > { %10475 = vset.pattern.permute.xlu1 %v16348_v44  ;;  %v11944_v55 = vpop.f32.mrf.mxu3 }
 0x211   : > { %16379 = vst [vmem:[#allocation14_spill] sm:$0xff] %v11944_v55  ;;  %1984 = vperm.xlu1 %10475, %v373_v52  }
 0x212   : > { %v1426_v25 = vpop.f32.mrf.mxu0 }
 0x213   : > { %v1684_v62 = vpack.c.bf16 %v1426_v25, %v1424_v8  ;;  %v2677_v57 = vpop.f32.mrf.mxu1  ;;  %v2282_v25 = vsel %vm2154_vm14, 1.0, %v16352_v40  ;;  %vm859_vm14 = vcmp.eq.s32.totalorder %v11522_v24, %v11235_v56 }
 0x215   : > { %10045 = vmatmul.msk.bf16.gmra.mxu3 %vm3042_vm6, %v1684_v62  ;;  %10486 = vset.pattern.permute.xlu0 %v16350_v2 }
 0x216   : > { %9901 = vmatmul.msk.bf16.gmra.mxu1 %vm1147_vm2, %v2392_v6  ;;  %693 = vperm.xlu0 %10486, %v11832_v59   ;;  %v386_v6 = vld [vmem:[%s11025_s18 + $0x2f8] sm:$0xff]  ;;  %v11989_v59 = vpop.permute.xlu1 %624 }
 0x217   : > { %2008 = vperm.xlu2 %10445, %v11949_v53  }
 0x218   : > { %v11962_v52 = vpop.f32.mrf.mxu3 }
 0x219   : > { %16380 = vst [vmem:[#allocation15_spill] sm:$0xff] %v11962_v52  ;;  %1990 = vperm.xlu1 %10475, %v375_v11   ;;  %v12006_v16 = vpop.f32.mrf.mxu2 }
 0x21a   : > { %v1429_v45 = vpop.f32.mrf.mxu0 }
 0x21b   : > { %v2679_v8 = vpop.f32.mrf.mxu1 }
 0x21c   : > { %v2969_v19 = vpack.c.bf16 %v2679_v8, %v2677_v57  ;;  %v2393_v57 = vpack.c.bf16 %v2282_v25, %v2281_v50  ;;  %v1844_v50 = vpop.permute.xlu2 %1843  ;;  %v2283_v25 = vsel %vm2155_vm1, 1.0, %v16352_v40 }
 0x21d   : > { %9846 = vmatmul.msk.bf16.gmra.mxu0 %vm1147_vm2, %v1083_v20  ;;  %vm2156_vm3 = vcmp.eq.s32.totalorder %v1844_v50, %v11235_v56 }
 0x21e   : > { %9965 = vmatmul.msk.bf16.gmra.mxu2 %vm3042_vm6, %v2969_v19  ;;  %10489 = vset.pattern.permute.xlu0 %v16348_v44  ;;  %v388_v19 = vld [vmem:[%s11025_s18 + $0x308] sm:$0xff] }
 0x21f   : > { %2014 = vperm.xlu2 %10445, %v11966_v23  }
 0x220   : > { %v11977_v60 = vpop.f32.mrf.mxu3 }
 0x221   : > { %16381 = vst [vmem:[#allocation16_spill] sm:$0xff] %v11977_v60  ;;  %10476 = vset.pattern.permute.xlu1 %v16350_v2 }
 0x222   : > { %672 = vperm.xlu1 %10476, %v375_v11   ;;  %v1431_v37 = vpop.f32.mrf.mxu0  ;;  %v982_v11 = vsel %vm854_vm15, 1.0, %v16352_v40 }
 0x223   : > { %v1685_v41 = vpack.c.bf16 %v1431_v37, %v1429_v45  ;;  %v2682_v62 = vpop.f32.mrf.mxu1  ;;  %v1084_v18 = vpack.c.bf16 %v982_v11, %v981_v46  ;;  %v389_v11 = vld [vmem:[%s11025_s18 + $0x310] sm:$0xff] }
 0x224   : > { %v16385_v46 = vld [vmem:[#allocation19_spill] sm:$0xff] }
 0x225   : > { %10046 = vmatmul.msk.bf16.gmra.mxu3 %vm3042_vm6, %v1685_v41  ;;  %v12012_v41 = vpop.permute.xlu1 %1858  ;;  %vm856_vm5 = vcmp.eq.s32.totalorder %v16385_v46, %v11235_v56  ;;  %v12045_v46 = vld [vmem:[%s11025_s18 + $0x2f0] sm:$0xff] }
 0x226   : > { %9902 = vmatmul.msk.bf16.gmra.mxu1 %vm1147_vm2, %v2393_v57  ;;  %v2284_v57 = vsel %vm2156_vm3, 1.0, %v16352_v40  ;;  %vm2161_vm15 = vcmp.eq.s32.totalorder %v12012_v41, %v11235_v56  ;;  %vm861_vm3 = vcmp.eq.s32.totalorder %v11629_v9, %v11235_v56 }
 0x227   : > { %2023 = vperm.xlu2 %10445, %v386_v6   ;;  %v2394_v22 = vpack.c.bf16 %v2284_v57, %v2283_v25  ;;  %v1850_v57 = vpop.permute.xlu2 %1849 }
 0x228   : > { %v11992_v38 = vpop.f32.mrf.mxu3  ;;  %vm2158_vm8 = vcmp.eq.s32.totalorder %v1850_v57, %v11235_v56 }
 0x229   : > { %16383 = vst [vmem:[#allocation17_spill] sm:$0xff] %v11992_v38 }
 0x22a   : > { %10477 = vset.pattern.permute.xlu1 %v16348_v44  ;;  %v1434_v45 = vpop.f32.mrf.mxu0 }
 0x22b   : > { %2002 = vperm.xlu1 %10477, %v11995_v26   ;;  %v2684_v20 = vpop.f32.mrf.mxu1 }
 0x22c   : > { %v2970_v8 = vpack.c.bf16 %v2684_v20, %v2682_v62 }
 0x22d   : > { %9847 = vmatmul.msk.bf16.gmra.mxu0 %vm1147_vm2, %v1084_v18  ;;  %v12027_v20 = vpop.permute.xlu1 %627 }
 0x22e   : > { %9966 = vmatmul.msk.bf16.gmra.mxu2 %vm3042_vm6, %v2970_v8  ;;  %v984_v8 = vsel %vm856_vm5, 1.0, %v16352_v40  ;;  %vm2164_vm5 = vcmp.eq.s32.totalorder %v11594_v31, %v11235_v56  ;;  %v397_v31 = vld [vmem:[%s11025_s18 + $0x350] sm:$0xff] }
 0x22f   : > { %2029 = vperm.xlu2 %10445, %v388_v19  }
 0x230   : > { %v12009_v37 = vpop.f32.mrf.mxu3 }
 0x231   : > { %16384 = vst [vmem:[#allocation18_spill] sm:$0xff] %v12009_v37  ;;  %v395_v37 = vld [vmem:[%s11025_s18 + $0x340] sm:$0xff] }
 0x232   : > { %v1436_v62 = vpop.f32.mrf.mxu0 }
 0x233   : > { %v1686_v6 = vpack.c.bf16 %v1436_v62, %v1434_v45  ;;  %10478 = vset.pattern.permute.xlu1 %v16350_v2  ;;  %v2687_v51 = vpop.f32.mrf.mxu1  ;;  %v983_v45 = vsel %vm855_vm4, 1.0, %v16352_v40  ;;  %v392_v62 = vld [vmem:[%s11025_s18 + $0x328] sm:$0xff] }
 0x234   : > { %675 = vperm.xlu1 %10478, %v11899_v13   ;;  %v12029_v13 = vpop.f32.mrf.mxu2  ;;  %v1085_v27 = vpack.c.bf16 %v984_v8, %v983_v45  ;;  %v2286_v45 = vsel %vm2158_vm8, 1.0, %v16352_v40  ;;  %vm864_vm8 = vcmp.eq.s32.totalorder %v11778_v12, %v11235_v56 }
 0x235   : > { %10047 = vmatmul.msk.bf16.gmra.mxu3 %vm3042_vm6, %v1686_v6  ;;  %v12048_v8 = vpop.permute.xlu1 %630 }
 0x236   : > { %9903 = vmatmul.msk.bf16.gmra.mxu1 %vm1147_vm2, %v2394_v22  ;;  %v2285_v22 = vsel %vm2157_vm7, 1.0, %v16352_v40  ;;  %vm863_vm7 = vcmp.eq.s32.totalorder %v11716_v32, %v11235_v56 }
 0x237   : > { %2032 = vperm.xlu2 %10445, %v389_v11  }
 0x238   : > { %v12025_v18 = vpop.f32.mrf.mxu3 }
 0x239   : > { %16386 = vst [vmem:[#allocation19_spill] sm:$0xff] %v12025_v18 }
 0x23a   : > { %v1439_v19 = vpop.f32.mrf.mxu0 }
 0x23b   : > { %v2689_v50 = vpop.f32.mrf.mxu1 }
 0x23c   : > { %v2971_v25 = vpack.c.bf16 %v2689_v50, %v2687_v51  ;;  %678 = vperm.xlu1 %10478, %v11917_v58   ;;  %v583_v58 = vpop.permute.xlu0 %582  ;;  %v2395_v50 = vpack.c.bf16 %v2286_v45, %v2285_v22  ;;  %v986_v22 = vsel %vm858_vm10, 1.0, %v16352_v40  ;;  %v1853_v45 = vpop.permute.xlu2 %1852  ;;  %vm2166_vm10 = vcmp.eq.s32.totalorder %v11615_v29, %v11235_v56 }
 0x23d   : > { %9848 = vmatmul.msk.bf16.gmra.mxu0 %vm1147_vm2, %v1085_v27  ;;  %vm857_vm9 = vcmp.eq.s32.totalorder %v583_v58, %v11235_v56  ;;  %vm2159_vm11 = vcmp.eq.s32.totalorder %v1853_v45, %v11235_v56  ;;  %v987_v45 = vsel %vm859_vm14, 1.0, %v16352_v40 }
 0x23e   : > { %9967 = vmatmul.msk.bf16.gmra.mxu2 %vm3042_vm6, %v2971_v25  ;;  %v393_v25 = vld [vmem:[%s11025_s18 + $0x330] sm:$0xff] }
 0x23f   : > { %2041 = vperm.xlu2 %10445, %v392_v62  }
 0x240   : > { %v12039_v6 = vpop.f32.mrf.mxu3 }
 0x241   : > { %16387 = vst [vmem:[#allocation20_spill] sm:$0xff] %v12039_v6  ;;  %v12042_v51 = vpop.f32.mrf.mxu2 }
 0x242   : > { %v1441_v11 = vpop.f32.mrf.mxu0 }
 0x243   : > { %v1687_v21 = vpack.c.bf16 %v1441_v11, %v1439_v19  ;;  %v2692_v27 = vpop.f32.mrf.mxu1  ;;  %v985_v19 = vsel %vm857_vm9, 1.0, %v16352_v40  ;;  %v387_v11 = vld [vmem:[%s11025_s18 + $0x300] sm:$0xff] }
 0x244   : > { %10480 = vset.pattern.permute.xlu1 %v16348_v44  ;;  %v1086_v6 = vpack.c.bf16 %v986_v22, %v985_v19  ;;  %v2288_v19 = vsel %vm2160_vm12, 1.0, %v16352_v40 }
 0x245   : > { %2020 = vperm.xlu1 %10480, %v12045_v46   ;;  %10048 = vmatmul.msk.bf16.gmra.mxu3 %vm3042_vm6, %v1687_v21 }
 0x246   : > { %9904 = vmatmul.msk.bf16.gmra.mxu1 %vm1147_vm2, %v2395_v50  ;;  %v12066_v50 = vpop.permute.xlu1 %1876 }
 0x247   : > { %2044 = vperm.xlu2 %10445, %v393_v25   ;;  %v2287_v25 = vsel %vm2159_vm11, 1.0, %v16352_v40  ;;  %vm865_vm11 = vcmp.eq.s32.totalorder %v11800_v30, %v11235_v56 }
 0x248   : > { %v12059_v62 = vpop.f32.mrf.mxu3 }
 0x249   : > { %16388 = vst [vmem:[#allocation21_spill] sm:$0xff] %v12059_v62  ;;  %v12061_v57 = vpop.f32.mrf.mxu2  ;;  %v398_v62 = vld [vmem:[%s11025_s18 + $0x358] sm:$0xff] }
 0x24a   : > { %v1444_v58 = vpop.f32.mrf.mxu0 }
 0x24b   : > { %v2694_v18 = vpop.f32.mrf.mxu1 }
 0x24c   : > { %v2972_v21 = vpack.c.bf16 %v2694_v18, %v2692_v27 }
 0x24d   : > { %2026 = vperm.xlu1 %10480, %v387_v11   ;;  %9849 = vmatmul.msk.bf16.gmra.mxu0 %vm1147_vm2, %v1086_v6  ;;  %v2396_v6 = vpack.c.bf16 %v2288_v19, %v2287_v25  ;;  %v391_v19 = vld [vmem:[%s11025_s18 + $0x320] sm:$0xff] }
 0x24e   : > { %9968 = vmatmul.msk.bf16.gmra.mxu2 %vm3042_vm6, %v2972_v21  ;;  %v12088_v43 = vpop.permute.xlu1 %1882 }
 0x24f   : > { %2050 = vperm.xlu2 %10445, %v395_v37   ;;  %v988_v37 = vsel %vm860_vm13, 1.0, %v16352_v40  ;;  %vm2167_vm13 = vcmp.eq.s32.totalorder %v12066_v50, %v11235_v56 }
 0x250   : > { %v12073_v7 = vpop.f32.mrf.mxu3  ;;  %v1087_v25 = vpack.c.bf16 %v988_v37, %v987_v45  ;;  %v598_v45 = vpop.permute.xlu0 %597 }
 0x251   : > { %16389 = vst [vmem:[#allocation22_spill] sm:$0xff] %v12073_v7  ;;  %v12076_v18 = vpop.f32.mrf.mxu2  ;;  %vm862_vm1 = vcmp.eq.s32.totalorder %v598_v45, %v11235_v56 }
 0x252   : > { %v1446_v27 = vpop.f32.mrf.mxu0 }
 0x253   : > { %v1688_v22 = vpack.c.bf16 %v1446_v27, %v1444_v58  ;;  %v2697_v11 = vpop.f32.mrf.mxu1 }
 0x255   : > { %10481 = vset.pattern.permute.xlu1 %v16350_v2  ;;  %10049 = vmatmul.msk.bf16.gmra.mxu3 %vm3042_vm6, %v1688_v22  ;;  %v400_v22 = vld [vmem:[%s11025_s18 + $0x368] sm:$0xff] }
 0x256   : > { %684 = vperm.xlu1 %10481, %v11995_v26   ;;  %9905 = vmatmul.msk.bf16.gmra.mxu1 %vm1147_vm2, %v2396_v6  ;;  %v1862_v6 = vpop.permute.xlu2 %1861  ;;  %v12103_v24 = vpop.permute.xlu1 %636 }
 0x257   : > { %2059 = vperm.xlu2 %10445, %v398_v62   ;;  %vm2162_vm0 = vcmp.eq.s32.totalorder %v1862_v6, %v11235_v56 }
 0x258   : > { %v12091_v58 = vpop.f32.mrf.mxu3  ;;  %v2290_v41 = vsel %vm2162_vm0, 1.0, %v16352_v40  ;;  %vm868_vm0 = vcmp.eq.s32.totalorder %v11913_v14, %v11235_v56 }
 0x259   : > { %16390 = vst [vmem:[#allocation23_spill] sm:$0xff] %v12091_v58  ;;  %v12093_v17 = vpop.f32.mrf.mxu2 }
 0x25a   : > { %16391 = vst [vmem:[#allocation24_spill] sm:$0xff] %v12093_v17  ;;  %v1449_v21 = vpop.f32.mrf.mxu0 }
 0x25b   : > { %v2699_v27 = vpop.f32.mrf.mxu1 }
 0x25c   : > { %v2973_v26 = vpack.c.bf16 %v2699_v27, %v2697_v11  ;;  %v2289_v11 = vsel %vm2161_vm15, 1.0, %v16352_v40  ;;  %vm867_vm15 = vcmp.eq.s32.totalorder %v11878_v49, %v11235_v56 }
 0x25d   : > { %9850 = vmatmul.msk.bf16.gmra.mxu0 %vm1147_vm2, %v1087_v25  ;;  %v2397_v7 = vpack.c.bf16 %v2290_v41, %v2289_v11 }
 0x25e   : > { %10483 = vset.pattern.permute.xlu1 %v16348_v44  ;;  %9969 = vmatmul.msk.bf16.gmra.mxu2 %vm3042_vm6, %v2973_v26  ;;  %v990_v26 = vsel %vm862_vm1, 1.0, %v16352_v40  ;;  %v1865_v11 = vpop.permute.xlu2 %1864  ;;  %vm2169_vm1 = vcmp.eq.s32.totalorder %v12088_v43, %v11235_v56 }
 0x25f   : > { %2038 = vperm.xlu1 %10483, %v391_v19   ;;  %2065 = vperm.xlu2 %10445, %v400_v22   ;;  %v12124_v19 = vpop.permute.xlu1 %1894  ;;  %v989_v22 = vsel %vm861_vm3, 1.0, %v16352_v40  ;;  %vm2163_vm4 = vcmp.eq.s32.totalorder %v1865_v11, %v11235_v56 }
 0x260   : > { %v12106_v62 = vpop.f32.mrf.mxu3  ;;  %v1088_v9 = vpack.c.bf16 %v990_v26, %v989_v22  ;;  %v2292_v26 = vsel %vm2164_vm5, 1.0, %v16352_v40 }
 0x261   : > { %16392 = vst [vmem:[#allocation25_spill] sm:$0xff] %v12106_v62  ;;  %v12109_v37 = vpop.f32.mrf.mxu2 }
 0x262   : > { %16393 = vst [vmem:[#allocation26_spill] sm:$0xff] %v12109_v37  ;;  %v1451_v25 = vpop.f32.mrf.mxu0 }
 0x263   : > { %v1689_v27 = vpack.c.bf16 %v1451_v25, %v1449_v21  ;;  %v2702_v58 = vpop.f32.mrf.mxu1 }
 0x265   : > { %10050 = vmatmul.msk.bf16.gmra.mxu3 %vm3042_vm6, %v1689_v27 }
 0x266   : > { %9906 = vmatmul.msk.bf16.gmra.mxu1 %vm1147_vm2, %v2397_v7  ;;  %v1871_v32 = vpop.permute.xlu2 %1870 }
 0x267   : > { %10484 = vset.pattern.permute.xlu1 %v16350_v2  ;;  %10488 = vset.pattern.permute.xlu2 %v16350_v2  ;;  %v12139_v41 = vpop.permute.xlu1 %639  ;;  %vm2165_vm9 = vcmp.eq.s32.totalorder %v1871_v32, %v11235_v56 }
 0x268   : > { %687 = vperm.xlu1 %10484, %v11934_v61   ;;  %v12121_v21 = vpop.f32.mrf.mxu3  ;;  %699 = vperm.xlu2 %10488, %v11848_v28   ;;  %v2291_v61 = vsel %vm2163_vm4, 1.0, %v16352_v40  ;;  %vm869_vm4 = vcmp.eq.s32.totalorder %v11931_v42, %v11235_v56 }
 0x269   : > { %16394 = vst [vmem:[#allocation27_spill] sm:$0xff] %v12121_v21  ;;  %v12127_v7 = vpop.f32.mrf.mxu2  ;;  %v2398_v11 = vpack.c.bf16 %v2292_v26, %v2291_v61 }
 0x26a   : > { %16395 = vst [vmem:[#allocation28_spill] sm:$0xff] %v12127_v7  ;;  %v1454_v6 = vpop.f32.mrf.mxu0 }
 0x26b   : > { %v2704_v45 = vpop.f32.mrf.mxu1 }
 0x26c   : > { %v2974_v25 = vpack.c.bf16 %v2704_v45, %v2702_v58 }
 0x26d   : > { %9851 = vmatmul.msk.bf16.gmra.mxu0 %vm1147_vm2, %v1088_v9 }
 0x26e   : > { %9970 = vmatmul.msk.bf16.gmra.mxu2 %vm3042_vm6, %v2974_v25 }
 0x26f   : > { %v12159_v61 = vpop.permute.xlu1 %642 }
 0x270   : > { %690 = vperm.xlu1 %10484, %v11949_v53   ;;  %v12135_v28 = vpop.f32.mrf.mxu3  ;;  %702 = vperm.xlu2 %10488, %v12045_v46   ;;  %v991_v53 = vsel %vm863_vm7, 1.0, %v16352_v40  ;;  %v992_v46 = vsel %vm864_vm8, 1.0, %v16352_v40  ;;  %vm2172_vm8 = vcmp.eq.s32.totalorder %v11634_v39, %v11235_v56 }
 0x271   : > { %16396 = vst [vmem:[#allocation29_spill] sm:$0xff] %v12135_v28  ;;  %v12141_v58 = vpop.f32.mrf.mxu2  ;;  %v1089_v25 = vpack.c.bf16 %v992_v46, %v991_v53  ;;  %v2295_v28 = vsel %vm2167_vm13, 1.0, %v16352_v40  ;;  %vm873_vm13 = vcmp.eq.s32.totalorder %v12048_v8, %v11235_v56 }
 0x272   : > { %16397 = vst [vmem:[#allocation30_spill] sm:$0xff] %v12141_v58  ;;  %v1456_v27 = vpop.f32.mrf.mxu0  ;;  %v12756_v58 = vld [vmem:[%s11025_s18 + $0x3c8] sm:$0xff] }
 0x273   : > { %v1690_v22 = vpack.c.bf16 %v1456_v27, %v1454_v6  ;;  %v2707_v9 = vpop.f32.mrf.mxu1 }
 0x275   : > { %10051 = vmatmul.msk.bf16.gmra.mxu3 %vm3042_vm6, %v1690_v22  ;;  %v399_v22 = vld [vmem:[%s11025_s18 + $0x360] sm:$0xff] }
 0x276   : > { %9907 = vmatmul.msk.bf16.gmra.mxu1 %vm1147_vm2, %v2398_v11 }
 0x277   : > { %v12176_v29 = vpop.permute.xlu1 %1912 }
 0x278   : > { %10485 = vset.pattern.permute.xlu1 %v16348_v44  ;;  %v12154_v6 = vpop.f32.mrf.mxu3  ;;  %10492 = vset.pattern.permute.xlu2 %v16348_v44 }
 0x279   : > { %16398 = vst [vmem:[#allocation31_spill] sm:$0xff] %v12154_v6  ;;  %2056 = vperm.xlu1 %10485, %v397_v31   ;;  %v12157_v45 = vpop.f32.mrf.mxu2  ;;  %v2293_v31 = vsel %vm2165_vm9, 1.0, %v16352_v40  ;;  %v610_v6 = vpop.permute.xlu0 %609  ;;  %vm871_vm9 = vcmp.eq.s32.totalorder %v11989_v59, %v11235_v56 }
 0x27a   : > { %16399 = vst [vmem:[#allocation32_spill] sm:$0xff] %v12157_v45  ;;  %v1459_v12 = vpop.f32.mrf.mxu0  ;;  %vm866_vm12 = vcmp.eq.s32.totalorder %v610_v6, %v11235_v56  ;;  %v999_v39 = vsel %vm871_vm9, 1.0, %v16352_v40  ;;  %vm2179_vm9 = vcmp.eq.s32.totalorder %v12176_v29, %v11235_v56 }
 0x27b   : > { %v2709_v27 = vpop.f32.mrf.mxu1 }
 0x27c   : > { %v2975_v26 = vpack.c.bf16 %v2709_v27, %v2707_v9  ;;  %v2294_v9 = vsel %vm2166_vm10, 1.0, %v16352_v40  ;;  %vm872_vm10 = vcmp.eq.s32.totalorder %v12027_v20, %v11235_v56 }
 0x27d   : > { %9852 = vmatmul.msk.bf16.gmra.mxu0 %vm1147_vm2, %v1089_v25  ;;  %v2399_v32 = vpack.c.bf16 %v2294_v9, %v2293_v31 }
 0x27e   : > { %9971 = vmatmul.msk.bf16.gmra.mxu2 %vm3042_vm6, %v2975_v26  ;;  %v993_v26 = vsel %vm865_vm11, 1.0, %v16352_v40  ;;  %vm2173_vm11 = vcmp.eq.s32.totalorder %v12124_v19, %v11235_v56 }
 0x280   : > { %v12167_v11 = vpop.f32.mrf.mxu3 }
 0x281   : > { %16400 = vst [vmem:[#allocation33_spill] sm:$0xff] %v12167_v11  ;;  %2062 = vperm.xlu1 %10485, %v399_v22   ;;  %v12170_v53 = vpop.f32.mrf.mxu2  ;;  %v994_v22 = vsel %vm866_vm12, 1.0, %v16352_v40 }
 0x282   : > { %16401 = vst [vmem:[#allocation34_spill] sm:$0xff] %v12170_v53  ;;  %v1461_v46 = vpop.f32.mrf.mxu0  ;;  %v1090_v6 = vpack.c.bf16 %v994_v22, %v993_v26  ;;  %v10687_v53 = vld [vmem:[%s11025_s18 + $0x328] sm:$0xff] }
 0x283   : > { %v1691_v25 = vpack.c.bf16 %v1461_v46, %v1459_v12  ;;  %v2712_v27 = vpop.f32.mrf.mxu1  ;;  %v1880_v12 = vpop.permute.xlu2 %1879 }
 0x284   : > { %vm2168_vm14 = vcmp.eq.s32.totalorder %v1880_v12, %v11235_v56 }
 0x285   : > { %10052 = vmatmul.msk.bf16.gmra.mxu3 %vm3042_vm6, %v1691_v25  ;;  %v622_v25 = vpop.permute.xlu0 %621 }
 0x286   : > { %9908 = vmatmul.msk.bf16.gmra.mxu1 %vm1147_vm2, %v2399_v32  ;;  %v12192_v32 = vpop.permute.xlu1 %1918  ;;  %vm870_vm5 = vcmp.eq.s32.totalorder %v622_v25, %v11235_v56 }
 0x288   : > { %v12182_v11 = vpop.f32.mrf.mxu3 }
 0x289   : > { %16402 = vst [vmem:[#allocation35_spill] sm:$0xff] %v12182_v11  ;;  %10487 = vset.pattern.permute.xlu1 %v16350_v2  ;;  %v12185_v31 = vpop.f32.mrf.mxu2 }
 0x28a   : > { %16403 = vst [vmem:[#allocation36_spill] sm:$0xff] %v12185_v31  ;;  %v1464_v30 = vpop.f32.mrf.mxu0  ;;  %696 = vperm.xlu1 %10487, %v11966_v23  }
 0x28b   : > { %v2714_v46 = vpop.f32.mrf.mxu1  ;;  %v1886_v22 = vpop.permute.xlu2 %1885 }
 0x28c   : > { %v2976_v9 = vpack.c.bf16 %v2714_v46, %v2712_v27  ;;  %v2296_v27 = vsel %vm2168_vm14, 1.0, %v16352_v40  ;;  %vm2170_vm3 = vcmp.eq.s32.totalorder %v1886_v22, %v11235_v56 }
 0x28d   : > { %9853 = vmatmul.msk.bf16.gmra.mxu0 %vm1147_vm2, %v1090_v6  ;;  %v2400_v46 = vpack.c.bf16 %v2296_v27, %v2295_v28  ;;  %v12208_v12 = vpop.permute.xlu0 %633 }
 0x28e   : > { %9972 = vmatmul.msk.bf16.gmra.mxu2 %vm3042_vm6, %v2976_v9  ;;  %v12210_v9 = vpop.permute.xlu1 %648  ;;  %vm874_vm14 = vcmp.eq.s32.totalorder %v12208_v12, %v11235_v56 }
 0x290   : > { %v12195_v11 = vpop.f32.mrf.mxu3 }
 0x291   : > { %16404 = vst [vmem:[#allocation37_spill] sm:$0xff] %v12195_v11  ;;  %v12198_v23 = vpop.f32.mrf.mxu2  ;;  %v995_v11 = vsel %vm867_vm15, 1.0, %v16352_v40 }
 0x292   : > { %16405 = vst [vmem:[#allocation38_spill] sm:$0xff] %v12198_v23  ;;  %v1466_v26 = vpop.f32.mrf.mxu0  ;;  %10490 = vset.pattern.permute.xlu1 %v16348_v44 }
 0x293   : > { %v1692_v6 = vpack.c.bf16 %v1466_v26, %v1464_v30  ;;  %v2717_v50 = vpop.f32.mrf.mxu1  ;;  %v996_v30 = vsel %vm868_vm0, 1.0, %v16352_v40  ;;  %v1889_v62 = vpop.permute.xlu2 %1888  ;;  %vm2176_vm0 = vcmp.eq.s32.totalorder %v11658_v4, %v11235_v56 }
 0x294   : > { %v1091_v27 = vpack.c.bf16 %v996_v30, %v995_v11  ;;  %vm2171_vm7 = vcmp.eq.s32.totalorder %v1889_v62, %v11235_v56 }
 0x295   : > { %10053 = vmatmul.msk.bf16.gmra.mxu3 %vm3042_vm6, %v1692_v6 }
 0x296   : > { %9909 = vmatmul.msk.bf16.gmra.mxu1 %vm1147_vm2, %v2400_v46  ;;  %v2297_v46 = vsel %vm2169_vm1, 1.0, %v16352_v40  ;;  %v12228_v38 = vpop.permute.xlu1 %1930  ;;  %vm875_vm1 = vcmp.eq.s32.totalorder %v12103_v24, %v11235_v56 }
 0x297   : > { %v1003_v4 = vsel %vm875_vm1, 1.0, %v16352_v40 }
 0x298   : > { %v12214_v26 = vpop.f32.mrf.mxu3 }
 0x299   : > { %16406 = vst [vmem:[#allocation39_spill] sm:$0xff] %v12214_v26  ;;  %v12216_v28 = vpop.f32.mrf.mxu2  ;;  %v12226_v26 = vpop.permute.xlu0 %645 }
 0x29a   : > { %16407 = vst [vmem:[#allocation40_spill] sm:$0xff] %v12216_v28  ;;  %v1469_v49 = vpop.f32.mrf.mxu0 }
 0x29b   : > { %v2719_v21 = vpop.f32.mrf.mxu1  ;;  %v1898_v22 = vpop.permute.xlu2 %1897 }
 0x29c   : > { %v2977_v14 = vpack.c.bf16 %v2719_v21, %v2717_v50  ;;  %v2298_v50 = vsel %vm2170_vm3, 1.0, %v16352_v40  ;;  %vm2174_vm12 = vcmp.eq.s32.totalorder %v1898_v22, %v11235_v56  ;;  %vm876_vm3 = vcmp.eq.s32.totalorder %v12139_v41, %v11235_v56 }
 0x29d   : > { %9854 = vmatmul.msk.bf16.gmra.mxu0 %vm1147_vm2, %v1091_v27  ;;  %v2401_v43 = vpack.c.bf16 %v2298_v50, %v2297_v46 }
 0x29e   : > { %9973 = vmatmul.msk.bf16.gmra.mxu2 %vm3042_vm6, %v2977_v14  ;;  %v997_v14 = vsel %vm869_vm4, 1.0, %v16352_v40  ;;  %v12242_v52 = vpop.permute.xlu1 %651 }
 0x2a0   : > { %v12223_v6 = vpop.f32.mrf.mxu3 }
 0x2a1   : > { %16408 = vst [vmem:[#allocation41_spill] sm:$0xff] %v12223_v6  ;;  %v12230_v11 = vpop.f32.mrf.mxu2  ;;  %v998_v6 = vsel %vm870_vm5, 1.0, %v16352_v40  ;;  %v12246_v50 = vpop.permute.xlu0 %1927  ;;  %vm2178_vm5 = vcmp.eq.s32.totalorder %v11680_v3, %v11235_v56 }
 0x2a2   : > { %16409 = vst [vmem:[#allocation42_spill] sm:$0xff] %v12230_v11  ;;  %v1471_v21 = vpop.f32.mrf.mxu0 }
 0x2a3   : > { %v1693_v30 = vpack.c.bf16 %v1471_v21, %v1469_v49  ;;  %v2722_v27 = vpop.f32.mrf.mxu1  ;;  %v1092_v21 = vpack.c.bf16 %v998_v6, %v997_v14  ;;  %v2300_v14 = vsel %vm2172_vm8, 1.0, %v16352_v40  ;;  %vm877_vm8 = vcmp.eq.s32.totalorder %v12159_v61, %v11235_v56 }
 0x2a5   : > { %10054 = vmatmul.msk.bf16.gmra.mxu3 %vm3042_vm6, %v1693_v30 }
 0x2a6   : > { %9910 = vmatmul.msk.bf16.gmra.mxu1 %vm1147_vm2, %v2401_v43  ;;  %v2299_v43 = vsel %vm2171_vm7, 1.0, %v16352_v40  ;;  %vm878_vm7 = vcmp.eq.s32.totalorder %v12226_v26, %v11235_v56 }
 0x2a7   : > { %v2402_v62 = vpack.c.bf16 %v2300_v14, %v2299_v43 }
 0x2a8   : > { %v12240_v60 = vpop.f32.mrf.mxu3 }
 0x2a9   : > { %16410 = vst [vmem:[#allocation43_spill] sm:$0xff] %v12240_v60  ;;  %v12244_v49 = vpop.f32.mrf.mxu2  ;;  %v1901_v60 = vpop.permute.xlu2 %1900 }
 0x2aa   : > { %16411 = vst [vmem:[#allocation44_spill] sm:$0xff] %v12244_v49  ;;  %v1474_v46 = vpop.f32.mrf.mxu0  ;;  %v12261_v11 = vpop.permute.xlu0 %1939  ;;  %vm2175_vm15 = vcmp.eq.s32.totalorder %v1901_v60, %v11235_v56  ;;  %v2304_v60 = vsel %vm2176_vm0, 1.0, %v16352_v40 }
 0x2ab   : > { %v2724_v42 = vpop.f32.mrf.mxu1 }
 0x2ac   : > { %v2978_v25 = vpack.c.bf16 %v2724_v42, %v2722_v27  ;;  %v12259_v27 = vpop.permute.xlu1 %654 }
 0x2ad   : > { %9855 = vmatmul.msk.bf16.gmra.mxu0 %vm1147_vm2, %v1092_v21 }
 0x2ae   : > { %9974 = vmatmul.msk.bf16.gmra.mxu2 %vm3042_vm6, %v2978_v25  ;;  %v1000_v25 = vsel %vm872_vm10, 1.0, %v16352_v40 }
 0x2b0   : > { %v12253_v30 = vpop.f32.mrf.mxu3 }
 0x2b1   : > { %16412 = vst [vmem:[#allocation45_spill] sm:$0xff] %v12253_v30  ;;  %v12256_v49 = vpop.f32.mrf.mxu2  ;;  %v12275_v59 = vpop.permute.xlu2 %1906 }
 0x2b2   : > { %16413 = vst [vmem:[#allocation46_spill] sm:$0xff] %v12256_v49  ;;  %v1476_v6 = vpop.f32.mrf.mxu0  ;;  %v12282_v20 = vpop.permute.xlu0 %1945  ;;  %vm2177_vm4 = vcmp.eq.s32.totalorder %v12275_v59, %v11235_v56 }
 0x2b3   : > { %v1694_v21 = vpack.c.bf16 %v1476_v6, %v1474_v46  ;;  %v2727_v42 = vpop.f32.mrf.mxu1  ;;  %v1093_v6 = vpack.c.bf16 %v1000_v25, %v999_v39  ;;  %v2302_v25 = vsel %vm2174_vm12, 1.0, %v16352_v40  ;;  %vm880_vm12 = vcmp.eq.s32.totalorder %v12242_v52, %v11235_v56 }
 0x2b4   : > { %v12277_v55 = vpop.permute.xlu1 %1948 }
 0x2b5   : > { %10055 = vmatmul.msk.bf16.gmra.mxu3 %vm3042_vm6, %v1694_v21 }
 0x2b6   : > { %9911 = vmatmul.msk.bf16.gmra.mxu1 %vm1147_vm2, %v2402_v62  ;;  %v2301_v62 = vsel %vm2173_vm11, 1.0, %v16352_v40  ;;  %vm879_vm11 = vcmp.eq.s32.totalorder %v12210_v9, %v11235_v56 }
 0x2b8   : > { %v12271_v30 = vpop.f32.mrf.mxu3 }
 0x2b9   : > { %16414 = vst [vmem:[#allocation47_spill] sm:$0xff] %v12271_v30  ;;  %v12273_v46 = vpop.f32.mrf.mxu2  ;;  %v2403_v30 = vpack.c.bf16 %v2302_v25, %v2301_v62  ;;  %v12300_v22 = vpop.permute.xlu2 %1915  ;;  %v1002_v62 = vsel %vm874_vm14, 1.0, %v16352_v40 }
 0x2ba   : > { %16415 = vst [vmem:[#allocation48_spill] sm:$0xff] %v12273_v46  ;;  %v1479_v43 = vpop.f32.mrf.mxu0  ;;  %v12297_v19 = vpop.permute.xlu0 %1963  ;;  %vm2180_vm10 = vcmp.eq.s32.totalorder %v12300_v22, %v11235_v56  ;;  %v1007_v22 = vsel %vm879_vm11, 1.0, %v16352_v40 }
 0x2bb   : > { %v2729_v14 = vpop.f32.mrf.mxu1 }
 0x2bc   : > { %v2979_v49 = vpack.c.bf16 %v2729_v14, %v2727_v42 }
 0x2bd   : > { %9856 = vmatmul.msk.bf16.gmra.mxu0 %vm1147_vm2, %v1093_v6 }
 0x2be   : > { %9975 = vmatmul.msk.bf16.gmra.mxu2 %vm3042_vm6, %v2979_v49  ;;  %v12302_v49 = vpop.permute.xlu1 %1954 }
 0x2c0   : > { %v12286_v21 = vpop.f32.mrf.mxu3 }
 0x2c1   : > { %16416 = vst [vmem:[#allocation49_spill] sm:$0xff] %v12286_v21  ;;  %v12289_v42 = vpop.f32.mrf.mxu2 }
 0x2c2   : > { %16417 = vst [vmem:[#allocation50_spill] sm:$0xff] %v12289_v42  ;;  %v1481_v39 = vpop.f32.mrf.mxu0 }
 0x2c3   : > { %v1695_v14 = vpack.c.bf16 %v1481_v39, %v1479_v43  ;;  %v2732_v6 = vpop.f32.mrf.mxu1  ;;  %v1001_v43 = vsel %vm873_vm13, 1.0, %v16352_v40  ;;  %vm2181_vm13 = vcmp.eq.s32.totalorder %v12192_v32, %v11235_v56 }
 0x2c4   : > { %v1094_v12 = vpack.c.bf16 %v1002_v62, %v1001_v43  ;;  %v12322_v43 = vpop.permute.xlu2 %1921 }
 0x2c5   : > { %10056 = vmatmul.msk.bf16.gmra.mxu3 %vm3042_vm6, %v1695_v14  ;;  %vm2182_vm14 = vcmp.eq.s32.totalorder %v12322_v43, %v11235_v56 }
 0x2c6   : > { %9912 = vmatmul.msk.bf16.gmra.mxu1 %vm1147_vm2, %v2403_v30  ;;  %v12312_v30 = vpop.permute.xlu0 %1975  ;;  %v12315_v42 = vpop.permute.xlu1 %660 }
 0x2c8   : > { %v12306_v39 = vpop.f32.mrf.mxu3 }
 0x2c9   : > { %16418 = vst [vmem:[#allocation51_spill] sm:$0xff] %v12306_v39  ;;  %v12308_v8 = vpop.f32.mrf.mxu2 }
 0x2ca   : > { %16419 = vst [vmem:[#allocation52_spill] sm:$0xff] %v12308_v8  ;;  %v1484_v25 = vpop.f32.mrf.mxu0  ;;  %v2303_v8 = vsel %vm2175_vm15, 1.0, %v16352_v40  ;;  %vm881_vm15 = vcmp.eq.s32.totalorder %v12259_v27, %v11235_v56 }
 0x2cb   : > { %v2734_v21 = vpop.f32.mrf.mxu1  ;;  %v2404_v46 = vpack.c.bf16 %v2304_v60, %v2303_v8 }
 0x2cc   : > { %v2980_v14 = vpack.c.bf16 %v2734_v21, %v2732_v6 }
 0x2cd   : > { %9857 = vmatmul.msk.bf16.gmra.mxu0 %vm1147_vm2, %v1094_v12 }
 0x2ce   : > { %9976 = vmatmul.msk.bf16.gmra.mxu2 %vm3042_vm6, %v2980_v14  ;;  %v1004_v14 = vsel %vm876_vm3, 1.0, %v16352_v40  ;;  %vm2184_vm3 = vcmp.eq.s32.totalorder %v12246_v50, %v11235_v56 }
 0x2cf   : > { %v1095_v41 = vpack.c.bf16 %v1004_v14, %v1003_v4 }
 0x2d0   : > { %v12319_v39 = vpop.f32.mrf.mxu3 }
 0x2d1   : > { %16420 = vst [vmem:[#allocation53_spill] sm:$0xff] %v12319_v39  ;;  %v12324_v21 = vpop.f32.mrf.mxu2  ;;  %v12335_v39 = vpop.permute.xlu0 %1981 }
 0x2d2   : > { %16421 = vst [vmem:[#allocation54_spill] sm:$0xff] %v12324_v21  ;;  %v1486_v6 = vpop.f32.mrf.mxu0  ;;  %v12337_v21 = vpop.permute.xlu1 %1966 }
 0x2d3   : > { %v1696_v62 = vpack.c.bf16 %v1486_v6, %v1484_v25  ;;  %v2737_v12 = vpop.f32.mrf.mxu1  ;;  %v12343_v6 = vpop.permute.xlu2 %1924 }
 0x2d4   : > { %vm2183_vm1 = vcmp.eq.s32.totalorder %v12343_v6, %v11235_v56 }
 0x2d5   : > { %10057 = vmatmul.msk.bf16.gmra.mxu3 %vm3042_vm6, %v1696_v62 }
 0x2d6   : > { %9913 = vmatmul.msk.bf16.gmra.mxu1 %vm1147_vm2, %v2404_v46  ;;  %v2305_v46 = vsel %vm2177_vm4, 1.0, %v16352_v40  ;;  %vm883_vm4 = vcmp.eq.s32.totalorder %v12315_v42, %v11235_v56 }
 0x2d8   : > { %v12339_v25 = vpop.f32.mrf.mxu3 }
 0x2d9   : > { %16422 = vst [vmem:[#allocation55_spill] sm:$0xff] %v12339_v25  ;;  %v12341_v8 = vpop.f32.mrf.mxu2  ;;  %v12352_v25 = vpop.permute.xlu0 %1999 }
 0x2da   : > { %16423 = vst [vmem:[#allocation56_spill] sm:$0xff] %v12341_v8  ;;  %v1489_v24 = vpop.f32.mrf.mxu0  ;;  %v12354_v8 = vpop.permute.xlu1 %663 }
 0x2db   : > { %v2739_v60 = vpop.f32.mrf.mxu1  ;;  %v12363_v3 = vpop.permute.xlu2 %1933 }
 0x2dc   : > { %v2981_v62 = vpack.c.bf16 %v2739_v60, %v2737_v12  ;;  %v2306_v12 = vsel %vm2178_vm5, 1.0, %v16352_v40  ;;  %vm884_vm5 = vcmp.eq.s32.totalorder %v12354_v8, %v11235_v56 }
 0x2dd   : > { %9858 = vmatmul.msk.bf16.gmra.mxu0 %vm1147_vm2, %v1095_v41  ;;  %v2405_v60 = vpack.c.bf16 %v2306_v12, %v2305_v46 }
 0x2de   : > { %9977 = vmatmul.msk.bf16.gmra.mxu2 %vm3042_vm6, %v2981_v62  ;;  %v1006_v62 = vsel %vm878_vm7, 1.0, %v16352_v40  ;;  %vm2185_vm7 = vcmp.eq.s32.totalorder %v12228_v38, %v11235_v56 }
 0x2e0   : > { %v12359_v14 = vpop.f32.mrf.mxu3 }
 0x2e1   : > { %v12356_v28 = vpop.f32.mrf.mxu2  ;;  %16425 = vst [vmem:[#allocation58_spill] sm:$0xff] %v12359_v14  ;;  %v12375_v5 = vpop.permute.xlu0 %2011 }
 0x2e2   : > { %16424 = vst [vmem:[#allocation57_spill] sm:$0xff] %v12356_v28  ;;  %v1491_v4 = vpop.f32.mrf.mxu0  ;;  %v1005_v28 = vsel %vm877_vm8, 1.0, %v16352_v40  ;;  %vm2186_vm8 = vcmp.eq.s32.totalorder %v12363_v3, %v11235_v56 }
 0x2e3   : > { %v1697_v41 = vpack.c.bf16 %v1491_v4, %v1489_v24  ;;  %v2742_v59 = vpop.f32.mrf.mxu1  ;;  %v1096_v46 = vpack.c.bf16 %v1006_v62, %v1005_v28  ;;  %v12373_v4 = vpop.permute.xlu1 %666  ;;  %v2307_v28 = vsel %vm2179_vm9, 1.0, %v16352_v40 }
 0x2e4   : > { %v12383_v61 = vpop.permute.xlu2 %1936  ;;  %vm885_vm9 = vcmp.eq.s32.totalorder %v12373_v4, %v11235_v56 }
 0x2e5   : > { %10058 = vmatmul.msk.bf16.gmra.mxu3 %vm3042_vm6, %v1697_v41  ;;  %v1013_v3 = vsel %vm885_vm9, 1.0, %v16352_v40  ;;  %vm2187_vm11 = vcmp.eq.s32.totalorder %v12383_v61, %v11235_v56  ;;  %vm2193_vm9 = vcmp.eq.s32.totalorder %v12302_v49, %v11235_v56 }
 0x2e6   : > { %9914 = vmatmul.msk.bf16.gmra.mxu1 %vm1147_vm2, %v2405_v60  ;;  %v2308_v60 = vsel %vm2180_vm10, 1.0, %v16352_v40 }
 0x2e8   : > { %v12377_v23 = vpop.f32.mrf.mxu3 }
 0x2e9   : > { %v12371_v14 = vpop.f32.mrf.mxu2  ;;  %16427 = vst [vmem:[#allocation60_spill] sm:$0xff] %v12377_v23  ;;  %v12401_v23 = vpop.permute.xlu0 %2017 }
 0x2ea   : > { %16426 = vst [vmem:[#allocation59_spill] sm:$0xff] %v12371_v14  ;;  %v1494_v24 = vpop.f32.mrf.mxu0 }
 0x2eb   : > { %v2744_v26 = vpop.f32.mrf.mxu1 }
 0x2ec   : > { %v2982_v12 = vpack.c.bf16 %v2744_v26, %v2742_v59  ;;  %v12395_v26 = vpop.permute.xlu1 %1984  ;;  %v12405_v9 = vpop.permute.xlu2 %1942 }
 0x2ed   : > { %9859 = vmatmul.msk.bf16.gmra.mxu0 %vm1147_vm2, %v1096_v46  ;;  %v2406_v46 = vpack.c.bf16 %v2308_v60, %v2307_v28 }
 0x2ee   : > { %9978 = vmatmul.msk.bf16.gmra.mxu2 %vm3042_vm6, %v2982_v12  ;;  %v1008_v12 = vsel %vm880_vm12, 1.0, %v16352_v40  ;;  %vm2188_vm12 = vcmp.eq.s32.totalorder %v12261_v11, %v11235_v56 }
 0x2ef   : > { %v1097_v52 = vpack.c.bf16 %v1008_v12, %v1007_v22 }
 0x2f1   : > { %v12388_v41 = vpop.f32.mrf.mxu2  ;;  %v658_v22 = vpop.permute.xlu0 %657 }
 0x2f2   : > { %16428 = vst [vmem:[#allocation61_spill] sm:$0xff] %v12388_v41  ;;  %v1496_v59 = vpop.f32.mrf.mxu0  ;;  %v12403_v41 = vpop.f32.mrf.mxu3  ;;  %vm882_vm0 = vcmp.eq.s32.totalorder %v658_v22, %v11235_v56 }
 0x2f3   : > { %v1698_v29 = vpack.c.bf16 %v1496_v59, %v1494_v24  ;;  %v2747_v62 = vpop.f32.mrf.mxu1  ;;  %16429 = vst [vmem:[#allocation62_spill] sm:$0xff] %v12403_v41 }
 0x2f5   : > { %10059 = vmatmul.msk.bf16.gmra.mxu3 %vm3042_vm6, %v1698_v29  ;;  %v12413_v29 = vpop.permute.xlu1 %1990 }
 0x2f6   : > { %9915 = vmatmul.msk.bf16.gmra.mxu1 %vm1147_vm2, %v2406_v46  ;;  %v2309_v46 = vsel %vm2181_vm13, 1.0, %v16352_v40 }
 0x2f9   : > { %v12407_v24 = vpop.f32.mrf.mxu2 }
 0x2fa   : > { %16430 = vst [vmem:[#allocation63_spill] sm:$0xff] %v12407_v24  ;;  %v1499_v28 = vpop.f32.mrf.mxu0  ;;  %v12418_v12 = vpop.f32.mrf.mxu3  ;;  %v1009_v24 = vsel %vm881_vm15, 1.0, %v16352_v40  ;;  %vm2189_vm15 = vcmp.eq.s32.totalorder %v12405_v9, %v11235_v56 }
 0x2fb   : > { %v2749_v59 = vpop.f32.mrf.mxu1  ;;  %16431 = vst [vmem:[#allocation64_spill] sm:$0xff] %v12418_v12  ;;  %v1010_v12 = vsel %vm882_vm0, 1.0, %v16352_v40  ;;  %vm2190_vm0 = vcmp.eq.s32.totalorder %v12282_v20, %v11235_v56 }
 0x2fc   : > { %v2983_v60 = vpack.c.bf16 %v2749_v59, %v2747_v62  ;;  %v12423_v59 = vpop.permute.xlu2 %1951  ;;  %v1098_v14 = vpack.c.bf16 %v1010_v12, %v1009_v24  ;;  %v2311_v24 = vsel %vm2183_vm1, 1.0, %v16352_v40 }
 0x2fd   : > { %9860 = vmatmul.msk.bf16.gmra.mxu0 %vm1147_vm2, %v1097_v52  ;;  %v2310_v52 = vsel %vm2182_vm14, 1.0, %v16352_v40 }
 0x2fe   : > { %9979 = vmatmul.msk.bf16.gmra.mxu2 %vm3042_vm6, %v2983_v60  ;;  %v2407_v43 = vpack.c.bf16 %v2310_v52, %v2309_v46  ;;  %v2312_v46 = vsel %vm2184_vm3, 1.0, %v16352_v40 }
 0x2ff   : > { %v2408_v50 = vpack.c.bf16 %v2312_v46, %v2311_v24  ;;  %v2313_v46 = vsel %vm2185_vm7, 1.0, %v16352_v40 }
 0x301   : > { %v12420_v41 = vpop.f32.mrf.mxu2 }
 0x302   : > { %16432 = vst [vmem:[#allocation65_spill] sm:$0xff] %v12420_v41  ;;  %v1501_v62 = vpop.f32.mrf.mxu0  ;;  %v12432_v41 = vpop.permute.xlu1 %672 }
 0x303   : > { %v1699_v32 = vpack.c.bf16 %v1501_v62, %v1499_v28  ;;  %v2752_v60 = vpop.f32.mrf.mxu1  ;;  %v12436_v27 = vpop.f32.mrf.mxu3  ;;  %vm887_vm13 = vcmp.eq.s32.totalorder %v12432_v41, %v11235_v56 }
 0x304   : > { %16434 = vst [vmem:[#allocation67_spill] sm:$0xff] %v12436_v27  ;;  %v12438_v62 = vpop.permute.xlu2 %1957  ;;  %v1015_v11 = vsel %vm887_vm13, 1.0, %v16352_v40  ;;  %vm2197_vm13 = vcmp.eq.s32.totalorder %v12337_v21, %v11235_v56 }
 0x305   : > { %10060 = vmatmul.msk.bf16.gmra.mxu3 %vm3042_vm6, %v1699_v32 }
 0x306   : > { %9916 = vmatmul.msk.bf16.gmra.mxu1 %vm1147_vm2, %v2407_v43  ;;  %v1011_v43 = vsel %vm883_vm4, 1.0, %v16352_v40  ;;  %vm2191_vm4 = vcmp.eq.s32.totalorder %v12277_v55, %v11235_v56 }
 0x309   : > { %v12434_v34 = vpop.f32.mrf.mxu2 }
 0x30a   : > { %16433 = vst [vmem:[#allocation66_spill] sm:$0xff] %v12434_v34  ;;  %v1504_v31 = vpop.f32.mrf.mxu0  ;;  %v12448_v12 = vpop.permute.xlu1 %2002 }
 0x30b   : > { %v2754_v22 = vpop.f32.mrf.mxu1 }
 0x30c   : > { %v2984_v28 = vpack.c.bf16 %v2754_v22, %v2752_v60  ;;  %v12456_v60 = vpop.f32.mrf.mxu3  ;;  %v1012_v22 = vsel %vm884_vm5, 1.0, %v16352_v40  ;;  %vm2192_vm5 = vcmp.eq.s32.totalorder %v12423_v59, %v11235_v56 }
 0x30d   : > { %9861 = vmatmul.msk.bf16.gmra.mxu0 %vm1147_vm2, %v1098_v14  ;;  %16436 = vst [vmem:[#allocation69_spill] sm:$0xff] %v12456_v60  ;;  %v1099_v27 = vpack.c.bf16 %v1012_v22, %v1011_v43 }
 0x30e   : > { %9980 = vmatmul.msk.bf16.gmra.mxu2 %vm3042_vm6, %v2984_v28  ;;  %v12462_v28 = vpop.permute.xlu2 %1960 }
 0x311   : > { %v12450_v52 = vpop.f32.mrf.mxu2 }
 0x312   : > { %16435 = vst [vmem:[#allocation68_spill] sm:$0xff] %v12450_v52  ;;  %v1506_v32 = vpop.f32.mrf.mxu0  ;;  %v676_v42 = vpop.permute.xlu1 %675 }
 0x313   : > { %v1700_v6 = vpack.c.bf16 %v1506_v32, %v1504_v31  ;;  %v2757_v14 = vpop.f32.mrf.mxu1  ;;  %vm888_vm14 = vcmp.eq.s32.totalorder %v676_v42, %v11235_v56 }
 0x314   : > { %v12470_v24 = vpop.f32.mrf.mxu3 }
 0x315   : > { %10061 = vmatmul.msk.bf16.gmra.mxu3 %vm3042_vm6, %v1700_v6  ;;  %16438 = vst [vmem:[#allocation71_spill] sm:$0xff] %v12470_v24 }
 0x316   : > { %9917 = vmatmul.msk.bf16.gmra.mxu1 %vm1147_vm2, %v2408_v50  ;;  %v12475_v6 = vpop.permute.xlu2 %1969  ;;  %v670_v50 = vpop.permute.xlu0 %669 }
 0x317   : > { %vm886_vm10 = vcmp.eq.s32.totalorder %v670_v50, %v11235_v56 }
 0x318   : > { %v1014_v24 = vsel %vm886_vm10, 1.0, %v16352_v40  ;;  %vm2194_vm10 = vcmp.eq.s32.totalorder %v12438_v62, %v11235_v56 }
 0x319   : > { %v12464_v52 = vpop.f32.mrf.mxu2  ;;  %v1100_v60 = vpack.c.bf16 %v1014_v24, %v1013_v3  ;;  %v2315_v24 = vsel %vm2187_vm11, 1.0, %v16352_v40  ;;  %vm2195_vm11 = vcmp.eq.s32.totalorder %v12462_v28, %v11235_v56 }
 0x31a   : > { %16437 = vst [vmem:[#allocation70_spill] sm:$0xff] %v12464_v52  ;;  %v1509_v8 = vpop.f32.mrf.mxu0  ;;  %v679_v38 = vpop.permute.xlu1 %678 }
 0x31b   : > { %v2759_v31 = vpop.f32.mrf.mxu1  ;;  %vm889_vm3 = vcmp.eq.s32.totalorder %v679_v38, %v11235_v56 }
 0x31c   : > { %v2985_v32 = vpack.c.bf16 %v2759_v31, %v2757_v14 }
 0x31d   : > { %9862 = vmatmul.msk.bf16.gmra.mxu0 %vm1147_vm2, %v1099_v27  ;;  %v2314_v27 = vsel %vm2186_vm8, 1.0, %v16352_v40 }
 0x31e   : > { %9981 = vmatmul.msk.bf16.gmra.mxu2 %vm3042_vm6, %v2985_v32  ;;  %v2409_v32 = vpack.c.bf16 %v2314_v27, %v2313_v46  ;;  %v12491_v15 = vpop.permute.xlu2 %1972  ;;  %v2316_v46 = vsel %vm2188_vm12, 1.0, %v16352_v40  ;;  %vm2196_vm12 = vcmp.eq.s32.totalorder %v12297_v19, %v11235_v56  ;;  %v10681_v19 = vld [vmem:[%s11025_s18 + $0x300] sm:$0xff] }
 0x321   : > { %v12477_v43 = vpop.f32.mrf.mxu2 }
 0x322   : > { %16439 = vst [vmem:[#allocation72_spill] sm:$0xff] %v12477_v43  ;;  %v1511_v14 = vpop.f32.mrf.mxu0  ;;  %v12487_v43 = vpop.f32.mrf.mxu3 }
 0x323   : > { %v1701_v22 = vpack.c.bf16 %v1511_v14, %v1509_v8  ;;  %v2762_v31 = vpop.f32.mrf.mxu1  ;;  %16440 = vst [vmem:[#allocation73_spill] sm:$0xff] %v12487_v43  ;;  %v12493_v8 = vpop.permute.xlu1 %2020 }
 0x325   : > { %10062 = vmatmul.msk.bf16.gmra.mxu3 %vm3042_vm6, %v1701_v22  ;;  %v2410_v22 = vpack.c.bf16 %v2316_v46, %v2315_v24  ;;  %v2317_v46 = vsel %vm2189_vm15, 1.0, %v16352_v40  ;;  %vm2199_vm15 = vcmp.eq.s32.totalorder %v12491_v15, %v11235_v56 }
 0x326   : > { %9918 = vmatmul.msk.bf16.gmra.mxu1 %vm1147_vm2, %v2409_v32  ;;  %v12514_v32 = vpop.permute.xlu2 %1978 }
 0x329   : > { %v12489_v52 = vpop.f32.mrf.mxu2 }
 0x32a   : > { %16441 = vst [vmem:[#allocation74_spill] sm:$0xff] %v12489_v52  ;;  %v1514_v4 = vpop.f32.mrf.mxu0 }
 0x32b   : > { %v2764_v34 = vpop.f32.mrf.mxu1  ;;  %v12516_v3 = vpop.permute.xlu1 %2026 }
 0x32c   : > { %v2986_v50 = vpack.c.bf16 %v2764_v34, %v2762_v31  ;;  %v1016_v31 = vsel %vm888_vm14, 1.0, %v16352_v40  ;;  %vm2198_vm14 = vcmp.eq.s32.totalorder %v12475_v6, %v11235_v56 }
 0x32d   : > { %9863 = vmatmul.msk.bf16.gmra.mxu0 %vm1147_vm2, %v1100_v60  ;;  %v12508_v60 = vpop.f32.mrf.mxu3  ;;  %v1101_v41 = vpack.c.bf16 %v1016_v31, %v1015_v11 }
 0x32e   : > { %9982 = vmatmul.msk.bf16.gmra.mxu2 %vm3042_vm6, %v2986_v50  ;;  %16443 = vst [vmem:[#allocation76_spill] sm:$0xff] %v12508_v60 }
 0x331   : > { %v12503_v14 = vpop.f32.mrf.mxu2 }
 0x332   : > { %16442 = vst [vmem:[#allocation75_spill] sm:$0xff] %v12503_v14  ;;  %v1516_v34 = vpop.f32.mrf.mxu0 }
 0x333   : > { %v1702_v61 = vpack.c.bf16 %v1516_v34, %v1514_v4  ;;  %v2767_v27 = vpop.f32.mrf.mxu1  ;;  %v685_v24 = vpop.permute.xlu1 %684 }
 0x334   : > { %vm891_vm7 = vcmp.eq.s32.totalorder %v685_v24, %v11235_v56 }
 0x335   : > { %10063 = vmatmul.msk.bf16.gmra.mxu3 %vm3042_vm6, %v1702_v61  ;;  %v12520_v34 = vpop.f32.mrf.mxu3  ;;  %v2318_v61 = vsel %vm2190_vm0, 1.0, %v16352_v40  ;;  %v1019_v59 = vsel %vm891_vm7, 1.0, %v16352_v40  ;;  %vm2200_vm0 = vcmp.eq.s32.totalorder %v12312_v30, %v11235_v56 }
 0x336   : > { %9919 = vmatmul.msk.bf16.gmra.mxu1 %vm1147_vm2, %v2410_v22  ;;  %16445 = vst [vmem:[#allocation78_spill] sm:$0xff] %v12520_v34  ;;  %v12530_v22 = vpop.permute.xlu2 %1987  ;;  %v2411_v20 = vpack.c.bf16 %v2318_v61, %v2317_v46  ;;  %v2319_v61 = vsel %vm2191_vm4, 1.0, %v16352_v40  ;;  %vm2203_vm4 = vcmp.eq.s32.totalorder %v12395_v26, %v11235_v56  ;;  %v12737_v26 = vld [vmem:[%s11025_s18 + $0x3b0] sm:$0xff] }
 0x339   : > { %v12518_v50 = vpop.f32.mrf.mxu2 }
 0x33a   : > { %16444 = vst [vmem:[#allocation77_spill] sm:$0xff] %v12518_v50  ;;  %v1519_v42 = vpop.f32.mrf.mxu0 }
 0x33b   : > { %v2769_v60 = vpop.f32.mrf.mxu1 }
 0x33c   : > { %v2987_v4 = vpack.c.bf16 %v2769_v60, %v2767_v27  ;;  %v682_v60 = vpop.permute.xlu0 %681 }
 0x33d   : > { %9864 = vmatmul.msk.bf16.gmra.mxu0 %vm1147_vm2, %v1101_v41  ;;  %vm890_vm1 = vcmp.eq.s32.totalorder %v682_v60, %v11235_v56  ;;  %v12540_v34 = vpop.f32.mrf.mxu3 }
 0x33e   : > { %9983 = vmatmul.msk.bf16.gmra.mxu2 %vm3042_vm6, %v2987_v4  ;;  %v1018_v41 = vsel %vm890_vm1, 1.0, %v16352_v40  ;;  %v1017_v4 = vsel %vm889_vm3, 1.0, %v16352_v40  ;;  %16447 = vst [vmem:[#allocation80_spill] sm:$0xff] %v12540_v34  ;;  %v12546_v38 = vpop.permute.xlu2 %1993  ;;  %vm2201_vm1 = vcmp.eq.s32.totalorder %v12514_v32, %v11235_v56  ;;  %vm2202_vm3 = vcmp.eq.s32.totalorder %v12335_v39, %v11235_v56  ;;  %v12703_v32 = vld [vmem:[%s11025_s18 + $0x3b8] sm:$0xff] }
 0x33f   : > { %v1102_v43 = vpack.c.bf16 %v1018_v41, %v1017_v4 }
 0x341   : > { %v12532_v27 = vpop.f32.mrf.mxu2 }
 0x342   : > { %16446 = vst [vmem:[#allocation79_spill] sm:$0xff] %v12532_v27  ;;  %v1521_v11 = vpop.f32.mrf.mxu0  ;;  %v12542_v27 = vpop.permute.xlu1 %2038 }
 0x343   : > { %v1703_v9 = vpack.c.bf16 %v1521_v11, %v1519_v42  ;;  %v2772_v31 = vpop.f32.mrf.mxu1 }
 0x344   : > { %v12705_v39 = vpop.permute.xlu0 %2035 }
 0x345   : > { %10064 = vmatmul.msk.bf16.gmra.mxu3 %vm3042_vm6, %v1703_v9  ;;  %v12555_v9 = vpop.f32.mrf.mxu3 }
 0x346   : > { %9920 = vmatmul.msk.bf16.gmra.mxu1 %vm1147_vm2, %v2411_v20  ;;  %16449 = vst [vmem:[#allocation82_spill] sm:$0xff] %v12555_v9 }
 0x349   : > { %v12544_v50 = vpop.f32.mrf.mxu2 }
 0x34a   : > { %16448 = vst [vmem:[#allocation81_spill] sm:$0xff] %v12544_v50  ;;  %v1524_v60 = vpop.f32.mrf.mxu0  ;;  %v688_v11 = vpop.permute.xlu1 %687 }
 0x34b   : > { %v2774_v42 = vpop.f32.mrf.mxu1  ;;  %vm892_vm8 = vcmp.eq.s32.totalorder %v688_v11, %v11235_v56 }
 0x34c   : > { %v2988_v46 = vpack.c.bf16 %v2774_v42, %v2772_v31  ;;  %v2320_v31 = vsel %vm2192_vm5, 1.0, %v16352_v40  ;;  %v12562_v42 = vpop.permute.xlu2 %1996  ;;  %vm2204_vm5 = vcmp.eq.s32.totalorder %v12530_v22, %v11235_v56 }
 0x34d   : > { %9865 = vmatmul.msk.bf16.gmra.mxu0 %vm1147_vm2, %v1102_v43  ;;  %v2412_v4 = vpack.c.bf16 %v2320_v31, %v2319_v61 }
 0x34e   : > { %9984 = vmatmul.msk.bf16.gmra.mxu2 %vm3042_vm6, %v2988_v46  ;;  %v1020_v46 = vsel %vm892_vm8, 1.0, %v16352_v40  ;;  %vm2205_vm8 = vcmp.eq.s32.totalorder %v12413_v29, %v11235_v56 }
 0x34f   : > { %v1103_v9 = vpack.c.bf16 %v1020_v46, %v1019_v59  ;;  %v12585_v59 = vld [vmem:[%s11025_s18 + $0x378] sm:$0xff]  ;;  %v2333_v29 = vsel %vm2205_vm8, 1.0, %v16352_v40 }
 0x350   : > { %2071 = vperm.xlu1 %10490, %v12585_v59  }
 0x351   : > { %v12557_v20 = vpop.f32.mrf.mxu2 }
 0x352   : > { %16450 = vst [vmem:[#allocation83_spill] sm:$0xff] %v12557_v20  ;;  %v1526_v41 = vpop.f32.mrf.mxu0  ;;  %v12570_v20 = vpop.f32.mrf.mxu3 }
 0x353   : > { %v1704_v55 = vpack.c.bf16 %v1526_v41, %v1524_v60  ;;  %v2777_v43 = vpop.f32.mrf.mxu1  ;;  %16452 = vst [vmem:[#allocation85_spill] sm:$0xff] %v12570_v20  ;;  %v2321_v41 = vsel %vm2193_vm9, 1.0, %v16352_v40 }
 0x354   : > { %v12576_v61 = vpop.permute.xlu2 %2005 }
 0x355   : > { %10065 = vmatmul.msk.bf16.gmra.mxu3 %vm3042_vm6, %v1704_v55 }
 0x356   : > { %9921 = vmatmul.msk.bf16.gmra.mxu1 %vm1147_vm2, %v2412_v4 }
 0x358   : > { %10491 = vset.pattern.permute.xlu1 %v16350_v2 }
 0x359   : > { %v12568_v34 = vpop.f32.mrf.mxu2 }
 0x35a   : > { %16451 = vst [vmem:[#allocation84_spill] sm:$0xff] %v12568_v34  ;;  %v1529_v24 = vpop.f32.mrf.mxu0  ;;  %v12588_v46 = vpop.f32.mrf.mxu3 }
 0x35b   : > { %v2779_v60 = vpop.f32.mrf.mxu1  ;;  %16454 = vst [vmem:[#allocation87_spill] sm:$0xff] %v12588_v46  ;;  %v12610_v46 = vld [vmem:[%s11025_s18 + $0x370] sm:$0xff] }
 0x35c   : > { %v2989_v11 = vpack.c.bf16 %v2779_v60, %v2777_v43  ;;  %v2322_v43 = vsel %vm2194_vm10, 1.0, %v16352_v40  ;;  %v12592_v62 = vpop.permute.xlu2 %2008  ;;  %2068 = vperm.xlu0 %10489, %v12610_v46   ;;  %vm2206_vm10 = vcmp.eq.s32.totalorder %v12546_v38, %v11235_v56 }
 0x35d   : > { %9866 = vmatmul.msk.bf16.gmra.mxu0 %vm1147_vm2, %v1103_v9  ;;  %v2413_v49 = vpack.c.bf16 %v2322_v43, %v2321_v41  ;;  %v2323_v43 = vsel %vm2195_vm11, 1.0, %v16352_v40  ;;  %vm2207_vm11 = vcmp.eq.s32.totalorder %v12562_v42, %v11235_v56 }
 0x35e   : > { %9985 = vmatmul.msk.bf16.gmra.mxu2 %vm3042_vm6, %v2989_v11  ;;  %v2335_v42 = vsel %vm2207_vm11, 1.0, %v16352_v40 }
 0x361   : > { %v12581_v31 = vpop.f32.mrf.mxu2 }
 0x362   : > { %16453 = vst [vmem:[#allocation86_spill] sm:$0xff] %v12581_v31  ;;  %v1531_v55 = vpop.f32.mrf.mxu0  ;;  %v12603_v41 = vpop.f32.mrf.mxu3  ;;  %v12623_v31 = vld [vmem:[%s11025_s18 + $0x388] sm:$0xff] }
 0x363   : > { %v1705_v4 = vpack.c.bf16 %v1531_v55, %v1529_v24  ;;  %v2782_v9 = vpop.f32.mrf.mxu1  ;;  %v10680_v55 = vld [vmem:[%s11025_s18 + $0x2f8] sm:$0xff]  ;;  %16456 = vst [vmem:[#allocation89_spill] sm:$0xff] %v12603_v41 }
 0x364   : > { %705 = vperm.xlu1 %10491, %v10680_v55   ;;  %2077 = vperm.xlu0 %10489, %v12623_v31  }
 0x365   : > { %10066 = vmatmul.msk.bf16.gmra.mxu3 %vm3042_vm6, %v1705_v4  ;;  %v2324_v4 = vsel %vm2196_vm12, 1.0, %v16352_v40  ;;  %vm2208_vm12 = vcmp.eq.s32.totalorder %v12352_v25, %v11235_v56 }
 0x366   : > { %9922 = vmatmul.msk.bf16.gmra.mxu1 %vm1147_vm2, %v2413_v49  ;;  %v2414_v28 = vpack.c.bf16 %v2324_v4, %v2323_v43  ;;  %v2325_v4 = vsel %vm2197_vm13, 1.0, %v16352_v40  ;;  %v2336_v7 = vsel %vm2208_vm12, 1.0, %v16352_v40 }
 0x369   : > { %v12594_v60 = vpop.f32.mrf.mxu2 }
 0x36a   : > { %16455 = vst [vmem:[#allocation88_spill] sm:$0xff] %v12594_v60  ;;  %v1534_v11 = vpop.f32.mrf.mxu0  ;;  %v12612_v60 = vpop.permute.xlu2 %2014 }
 0x36b   : > { %v2784_v20 = vpop.f32.mrf.mxu1 }
 0x36c   : > { %v2990_v24 = vpack.c.bf16 %v2784_v20, %v2782_v9  ;;  %708 = vperm.xlu1 %10491, %v10681_v19  }
 0x36e   : > { %9986 = vmatmul.msk.bf16.gmra.mxu2 %vm3042_vm6, %v2990_v24  ;;  %v12618_v24 = vpop.f32.mrf.mxu3 }
 0x36f   : > { %16458 = vst [vmem:[#allocation91_spill] sm:$0xff] %v12618_v24  ;;  %v12639_v24 = vld [vmem:[%s11025_s18 + $0x390] sm:$0xff] }
 0x370   : > { %2080 = vperm.xlu0 %10489, %v12639_v24  }
 0x371   : > { %v12607_v20 = vpop.f32.mrf.mxu2 }
 0x372   : > { %16457 = vst [vmem:[#allocation90_spill] sm:$0xff] %v12607_v20  ;;  %v1536_v9 = vpop.f32.mrf.mxu0  ;;  %v12629_v43 = vpop.permute.xlu2 %2023 }
 0x373   : > { %v1706_v49 = vpack.c.bf16 %v1536_v9, %v1534_v11  ;;  %v2787_v55 = vpop.f32.mrf.mxu1 }
 0x374   : > { %10494 = vset.pattern.permute.xlu1 %v16348_v44 }
 0x375   : > { %10067 = vmatmul.msk.bf16.gmra.mxu3 %vm3042_vm6, %v1706_v49 }
 0x376   : > { %9923 = vmatmul.msk.bf16.gmra.mxu1 %vm1147_vm2, %v2414_v28  ;;  %v2326_v28 = vsel %vm2198_vm14, 1.0, %v16352_v40 }
 0x377   : > { %v2415_v21 = vpack.c.bf16 %v2326_v28, %v2325_v4  ;;  %v12655_v4 = vld [vmem:[%s11025_s18 + $0x380] sm:$0xff]  ;;  %v10682_v28 = vld [vmem:[%s11025_s18 + $0x318] sm:$0xff] }
 0x378   : > { %2074 = vperm.xlu2 %10492, %v12655_v4   ;;  %10495 = vset.pattern.permute.xlu0 %v16350_v2 }
 0x379   : > { %v12620_v41 = vpop.f32.mrf.mxu2  ;;  %717 = vperm.xlu0 %10495, %v10682_v28  }
 0x37a   : > { %16459 = vst [vmem:[#allocation92_spill] sm:$0xff] %v12620_v41  ;;  %v1539_v20 = vpop.f32.mrf.mxu0  ;;  %v12641_v41 = vpop.f32.mrf.mxu3 }
 0x37b   : > { %v2789_v11 = vpop.f32.mrf.mxu1  ;;  %16461 = vst [vmem:[#allocation94_spill] sm:$0xff] %v12641_v41  ;;  %v12646_v6 = vpop.permute.xlu2 %2029  ;;  %v12674_v41 = vld [vmem:[%s11025_s18 + $0x3a0] sm:$0xff] }
 0x37c   : > { %v2991_v9 = vpack.c.bf16 %v2789_v11, %v2787_v55 }
 0x37e   : > { %9987 = vmatmul.msk.bf16.gmra.mxu2 %vm3042_vm6, %v2991_v9 }
 0x380   : > { %10493 = vset.pattern.permute.xlu2 %v16350_v2 }
 0x381   : > { %v12635_v49 = vpop.f32.mrf.mxu2  ;;  %10499 = vset.pattern.permute.xlu0 %v16348_v44 }
 0x382   : > { %16460 = vst [vmem:[#allocation93_spill] sm:$0xff] %v12635_v49  ;;  %v1541_v55 = vpop.f32.mrf.mxu0  ;;  %v12651_v49 = vld [vmem:[%s11025_s18 + $0x398] sm:$0xff]  ;;  %2092 = vperm.xlu0 %10499, %v12737_v26  }
 0x383   : > { %v2792_v19 = vpop.f32.mrf.mxu1  ;;  %v1707_v11 = vpack.c.bf16 %v1541_v55, %v1539_v20  ;;  %2083 = vperm.xlu1 %10494, %v12651_v49   ;;  %v12663_v55 = vpop.f32.mrf.mxu3 }
 0x384   : > { %16463 = vst [vmem:[#allocation96_spill] sm:$0xff] %v12663_v55 }
 0x385   : > { %10068 = vmatmul.msk.bf16.gmra.mxu3 %vm3042_vm6, %v1707_v11  ;;  %v12669_v11 = vpop.permute.xlu2 %2032 }
 0x386   : > { %9924 = vmatmul.msk.bf16.gmra.mxu1 %vm1147_vm2, %v2415_v21 }
 0x389   : > { %v12648_v9 = vpop.f32.mrf.mxu2 }
 0x38a   : > { %16462 = vst [vmem:[#allocation95_spill] sm:$0xff] %v12648_v9  ;;  %v1544_v30 = vpop.f32.mrf.mxu0  ;;  %2101 = vperm.xlu0 %10499, %v12756_v58  }
 0x38b   : > { %v2794_v34 = vpop.f32.mrf.mxu1  ;;  %2086 = vperm.xlu1 %10494, %v12674_v41   ;;  %v12681_v28 = vpop.f32.mrf.mxu3 }
 0x38c   : > { %v2992_v20 = vpack.c.bf16 %v2794_v34, %v2792_v19  ;;  %v2327_v34 = vsel %vm2199_vm15, 1.0, %v16352_v40  ;;  %v2328_v19 = vsel %vm2200_vm0, 1.0, %v16352_v40  ;;  %16465 = vst [vmem:[#allocation98_spill] sm:$0xff] %v12681_v28  ;;  %vm2209_vm15 = vcmp.eq.s32.totalorder %v12448_v12, %v11235_v56 }
 0x38d   : > { %v2416_v55 = vpack.c.bf16 %v2328_v19, %v2327_v34  ;;  %v10684_v19 = vld [vmem:[%s11025_s18 + $0x320] sm:$0xff]  ;;  %v12687_v52 = vpop.permute.xlu2 %2041  ;;  %v2337_v12 = vsel %vm2209_vm15, 1.0, %v16352_v40  ;;  %vm2216_vm15 = vcmp.eq.s32.totalorder %v12629_v43, %v11235_v56 }
 0x38e   : > { %9988 = vmatmul.msk.bf16.gmra.mxu2 %vm3042_vm6, %v2992_v20  ;;  %v10683_v20 = vld [vmem:[%s11025_s18 + $0x308] sm:$0xff] }
 0x38f   : > { %711 = vperm.xlu2 %10493, %v10683_v20  }
 0x391   : > { %v12671_v21 = vpop.f32.mrf.mxu2 }
 0x392   : > { %16464 = vst [vmem:[#allocation97_spill] sm:$0xff] %v12671_v21  ;;  %v1546_v50 = vpop.f32.mrf.mxu0 }
 0x393   : > { %v2797_v15 = vpop.f32.mrf.mxu1  ;;  %10497 = vset.pattern.permute.xlu1 %v16350_v2  ;;  %v1708_v34 = vpack.c.bf16 %v1546_v50, %v1544_v30  ;;  %v2330_v50 = vsel %vm2202_vm3, 1.0, %v16352_v40 }
 0x394   : > { %720 = vperm.xlu1 %10497, %v10684_v19  }
 0x395   : > { %10069 = vmatmul.msk.bf16.gmra.mxu3 %vm3042_vm6, %v1708_v34 }
 0x396   : > { %9925 = vmatmul.msk.bf16.gmra.mxu1 %vm1147_vm2, %v2416_v55  ;;  %v10685_v55 = vld [vmem:[%s11025_s18 + $0x310] sm:$0xff] }
 0x397   : > { %714 = vperm.xlu2 %10493, %v10685_v55  }
 0x399   : > { %v12683_v21 = vpop.f32.mrf.mxu2 }
 0x39a   : > { %16466 = vst [vmem:[#allocation99_spill] sm:$0xff] %v12683_v21 }
 0x39b   : > { %v2799_v9 = vpop.f32.mrf.mxu1 }
 0x39c   : > { %v2993_v14 = vpack.c.bf16 %v2799_v9, %v2797_v15  ;;  %v2329_v9 = vsel %vm2201_vm1, 1.0, %v16352_v40  ;;  %v12698_v15 = vpop.f32.mrf.mxu3  ;;  %10500 = vset.pattern.permute.xlu1 %v16348_v44  ;;  %vm2210_vm1 = vcmp.eq.s32.totalorder %v12576_v61, %v11235_v56 }
 0x39d   : > { %16467 = vst [vmem:[#allocation100_spill] sm:$0xff] %v12698_v15  ;;  %v2417_v19 = vpack.c.bf16 %v2330_v50, %v2329_v9  ;;  %2095 = vperm.xlu1 %10500, %v12703_v32   ;;  %v12715_v15 = vpop.permute.xlu0 %2047  ;;  %v12720_v50 = vld [vmem:[%s11025_s18 + $0x3a8] sm:$0xff] }
 0x39e   : > { %9989 = vmatmul.msk.bf16.gmra.mxu2 %vm3042_vm6, %v2993_v14  ;;  %v12710_v14 = vpop.permute.xlu2 %2044 }
 0x39f   : > { %10496 = vset.pattern.permute.xlu2 %v16348_v44 }
 0x3a0   : > { %2089 = vperm.xlu2 %10496, %v12720_v50  }
 0x3a1   : > { %v12700_v30 = vpop.f32.mrf.mxu2 }
 0x3a2   : > { %16468 = vst [vmem:[#allocation101_spill] sm:$0xff] %v12700_v30  ;;  %v2332_v30 = vsel %vm2204_vm5, 1.0, %v16352_v40  ;;  %vm2211_vm5 = vcmp.eq.s32.totalorder %v12592_v62, %v11235_v56 }
 0x3a3   : > { %v2802_v20 = vpop.f32.mrf.mxu1 }
 0x3a4   : > { %v12717_v28 = vpop.f32.mrf.mxu3 }
 0x3a5   : > { %16470 = vst [vmem:[#allocation103_spill] sm:$0xff] %v12717_v28  ;;  %10501 = vset.pattern.permute.xlu1 %v16350_v2  ;;  %v691_v28 = vpop.permute.xlu1 %690  ;;  %v12741_v22 = vpop.permute.xlu0 %2053 }
 0x3a6   : > { %9926 = vmatmul.msk.bf16.gmra.mxu1 %vm1147_vm2, %v2417_v19  ;;  %v10686_v19 = vld [vmem:[%s11025_s18 + $0x338] sm:$0xff]  ;;  %vm893_vm7 = vcmp.eq.s32.totalorder %v691_v28, %v11235_v56  ;;  %v10689_v28 = vld [vmem:[%s11025_s18 + $0x330] sm:$0xff] }
 0x3a7   : > { %729 = vperm.xlu1 %10501, %v10686_v19  }
 0x3a8   : > { %10498 = vset.pattern.permute.xlu2 %v16350_v2 }
 0x3a9   : > { %v12713_v34 = vpop.f32.mrf.mxu2  ;;  %723 = vperm.xlu2 %10498, %v10687_v53   ;;  %v1021_v53 = vsel %vm893_vm7, 1.0, %v16352_v40 }
 0x3aa   : > { %16469 = vst [vmem:[#allocation102_spill] sm:$0xff] %v12713_v34 }
 0x3ab   : > { %v2804_v55 = vpop.f32.mrf.mxu1 }
 0x3ac   : > { %v2994_v9 = vpack.c.bf16 %v2804_v55, %v2802_v20  ;;  %v2331_v20 = vsel %vm2203_vm4, 1.0, %v16352_v40  ;;  %v12731_v55 = vpop.permute.xlu2 %2050  ;;  %v12743_v19 = vpop.f32.mrf.mxu3  ;;  %vm2212_vm4 = vcmp.eq.s32.totalorder %v12375_v5, %v11235_v56  ;;  %v2339_v5 = vsel %vm2211_vm5, 1.0, %v16352_v40 }
 0x3ad   : > { %16472 = vst [vmem:[#allocation105_spill] sm:$0xff] %v12743_v19  ;;  %v12753_v45 = vpop.permute.xlu1 %2056 }
 0x3ae   : > { %9990 = vmatmul.msk.bf16.gmra.mxu2 %vm3042_vm6, %v2994_v9  ;;  %v2418_v9 = vpack.c.bf16 %v2332_v30, %v2331_v20 }
 0x3b1   : > { %v12733_v34 = vpop.f32.mrf.mxu2  ;;  %726 = vperm.xlu2 %10498, %v10689_v28  }
 0x3b2   : > { %16471 = vst [vmem:[#allocation104_spill] sm:$0xff] %v12733_v34  ;;  %v10688_v34 = vld [vmem:[%s11025_s18 + $0x340] sm:$0xff] }
 0x3b3   : > { %v2807_v21 = vpop.f32.mrf.mxu1  ;;  %732 = vperm.xlu1 %10501, %v10688_v34   ;;  %v694_v34 = vpop.permute.xlu0 %693 }
 0x3b4   : > { %v12751_v20 = vpop.permute.xlu2 %2059  ;;  %vm894_vm9 = vcmp.eq.s32.totalorder %v694_v34, %v11235_v56  ;;  %v12776_v34 = vld [vmem:[%s11025_s18 + $0x3d0] sm:$0xff] }
 0x3b5   : > { %2104 = vperm.xlu0 %10499, %v12776_v34  }
 0x3b6   : > { %9927 = vmatmul.msk.bf16.gmra.mxu1 %vm1147_vm2, %v2418_v9  ;;  %v1022_v9 = vsel %vm894_vm9, 1.0, %v16352_v40  ;;  %vm2214_vm9 = vcmp.eq.s32.totalorder %v12401_v23, %v11235_v56 }
 0x3b7   : > { %v2342_v23 = vsel %vm2214_vm9, 1.0, %v16352_v40 }
 0x3b9   : > { %v12748_v54 = vpop.f32.mrf.mxu2  ;;  %10502 = vset.pattern.permute.xlu2 %v16348_v44 }
 0x3ba   : > { %16473 = vst [vmem:[#allocation106_spill] sm:$0xff] %v12748_v54 }
 0x3bb   : > { %v2809_v30 = vpop.f32.mrf.mxu1  ;;  %10504 = vset.pattern.permute.xlu1 %v16348_v44 }
 0x3bc   : > { %v2995_v63 = vpack.c.bf16 %v2809_v30, %v2807_v21  ;;  %v12768_v21 = vpop.f32.mrf.mxu3  ;;  %v1104_v30 = vpack.c.bf16 %v1022_v9, %v1021_v53  ;;  %v12780_v38 = vpop.permute.xlu2 %2065 }
 0x3bd   : > { %16474 = vst [vmem:[#allocation107_spill] sm:$0xff] %v12768_v21  ;;  %v12782_v21 = vpop.permute.xlu1 %2062  ;;  %10505 = vset.pattern.permute.xlu0 %v16350_v2 }
 0x3be   : > { %9991 = vmatmul.msk.bf16.gmra.mxu2 %vm3042_vm6, %v2995_v63  ;;  %v2334_v63 = vsel %vm2206_vm10, 1.0, %v16352_v40  ;;  %9867 = vmatmul.msk.bf16.gmra.mxu0 %vm1147_vm2, %v1104_v30  ;;  %vm2213_vm10 = vcmp.eq.s32.totalorder %v12612_v60, %v11235_v56 }
 0x3bf   : > { %v2419_v54 = vpack.c.bf16 %v2334_v63, %v2333_v29  ;;  %v1549_v29 = vpop.f32.mrf.mxu0  ;;  %v12795_v63 = vld [vmem:[%s11025_s18 + $0x3c0] sm:$0xff]  ;;  %v2341_v60 = vsel %vm2213_vm10, 1.0, %v16352_v40 }
 0x3c0   : > { %2098 = vperm.xlu2 %10502, %v12795_v63  }
 0x3c1   : > { %v12772_v19 = vpop.f32.mrf.mxu2 }
 0x3c2   : > { %16475 = vst [vmem:[#allocation108_spill] sm:$0xff] %v12772_v19  ;;  %v12791_v19 = vld [vmem:[%s11025_s18 + $0x3d8] sm:$0xff] }
 0x3c3   : > { %v2812_v28 = vpop.f32.mrf.mxu1  ;;  %2107 = vperm.xlu1 %10504, %v12791_v19  }
 0x3c4   : > { %v12786_v53 = vpop.f32.mrf.mxu3 }
 0x3c5   : > { %16476 = vst [vmem:[#allocation109_spill] sm:$0xff] %v12786_v53  ;;  %v697_v53 = vpop.permute.xlu1 %696 }
 0x3c6   : > { %9928 = vmatmul.msk.bf16.gmra.mxu1 %vm1147_vm2, %v2419_v54  ;;  %v10690_v54 = vld [vmem:[%s11025_s18 + $0x358] sm:$0xff]  ;;  %vm895_vm13 = vcmp.eq.s32.totalorder %v697_v53, %v11235_v56 }
 0x3c7   : > { %741 = vperm.xlu0 %10505, %v10690_v54   ;;  %v1551_v53 = vpop.f32.mrf.mxu0 }
 0x3c8   : > { %v1709_v10 = vpack.c.bf16 %v1551_v53, %v1549_v29  ;;  %10503 = vset.pattern.permute.xlu2 %v16350_v2  ;;  %v10692_v29 = vld [vmem:[%s11025_s18 + $0x360] sm:$0xff] }
 0x3c9   : > { %v12788_v9 = vpop.f32.mrf.mxu2 }
 0x3ca   : > { %16477 = vst [vmem:[#allocation110_spill] sm:$0xff] %v12788_v9  ;;  %v700_v9 = vpop.permute.xlu2 %699  ;;  %10070 = vmatmul.msk.bf16.gmra.mxu3 %vm3042_vm6, %v1709_v10  ;;  %v10693_v10 = vld [vmem:[%s11025_s18 + $0x350] sm:$0xff] }
 0x3cb   : > { %v2814_v47 = vpop.f32.mrf.mxu1  ;;  %vm896_vm14 = vcmp.eq.s32.totalorder %v700_v9, %v11235_v56  ;;  %v2420_v9 = vpack.c.bf16 %v2336_v7, %v2335_v42 }
 0x3cc   : > { %v2996_v30 = vpack.c.bf16 %v2814_v47, %v2812_v28  ;;  %v1023_v47 = vsel %vm895_vm13, 1.0, %v16352_v40  ;;  %v1024_v28 = vsel %vm896_vm14, 1.0, %v16352_v40  ;;  %v12818_v37 = vpop.f32.mrf.mxu3  ;;  %vm2215_vm13 = vcmp.eq.s32.totalorder %v12493_v8, %v11235_v56 }
 0x3cd   : > { %v1105_v25 = vpack.c.bf16 %v1024_v28, %v1023_v47  ;;  %16479 = vst [vmem:[#allocation112_spill] sm:$0xff] %v12818_v37  ;;  %v10691_v47 = vld [vmem:[%s11025_s18 + $0x348] sm:$0xff]  ;;  %v12823_v28 = vpop.permute.xlu1 %2071 }
 0x3ce   : > { %9992 = vmatmul.msk.bf16.gmra.mxu2 %vm3042_vm6, %v2996_v30  ;;  %v12814_v30 = vld [vmem:[%s11025_s18 + $0x3e0] sm:$0xff]  ;;  %735 = vperm.xlu2 %10503, %v10691_v47   ;;  %v12854_v61 = vpop.permute.xlu0 %2068 }
 0x3cf   : > { %2110 = vperm.xlu1 %10504, %v12814_v30   ;;  %9868 = vmatmul.msk.bf16.gmra.mxu0 %vm1147_vm2, %v1105_v25 }
 0x3d0   : > { %10509 = vset.pattern.permute.xlu0 %v16348_v44 }
 0x3d1   : > { %v12811_v0 = vpop.f32.mrf.mxu2 }
 0x3d2   : > { %16478 = vst [vmem:[#allocation111_spill] sm:$0xff] %v12811_v0  ;;  %v703_v53 = vpop.permute.xlu2 %702 }
 0x3d3   : > { %v2817_v54 = vpop.f32.mrf.mxu1  ;;  %vm897_vm0 = vcmp.eq.s32.totalorder %v703_v53, %v11235_v56 }
 0x3d4   : > { %v12833_v42 = vpop.f32.mrf.mxu3 }
 0x3d5   : > { %16481 = vst [vmem:[#allocation114_spill] sm:$0xff] %v12833_v42  ;;  %v12848_v42 = vld [vmem:[%s11025_s18 + $0x3f8] sm:$0xff] }
 0x3d6   : > { %9929 = vmatmul.msk.bf16.gmra.mxu1 %vm1147_vm2, %v2420_v9  ;;  %738 = vperm.xlu2 %10503, %v10693_v10   ;;  %v706_v9 = vpop.permute.xlu1 %705 }
 0x3d7   : > { %10507 = vset.pattern.permute.xlu1 %v16350_v2  ;;  %vm898_vm3 = vcmp.eq.s32.totalorder %v706_v9, %v11235_v56 }
 0x3d8   : > { %744 = vperm.xlu1 %10507, %v10692_v29   ;;  %v1026_v47 = vsel %vm898_vm3, 1.0, %v16352_v40  ;;  %v2338_v29 = vsel %vm2210_vm1, 1.0, %v16352_v40  ;;  %vm2217_vm1 = vcmp.eq.s32.totalorder %v12516_v3, %v11235_v56 }
 0x3d9   : > { %v12827_v0 = vpop.f32.mrf.mxu2  ;;  %v2421_v53 = vpack.c.bf16 %v2338_v29, %v2337_v12  ;;  %v12864_v29 = vld [vmem:[%s11025_s18 + $0x3e8] sm:$0xff] }
 0x3da   : > { %16480 = vst [vmem:[#allocation113_spill] sm:$0xff] %v12827_v0  ;;  %v12857_v9 = vpop.permute.xlu2 %2074 }
 0x3db   : > { %v2819_v25 = vpop.f32.mrf.mxu1 }
 0x3dc   : > { %v2997_v7 = vpack.c.bf16 %v2819_v25, %v2817_v54  ;;  %v1025_v54 = vsel %vm897_vm0, 1.0, %v16352_v40 }
 0x3de   : > { %9993 = vmatmul.msk.bf16.gmra.mxu2 %vm3042_vm6, %v2997_v7  ;;  %v1106_v7 = vpack.c.bf16 %v1026_v47, %v1025_v54  ;;  %10506 = vset.pattern.permute.xlu2 %v16348_v44  ;;  %v12859_v54 = vpop.f32.mrf.mxu3 }
 0x3df   : > { %16483 = vst [vmem:[#allocation116_spill] sm:$0xff] %v12859_v54  ;;  %2113 = vperm.xlu2 %10506, %v12864_v29  }
 0x3e0   : > { %10510 = vset.pattern.permute.xlu1 %v16348_v44  ;;  %9869 = vmatmul.msk.bf16.gmra.mxu0 %vm1147_vm2, %v1106_v7  ;;  %v709_v44 = vpop.permute.xlu1 %708 }
 0x3e1   : > { %v12844_v25 = vpop.f32.mrf.mxu2  ;;  %2119 = vperm.xlu1 %10510, %v12848_v42   ;;  %vm899_vm7 = vcmp.eq.s32.totalorder %v709_v44, %v11235_v56 }
 0x3e2   : > { %16482 = vst [vmem:[#allocation115_spill] sm:$0xff] %v12844_v25  ;;  %v1027_v7 = vsel %vm899_vm7, 1.0, %v16352_v40  ;;  %v12887_v25 = vld [vmem:[%s11025_s18 + $0x3f0] sm:$0xff]  ;;  %vm2219_vm7 = vcmp.eq.s32.totalorder %v12669_v11, %v11235_v56 }
 0x3e3   : > { %v2822_v10 = vpop.f32.mrf.mxu1  ;;  %2116 = vperm.xlu0 %10509, %v12887_v25   ;;  %v2347_v11 = vsel %vm2219_vm7, 1.0, %v16352_v40 }
 0x3e6   : > { %9930 = vmatmul.msk.bf16.gmra.mxu1 %vm1147_vm2, %v2421_v53  ;;  %v2340_v53 = vsel %vm2212_vm4, 1.0, %v16352_v40  ;;  %v12881_v62 = vpop.f32.mrf.mxu3  ;;  %vm2218_vm4 = vcmp.eq.s32.totalorder %v12646_v6, %v11235_v56 }
 0x3e7   : > { %16485 = vst [vmem:[#allocation118_spill] sm:$0xff] %v12881_v62  ;;  %v2422_v0 = vpack.c.bf16 %v2340_v53, %v2339_v5  ;;  %10508 = vset.pattern.permute.xlu2 %v16350_v2 }
 0x3e9   : > { %v12861_v47 = vpop.f32.mrf.mxu2  ;;  %10511 = vset.pattern.permute.xlu1 %v16350_v2 }
 0x3ea   : > { %16484 = vst [vmem:[#allocation117_spill] sm:$0xff] %v12861_v47  ;;  %753 = vperm.xlu1 %10511, %v12585_v59   ;;  %v1554_v47 = vpop.f32.mrf.mxu0 }
 0x3eb   : > { %v2824_v37 = vpop.f32.mrf.mxu1  ;;  %10512 = vset.pattern.permute.xlu0 %v16350_v2 }
 0x3ec   : > { %v2998_v12 = vpack.c.bf16 %v2824_v37, %v2822_v10  ;;  %v12875_v37 = vpop.permute.xlu0 %2077  ;;  %v712_v10 = vpop.permute.xlu2 %711  ;;  %759 = vperm.xlu0 %10512, %v12623_v31  }
 0x3ed   : > { %vm900_vm8 = vcmp.eq.s32.totalorder %v712_v10, %v11235_v56  ;;  %v10694_v10 = vld [vmem:[%s11025_s18 + $0x368] sm:$0xff] }
 0x3ee   : > { %9994 = vmatmul.msk.bf16.gmra.mxu2 %vm3042_vm6, %v2998_v12  ;;  %v1028_v59 = vsel %vm900_vm8, 1.0, %v16352_v40  ;;  %747 = vperm.xlu2 %10508, %v10694_v10   ;;  %v12900_v5 = vpop.f32.mrf.mxu3  ;;  %vm2220_vm8 = vcmp.eq.s32.totalorder %v12705_v39, %v11235_v56 }
 0x3ef   : > { %v1107_v44 = vpack.c.bf16 %v1028_v59, %v1027_v7  ;;  %16487 = vst [vmem:[#allocation120_spill] sm:$0xff] %v12900_v5  ;;  %v10788_v5 = vld [vmem:[%s11025_s18 + $0x378] sm:$0xff] }
 0x3f1   : > { %v12883_v12 = vpop.f32.mrf.mxu2  ;;  %9870 = vmatmul.msk.bf16.gmra.mxu0 %vm1147_vm2, %v1107_v44 }
 0x3f2   : > { %16486 = vst [vmem:[#allocation119_spill] sm:$0xff] %v12883_v12  ;;  %762 = vperm.xlu1 %10511, %v12639_v24   ;;  %v1556_v59 = vpop.f32.mrf.mxu0 }
 0x3f3   : > { %v2827_v54 = vpop.f32.mrf.mxu1  ;;  %v1710_v53 = vpack.c.bf16 %v1556_v59, %v1554_v47 }
 0x3f4   : > { %v12894_v62 = vpop.permute.xlu0 %2080  ;;  %v715_v24 = vpop.permute.xlu2 %714  ;;  %774 = vperm.xlu0 %10512, %v12737_v26  }
 0x3f5   : > { %10071 = vmatmul.msk.bf16.gmra.mxu3 %vm3042_vm6, %v1710_v53  ;;  %vm901_vm11 = vcmp.eq.s32.totalorder %v715_v24, %v11235_v56 }
 0x3f6   : > { %9931 = vmatmul.msk.bf16.gmra.mxu1 %vm1147_vm2, %v2422_v0  ;;  %v12909_v0 = vpop.permute.xlu1 %2083  ;;  %750 = vperm.xlu2 %10508, %v12610_v46   ;;  %v1029_v31 = vsel %vm901_vm11, 1.0, %v16352_v40  ;;  %vm2221_vm11 = vcmp.eq.s32.totalorder %v12542_v27, %v11235_v56 }
 0x3f9   : > { %v12897_v12 = vpop.f32.mrf.mxu2 }
 0x3fa   : > { %768 = vperm.xlu1 %10511, %v12674_v41   ;;  %v12926_v41 = vpop.f32.mrf.mxu3 }
 0x3fb   : > { %v2829_v7 = vpop.f32.mrf.mxu1  ;;  %16488 = vst [vmem:[#allocation121_spill] sm:$0xff] %v12926_v41 }
 0x3fc   : > { %v2999_v17 = vpack.c.bf16 %v2829_v7, %v2827_v54  ;;  %v718_v54 = vpop.permute.xlu0 %717  ;;  %v2423_v7 = vpack.c.bf16 %v2342_v23, %v2341_v60  ;;  %v12928_v59 = vpop.permute.xlu2 %2089  ;;  %783 = vperm.xlu0 %10512, %v12756_v58   ;;  %v2343_v58 = vsel %vm2215_vm13, 1.0, %v16352_v40  ;;  %vm2222_vm13 = vcmp.eq.s32.totalorder %v12687_v52, %v11235_v56 }
 0x3fd   : > { %vm902_vm12 = vcmp.eq.s32.totalorder %v718_v54, %v11235_v56  ;;  %v1559_v54 = vpop.f32.mrf.mxu0 }
 0x3fe   : > { %9995 = vmatmul.msk.bf16.gmra.mxu2 %vm3042_vm6, %v2999_v17  ;;  %v1030_v47 = vsel %vm902_vm12, 1.0, %v16352_v40  ;;  %v12924_v46 = vpop.permute.xlu1 %2086  ;;  %756 = vperm.xlu2 %10508, %v12655_v4  }
 0x3ff   : > { %v1108_v10 = vpack.c.bf16 %v1030_v47, %v1029_v31 }
 0x401   : > { %v12918_v17 = vpop.f32.mrf.mxu2  ;;  %9871 = vmatmul.msk.bf16.gmra.mxu0 %vm1147_vm2, %v1108_v10 }
 0x402   : > { %777 = vperm.xlu1 %10511, %v12703_v32   ;;  %v12945_v23 = vpop.f32.mrf.mxu3 }
 0x403   : > { %v2832_v44 = vpop.f32.mrf.mxu1  ;;  %16489 = vst [vmem:[#allocation122_spill] sm:$0xff] %v12945_v23 }
 0x404   : > { %v724_v32 = vpop.permute.xlu2 %723  ;;  %792 = vperm.xlu0 %10512, %v12814_v30   ;;  %v12983_v6 = vpop.permute.xlu0 %2092 }
 0x405   : > { %vm904_vm0 = vcmp.eq.s32.totalorder %v724_v32, %v11235_v56  ;;  %v1561_v43 = vpop.f32.mrf.mxu0  ;;  %v2345_v32 = vsel %vm2217_vm1, 1.0, %v16352_v40 }
 0x406   : > { %9932 = vmatmul.msk.bf16.gmra.mxu1 %vm1147_vm2, %v2423_v7  ;;  %v721_v26 = vpop.permute.xlu1 %720  ;;  %765 = vperm.xlu2 %10508, %v12651_v49   ;;  %v1032_v60 = vsel %vm904_vm0, 1.0, %v16352_v40  ;;  %v2344_v49 = vsel %vm2216_vm15, 1.0, %v16352_v40  ;;  %v1711_v7 = vpack.c.bf16 %v1561_v43, %v1559_v54  ;;  %vm2223_vm15 = vcmp.eq.s32.totalorder %v12710_v14, %v11235_v56 }
 0x407   : > { %vm903_vm14 = vcmp.eq.s32.totalorder %v721_v26, %v11235_v56  ;;  %vm2224_vm0 = vcmp.eq.s32.totalorder %v12715_v15, %v11235_v56 }
 0x408   : > { %v1031_v4 = vsel %vm903_vm14, 1.0, %v16352_v40  ;;  %10072 = vmatmul.msk.bf16.gmra.mxu3 %vm3042_vm6, %v1711_v7 }
 0x409   : > { %v12932_v53 = vpop.f32.mrf.mxu2 }
 0x40a   : > { %786 = vperm.xlu1 %10511, %v12776_v34   ;;  %v1109_v34 = vpack.c.bf16 %v1032_v60, %v1031_v4 }
 0x40b   : > { %v2834_v24 = vpop.f32.mrf.mxu1 }
 0x40c   : > { %v3000_v31 = vpack.c.bf16 %v2834_v24, %v2832_v44  ;;  %v2424_v44 = vpack.c.bf16 %v2344_v49, %v2343_v58  ;;  %801 = vperm.xlu0 %10512, %v12848_v42   ;;  %v727_v30 = vpop.permute.xlu2 %726  ;;  %v2346_v58 = vsel %vm2218_vm4, 1.0, %v16352_v40  ;;  %vm2225_vm4 = vcmp.eq.s32.totalorder %v12731_v55, %v11235_v56 }
 0x40d   : > { %v1564_v54 = vpop.f32.mrf.mxu0  ;;  %vm905_vm3 = vcmp.eq.s32.totalorder %v727_v30, %v11235_v56 }
 0x40e   : > { %9996 = vmatmul.msk.bf16.gmra.mxu2 %vm3042_vm6, %v3000_v31  ;;  %771 = vperm.xlu2 %10508, %v12720_v50   ;;  %v12962_v31 = vpop.f32.mrf.mxu3 }
 0x40f   : > { %v12955_v10 = vpop.permute.xlu1 %2095  ;;  %16490 = vst [vmem:[#allocation123_spill] sm:$0xff] %v12962_v31 }
 0x411   : > { %v12948_v8 = vpop.f32.mrf.mxu2  ;;  %9872 = vmatmul.msk.bf16.gmra.mxu0 %vm1147_vm2, %v1109_v34 }
 0x412   : > { %795 = vperm.xlu1 %10511, %v12864_v29   ;;  %v1033_v29 = vsel %vm905_vm3, 1.0, %v16352_v40 }
 0x413   : > { %v2837_v47 = vpop.f32.mrf.mxu1 }
 0x415   : > { %v1566_v34 = vpop.f32.mrf.mxu0 }
 0x416   : > { %9933 = vmatmul.msk.bf16.gmra.mxu1 %vm1147_vm2, %v2424_v44  ;;  %780 = vperm.xlu2 %10508, %v12795_v63   ;;  %v12979_v63 = vpop.f32.mrf.mxu3  ;;  %v1712_v43 = vpack.c.bf16 %v1566_v34, %v1564_v54 }
 0x417   : > { %16491 = vst [vmem:[#allocation124_spill] sm:$0xff] %v12979_v63 }
 0x418   : > { %10073 = vmatmul.msk.bf16.gmra.mxu3 %vm3042_vm6, %v1712_v43 }
 0x419   : > { %v12960_v24 = vpop.f32.mrf.mxu2  ;;  %v730_v50 = vpop.permute.xlu1 %729 }
 0x41a   : > { %vm906_vm5 = vcmp.eq.s32.totalorder %v730_v50, %v11235_v56  ;;  %v12985_v44 = vpop.permute.xlu2 %2098 }
 0x41b   : > { %v2839_v26 = vpop.f32.mrf.mxu1  ;;  %v1034_v3 = vsel %vm906_vm5, 1.0, %v16352_v40  ;;  %vm2226_vm5 = vcmp.eq.s32.totalorder %v12741_v22, %v11235_v56 }
 0x41c   : > { %v3001_v4 = vpack.c.bf16 %v2839_v26, %v2837_v47  ;;  %v1110_v49 = vpack.c.bf16 %v1034_v3, %v1033_v29  ;;  %v2425_v47 = vpack.c.bf16 %v2346_v58, %v2345_v32  ;;  %v2348_v3 = vsel %vm2220_vm8, 1.0, %v16352_v40 }
 0x41d   : > { %v1569_v50 = vpop.f32.mrf.mxu0 }
 0x41e   : > { %9997 = vmatmul.msk.bf16.gmra.mxu2 %vm3042_vm6, %v3001_v4  ;;  %789 = vperm.xlu2 %10508, %v12791_v19   ;;  %v12996_v29 = vpop.f32.mrf.mxu3  ;;  %v12999_v19 = vpop.permute.xlu0 %2101 }
 0x41f   : > { %16492 = vst [vmem:[#allocation125_spill] sm:$0xff] %v12996_v29 }
 0x421   : > { %v12975_v42 = vpop.f32.mrf.mxu2  ;;  %9873 = vmatmul.msk.bf16.gmra.mxu0 %vm1147_vm2, %v1110_v49 }
 0x423   : > { %v2842_v60 = vpop.f32.mrf.mxu1 }
 0x425   : > { %v733_v30 = vpop.permute.xlu1 %732 }
 0x426   : > { %9934 = vmatmul.msk.bf16.gmra.mxu1 %vm1147_vm2, %v2425_v47  ;;  %vm907_vm9 = vcmp.eq.s32.totalorder %v733_v30, %v11235_v56  ;;  %798 = vperm.xlu2 %10508, %v12887_v25   ;;  %v2426_v47 = vpack.c.bf16 %v2348_v3, %v2347_v11  ;;  %v1571_v25 = vpop.f32.mrf.mxu0 }
 0x427   : > { %v1035_v54 = vsel %vm907_vm9, 1.0, %v16352_v40  ;;  %v13011_v34 = vpop.permute.xlu0 %2104  ;;  %v1713_v43 = vpack.c.bf16 %v1571_v25, %v1569_v50  ;;  %vm2227_vm9 = vcmp.eq.s32.totalorder %v12753_v45, %v11235_v56 }
 0x428   : > { %v736_v32 = vpop.permute.xlu2 %735 }
 0x429   : > { %v12989_v7 = vpop.f32.mrf.mxu2  ;;  %vm908_vm10 = vcmp.eq.s32.totalorder %v736_v32, %v11235_v56  ;;  %10074 = vmatmul.msk.bf16.gmra.mxu3 %vm3042_vm6, %v1713_v43 }
 0x42a   : > { %v1036_v58 = vsel %vm908_vm10, 1.0, %v16352_v40 }
 0x42b   : > { %v2844_v26 = vpop.f32.mrf.mxu1  ;;  %v1111_v49 = vpack.c.bf16 %v1036_v58, %v1035_v54 }
 0x42c   : > { %v3002_v4 = vpack.c.bf16 %v2844_v26, %v2842_v60  ;;  %v13013_v26 = vpop.f32.mrf.mxu3 }
 0x42d   : > { %16493 = vst [vmem:[#allocation126_spill] sm:$0xff] %v13013_v26 }
 0x42e   : > { %9998 = vmatmul.msk.bf16.gmra.mxu2 %vm3042_vm6, %v3002_v4 }
 0x430   : > { %v739_v11 = vpop.permute.xlu2 %738 }
 0x431   : > { %v13006_v39 = vpop.f32.mrf.mxu2  ;;  %9874 = vmatmul.msk.bf16.gmra.mxu0 %vm1147_vm2, %v1111_v49  ;;  %vm909_vm12 = vcmp.eq.s32.totalorder %v739_v11, %v11235_v56  ;;  %v2349_v49 = vsel %vm2221_vm11, 1.0, %v16352_v40  ;;  %vm2228_vm11 = vcmp.eq.s32.totalorder %v12751_v20, %v11235_v56 }
 0x432   : > { %v1037_v50 = vsel %vm909_vm12, 1.0, %v16352_v40 }
 0x433   : > { %v2847_v60 = vpop.f32.mrf.mxu1 }
 0x434   : > { %v13033_v25 = vpop.f32.mrf.mxu3 }
 0x435   : > { %v13021_v54 = vpop.permute.xlu1 %2107  ;;  %16494 = vst [vmem:[#allocation127_spill] sm:$0xff] %v13033_v25 }
 0x436   : > { %9935 = vmatmul.msk.bf16.gmra.mxu1 %vm1147_vm2, %v2426_v47  ;;  %v2350_v47 = vsel %vm2222_vm13, 1.0, %v16352_v40  ;;  %vm2229_vm13 = vcmp.eq.s32.totalorder %v12782_v21, %v11235_v56 }
 0x439   : > { %v13016_v4 = vpop.f32.mrf.mxu2  ;;  %v742_v3 = vpop.permute.xlu0 %741 }
 0x43a   : > { %vm910_vm14 = vcmp.eq.s32.totalorder %v742_v3, %v11235_v56  ;;  %v13039_v11 = vpop.permute.xlu2 %2113 }
 0x43b   : > { %v2849_v30 = vpop.f32.mrf.mxu1  ;;  %v1574_v58 = vpop.f32.mrf.mxu0  ;;  %v1038_v27 = vsel %vm910_vm14, 1.0, %v16352_v40 }
 0x43c   : > { %v3003_v32 = vpack.c.bf16 %v2849_v30, %v2847_v60  ;;  %v1112_v30 = vpack.c.bf16 %v1038_v27, %v1037_v50  ;;  %v13044_v25 = vpop.f32.mrf.mxu3 }
 0x43d   : > { %16495 = vst [vmem:[#allocation128_spill] sm:$0xff] %v13044_v25 }
 0x43e   : > { %9999 = vmatmul.msk.bf16.gmra.mxu2 %vm3042_vm6, %v3003_v32  ;;  %v2427_v32 = vpack.c.bf16 %v2350_v47, %v2349_v49 }
 0x441   : > { %v13029_v60 = vpop.f32.mrf.mxu2  ;;  %9875 = vmatmul.msk.bf16.gmra.mxu0 %vm1147_vm2, %v1112_v30  ;;  %v13037_v52 = vpop.permute.xlu1 %2110 }
 0x443   : > { %v2852_v43 = vpop.f32.mrf.mxu1  ;;  %v1576_v3 = vpop.f32.mrf.mxu0 }
 0x444   : > { %v1714_v26 = vpack.c.bf16 %v1576_v3, %v1574_v58  ;;  %v13059_v30 = vpop.f32.mrf.mxu3 }
 0x445   : > { %16497 = vst [vmem:[#allocation130_spill] sm:$0xff] %v13059_v30 }
 0x446   : > { %9936 = vmatmul.msk.bf16.gmra.mxu1 %vm1147_vm2, %v2427_v32  ;;  %10075 = vmatmul.msk.bf16.gmra.mxu3 %vm3042_vm6, %v1714_v26  ;;  %v2351_v26 = vsel %vm2223_vm15, 1.0, %v16352_v40 }
 0x448   : > { %v748_v49 = vpop.permute.xlu2 %747 }
 0x449   : > { %v13041_v29 = vpop.f32.mrf.mxu2  ;;  %vm912_vm3 = vcmp.eq.s32.totalorder %v748_v49, %v11235_v56 }
 0x44a   : > { %v745_v50 = vpop.permute.xlu1 %744  ;;  %v1040_v14 = vsel %vm912_vm3, 1.0, %v16352_v40  ;;  %vm2231_vm3 = vcmp.eq.s32.totalorder %v12854_v61, %v11235_v56 }
 0x44b   : > { %v2854_v63 = vpop.f32.mrf.mxu1  ;;  %vm911_vm1 = vcmp.eq.s32.totalorder %v745_v50, %v11235_v56 }
 0x44c   : > { %v3004_v31 = vpack.c.bf16 %v2854_v63, %v2852_v43  ;;  %v1039_v58 = vsel %vm911_vm1, 1.0, %v16352_v40  ;;  %v1579_v27 = vpop.f32.mrf.mxu0  ;;  %v2352_v63 = vsel %vm2224_vm0, 1.0, %v16352_v40  ;;  %vm2230_vm0 = vcmp.eq.s32.totalorder %v12780_v38, %v11235_v56 }
 0x44d   : > { %v1113_v43 = vpack.c.bf16 %v1040_v14, %v1039_v58  ;;  %v2353_v14 = vsel %vm2225_vm4, 1.0, %v16352_v40  ;;  %vm2232_vm1 = vcmp.eq.s32.totalorder %v12823_v28, %v11235_v56 }
 0x44e   : > { %10000 = vmatmul.msk.bf16.gmra.mxu2 %vm3042_vm6, %v3004_v31  ;;  %v2428_v31 = vpack.c.bf16 %v2352_v63, %v2351_v26  ;;  %v13073_v26 = vpop.f32.mrf.mxu3 }
 0x44f   : > { %16499 = vst [vmem:[#allocation132_spill] sm:$0xff] %v13073_v26 }
 0x450   : > { %v751_v58 = vpop.permute.xlu2 %750 }
 0x451   : > { %v13056_v47 = vpop.f32.mrf.mxu2  ;;  %9876 = vmatmul.msk.bf16.gmra.mxu0 %vm1147_vm2, %v1113_v43  ;;  %vm913_vm7 = vcmp.eq.s32.totalorder %v751_v58, %v11235_v56 }
 0x452   : > { %16496 = vst [vmem:[#allocation129_spill] sm:$0xff] %v13056_v47  ;;  %v1041_v63 = vsel %vm913_vm7, 1.0, %v16352_v40  ;;  %vm2233_vm7 = vcmp.eq.s32.totalorder %v12857_v9, %v11235_v56 }
 0x453   : > { %v2857_v15 = vpop.f32.mrf.mxu1  ;;  %v13063_v32 = vpop.permute.xlu1 %2119 }
 0x454   : > { %v1581_v3 = vpop.f32.mrf.mxu0 }
 0x455   : > { %v1715_v50 = vpack.c.bf16 %v1581_v3, %v1579_v27 }
 0x456   : > { %9937 = vmatmul.msk.bf16.gmra.mxu1 %vm1147_vm2, %v2428_v31 }
 0x457   : > { %10076 = vmatmul.msk.bf16.gmra.mxu3 %vm3042_vm6, %v1715_v50  ;;  %v13085_v50 = vpop.permute.xlu0 %2116 }
 0x459   : > { %v13065_v25 = vpop.f32.mrf.mxu2 }
 0x45a   : > { %16498 = vst [vmem:[#allocation131_spill] sm:$0xff] %v13065_v25 }
 0x45b   : > { %v2859_v49 = vpop.f32.mrf.mxu1 }
 0x45c   : > { %v3005_v23 = vpack.c.bf16 %v2859_v49, %v2857_v15  ;;  %v754_v27 = vpop.permute.xlu1 %753  ;;  %v2354_v15 = vsel %vm2226_vm5, 1.0, %v16352_v40  ;;  %v13087_v49 = vpop.f32.mrf.mxu3 }
 0x45d   : > { %vm914_vm8 = vcmp.eq.s32.totalorder %v754_v27, %v11235_v56  ;;  %v1584_v55 = vpop.f32.mrf.mxu0  ;;  %v2429_v3 = vpack.c.bf16 %v2354_v15, %v2353_v14  ;;  %16501 = vst [vmem:[#allocation134_spill] sm:$0xff] %v13087_v49 }
 0x45e   : > { %10001 = vmatmul.msk.bf16.gmra.mxu2 %vm3042_vm6, %v3005_v23  ;;  %v1042_v22 = vsel %vm914_vm8, 1.0, %v16352_v40  ;;  %vm2234_vm8 = vcmp.eq.s32.totalorder %v12875_v37, %v11235_v56 }
 0x45f   : > { %v1114_v31 = vpack.c.bf16 %v1042_v22, %v1041_v63  ;;  %v757_v63 = vpop.permute.xlu2 %756  ;;  %v760_v14 = vpop.permute.xlu0 %759 }
 0x460   : > { %vm915_vm10 = vcmp.eq.s32.totalorder %v757_v63, %v11235_v56  ;;  %vm916_vm12 = vcmp.eq.s32.totalorder %v760_v14, %v11235_v56 }
 0x461   : > { %v13080_v43 = vpop.f32.mrf.mxu2  ;;  %9877 = vmatmul.msk.bf16.gmra.mxu0 %vm1147_vm2, %v1114_v31  ;;  %v1043_v15 = vsel %vm915_vm10, 1.0, %v16352_v40  ;;  %v1044_v22 = vsel %vm916_vm12, 1.0, %v16352_v40  ;;  %v2356_v31 = vsel %vm2228_vm11, 1.0, %v16352_v40  ;;  %vm2235_vm11 = vcmp.eq.s32.totalorder %v12894_v62, %v11235_v56 }
 0x462   : > { %16500 = vst [vmem:[#allocation133_spill] sm:$0xff] %v13080_v43  ;;  %vm2236_vm12 = vcmp.eq.s32.totalorder %v12909_v0, %v11235_v56  ;;  %v10764_v43 = vld [vmem:[%s11025_s18 + $0x298] sm:$0xff] }
 0x463   : > { %v2862_v23 = vpop.f32.mrf.mxu1 }
 0x465   : > { %v1586_v58 = vpop.f32.mrf.mxu0 }
 0x466   : > { %9938 = vmatmul.msk.bf16.gmra.mxu1 %vm1147_vm2, %v2429_v3  ;;  %v1716_v27 = vpack.c.bf16 %v1586_v58, %v1584_v55  ;;  %v13101_v55 = vpop.f32.mrf.mxu3 }
 0x467   : > { %16503 = vst [vmem:[#allocation136_spill] sm:$0xff] %v13101_v55 }
 0x468   : > { %10077 = vmatmul.msk.bf16.gmra.mxu3 %vm3042_vm6, %v1716_v27 }
 0x469   : > { %v13089_v26 = vpop.f32.mrf.mxu2 }
 0x46a   : > { %16502 = vst [vmem:[#allocation135_spill] sm:$0xff] %v13089_v26  ;;  %v13949_v26 = vld [vmem:[%s11025_s18 + $0x280] sm:$0xff] }
 0x46b   : > { %v2864_v30 = vpop.f32.mrf.mxu1 }
 0x46c   : > { %v3006_v25 = vpack.c.bf16 %v2864_v30, %v2862_v23  ;;  %v2355_v30 = vsel %vm2227_vm9, 1.0, %v16352_v40 }
 0x46d   : > { %v2430_v58 = vpack.c.bf16 %v2356_v31, %v2355_v30  ;;  %v766_v30 = vpop.permute.xlu2 %765 }
 0x46e   : > { %10002 = vmatmul.msk.bf16.gmra.mxu2 %vm3042_vm6, %v3006_v25  ;;  %v1115_v25 = vpack.c.bf16 %v1044_v22, %v1043_v15  ;;  %v1589_v23 = vpop.f32.mrf.mxu0  ;;  %v13109_v20 = vpop.f32.mrf.mxu3  ;;  %vm918_vm15 = vcmp.eq.s32.totalorder %v766_v30, %v11235_v56 }
 0x46f   : > { %16505 = vst [vmem:[#allocation138_spill] sm:$0xff] %v13109_v20  ;;  %v763_v15 = vpop.permute.xlu1 %762 }
 0x470   : > { %vm917_vm14 = vcmp.eq.s32.totalorder %v763_v15, %v11235_v56 }
 0x471   : > { %v13104_v45 = vpop.f32.mrf.mxu2  ;;  %9878 = vmatmul.msk.bf16.gmra.mxu0 %vm1147_vm2, %v1115_v25  ;;  %v1045_v22 = vsel %vm917_vm14, 1.0, %v16352_v40  ;;  %v1046_v25 = vsel %vm918_vm15, 1.0, %v16352_v40  ;;  %vm2237_vm15 = vcmp.eq.s32.totalorder %v12924_v46, %v11235_v56 }
 0x472   : > { %16504 = vst [vmem:[#allocation137_spill] sm:$0xff] %v13104_v45 }
 0x473   : > { %v2867_v3 = vpop.f32.mrf.mxu1 }
 0x476   : > { %9939 = vmatmul.msk.bf16.gmra.mxu1 %vm1147_vm2, %v2430_v58  ;;  %v1591_v63 = vpop.f32.mrf.mxu0 }
 0x477   : > { %v1717_v55 = vpack.c.bf16 %v1591_v63, %v1589_v23  ;;  %v1116_v23 = vpack.c.bf16 %v1046_v25, %v1045_v22  ;;  %v13127_v63 = vpop.f32.mrf.mxu3 }
 0x479   : > { %v13111_v27 = vpop.f32.mrf.mxu2  ;;  %10078 = vmatmul.msk.bf16.gmra.mxu3 %vm3042_vm6, %v1717_v55  ;;  %v2357_v55 = vsel %vm2229_vm13, 1.0, %v16352_v40 }
 0x47a   : > { %16506 = vst [vmem:[#allocation139_spill] sm:$0xff] %v13111_v27 }
 0x47b   : > { %v2869_v14 = vpop.f32.mrf.mxu1 }
 0x47c   : > { %v3007_v49 = vpack.c.bf16 %v2869_v14, %v2867_v3 }
 0x47e   : > { %10003 = vmatmul.msk.bf16.gmra.mxu2 %vm3042_vm6, %v3007_v49  ;;  %v1594_v21 = vpop.f32.mrf.mxu0  ;;  %v2358_v49 = vsel %vm2230_vm0, 1.0, %v16352_v40  ;;  %vm2238_vm0 = vcmp.eq.s32.totalorder %v12928_v59, %v11235_v56 }
 0x47f   : > { %v2431_v58 = vpack.c.bf16 %v2358_v49, %v2357_v55  ;;  %v13137_v25 = vpop.f32.mrf.mxu3  ;;  %v769_v55 = vpop.permute.xlu1 %768  ;;  %v2360_v49 = vsel %vm2232_vm1, 1.0, %v16352_v40  ;;  %v2366_v46 = vsel %vm2238_vm0, 1.0, %v16352_v40  ;;  %vm2246_vm0 = vcmp.eq.s32.totalorder %v13039_v11, %v11235_v56 }
 0x480   : > { %vm919_vm4 = vcmp.eq.s32.totalorder %v769_v55, %v11235_v56 }
 0x481   : > { %v13124_v31 = vpop.f32.mrf.mxu2  ;;  %9879 = vmatmul.msk.bf16.gmra.mxu0 %vm1147_vm2, %v1116_v23  ;;  %v772_v23 = vpop.permute.xlu2 %771  ;;  %v1047_v28 = vsel %vm919_vm4, 1.0, %v16352_v40  ;;  %vm2240_vm4 = vcmp.eq.s32.totalorder %v12955_v10, %v11235_v56 }
 0x482   : > { %16507 = vst [vmem:[#allocation140_spill] sm:$0xff] %v13124_v31  ;;  %vm920_vm5 = vcmp.eq.s32.totalorder %v772_v23, %v11235_v56 }
 0x483   : > { %v2872_v3 = vpop.f32.mrf.mxu1  ;;  %v1048_v61 = vsel %vm920_vm5, 1.0, %v16352_v40  ;;  %vm2239_vm5 = vcmp.eq.s32.totalorder %v12983_v6, %v11235_v56 }
 0x486   : > { %9940 = vmatmul.msk.bf16.gmra.mxu1 %vm1147_vm2, %v2431_v58  ;;  %v1596_v14 = vpop.f32.mrf.mxu0  ;;  %v2359_v58 = vsel %vm2231_vm3, 1.0, %v16352_v40 }
 0x487   : > { %v1718_v30 = vpack.c.bf16 %v1596_v14, %v1594_v21  ;;  %v1117_v21 = vpack.c.bf16 %v1048_v61, %v1047_v28  ;;  %v775_v28 = vpop.permute.xlu0 %774 }
 0x488   : > { %vm921_vm10 = vcmp.eq.s32.totalorder %v775_v28, %v11235_v56 }
 0x489   : > { %v13131_v38 = vpop.f32.mrf.mxu2  ;;  %10079 = vmatmul.msk.bf16.gmra.mxu3 %vm3042_vm6, %v1718_v30  ;;  %v1049_v9 = vsel %vm921_vm10, 1.0, %v16352_v40  ;;  %vm2242_vm10 = vcmp.eq.s32.totalorder %v12999_v19, %v11235_v56 }
 0x48a   : > { %16508 = vst [vmem:[#allocation141_spill] sm:$0xff] %v13131_v38 }
 0x48b   : > { %v2874_v15 = vpop.f32.mrf.mxu1 }
 0x48c   : > { %v3008_v22 = vpack.c.bf16 %v2874_v15, %v2872_v3  ;;  %v2432_v3 = vpack.c.bf16 %v2360_v49, %v2359_v58  ;;  %v778_v49 = vpop.permute.xlu1 %777 }
 0x48d   : > { %vm922_vm9 = vcmp.eq.s32.totalorder %v778_v49, %v11235_v56 }
 0x48e   : > { %10004 = vmatmul.msk.bf16.gmra.mxu2 %vm3042_vm6, %v3008_v22  ;;  %v1599_v15 = vpop.f32.mrf.mxu0  ;;  %v13151_v22 = vpop.f32.mrf.mxu3  ;;  %v1050_v61 = vsel %vm922_vm9, 1.0, %v16352_v40  ;;  %vm2241_vm9 = vcmp.eq.s32.totalorder %v12985_v44, %v11235_v56  ;;  %v2370_v44 = vsel %vm2242_vm10, 1.0, %v16352_v40 }
 0x48f   : > { %v1118_v37 = vpack.c.bf16 %v1050_v61, %v1049_v9  ;;  %v781_v61 = vpop.permute.xlu2 %780 }
 0x490   : > { %vm923_vm13 = vcmp.eq.s32.totalorder %v781_v61, %v11235_v56 }
 0x491   : > { %v13147_v14 = vpop.f32.mrf.mxu2  ;;  %9880 = vmatmul.msk.bf16.gmra.mxu0 %vm1147_vm2, %v1117_v21  ;;  %v2362_v21 = vsel %vm2234_vm8, 1.0, %v16352_v40  ;;  %v1051_v9 = vsel %vm923_vm13, 1.0, %v16352_v40  ;;  %vm2243_vm13 = vcmp.eq.s32.totalorder %v13011_v34, %v11235_v56 }
 0x492   : > { %16509 = vst [vmem:[#allocation142_spill] sm:$0xff] %v13147_v14 }
 0x493   : > { %v2877_v30 = vpop.f32.mrf.mxu1 }
 0x496   : > { %9941 = vmatmul.msk.bf16.gmra.mxu1 %vm1147_vm2, %v2432_v3  ;;  %v1601_v55 = vpop.f32.mrf.mxu0  ;;  %v13161_v58 = vpop.f32.mrf.mxu3 }
 0x497   : > { %v1719_v38 = vpack.c.bf16 %v1601_v55, %v1599_v15 }
 0x499   : > { %v13153_v20 = vpop.f32.mrf.mxu2  ;;  %10080 = vmatmul.msk.bf16.gmra.mxu3 %vm3042_vm6, %v1719_v38  ;;  %v2361_v38 = vsel %vm2233_vm7, 1.0, %v16352_v40 }
 0x49a   : > { %16510 = vst [vmem:[#allocation143_spill] sm:$0xff] %v13153_v20 }
 0x49b   : > { %v2879_v23 = vpop.f32.mrf.mxu1 }
 0x49c   : > { %v3009_v31 = vpack.c.bf16 %v2879_v23, %v2877_v30  ;;  %v2433_v30 = vpack.c.bf16 %v2362_v21, %v2361_v38  ;;  %v784_v21 = vpop.permute.xlu0 %783 }
 0x49d   : > { %vm924_vm14 = vcmp.eq.s32.totalorder %v784_v21, %v11235_v56 }
 0x49e   : > { %10005 = vmatmul.msk.bf16.gmra.mxu2 %vm3042_vm6, %v3009_v31  ;;  %v1604_v31 = vpop.f32.mrf.mxu0  ;;  %v13173_v55 = vpop.f32.mrf.mxu3  ;;  %v1052_v62 = vsel %vm924_vm14, 1.0, %v16352_v40  ;;  %vm2244_vm14 = vcmp.eq.s32.totalorder %v13021_v54, %v11235_v56 }
 0x49f   : > { %v1119_v0 = vpack.c.bf16 %v1052_v62, %v1051_v9  ;;  %v787_v9 = vpop.permute.xlu1 %786 }
 0x4a0   : > { %vm925_vm1 = vcmp.eq.s32.totalorder %v787_v9, %v11235_v56 }
 0x4a1   : > { %v13169_v3 = vpop.f32.mrf.mxu2  ;;  %9881 = vmatmul.msk.bf16.gmra.mxu0 %vm1147_vm2, %v1118_v37  ;;  %v2364_v37 = vsel %vm2236_vm12, 1.0, %v16352_v40 }
 0x4a2   : > { %16511 = vst [vmem:[#allocation144_spill] sm:$0xff] %v13169_v3 }
 0x4a3   : > { %v2882_v15 = vpop.f32.mrf.mxu1 }
 0x4a6   : > { %9942 = vmatmul.msk.bf16.gmra.mxu1 %vm1147_vm2, %v2433_v30  ;;  %v1606_v49 = vpop.f32.mrf.mxu0  ;;  %v13183_v38 = vpop.f32.mrf.mxu3 }
 0x4a7   : > { %v1720_v20 = vpack.c.bf16 %v1606_v49, %v1604_v31 }
 0x4a9   : > { %v13175_v23 = vpop.f32.mrf.mxu2  ;;  %10081 = vmatmul.msk.bf16.gmra.mxu3 %vm3042_vm6, %v1720_v20  ;;  %v2363_v20 = vsel %vm2235_vm11, 1.0, %v16352_v40 }
 0x4aa   : > { %16512 = vst [vmem:[#allocation145_spill] sm:$0xff] %v13175_v23  ;;  %v2434_v30 = vpack.c.bf16 %v2364_v37, %v2363_v20  ;;  %v790_v20 = vpop.permute.xlu2 %789  ;;  %v2365_v37 = vsel %vm2237_vm15, 1.0, %v16352_v40  ;;  %vm2245_vm15 = vcmp.eq.s32.totalorder %v13037_v52, %v11235_v56 }
 0x4ab   : > { %v2884_v28 = vpop.f32.mrf.mxu1  ;;  %vm926_vm3 = vcmp.eq.s32.totalorder %v790_v20, %v11235_v56 }
 0x4ac   : > { %v3010_v14 = vpack.c.bf16 %v2884_v28, %v2882_v15 }
 0x4ae   : > { %10006 = vmatmul.msk.bf16.gmra.mxu2 %vm3042_vm6, %v3010_v14  ;;  %v1609_v14 = vpop.f32.mrf.mxu0  ;;  %v13195_v49 = vpop.f32.mrf.mxu3 }
 0x4b1   : > { %v13191_v31 = vpop.f32.mrf.mxu2  ;;  %9882 = vmatmul.msk.bf16.gmra.mxu0 %vm1147_vm2, %v1119_v0 }
 0x4b2   : > { %16513 = vst [vmem:[#allocation146_spill] sm:$0xff] %v13191_v31 }
 0x4b3   : > { %v2887_v15 = vpop.f32.mrf.mxu1 }
 0x4b6   : > { %9943 = vmatmul.msk.bf16.gmra.mxu1 %vm1147_vm2, %v2434_v30  ;;  %v1611_v61 = vpop.f32.mrf.mxu0 }
 0x4b7   : > { %v1721_v3 = vpack.c.bf16 %v1611_v61, %v1609_v14 }
 0x4b9   : > { %v3446_v28 = vpop.f32.mrf.mxu2  ;;  %10082 = vmatmul.msk.bf16.gmra.mxu3 %vm3042_vm6, %v1721_v3  ;;  %v1054_v3 = vsel %vm926_vm3, 1.0, %v16352_v40  ;;  %vm2247_vm3 = vcmp.eq.s32.totalorder %v13085_v50, %v11235_v56  ;;  %v10702_v50 = vld [vmem:[%s11025_s18 + $0x30] sm:$0xff] }
 0x4ba   : > { %v13198_v21 = vadd.f32 %v13127_v63, %v3446_v28  ;;  %v13208_v63 = vpop.f32.mrf.mxu3 }
 0x4bb   : > { %v2889_v23 = vpop.f32.mrf.mxu1 }
 0x4bc   : > { %16514 = vst [vmem:[#allocation147_spill] sm:$0xff] %v13198_v21  ;;  %v3011_v27 = vpack.c.bf16 %v2889_v23, %v2887_v15  ;;  %v1053_v23 = vsel %vm925_vm1, 1.0, %v16352_v40  ;;  %v2435_v15 = vpack.c.bf16 %v2366_v46, %v2365_v37  ;;  %v793_v37 = vpop.permute.xlu0 %792  ;;  %v2368_v46 = vsel %vm2240_vm4, 1.0, %v16352_v40 }
 0x4bd   : > { %v1120_v62 = vpack.c.bf16 %v1054_v3, %v1053_v23  ;;  %v796_v3 = vpop.permute.xlu1 %795  ;;  %vm927_vm8 = vcmp.eq.s32.totalorder %v793_v37, %v11235_v56  ;;  %vm2248_vm1 = vcmp.eq.s32.totalorder %v13063_v32, %v11235_v56 }
 0x4be   : > { %10007 = vmatmul.msk.bf16.gmra.mxu2 %vm3042_vm6, %v3011_v27  ;;  %v1614_v0 = vpop.f32.mrf.mxu0  ;;  %vm928_vm7 = vcmp.eq.s32.totalorder %v796_v3, %v11235_v56  ;;  %v1055_v6 = vsel %vm927_vm8, 1.0, %v16352_v40 }
 0x4bf   : > { %v1056_v10 = vsel %vm928_vm7, 1.0, %v16352_v40 }
 0x4c1   : > { %v3449_v59 = vpop.f32.mrf.mxu2  ;;  %9883 = vmatmul.msk.bf16.gmra.mxu0 %vm1147_vm2, %v1120_v62 }
 0x4c2   : > { %v13215_v27 = vadd.f32 %v13137_v25, %v3449_v59  ;;  %v13219_v30 = vpop.f32.mrf.mxu3  ;;  %v1121_v59 = vpack.c.bf16 %v1056_v10, %v1055_v6 }
 0x4c3   : > { %v2892_v14 = vpop.f32.mrf.mxu1 }
 0x4c4   : > { %16515 = vst [vmem:[#allocation148_spill] sm:$0xff] %v13215_v27 }
 0x4c6   : > { %9944 = vmatmul.msk.bf16.gmra.mxu1 %vm1147_vm2, %v2435_v15  ;;  %v1616_v61 = vpop.f32.mrf.mxu0 }
 0x4c7   : > { %v1722_v23 = vpack.c.bf16 %v1616_v61, %v1614_v0 }
 0x4c9   : > { %v3451_v28 = vpop.f32.mrf.mxu2  ;;  %10083 = vmatmul.msk.bf16.gmra.mxu3 %vm3042_vm6, %v1722_v23 }
 0x4ca   : > { %v13222_v9 = vadd.f32 %v13151_v22, %v3451_v28  ;;  %v2367_v22 = vsel %vm2239_vm5, 1.0, %v16352_v40  ;;  %v13233_v62 = vpop.f32.mrf.mxu3 }
 0x4cb   : > { %v2894_v20 = vpop.f32.mrf.mxu1  ;;  %v2436_v0 = vpack.c.bf16 %v2368_v46, %v2367_v22  ;;  %v802_v22 = vpop.permute.xlu0 %801 }
 0x4cc   : > { %16516 = vst [vmem:[#allocation149_spill] sm:$0xff] %v13222_v9  ;;  %v3012_v25 = vpack.c.bf16 %v2894_v20, %v2892_v14  ;;  %vm930_vm12 = vcmp.eq.s32.totalorder %v802_v22, %v11235_v56 }
 0x4ce   : > { %10008 = vmatmul.msk.bf16.gmra.mxu2 %vm3042_vm6, %v3012_v25  ;;  %v1619_v15 = vpop.f32.mrf.mxu0 }
 0x4d1   : > { %v3454_v14 = vpop.f32.mrf.mxu2  ;;  %9884 = vmatmul.msk.bf16.gmra.mxu0 %vm1147_vm2, %v1121_v59  ;;  %v1058_v59 = vsel %vm930_vm12, 1.0, %v16352_v40 }
 0x4d2   : > { %v13239_v28 = vadd.f32 %v13161_v58, %v3454_v14  ;;  %v13243_v20 = vpop.f32.mrf.mxu3  ;;  %v799_v58 = vpop.permute.xlu2 %798 }
 0x4d3   : > { %v2897_v61 = vpop.f32.mrf.mxu1  ;;  %vm929_vm11 = vcmp.eq.s32.totalorder %v799_v58, %v11235_v56 }
 0x4d4   : > { %16517 = vst [vmem:[#allocation150_spill] sm:$0xff] %v13239_v28  ;;  %v13600_v28 = vld [vmem:[%s11025_s18 + $0x160] sm:$0xff] }
 0x4d6   : > { %9945 = vmatmul.msk.bf16.gmra.mxu1 %vm1147_vm2, %v2436_v0  ;;  %v1621_v25 = vpop.f32.mrf.mxu0  ;;  %v2369_v0 = vsel %vm2241_vm9, 1.0, %v16352_v40 }
 0x4d7   : > { %v1723_v10 = vpack.c.bf16 %v1621_v25, %v1619_v15  ;;  %v2437_v25 = vpack.c.bf16 %v2370_v44, %v2369_v0  ;;  %v2371_v44 = vsel %vm2243_vm13, 1.0, %v16352_v40 }
 0x4d9   : > { %v3456_v23 = vpop.f32.mrf.mxu2  ;;  %10084 = vmatmul.msk.bf16.gmra.mxu3 %vm3042_vm6, %v1723_v10 }
 0x4da   : > { %v13246_v3 = vadd.f32 %v13173_v55, %v3456_v23  ;;  %v13255_v6 = vpop.f32.mrf.mxu3  ;;  %v1057_v55 = vsel %vm929_vm11, 1.0, %v16352_v40 }
 0x4db   : > { %v2899_v37 = vpop.f32.mrf.mxu1  ;;  %v1122_v14 = vpack.c.bf16 %v1058_v59, %v1057_v55 }
 0x4dc   : > { %16518 = vst [vmem:[#allocation151_spill] sm:$0xff] %v13246_v3  ;;  %v3013_v46 = vpack.c.bf16 %v2899_v37, %v2897_v61  ;;  %v16336_v3 = vmov 2  }
 0x4dd   : > { %10513 = vset.pattern.permute.xlu1 %v16336_v3  ;;  %10514 = vset.pattern.permute.xlu2 %v16336_v3 }
 0x4de   : > { %10009 = vmatmul.msk.bf16.gmra.mxu2 %vm3042_vm6, %v3013_v46  ;;  %v1624_v15 = vpop.f32.mrf.mxu0 }
 0x4e1   : > { %v3459_v19 = vpop.f32.mrf.mxu2  ;;  %9885 = vmatmul.msk.bf16.gmra.mxu0 %vm1147_vm2, %v1122_v14  ;;  %v2372_v14 = vsel %vm2244_vm14, 1.0, %v16352_v40 }
 0x4e2   : > { %v13263_v61 = vadd.f32 %v13183_v38, %v3459_v19  ;;  %v13267_v37 = vpop.f32.mrf.mxu3  ;;  %v10695_v38 = vld [vmem:[%s11025_s18] sm:$0xff] }
 0x4e3   : > { %v2902_v23 = vpop.f32.mrf.mxu1  ;;  %4098 = vperm.xlu1 %10513, %v10695_v38  }
 0x4e4   : > { %16519 = vst [vmem:[#allocation152_spill] sm:$0xff] %v13263_v61 }
 0x4e6   : > { %9946 = vmatmul.msk.bf16.gmra.mxu1 %vm1147_vm2, %v2437_v25  ;;  %v1626_v46 = vpop.f32.mrf.mxu0  ;;  %v2438_v25 = vpack.c.bf16 %v2372_v14, %v2371_v44 }
 0x4e7   : > { %v1724_v55 = vpack.c.bf16 %v1626_v46, %v1624_v15  ;;  %v10697_v46 = vld [vmem:[%s11025_s18 + $0x10] sm:$0xff] }
 0x4e9   : > { %v3461_v10 = vpop.f32.mrf.mxu2  ;;  %10085 = vmatmul.msk.bf16.gmra.mxu3 %vm3042_vm6, %v1724_v55 }
 0x4ea   : > { %v13270_v58 = vadd.f32 %v13195_v49, %v3461_v10  ;;  %v10696_v49 = vld [vmem:[%s11025_s18 + $0x8] sm:$0xff]  ;;  %v16338_v10 = vmov 3  }
 0x4eb   : > { %v2904_v22 = vpop.f32.mrf.mxu1  ;;  %4101 = vperm.xlu2 %10514, %v10696_v49   ;;  %v13282_v0 = vpop.f32.mrf.mxu3  ;;  %10515 = vset.pattern.permute.xlu0 %v16338_v10 }
 0x4ec   : > { %16520 = vst [vmem:[#allocation153_spill] sm:$0xff] %v13270_v58  ;;  %v3014_v59 = vpack.c.bf16 %v2904_v22, %v2902_v23  ;;  %10516 = vset.pattern.permute.xlu1 %v16338_v10  ;;  %6052 = vperm.xlu0 %10515, %v10695_v38   ;;  %v2373_v38 = vsel %vm2245_vm15, 1.0, %v16352_v40 }
 0x4ed   : > { %6055 = vperm.xlu1 %10516, %v10696_v49   ;;  %v2374_v49 = vsel %vm2246_vm0, 1.0, %v16352_v40 }
 0x4ee   : > { %10010 = vmatmul.msk.bf16.gmra.mxu2 %vm3042_vm6, %v3014_v59  ;;  %v1629_v15 = vpop.f32.mrf.mxu0 }
 0x4f1   : > { %v3464_v19 = vpop.f32.mrf.mxu2 }
 0x4f2   : > { %v13287_v23 = vadd.f32 %v13208_v63, %v3464_v19  ;;  %v10698_v19 = vld [vmem:[%s11025_s18 + $0x18] sm:$0xff] }
 0x4f3   : > { %v2907_v34 = vpop.f32.mrf.mxu1  ;;  %v13292_v54 = vpop.f32.mrf.mxu3  ;;  %4104 = vperm.xlu2 %10514, %v10697_v46  }
 0x4f4   : > { %16521 = vst [vmem:[#allocation154_spill] sm:$0xff] %v13287_v23  ;;  %6061 = vperm.xlu0 %10515, %v10698_v19   ;;  %v13546_v23 = vld [vmem:[%s11025_s18 + $0x138] sm:$0xff] }
 0x4f5   : > { %10517 = vset.pattern.permute.xlu1 %v16336_v3 }
 0x4f6   : > { %9947 = vmatmul.msk.bf16.gmra.mxu1 %vm1147_vm2, %v2438_v25  ;;  %v1631_v55 = vpop.f32.mrf.mxu0  ;;  %4107 = vperm.xlu1 %10517, %v10698_v19   ;;  %v2439_v25 = vpack.c.bf16 %v2374_v49, %v2373_v38  ;;  %v10701_v49 = vld [vmem:[%s11025_s18 + $0x38] sm:$0xff] }
 0x4f7   : > { %v1725_v44 = vpack.c.bf16 %v1631_v55, %v1629_v15 }
 0x4f9   : > { %v3466_v22 = vpop.f32.mrf.mxu2  ;;  %10086 = vmatmul.msk.bf16.gmra.mxu3 %vm3042_vm6, %v1725_v44 }
 0x4fa   : > { %v13296_v63 = vadd.f32 %v13219_v30, %v3466_v22  ;;  %v10699_v22 = vld [vmem:[%s11025_s18 + $0x20] sm:$0xff] }
 0x4fb   : > { %v2909_v59 = vpop.f32.mrf.mxu1  ;;  %10518 = vset.pattern.permute.xlu2 %v16338_v10 }
 0x4fc   : > { %16522 = vst [vmem:[#allocation155_spill] sm:$0xff] %v13296_v63  ;;  %v3015_v14 = vpack.c.bf16 %v2909_v59, %v2907_v34  ;;  %v13307_v30 = vpop.f32.mrf.mxu3  ;;  %6058 = vperm.xlu2 %10518, %v10697_v46   ;;  %6064 = vperm.xlu0 %10515, %v10699_v22   ;;  %v10700_v46 = vld [vmem:[%s11025_s18 + $0x28] sm:$0xff] }
 0x4fe   : > { %10011 = vmatmul.msk.bf16.gmra.mxu2 %vm3042_vm6, %v3015_v14  ;;  %v1634_v52 = vpop.f32.mrf.mxu0  ;;  %4110 = vperm.xlu1 %10517, %v10699_v22  }
 0x501   : > { %v3469_v15 = vpop.f32.mrf.mxu2 }
 0x502   : > { %v13312_v34 = vadd.f32 %v13233_v62, %v3469_v15  ;;  %v2375_v15 = vsel %vm2247_vm3, 1.0, %v16352_v40 }
 0x503   : > { %v2912_v11 = vpop.f32.mrf.mxu1 }
 0x504   : > { %16523 = vst [vmem:[#allocation156_spill] sm:$0xff] %v13312_v34  ;;  %v13316_v55 = vpop.f32.mrf.mxu3  ;;  %10519 = vset.pattern.permute.xlu2 %v16336_v3  ;;  %10521 = vset.pattern.permute.xlu0 %v16336_v3  ;;  %v13462_v34 = vld [vmem:[%s11025_s18 + $0xe0] sm:$0xff] }
 0x505   : > { %4113 = vperm.xlu2 %10519, %v10700_v46   ;;  %4119 = vperm.xlu0 %10521, %v10701_v49  }
 0x506   : > { %9948 = vmatmul.msk.bf16.gmra.mxu1 %vm1147_vm2, %v2439_v25  ;;  %v1636_v44 = vpop.f32.mrf.mxu0  ;;  %10520 = vset.pattern.permute.xlu1 %v16338_v10 }
 0x507   : > { %v1726_v19 = vpack.c.bf16 %v1636_v44, %v1634_v52  ;;  %6067 = vperm.xlu1 %10520, %v10700_v46   ;;  %v10703_v44 = vld [vmem:[%s11025_s18 + $0x40] sm:$0xff] }
 0x509   : > { %v3471_v59 = vpop.f32.mrf.mxu2  ;;  %10087 = vmatmul.msk.bf16.gmra.mxu3 %vm3042_vm6, %v1726_v19 }
 0x50a   : > { %v13321_v14 = vadd.f32 %v13243_v20, %v3471_v59  ;;  %v2376_v20 = vsel %vm2248_vm1, 1.0, %v16352_v40 }
 0x50b   : > { %v2914_v62 = vpop.f32.mrf.mxu1  ;;  %v2440_v52 = vpack.c.bf16 %v2376_v20, %v2375_v15 }
 0x50c   : > { %16524 = vst [vmem:[#allocation157_spill] sm:$0xff] %v13321_v14  ;;  %v3016_v38 = vpack.c.bf16 %v2914_v62, %v2912_v11  ;;  %v13334_v32 = vpop.f32.mrf.mxu3 }
 0x50d   : > { %4116 = vperm.xlu2 %10519, %v10702_v50   ;;  %10525 = vset.pattern.permute.xlu0 %v16338_v10 }
 0x50e   : > { %10012 = vmatmul.msk.bf16.gmra.mxu2 %vm3042_vm6, %v3016_v38  ;;  %v1639_v25 = vpop.f32.mrf.mxu0  ;;  %6076 = vperm.xlu0 %10525, %v10703_v44  }
 0x50f   : > { %6070 = vperm.xlu1 %10520, %v10702_v50  }
 0x511   : > { %v3474_v11 = vpop.f32.mrf.mxu2 }
 0x512   : > { %v13338_v22 = vadd.f32 %v13255_v6, %v3474_v11 }
 0x513   : > { %v2917_v59 = vpop.f32.mrf.mxu1 }
 0x514   : > { %16525 = vst [vmem:[#allocation158_spill] sm:$0xff] %v13338_v22  ;;  %v13343_v62 = vpop.f32.mrf.mxu3 }
 0x515   : > { %10522 = vset.pattern.permute.xlu2 %v16338_v10 }
 0x516   : > { %9949 = vmatmul.msk.bf16.gmra.mxu1 %vm1147_vm2, %v2440_v52  ;;  %v1641_v19 = vpop.f32.mrf.mxu0  ;;  %6073 = vperm.xlu2 %10522, %v10701_v49   ;;  %v10704_v52 = vld [vmem:[%s11025_s18 + $0x58] sm:$0xff] }
 0x517   : > { %v1727_v20 = vpack.c.bf16 %v1641_v19, %v1639_v25  ;;  %6085 = vperm.xlu0 %10525, %v10704_v52   ;;  %10523 = vset.pattern.permute.xlu1 %v16336_v3 }
 0x518   : > { %4122 = vperm.xlu1 %10523, %v10703_v44  }
 0x519   : > { %v3476_v46 = vpop.f32.mrf.mxu2  ;;  %10088 = vmatmul.msk.bf16.gmra.mxu3 %vm3042_vm6, %v1727_v20 }
 0x51a   : > { %v13347_v38 = vadd.f32 %v13267_v37, %v3476_v46  ;;  %v10706_v46 = vld [vmem:[%s11025_s18 + $0x60] sm:$0xff] }
 0x51b   : > { %v2919_v6 = vpop.f32.mrf.mxu1 }
 0x51c   : > { %16526 = vst [vmem:[#allocation159_spill] sm:$0xff] %v13347_v38  ;;  %v3017_v15 = vpack.c.bf16 %v2919_v6, %v2917_v59  ;;  %v13352_v50 = vpop.f32.mrf.mxu3  ;;  %v10705_v59 = vld [vmem:[%s11025_s18 + $0x48] sm:$0xff]  ;;  %v10708_v38 = vld [vmem:[%s11025_s18 + $0x78] sm:$0xff] }
 0x51e   : > { %10013 = vmatmul.msk.bf16.gmra.mxu2 %vm3042_vm6, %v3017_v15  ;;  %v1644_v11 = vpop.f32.mrf.mxu0  ;;  %10524 = vset.pattern.permute.xlu2 %v16336_v3 }
 0x51f   : > { %4125 = vperm.xlu2 %10524, %v10705_v59   ;;  %6088 = vperm.xlu0 %10525, %v10706_v46  }
 0x520   : > { %10526 = vset.pattern.permute.xlu1 %v16338_v10 }
 0x521   : > { %v3479_v49 = vpop.f32.mrf.mxu2  ;;  %6079 = vperm.xlu1 %10526, %v10705_v59  }
 0x522   : > { %v13357_v37 = vadd.f32 %v13282_v0, %v3479_v49  ;;  %v10707_v0 = vld [vmem:[%s11025_s18 + $0x50] sm:$0xff] }
 0x523   : > { %v2922_v25 = vpop.f32.mrf.mxu1 }
 0x524   : > { %16527 = vst [vmem:[#allocation160_spill] sm:$0xff] %v13357_v37  ;;  %v13361_v19 = vpop.f32.mrf.mxu3  ;;  %v16529_v37 = vmov 2  }
 0x526   : > { %v1646_v44 = vpop.f32.mrf.mxu0 }
 0x527   : > { %v1728_v3 = vpack.c.bf16 %v1646_v44, %v1644_v11  ;;  %4128 = vperm.xlu2 %10524, %v10707_v0   ;;  %10531 = vset.pattern.permute.xlu0 %v16529_v37 }
 0x528   : > { %4143 = vperm.xlu0 %10531, %v10708_v38  }
 0x529   : > { %v3481_v6 = vpop.f32.mrf.mxu2  ;;  %10089 = vmatmul.msk.bf16.gmra.mxu3 %vm3042_vm6, %v1728_v3  ;;  %10527 = vset.pattern.permute.xlu1 %v16529_v37  ;;  %v10709_v3 = vld [vmem:[%s11025_s18 + $0x80] sm:$0xff] }
 0x52a   : > { %v13365_v20 = vadd.f32 %v13292_v54, %v3481_v6  ;;  %4131 = vperm.xlu1 %10527, %v10704_v52  }
 0x52b   : > { %v2924_v15 = vpop.f32.mrf.mxu1 }
 0x52c   : > { %16528 = vst [vmem:[#allocation161_spill] sm:$0xff] %v13365_v20  ;;  %v3018_v49 = vpack.c.bf16 %v2924_v15, %v2922_v25  ;;  %v13372_v10 = vpop.f32.mrf.mxu3  ;;  %v16531_v25 = vmov 3  }
 0x52e   : > { %10014 = vmatmul.msk.bf16.gmra.mxu2 %vm3042_vm6, %v3018_v49  ;;  %v1649_v22 = vpop.f32.mrf.mxu0 }
 0x52f   : > { %10528 = vset.pattern.permute.xlu2 %v16531_v25 }
 0x530   : > { %6082 = vperm.xlu2 %10528, %v10707_v0   ;;  %10535 = vset.pattern.permute.xlu0 %v16531_v25  ;;  %v10710_v0 = vld [vmem:[%s11025_s18 + $0x68] sm:$0xff] }
 0x531   : > { %v3484_v59 = vpop.f32.mrf.mxu2  ;;  %6100 = vperm.xlu0 %10535, %v10709_v3  }
 0x532   : > { %v13376_v54 = vadd.f32 %v13307_v30, %v3484_v59  ;;  %4134 = vperm.xlu1 %10527, %v10706_v46   ;;  %v13391_v59 = vld [vmem:[%s11025_s18 + $0x98] sm:$0xff] }
 0x533   : > { %v2927_v11 = vpop.f32.mrf.mxu1 }
 0x534   : > { %16530 = vst [vmem:[#allocation162_spill] sm:$0xff] %v13376_v54  ;;  %v13384_v20 = vpop.f32.mrf.mxu3 }
 0x536   : > { %v1651_v44 = vpop.f32.mrf.mxu0 }
 0x537   : > { %v1729_v30 = vpack.c.bf16 %v1651_v44, %v1649_v22  ;;  %v10712_v44 = vld [vmem:[%s11025_s18 + $0x70] sm:$0xff] }
 0x538   : > { %10529 = vset.pattern.permute.xlu2 %v16529_v37 }
 0x539   : > { %v3486_v6 = vpop.f32.mrf.mxu2  ;;  %10090 = vmatmul.msk.bf16.gmra.mxu3 %vm3042_vm6, %v1729_v30  ;;  %4137 = vperm.xlu2 %10529, %v10710_v0  }
 0x53a   : > { %v13382_v15 = vadd.f32 %v13316_v55, %v3486_v6  ;;  %6109 = vperm.xlu0 %10535, %v13391_v59   ;;  %10530 = vset.pattern.permute.xlu1 %v16531_v25 }
 0x53b   : > { %v2929_v49 = vpop.f32.mrf.mxu1  ;;  %6091 = vperm.xlu1 %10530, %v10710_v0  }
 0x53c   : > { %16532 = vst [vmem:[#allocation163_spill] sm:$0xff] %v13382_v15  ;;  %v3019_v52 = vpack.c.bf16 %v2929_v49, %v2927_v11  ;;  %v13398_v11 = vpop.f32.mrf.mxu3  ;;  %v13402_v49 = vld [vmem:[%s11025_s18 + $0xa0] sm:$0xff] }
 0x53e   : > { %10015 = vmatmul.msk.bf16.gmra.mxu2 %vm3042_vm6, %v3019_v52  ;;  %v1654_v6 = vpop.f32.mrf.mxu0 }
 0x541   : > { %v3489_v55 = vpop.f32.mrf.mxu2  ;;  %4140 = vperm.xlu2 %10529, %v10712_v44  }
 0x542   : > { %v13395_v22 = vadd.f32 %v13334_v32, %v3489_v55  ;;  %6112 = vperm.xlu0 %10535, %v13402_v49  }
 0x543   : > { %v2932_v46 = vpop.f32.mrf.mxu1  ;;  %6094 = vperm.xlu1 %10530, %v10712_v44  }
 0x544   : > { %16533 = vst [vmem:[#allocation164_spill] sm:$0xff] %v13395_v22  ;;  %v13411_v0 = vpop.f32.mrf.mxu3 }
 0x545   : > { %16535 = vst [vmem:[#allocation166_spill] sm:$0xff] %v13411_v0  ;;  %v10717_v0 = vld [vmem:[%s11025_s18 + $0x90] sm:$0xff] }
 0x546   : > { %v1656_v52 = vpop.f32.mrf.mxu0 }
 0x547   : > { %v1730_v55 = vpack.c.bf16 %v1656_v52, %v1654_v6 }
 0x549   : > { %v3491_v30 = vpop.f32.mrf.mxu2  ;;  %10091 = vmatmul.msk.bf16.gmra.mxu3 %vm3042_vm6, %v1730_v55  ;;  %10532 = vset.pattern.permute.xlu2 %v16531_v25 }
 0x54a   : > { %v13406_v15 = vadd.f32 %v13343_v62, %v3491_v30  ;;  %6097 = vperm.xlu2 %10532, %v10708_v38   ;;  %10541 = vset.pattern.permute.xlu0 %v16529_v37  ;;  %v13415_v62 = vld [vmem:[%s11025_s18 + $0xb8] sm:$0xff]  ;;  %v10715_v38 = vld [vmem:[%s11025_s18 + $0x88] sm:$0xff] }
 0x54b   : > { %v2934_v32 = vpop.f32.mrf.mxu1  ;;  %4167 = vperm.xlu0 %10541, %v13415_v62   ;;  %10533 = vset.pattern.permute.xlu1 %v16529_v37 }
 0x54c   : > { %16534 = vst [vmem:[#allocation165_spill] sm:$0xff] %v13406_v15  ;;  %v3020_v22 = vpack.c.bf16 %v2934_v32, %v2932_v46  ;;  %4146 = vperm.xlu1 %10533, %v10709_v3   ;;  %v13431_v32 = vld [vmem:[%s11025_s18 + $0xc0] sm:$0xff] }
 0x54e   : > { %10016 = vmatmul.msk.bf16.gmra.mxu2 %vm3042_vm6, %v3020_v22  ;;  %v1659_v14 = vpop.f32.mrf.mxu0  ;;  %v13424_v22 = vpop.f32.mrf.mxu3 }
 0x551   : > { %v3494_v54 = vpop.f32.mrf.mxu2 }
 0x552   : > { %v13419_v6 = vadd.f32 %v13352_v50, %v3494_v54  ;;  %10534 = vset.pattern.permute.xlu2 %v16529_v37 }
 0x553   : > { %v2937_v46 = vpop.f32.mrf.mxu1  ;;  %4149 = vperm.xlu2 %10534, %v10715_v38   ;;  %10545 = vset.pattern.permute.xlu0 %v16531_v25 }
 0x554   : > { %16536 = vst [vmem:[#allocation167_spill] sm:$0xff] %v13419_v6  ;;  %6124 = vperm.xlu0 %10545, %v13431_v32   ;;  %10536 = vset.pattern.permute.xlu1 %v16531_v25 }
 0x555   : > { %6103 = vperm.xlu1 %10536, %v10715_v38   ;;  %v13437_v55 = vpop.permute.xlu1 %4098 }
 0x556   : > { %v1661_v30 = vpop.f32.mrf.mxu0  ;;  %vm4481_vm13 = vcmp.eq.s32.totalorder %v13437_v55, %v11235_v56 }
 0x557   : > { %v1731_v54 = vpack.c.bf16 %v1661_v30, %v1659_v14  ;;  %v4609_v55 = vsel %vm4481_vm13, 1.0, %v16352_v40 }
 0x559   : > { %v3496_v44 = vpop.f32.mrf.mxu2  ;;  %10092 = vmatmul.msk.bf16.gmra.mxu3 %vm3042_vm6, %v1731_v54 }
 0x55a   : > { %v13428_v52 = vadd.f32 %v13361_v19, %v3496_v44 }
 0x55b   : > { %v2939_v50 = vpop.f32.mrf.mxu1  ;;  %4152 = vperm.xlu2 %10534, %v10717_v0  }
 0x55c   : > { %16537 = vst [vmem:[#allocation168_spill] sm:$0xff] %v13428_v52  ;;  %v3021_v3 = vpack.c.bf16 %v2939_v50, %v2937_v46  ;;  %v13443_v52 = vpop.f32.mrf.mxu3  ;;  %v13446_v46 = vld [vmem:[%s11025_s18 + $0xd8] sm:$0xff]  ;;  %v13449_v50 = vpop.permute.xlu2 %4101 }
 0x55d   : > { %16539 = vst [vmem:[#allocation170_spill] sm:$0xff] %v13443_v52  ;;  %6133 = vperm.xlu0 %10545, %v13446_v46   ;;  %10537 = vset.pattern.permute.xlu1 %v16529_v37  ;;  %vm4482_vm14 = vcmp.eq.s32.totalorder %v13449_v50, %v11235_v56 }
 0x55e   : > { %10017 = vmatmul.msk.bf16.gmra.mxu2 %vm3042_vm6, %v3021_v3  ;;  %v1664_v44 = vpop.f32.mrf.mxu0  ;;  %v6053_v38 = vpop.permute.xlu0 %6052  ;;  %4155 = vperm.xlu1 %10537, %v13391_v59   ;;  %v4610_v50 = vsel %vm4482_vm14, 1.0, %v16352_v40 }
 0x55f   : > { %v6056_v54 = vpop.permute.xlu1 %6055  ;;  %vm6435_vm4 = vcmp.eq.s32.totalorder %v6053_v38, %v11235_v56 }
 0x560   : > { %vm6436_vm5 = vcmp.eq.s32.totalorder %v6056_v54, %v11235_v56 }
 0x561   : > { %v3499_v19 = vpop.f32.mrf.mxu2 }
 0x562   : > { %v13441_v14 = vadd.f32 %v13372_v10, %v3499_v19  ;;  %v6563_v10 = vsel %vm6435_vm4, 1.0, %v16352_v40  ;;  %v6564_v19 = vsel %vm6436_vm5, 1.0, %v16352_v40 }
 0x563   : > { %v2942_v30 = vpop.f32.mrf.mxu1  ;;  %10538 = vset.pattern.permute.xlu2 %v16531_v25  ;;  %v6691_v59 = vpack.c.bf16 %v6564_v19, %v6563_v10  ;;  %v13482_v10 = vld [vmem:[%s11025_s18 + $0xf8] sm:$0xff] }
 0x564   : > { %16538 = vst [vmem:[#allocation169_spill] sm:$0xff] %v13441_v14  ;;  %6106 = vperm.xlu2 %10538, %v10717_v0   ;;  %v13465_v38 = vpop.f32.mrf.mxu3  ;;  %v13470_v54 = vpop.permute.xlu2 %4104 }
 0x565   : > { %6136 = vperm.xlu0 %10545, %v13462_v34   ;;  %10230 = vmatmul.msk.bf16.vlgmr.msrb.gmra.mxu0 %vm1147_vm2, %v6691_v59  ;;  %vm4483_vm3 = vcmp.eq.s32.totalorder %v13470_v54, %v11235_v56 }
 0x566   : > { %v1666_v52 = vpop.f32.mrf.mxu0  ;;  %4158 = vperm.xlu1 %10537, %v13402_v49   ;;  %v4611_v54 = vsel %vm4483_vm3, 1.0, %v16352_v40 }
 0x567   : > { %v1732_v15 = vpack.c.bf16 %v1666_v52, %v1664_v44 }
 0x569   : > { %v3501_v3 = vpop.f32.mrf.mxu2  ;;  %10093 = vmatmul.msk.bf16.gmra.mxu3 %vm3042_vm6, %v1732_v15  ;;  %v13479_v15 = vpop.permute.xlu1 %4107 }
 0x56a   : > { %v13459_v14 = vadd.f32 %v13384_v20, %v3501_v3  ;;  %v10720_v20 = vld [vmem:[%s11025_s18 + $0xa8] sm:$0xff]  ;;  %vm4484_vm4 = vcmp.eq.s32.totalorder %v13479_v15, %v11235_v56 }
 0x56b   : > { %v2944_v6 = vpop.f32.mrf.mxu1  ;;  %v4612_v15 = vsel %vm4484_vm4, 1.0, %v16352_v40 }
 0x56c   : > { %16540 = vst [vmem:[#allocation171_spill] sm:$0xff] %v13459_v14  ;;  %v3022_v0 = vpack.c.bf16 %v2944_v6, %v2942_v30  ;;  %10539 = vset.pattern.permute.xlu2 %v16529_v37  ;;  %v6062_v30 = vpop.permute.xlu0 %6061  ;;  %v6059_v49 = vpop.permute.xlu2 %6058  ;;  %v10725_v14 = vld [vmem:[%s11025_s18 + $0xc8] sm:$0xff] }
 0x56d   : > { %4161 = vperm.xlu2 %10539, %v10720_v20   ;;  %10551 = vset.pattern.permute.xlu0 %v16529_v37  ;;  %vm6438_vm7 = vcmp.eq.s32.totalorder %v6062_v30, %v11235_v56  ;;  %v13487_v19 = vpop.f32.mrf.mxu3  ;;  %vm6437_vm8 = vcmp.eq.s32.totalorder %v6059_v49, %v11235_v56 }
 0x56e   : > { %10018 = vmatmul.msk.bf16.gmra.mxu2 %vm3042_vm6, %v3022_v0  ;;  %4191 = vperm.xlu0 %10551, %v13482_v10   ;;  %v6566_v3 = vsel %vm6438_vm7, 1.0, %v16352_v40  ;;  %16542 = vst [vmem:[#allocation173_spill] sm:$0xff] %v13487_v19  ;;  %v10722_v0 = vld [vmem:[%s11025_s18 + $0xb0] sm:$0xff]  ;;  %v13498_v19 = vld [vmem:[%s11025_s18 + $0x100] sm:$0xff] }
 0x56f   : > { %10540 = vset.pattern.permute.xlu1 %v16531_v25 }
 0x570   : > { %6115 = vperm.xlu1 %10540, %v10720_v20  }
 0x571   : > { %v3504_v52 = vpop.f32.mrf.mxu2  ;;  %v13502_v49 = vpop.permute.xlu1 %4110 }
 0x572   : > { %v13476_v6 = vadd.f32 %v13398_v11, %v3504_v52  ;;  %v6565_v11 = vsel %vm6437_vm8, 1.0, %v16352_v40  ;;  %vm4485_vm8 = vcmp.eq.s32.totalorder %v13502_v49, %v11235_v56 }
 0x573   : > { %v2947_v44 = vpop.f32.mrf.mxu1  ;;  %v6692_v59 = vpack.c.bf16 %v6566_v3, %v6565_v11 }
 0x574   : > { %16541 = vst [vmem:[#allocation172_spill] sm:$0xff] %v13476_v6  ;;  %v13511_v11 = vpop.permute.xlu2 %4113 }
 0x575   : > { %4164 = vperm.xlu2 %10539, %v10722_v0   ;;  %10231 = vmatmul.msk.bf16.gmra.mxu0 %vm1147_vm2, %v6692_v59  ;;  %v13504_v20 = vpop.f32.mrf.mxu3  ;;  %v6065_v59 = vpop.permute.xlu0 %6064 }
 0x576   : > { %10555 = vset.pattern.permute.xlu0 %v16531_v25  ;;  %vm6439_vm9 = vcmp.eq.s32.totalorder %v6065_v59, %v11235_v56 }
 0x577   : > { %6148 = vperm.xlu0 %10555, %v13498_v19  }
 0x578   : > { %6118 = vperm.xlu1 %10540, %v10722_v0  }
 0x579   : > { %v13493_v52 = vpop.f32.mrf.mxu2  ;;  %v6068_v0 = vpop.permute.xlu1 %6067 }
 0x57a   : > { %16543 = vst [vmem:[#allocation174_spill] sm:$0xff] %v13493_v52  ;;  %v6567_v52 = vsel %vm6439_vm9, 1.0, %v16352_v40  ;;  %vm6440_vm10 = vcmp.eq.s32.totalorder %v6068_v0, %v11235_v56  ;;  %v13531_v0 = vld [vmem:[%s11025_s18 + $0x120] sm:$0xff]  ;;  %vm4486_vm9 = vcmp.eq.s32.totalorder %v13511_v11, %v11235_v56 }
 0x57b   : > { %v2949_v6 = vpop.f32.mrf.mxu1  ;;  %v4614_v49 = vsel %vm4486_vm9, 1.0, %v16352_v40 }
 0x57c   : > { %v3023_v30 = vpack.c.bf16 %v2949_v6, %v2947_v44 }
 0x57d   : > { %10542 = vset.pattern.permute.xlu2 %v16531_v25  ;;  %v13560_v58 = vpop.permute.xlu0 %4119 }
 0x57e   : > { %10019 = vmatmul.msk.bf16.gmra.mxu2 %vm3042_vm6, %v3023_v30  ;;  %6121 = vperm.xlu2 %10542, %v13415_v62   ;;  %v13515_v30 = vld [vmem:[%s11025_s18 + $0x118] sm:$0xff]  ;;  %v6568_v62 = vsel %vm6440_vm10, 1.0, %v16352_v40  ;;  %vm4488_vm13 = vcmp.eq.s32.totalorder %v13560_v58, %v11235_v56 }
 0x57f   : > { %6157 = vperm.xlu0 %10555, %v13515_v30  }
 0x580   : > { %10543 = vset.pattern.permute.xlu1 %v16529_v37 }
 0x581   : > { %v3509_v3 = vpop.f32.mrf.mxu2  ;;  %4170 = vperm.xlu1 %10543, %v13431_v32   ;;  %v13535_v32 = vpop.permute.xlu2 %4116 }
 0x582   : > { %v13509_v6 = vadd.f32 %v13424_v22, %v3509_v3  ;;  %v6693_v22 = vpack.c.bf16 %v6568_v62, %v6567_v52 }
 0x583   : > { %v2952_v44 = vpop.f32.mrf.mxu1 }
 0x584   : > { %16544 = vst [vmem:[#allocation175_spill] sm:$0xff] %v13509_v6  ;;  %v13526_v6 = vpop.f32.mrf.mxu3 }
 0x585   : > { %16546 = vst [vmem:[#allocation177_spill] sm:$0xff] %v13526_v6  ;;  %10232 = vmatmul.msk.bf16.gmra.mxu0 %vm1147_vm2, %v6693_v22 }
 0x586   : > { %10544 = vset.pattern.permute.xlu2 %v16529_v37 }
 0x587   : > { %4173 = vperm.xlu2 %10544, %v10725_v14   ;;  %6160 = vperm.xlu0 %10555, %v13531_v0  }
 0x589   : > { %v13523_v3 = vpop.f32.mrf.mxu2  ;;  %10546 = vset.pattern.permute.xlu1 %v16531_v25 }
 0x58a   : > { %16545 = vst [vmem:[#allocation176_spill] sm:$0xff] %v13523_v3  ;;  %6127 = vperm.xlu1 %10546, %v10725_v14   ;;  %v6074_v3 = vpop.permute.xlu2 %6073 }
 0x58b   : > { %v2954_v59 = vpop.f32.mrf.mxu1  ;;  %vm6442_vm12 = vcmp.eq.s32.totalorder %v6074_v3, %v11235_v56 }
 0x58c   : > { %v3024_v63 = vpack.c.bf16 %v2954_v59, %v2952_v44  ;;  %v6071_v44 = vpop.permute.xlu1 %6070  ;;  %v10727_v59 = vld [vmem:[%s11025_s18 + $0xd0] sm:$0xff]  ;;  %v4057_v22 = vpop.f32.mrf.mxu3  ;;  %v6570_v14 = vsel %vm6442_vm12, 1.0, %v16352_v40  ;;  %vm4487_vm12 = vcmp.eq.s32.totalorder %v13535_v32, %v11235_v56  ;;  %v10740_v32 = vld [vmem:[%s11025_s18 + $0x128] sm:$0xff] }
 0x58d   : > { %vm6441_vm11 = vcmp.eq.s32.totalorder %v6071_v44, %v11235_v56 }
 0x58e   : > { %10020 = vmatmul.msk.bf16.gmra.mxu2 %vm3042_vm6, %v3024_v63  ;;  %v6569_v63 = vsel %vm6441_vm11, 1.0, %v16352_v40 }
 0x58f   : > { %4176 = vperm.xlu2 %10544, %v10727_v59   ;;  %10561 = vset.pattern.permute.xlu0 %v16529_v37 }
 0x590   : > { %4215 = vperm.xlu0 %10561, %v13546_v23  }
 0x591   : > { %v3514_v52 = vpop.f32.mrf.mxu2 }
 0x592   : > { %v13539_v62 = vadd.f32 %v13465_v38, %v3514_v52  ;;  %v6694_v38 = vpack.c.bf16 %v6570_v14, %v6569_v63  ;;  %10547 = vset.pattern.permute.xlu1 %v16529_v37  ;;  %v13566_v14 = vld [vmem:[%s11025_s18 + $0x140] sm:$0xff] }
 0x593   : > { %v2957_v6 = vpop.f32.mrf.mxu1  ;;  %4179 = vperm.xlu1 %10547, %v13446_v46  }
 0x594   : > { %16547 = vst [vmem:[#allocation178_spill] sm:$0xff] %v13539_v62  ;;  %v13558_v3 = vpop.permute.xlu1 %4122  ;;  %v13563_v63 = vpop.f32.mrf.mxu3 }
 0x595   : > { %10233 = vmatmul.msk.bf16.gmra.mxu0 %vm1147_vm2, %v6694_v38  ;;  %16549 = vst [vmem:[#allocation180_spill] sm:$0xff] %v13563_v63 }
 0x597   : > { %10548 = vset.pattern.permute.xlu2 %v16531_v25 }
 0x598   : > { %6130 = vperm.xlu2 %10548, %v10727_v59   ;;  %10565 = vset.pattern.permute.xlu0 %v16531_v25  ;;  %v10730_v59 = vld [vmem:[%s11025_s18 + $0xe8] sm:$0xff] }
 0x599   : > { %v13551_v52 = vpop.f32.mrf.mxu2  ;;  %6172 = vperm.xlu0 %10565, %v13566_v14  }
 0x59a   : > { %16548 = vst [vmem:[#allocation179_spill] sm:$0xff] %v13551_v52 }
 0x59b   : > { %v2959_v44 = vpop.f32.mrf.mxu1  ;;  %4182 = vperm.xlu1 %10547, %v13462_v34   ;;  %v13584_v34 = vld [vmem:[%s11025_s18 + $0x158] sm:$0xff] }
 0x59c   : > { %v3025_v62 = vpack.c.bf16 %v2959_v44, %v2957_v6  ;;  %v6080_v38 = vpop.permute.xlu1 %6079  ;;  %v6077_v44 = vpop.permute.xlu0 %6076 }
 0x59d   : > { %vm6444_vm15 = vcmp.eq.s32.totalorder %v6080_v38, %v11235_v56  ;;  %vm6443_vm0 = vcmp.eq.s32.totalorder %v6077_v44, %v11235_v56  ;;  %v4062_v63 = vpop.f32.mrf.mxu3  ;;  %v4737_v38 = vpack.c.bf16 %v4610_v50, %v4609_v55  ;;  %v10732_v44 = vld [vmem:[%s11025_s18 + $0xf0] sm:$0xff]  ;;  %v13621_v50 = vld [vmem:[%s11025_s18 + $0x178] sm:$0xff] }
 0x59e   : > { %10021 = vmatmul.msk.bf16.gmra.mxu2 %vm3042_vm6, %v3025_v62  ;;  %v13573_v62 = vpop.permute.xlu2 %4125 }
 0x5a0   : > { %10549 = vset.pattern.permute.xlu2 %v16529_v37 }
 0x5a1   : > { %v3519_v46 = vpop.f32.mrf.mxu2  ;;  %4185 = vperm.xlu2 %10549, %v10730_v59   ;;  %6181 = vperm.xlu0 %10565, %v13584_v34  }
 0x5a2   : > { %v13570_v6 = vadd.f32 %v13504_v20, %v3519_v46  ;;  %v6572_v20 = vsel %vm6444_vm15, 1.0, %v16352_v40  ;;  %v6571_v46 = vsel %vm6443_vm0, 1.0, %v16352_v40  ;;  %vm4489_vm15 = vcmp.eq.s32.totalorder %v13558_v3, %v11235_v56 }
 0x5a3   : > { %10550 = vset.pattern.permute.xlu1 %v16531_v25  ;;  %vm4490_vm0 = vcmp.eq.s32.totalorder %v13573_v62, %v11235_v56 }
 0x5a4   : > { %16550 = vst [vmem:[#allocation181_spill] sm:$0xff] %v13570_v6  ;;  %v6695_v6 = vpack.c.bf16 %v6572_v20, %v6571_v46  ;;  %6139 = vperm.xlu1 %10550, %v10730_v59   ;;  %v6086_v55 = vpop.permute.xlu0 %6085  ;;  %v13607_v59 = vpop.permute.xlu1 %4131 }
 0x5a5   : > { %v13605_v46 = vpop.f32.mrf.mxu3  ;;  %vm6446_vm1 = vcmp.eq.s32.totalorder %v6086_v55, %v11235_v56 }
 0x5a6   : > { %10234 = vmatmul.msk.bf16.gmra.mxu0 %vm1147_vm2, %v6695_v6  ;;  %v13597_v61 = vpop.permute.xlu2 %4128  ;;  %16553 = vst [vmem:[#allocation184_spill] sm:$0xff] %v13605_v46  ;;  %v10735_v46 = vld [vmem:[%s11025_s18 + $0x108] sm:$0xff] }
 0x5a9   : > { %v13591_v52 = vpop.f32.mrf.mxu2  ;;  %4188 = vperm.xlu2 %10549, %v10732_v44   ;;  %6184 = vperm.xlu0 %10565, %v13600_v28  }
 0x5aa   : > { %16551 = vst [vmem:[#allocation182_spill] sm:$0xff] %v13591_v52 }
 0x5ac   : > { %6142 = vperm.xlu1 %10550, %v10732_v44  }
 0x5ad   : > { %v4067_v55 = vpop.f32.mrf.mxu3 }
 0x5ae   : > { %10094 = vmatmul.msk.bf16.vlgmr.msrb.gmra.mxu2 %vm1147_vm2, %v4737_v38  ;;  %v6083_v6 = vpop.permute.xlu2 %6082 }
 0x5af   : > { %vm6445_vm5 = vcmp.eq.s32.totalorder %v6083_v6, %v11235_v56  ;;  %v13632_v6 = vpop.permute.xlu1 %4134 }
 0x5b1   : > { %v3524_v9 = vpop.f32.mrf.mxu2  ;;  %10552 = vset.pattern.permute.xlu2 %v16531_v25  ;;  %10571 = vset.pattern.permute.xlu0 %v16529_v37 }
 0x5b2   : > { %v13603_v20 = vadd.f32 %v4057_v22, %v3524_v9  ;;  %v6574_v9 = vsel %vm6446_vm1, 1.0, %v16352_v40  ;;  %6145 = vperm.xlu2 %10552, %v13482_v10   ;;  %v6573_v22 = vsel %vm6445_vm5, 1.0, %v16352_v40  ;;  %4239 = vperm.xlu0 %10571, %v13621_v50   ;;  %v4738_v10 = vpack.c.bf16 %v4612_v15, %v4611_v54  ;;  %v6089_v15 = vpop.permute.xlu0 %6088 }
 0x5b3   : > { %v6696_v38 = vpack.c.bf16 %v6574_v9, %v6573_v22  ;;  %v13638_v9 = vld [vmem:[%s11025_s18 + $0x180] sm:$0xff]  ;;  %vm6447_vm7 = vcmp.eq.s32.totalorder %v6089_v15, %v11235_v56  ;;  %vm4491_vm5 = vcmp.eq.s32.totalorder %v13597_v61, %v11235_v56 }
 0x5b4   : > { %16552 = vst [vmem:[#allocation183_spill] sm:$0xff] %v13603_v20  ;;  %10553 = vset.pattern.permute.xlu1 %v16529_v37  ;;  %v13660_v20 = vld [vmem:[%s11025_s18 + $0x198] sm:$0xff] }
 0x5b5   : > { %4194 = vperm.xlu1 %10553, %v13498_v19  }
 0x5b6   : > { %10235 = vmatmul.msk.bf16.gmra.mxu0 %vm1147_vm2, %v6696_v38  ;;  %v13643_v19 = vpop.permute.xlu2 %4137 }
 0x5b7   : > { %v6092_v38 = vpop.permute.xlu1 %6091 }
 0x5b8   : > { %vm6448_vm10 = vcmp.eq.s32.totalorder %v6092_v38, %v11235_v56 }
 0x5b9   : > { %v13626_v44 = vpop.f32.mrf.mxu2  ;;  %v6576_v15 = vsel %vm6448_vm10, 1.0, %v16352_v40  ;;  %vm4493_vm10 = vcmp.eq.s32.totalorder %v13632_v6, %v11235_v56 }
 0x5ba   : > { %16554 = vst [vmem:[#allocation185_spill] sm:$0xff] %v13626_v44  ;;  %10554 = vset.pattern.permute.xlu2 %v16529_v37  ;;  %10575 = vset.pattern.permute.xlu0 %v16531_v25 }
 0x5bb   : > { %4197 = vperm.xlu2 %10554, %v10735_v46   ;;  %6196 = vperm.xlu0 %10575, %v13638_v9  }
 0x5bd   : > { %10556 = vset.pattern.permute.xlu1 %v16531_v25 }
 0x5be   : > { %10095 = vmatmul.msk.bf16.gmra.mxu2 %vm1147_vm2, %v4738_v10  ;;  %v6575_v10 = vsel %vm6447_vm7, 1.0, %v16352_v40  ;;  %6151 = vperm.xlu1 %10556, %v10735_v46   ;;  %v13667_v38 = vpop.permute.xlu2 %4140  ;;  %vm4492_vm7 = vcmp.eq.s32.totalorder %v13607_v59, %v11235_v56  ;;  %v10747_v59 = vld [vmem:[%s11025_s18 + $0x150] sm:$0xff] }
 0x5bf   : > { %v6697_v44 = vpack.c.bf16 %v6576_v15, %v6575_v10  ;;  %v13673_v15 = vld [vmem:[%s11025_s18 + $0x1a0] sm:$0xff] }
 0x5c1   : > { %v3529_v22 = vpop.f32.mrf.mxu2 }
 0x5c2   : > { %v13641_v54 = vadd.f32 %v4062_v63, %v3529_v22  ;;  %v13652_v63 = vpop.f32.mrf.mxu3  ;;  %v10737_v22 = vld [vmem:[%s11025_s18 + $0x110] sm:$0xff] }
 0x5c3   : > { %16556 = vst [vmem:[#allocation187_spill] sm:$0xff] %v13652_v63  ;;  %4200 = vperm.xlu2 %10554, %v10737_v22   ;;  %6205 = vperm.xlu0 %10575, %v13660_v20   ;;  %v13695_v63 = vld [vmem:[%s11025_s18 + $0x1b8] sm:$0xff] }
 0x5c4   : > { %16555 = vst [vmem:[#allocation186_spill] sm:$0xff] %v13641_v54  ;;  %v4613_v54 = vsel %vm4485_vm8, 1.0, %v16352_v40 }
 0x5c5   : > { %v4739_v46 = vpack.c.bf16 %v4614_v49, %v4613_v54 }
 0x5c6   : > { %10236 = vmatmul.msk.bf16.gmra.mxu0 %vm1147_vm2, %v6697_v44  ;;  %10557 = vset.pattern.permute.xlu1 %v16529_v37  ;;  %v6095_v44 = vpop.permute.xlu1 %6094 }
 0x5c7   : > { %4203 = vperm.xlu1 %10557, %v13515_v30   ;;  %vm6449_vm11 = vcmp.eq.s32.totalorder %v6095_v44, %v11235_v56 }
 0x5c8   : > { %v6577_v30 = vsel %vm6449_vm11, 1.0, %v16352_v40  ;;  %vm4494_vm11 = vcmp.eq.s32.totalorder %v13643_v19, %v11235_v56 }
 0x5c9   : > { %v13663_v11 = vpop.f32.mrf.mxu2 }
 0x5ca   : > { %16557 = vst [vmem:[#allocation188_spill] sm:$0xff] %v13663_v11  ;;  %v4072_v10 = vpop.f32.mrf.mxu3 }
 0x5cb   : > { %10558 = vset.pattern.permute.xlu2 %v16531_v25  ;;  %6208 = vperm.xlu0 %10575, %v13673_v15  }
 0x5cc   : > { %6154 = vperm.xlu2 %10558, %v10737_v22   ;;  %v6098_v22 = vpop.permute.xlu2 %6097 }
 0x5cd   : > { %vm6450_vm14 = vcmp.eq.s32.totalorder %v6098_v22, %v11235_v56  ;;  %v10395_v22 = vld [vmem:[%s16317_s2 + $0x28] sm:$0xff] }
 0x5ce   : > { %10096 = vmatmul.msk.bf16.gmra.mxu2 %vm1147_vm2, %v4739_v46  ;;  %v4615_v46 = vsel %vm4487_vm12, 1.0, %v16352_v40  ;;  %5600 = vmatpush.bf16.msrb.mxu3 %v10395_v22 }
 0x5cf   : > { %4206 = vperm.xlu1 %10557, %v13531_v0  }
 0x5d1   : > { %v3534_v54 = vpop.f32.mrf.mxu2 }
 0x5d2   : > { %v13676_v49 = vadd.f32 %v4067_v55, %v3534_v54  ;;  %v6578_v55 = vsel %vm6450_vm14, 1.0, %v16352_v40  ;;  %v4616_v54 = vsel %vm4488_vm13, 1.0, %v16352_v40  ;;  %v13698_v0 = vpop.f32.mrf.mxu3  ;;  %vm4495_vm14 = vcmp.eq.s32.totalorder %v13667_v38, %v11235_v56  ;;  %v10394_v38 = vld [vmem:[%s16317_s2 + $0x20] sm:$0xff] }
 0x5d3   : > { %v6698_v44 = vpack.c.bf16 %v6578_v55, %v6577_v30  ;;  %10581 = vset.pattern.permute.xlu0 %v16529_v37  ;;  %16560 = vst [vmem:[#allocation191_spill] sm:$0xff] %v13698_v0  ;;  %v13705_v30 = vpop.permute.xlu1 %4146  ;;  %v13707_v55 = vpop.permute.xlu0 %4143  ;;  %5601 = vmatpush.bf16.msrb.mxu3 %v10394_v38 }
 0x5d4   : > { %16558 = vst [vmem:[#allocation189_spill] sm:$0xff] %v13676_v49  ;;  %10559 = vset.pattern.permute.xlu2 %v16529_v37  ;;  %4263 = vperm.xlu0 %10581, %v13695_v63   ;;  %v4740_v49 = vpack.c.bf16 %v4616_v54, %v4615_v46  ;;  %v10397_v46 = vld [vmem:[%s16317_s2 + $0x38] sm:$0xff]  ;;  %v13718_v54 = vld [vmem:[%s11025_s18 + $0x1c0] sm:$0xff] }
 0x5d5   : > { %4209 = vperm.xlu2 %10559, %v10740_v32   ;;  %7554 = vmatpush.bf16.msrb.mxu1 %v10397_v46  ;;  %v4617_v46 = vsel %vm4489_vm15, 1.0, %v16352_v40  ;;  %vm4496_vm15 = vcmp.eq.s32.totalorder %v13707_v55, %v11235_v56  ;;  %v4623_v55 = vsel %vm4495_vm14, 1.0, %v16352_v40 }
 0x5d6   : > { %10237 = vmatmul.msk.bf16.gmra.mxu0 %vm1147_vm2, %v6698_v44 }
 0x5d7   : > { %10560 = vset.pattern.permute.xlu1 %v16531_v25 }
 0x5d8   : > { %6163 = vperm.xlu1 %10560, %v10740_v32  }
 0x5d9   : > { %v13692_v58 = vpop.f32.mrf.mxu2 }
 0x5da   : > { %16559 = vst [vmem:[#allocation190_spill] sm:$0xff] %v13692_v58  ;;  %v10742_v58 = vld [vmem:[%s11025_s18 + $0x130] sm:$0xff]  ;;  %v4077_v44 = vpop.f32.mrf.mxu3 }
 0x5db   : > { %v6101_v32 = vpop.permute.xlu0 %6100 }
 0x5dc   : > { %10585 = vset.pattern.permute.xlu0 %v16531_v25  ;;  %vm6451_vm3 = vcmp.eq.s32.totalorder %v6101_v32, %v11235_v56 }
 0x5dd   : > { %4212 = vperm.xlu2 %10559, %v10742_v58   ;;  %6220 = vperm.xlu0 %10585, %v13718_v54   ;;  %v6579_v22 = vsel %vm6451_vm3, 1.0, %v16352_v40 }
 0x5de   : > { %10097 = vmatmul.msk.bf16.gmra.mxu2 %vm1147_vm2, %v4740_v49  ;;  %v13721_v49 = vpop.permute.xlu2 %4149 }
 0x5df   : > { %vm4498_vm3 = vcmp.eq.s32.totalorder %v13721_v49, %v11235_v56 }
 0x5e0   : > { %6166 = vperm.xlu1 %10560, %v10742_v58   ;;  %v4626_v49 = vsel %vm4498_vm3, 1.0, %v16352_v40 }
 0x5e1   : > { %v3539_v0 = vpop.f32.mrf.mxu2 }
 0x5e2   : > { %v13712_v11 = vadd.f32 %v4072_v10, %v3539_v0  ;;  %v6104_v10 = vpop.permute.xlu1 %6103  ;;  %v6956_v62 = vpop.f32.mrf.mxu0 }
 0x5e3   : > { %vm6452_vm1 = vcmp.eq.s32.totalorder %v6104_v10, %v11235_v56  ;;  %v13738_v10 = vld [vmem:[%s11025_s18 + $0x1d8] sm:$0xff] }
 0x5e4   : > { %16561 = vst [vmem:[#allocation192_spill] sm:$0xff] %v13712_v11  ;;  %v6580_v0 = vsel %vm6452_vm1, 1.0, %v16352_v40  ;;  %v4618_v11 = vsel %vm4490_vm0, 1.0, %v16352_v40  ;;  %vm4497_vm1 = vcmp.eq.s32.totalorder %v13705_v30, %v11235_v56 }
 0x5e5   : > { %v6699_v3 = vpack.c.bf16 %v6580_v0, %v6579_v22  ;;  %10562 = vset.pattern.permute.xlu2 %v16531_v25  ;;  %6229 = vperm.xlu0 %10585, %v13738_v10   ;;  %v4741_v32 = vpack.c.bf16 %v4618_v11, %v4617_v46  ;;  %v13745_v0 = vpop.f32.mrf.mxu3  ;;  %v10396_v22 = vld [vmem:[%s16317_s2 + $0x30] sm:$0xff]  ;;  %v4625_v30 = vsel %vm4497_vm1, 1.0, %v16352_v40 }
 0x5e6   : > { %6169 = vperm.xlu2 %10562, %v13546_v23   ;;  %v13743_v58 = vpop.permute.xlu2 %4152  ;;  %16563 = vst [vmem:[#allocation194_spill] sm:$0xff] %v13745_v0  ;;  %7555 = vmatpush.bf16.msrb.mxu1 %v10396_v22  ;;  %v13757_v0 = vld [vmem:[%s11025_s18 + $0x1e0] sm:$0xff]  ;;  %v4620_v22 = vsel %vm4492_vm7, 1.0, %v16352_v40 }
 0x5e7   : > { %10238 = vmatmul.msk.bf16.gmra.mxu0 %vm1147_vm2, %v6699_v3  ;;  %v6110_v3 = vpop.permute.xlu0 %6109 }
 0x5e8   : > { %10563 = vset.pattern.permute.xlu1 %v16529_v37  ;;  %vm6454_vm4 = vcmp.eq.s32.totalorder %v6110_v3, %v11235_v56 }
 0x5e9   : > { %v13734_v52 = vpop.f32.mrf.mxu2  ;;  %4218 = vperm.xlu1 %10563, %v13566_v14   ;;  %v6582_v14 = vsel %vm6454_vm4, 1.0, %v16352_v40 }
 0x5ea   : > { %16562 = vst [vmem:[#allocation193_spill] sm:$0xff] %v13734_v52  ;;  %v6958_v52 = vpop.f32.mrf.mxu0  ;;  %v13760_v27 = vpop.permute.xlu1 %4155 }
 0x5eb   : > { %v7276_v46 = vpack.c.bf16 %v6958_v52, %v6956_v62  ;;  %v4619_v62 = vsel %vm4491_vm5, 1.0, %v16352_v40 }
 0x5ed   : > { %6232 = vperm.xlu0 %10585, %v13757_v0   ;;  %10302 = vmatmul.msk.bf16.vlgmr.msrb.gmra.mxu1 %vm3042_vm6, %v7276_v46 }
 0x5ee   : > { %10098 = vmatmul.msk.bf16.gmra.mxu2 %vm1147_vm2, %v4741_v32  ;;  %10564 = vset.pattern.permute.xlu2 %v16529_v37  ;;  %v10745_v32 = vld [vmem:[%s11025_s18 + $0x148] sm:$0xff]  ;;  %v6107_v52 = vpop.permute.xlu2 %6106 }
 0x5ef   : > { %4221 = vperm.xlu2 %10564, %v10745_v32   ;;  %vm6453_vm8 = vcmp.eq.s32.totalorder %v6107_v52, %v11235_v56  ;;  %v13779_v52 = vld [vmem:[%s11025_s18 + $0x1f8] sm:$0xff] }
 0x5f1   : > { %v3544_v23 = vpop.f32.mrf.mxu2  ;;  %10566 = vset.pattern.permute.xlu1 %v16531_v25 }
 0x5f2   : > { %v13753_v11 = vadd.f32 %v4077_v44, %v3544_v23  ;;  %v6581_v44 = vsel %vm6453_vm8, 1.0, %v16352_v40  ;;  %v4082_v23 = vpop.f32.mrf.mxu3  ;;  %v6961_v3 = vpop.f32.mrf.mxu0  ;;  %6175 = vperm.xlu1 %10566, %v10745_v32   ;;  %vm4499_vm8 = vcmp.eq.s32.totalorder %v13743_v58, %v11235_v56 }
 0x5f3   : > { %v6700_v46 = vpack.c.bf16 %v6582_v14, %v6581_v44  ;;  %v13784_v14 = vpop.permute.xlu1 %4158 }
 0x5f4   : > { %16564 = vst [vmem:[#allocation195_spill] sm:$0xff] %v13753_v11  ;;  %v4742_v11 = vpack.c.bf16 %v4620_v22, %v4619_v62  ;;  %v6113_v22 = vpop.permute.xlu0 %6112 }
 0x5f5   : > { %10591 = vset.pattern.permute.xlu0 %v16529_v37  ;;  %vm6455_vm9 = vcmp.eq.s32.totalorder %v6113_v22, %v11235_v56 }
 0x5f6   : > { %4287 = vperm.xlu0 %10591, %v13779_v52  }
 0x5f7   : > { %4224 = vperm.xlu2 %10564, %v10747_v59   ;;  %10239 = vmatmul.msk.bf16.gmra.mxu0 %vm1147_vm2, %v6700_v46  ;;  %v13793_v46 = vpop.permute.xlu2 %4161 }
 0x5f9   : > { %v13774_v61 = vpop.f32.mrf.mxu2 }
 0x5fa   : > { %16565 = vst [vmem:[#allocation196_spill] sm:$0xff] %v13774_v61  ;;  %v6963_v61 = vpop.f32.mrf.mxu0  ;;  %10567 = vset.pattern.permute.xlu1 %v16529_v37  ;;  %v13787_v32 = vpop.f32.mrf.mxu3 }
 0x5fb   : > { %16566 = vst [vmem:[#allocation197_spill] sm:$0xff] %v13787_v32  ;;  %v7277_v62 = vpack.c.bf16 %v6963_v61, %v6961_v3  ;;  %4227 = vperm.xlu1 %10567, %v13584_v34   ;;  %v6116_v34 = vpop.permute.xlu1 %6115  ;;  %v4621_v3 = vsel %vm4493_vm10, 1.0, %v16352_v40 }
 0x5fc   : > { %vm6456_vm12 = vcmp.eq.s32.totalorder %v6116_v34, %v11235_v56  ;;  %v10750_v34 = vld [vmem:[%s11025_s18 + $0x168] sm:$0xff] }
 0x5fd   : > { %10303 = vmatmul.msk.bf16.gmra.mxu1 %vm3042_vm6, %v7277_v62  ;;  %v6584_v61 = vsel %vm6456_vm12, 1.0, %v16352_v40  ;;  %vm4501_vm12 = vcmp.eq.s32.totalorder %v13784_v14, %v11235_v56  ;;  %v10762_v14 = vld [vmem:[%s11025_s18 + $0x1b0] sm:$0xff] }
 0x5fe   : > { %10099 = vmatmul.msk.bf16.gmra.mxu2 %vm1147_vm2, %v4742_v11  ;;  %10595 = vset.pattern.permute.xlu0 %v16531_v25  ;;  %v13799_v11 = vld [vmem:[%s11025_s18 + $0x200] sm:$0xff] }
 0x5ff   : > { %10568 = vset.pattern.permute.xlu2 %v16531_v25  ;;  %6244 = vperm.xlu0 %10595, %v13799_v11   ;;  %v13818_v32 = vpop.permute.xlu2 %4164 }
 0x600   : > { %6178 = vperm.xlu2 %10568, %v10747_v59   ;;  %v4622_v59 = vsel %vm4494_vm11, 1.0, %v16352_v40 }
 0x601   : > { %v3549_v44 = vpop.f32.mrf.mxu2  ;;  %v4743_v22 = vpack.c.bf16 %v4622_v59, %v4621_v3 }
 0x602   : > { %v13789_v21 = vadd.f32 %v4082_v23, %v3549_v44  ;;  %v6583_v23 = vsel %vm6455_vm9, 1.0, %v16352_v40  ;;  %v6966_v6 = vpop.f32.mrf.mxu0  ;;  %v4087_v19 = vpop.f32.mrf.mxu3  ;;  %vm4500_vm9 = vcmp.eq.s32.totalorder %v13760_v27, %v11235_v56 }
 0x603   : > { %v6701_v44 = vpack.c.bf16 %v6584_v61, %v6583_v23  ;;  %4230 = vperm.xlu1 %10567, %v13600_v28   ;;  %v6119_v59 = vpop.permute.xlu1 %6118  ;;  %v4628_v58 = vsel %vm4500_vm9, 1.0, %v16352_v40 }
 0x604   : > { %16567 = vst [vmem:[#allocation198_spill] sm:$0xff] %v13789_v21  ;;  %v13821_v21 = vld [vmem:[%s11025_s18 + $0x218] sm:$0xff]  ;;  %vm6457_vm13 = vcmp.eq.s32.totalorder %v6119_v59, %v11235_v56 }
 0x607   : > { %10240 = vmatmul.msk.bf16.gmra.mxu0 %vm1147_vm2, %v6701_v44  ;;  %6253 = vperm.xlu0 %10595, %v13821_v21   ;;  %v10752_v44 = vld [vmem:[%s11025_s18 + $0x170] sm:$0xff] }
 0x608   : > { %10569 = vset.pattern.permute.xlu2 %v16529_v37 }
 0x609   : > { %v13811_v62 = vpop.f32.mrf.mxu2  ;;  %4233 = vperm.xlu2 %10569, %v10750_v34  }
 0x60a   : > { %16568 = vst [vmem:[#allocation199_spill] sm:$0xff] %v13811_v62  ;;  %v6968_v28 = vpop.f32.mrf.mxu0 }
 0x60b   : > { %v7278_v3 = vpack.c.bf16 %v6968_v28, %v6966_v6  ;;  %10570 = vset.pattern.permute.xlu1 %v16531_v25  ;;  %v13836_v6 = vld [vmem:[%s11025_s18 + $0x220] sm:$0xff]  ;;  %v4624_v28 = vsel %vm4496_vm15, 1.0, %v16352_v40 }
 0x60c   : > { %6187 = vperm.xlu1 %10570, %v10750_v34   ;;  %v4744_v62 = vpack.c.bf16 %v4624_v28, %v4623_v55 }
 0x60d   : > { %10304 = vmatmul.msk.bf16.gmra.mxu1 %vm3042_vm6, %v7278_v3 }
 0x60e   : > { %10100 = vmatmul.msk.bf16.gmra.mxu2 %vm1147_vm2, %v4743_v22  ;;  %v6585_v22 = vsel %vm6457_vm13, 1.0, %v16352_v40  ;;  %vm4502_vm13 = vcmp.eq.s32.totalorder %v13793_v46, %v11235_v56 }
 0x60f   : > { %6256 = vperm.xlu0 %10595, %v13836_v6  }
 0x611   : > { %v3554_v23 = vpop.f32.mrf.mxu2  ;;  %4236 = vperm.xlu2 %10569, %v10752_v44  }
 0x612   : > { %v13824_v61 = vadd.f32 %v4087_v19, %v3554_v23  ;;  %v6122_v19 = vpop.permute.xlu2 %6121  ;;  %v13839_v23 = vpop.f32.mrf.mxu3 }
 0x613   : > { %16570 = vst [vmem:[#allocation201_spill] sm:$0xff] %v13839_v23  ;;  %vm6458_vm0 = vcmp.eq.s32.totalorder %v6122_v19, %v11235_v56  ;;  %v13853_v19 = vpop.permute.xlu1 %4170  ;;  %v13855_v23 = vpop.permute.xlu0 %4167 }
 0x614   : > { %16569 = vst [vmem:[#allocation200_spill] sm:$0xff] %v13824_v61  ;;  %v6586_v34 = vsel %vm6458_vm0, 1.0, %v16352_v40  ;;  %v6971_v61 = vpop.f32.mrf.mxu0  ;;  %6190 = vperm.xlu1 %10570, %v10752_v44   ;;  %vm4503_vm0 = vcmp.eq.s32.totalorder %v13818_v32, %v11235_v56  ;;  %vm4504_vm1 = vcmp.eq.s32.totalorder %v13855_v23, %v11235_v56 }
 0x615   : > { %v6702_v3 = vpack.c.bf16 %v6586_v34, %v6585_v22  ;;  %v13860_v22 = vld [vmem:[%s11025_s18 + $0x238] sm:$0xff] }
 0x617   : > { %10241 = vmatmul.msk.bf16.gmra.mxu0 %vm1147_vm2, %v6702_v3  ;;  %10601 = vset.pattern.permute.xlu0 %v16529_v37 }
 0x618   : > { %4311 = vperm.xlu0 %10601, %v13860_v22  }
 0x619   : > { %v13848_v59 = vpop.f32.mrf.mxu2  ;;  %10572 = vset.pattern.permute.xlu2 %v16531_v25 }
 0x61a   : > { %16571 = vst [vmem:[#allocation202_spill] sm:$0xff] %v13848_v59  ;;  %6193 = vperm.xlu2 %10572, %v13621_v50   ;;  %v4092_v34 = vpop.f32.mrf.mxu3  ;;  %v10757_v59 = vld [vmem:[%s11025_s18 + $0x190] sm:$0xff] }
 0x61b   : > { %v6128_v50 = vpop.permute.xlu1 %6127  ;;  %v6125_v3 = vpop.permute.xlu0 %6124 }
 0x61c   : > { %v6973_v38 = vpop.f32.mrf.mxu0  ;;  %10573 = vset.pattern.permute.xlu1 %v16529_v37  ;;  %vm6460_vm4 = vcmp.eq.s32.totalorder %v6128_v50, %v11235_v56  ;;  %vm6459_vm5 = vcmp.eq.s32.totalorder %v6125_v3, %v11235_v56  ;;  %v4745_v3 = vpack.c.bf16 %v4626_v49, %v4625_v30 }
 0x61d   : > { %v7279_v28 = vpack.c.bf16 %v6973_v38, %v6971_v61  ;;  %4242 = vperm.xlu1 %10573, %v13638_v9   ;;  %v10755_v61 = vld [vmem:[%s11025_s18 + $0x188] sm:$0xff]  ;;  %v6587_v9 = vsel %vm6459_vm5, 1.0, %v16352_v40  ;;  %v13884_v38 = vld [vmem:[%s11025_s18 + $0x240] sm:$0xff] }
 0x61e   : > { %10101 = vmatmul.msk.bf16.gmra.mxu2 %vm1147_vm2, %v4744_v62  ;;  %v13865_v62 = vpop.permute.xlu2 %4173 }
 0x61f   : > { %10305 = vmatmul.msk.bf16.gmra.mxu1 %vm3042_vm6, %v7279_v28  ;;  %vm4506_vm5 = vcmp.eq.s32.totalorder %v13865_v62, %v11235_v56 }
 0x620   : > { %10605 = vset.pattern.permute.xlu0 %v16531_v25 }
 0x621   : > { %v3559_v44 = vpop.f32.mrf.mxu2  ;;  %6268 = vperm.xlu0 %10605, %v13884_v38  }
 0x622   : > { %v13863_v55 = vadd.f32 %v4092_v34, %v3559_v44  ;;  %10574 = vset.pattern.permute.xlu2 %v16529_v37  ;;  %v6588_v34 = vsel %vm6460_vm4, 1.0, %v16352_v40  ;;  %vm4505_vm4 = vcmp.eq.s32.totalorder %v13853_v19, %v11235_v56 }
 0x623   : > { %4245 = vperm.xlu2 %10574, %v10755_v61   ;;  %v6703_v44 = vpack.c.bf16 %v6588_v34, %v6587_v9  ;;  %v13896_v34 = vld [vmem:[%s11025_s18 + $0x258] sm:$0xff]  ;;  %v6134_v45 = vpop.permute.xlu0 %6133  ;;  %v13899_v30 = vpop.permute.xlu1 %4179 }
 0x624   : > { %16572 = vst [vmem:[#allocation203_spill] sm:$0xff] %v13863_v55  ;;  %v6976_v50 = vpop.f32.mrf.mxu0  ;;  %vm6462_vm7 = vcmp.eq.s32.totalorder %v6134_v45, %v11235_v56 }
 0x625   : > { %10576 = vset.pattern.permute.xlu1 %v16531_v25  ;;  %v6590_v49 = vsel %vm6462_vm7, 1.0, %v16352_v40 }
 0x626   : > { %v13892_v55 = vpop.permute.xlu2 %4176  ;;  %6199 = vperm.xlu1 %10576, %v10755_v61  }
 0x627   : > { %10242 = vmatmul.msk.bf16.gmra.mxu0 %vm1147_vm2, %v6703_v44  ;;  %v13916_v44 = vld [vmem:[%s11025_s18 + $0x260] sm:$0xff] }
 0x629   : > { %v13887_v28 = vpop.f32.mrf.mxu2  ;;  %6277 = vperm.xlu0 %10605, %v13896_v34  }
 0x62a   : > { %16573 = vst [vmem:[#allocation204_spill] sm:$0xff] %v13887_v28 }
 0x62b   : > { %4248 = vperm.xlu2 %10574, %v10757_v59  }
 0x62c   : > { %v6978_v31 = vpop.f32.mrf.mxu0 }
 0x62d   : > { %v7280_v28 = vpack.c.bf16 %v6978_v31, %v6976_v50  ;;  %v4627_v31 = vsel %vm4499_vm8, 1.0, %v16352_v40 }
 0x62e   : > { %10102 = vmatmul.msk.bf16.gmra.mxu2 %vm1147_vm2, %v4745_v3  ;;  %v6131_v61 = vpop.permute.xlu2 %6130  ;;  %10577 = vset.pattern.permute.xlu1 %v16529_v37 }
 0x62f   : > { %10306 = vmatmul.msk.bf16.gmra.mxu1 %vm3042_vm6, %v7280_v28  ;;  %vm6461_vm10 = vcmp.eq.s32.totalorder %v6131_v61, %v11235_v56  ;;  %4251 = vperm.xlu1 %10577, %v13660_v20   ;;  %v4746_v20 = vpack.c.bf16 %v4628_v58, %v4627_v31  ;;  %v10760_v61 = vld [vmem:[%s11025_s18 + $0x1a8] sm:$0xff]  ;;  %v6137_v58 = vpop.permute.xlu0 %6136 }
 0x630   : > { %v6589_v45 = vsel %vm6461_vm10, 1.0, %v16352_v40  ;;  %vm6463_vm11 = vcmp.eq.s32.totalorder %v6137_v58, %v11235_v56  ;;  %vm4507_vm10 = vcmp.eq.s32.totalorder %v13892_v55, %v11235_v56 }
 0x631   : > { %v5002_v9 = vpop.f32.mrf.mxu2  ;;  %v6704_v27 = vpack.c.bf16 %v6590_v49, %v6589_v45  ;;  %6280 = vperm.xlu0 %10605, %v13916_v44  }
 0x633   : > { %10578 = vset.pattern.permute.xlu2 %v16531_v25 }
 0x634   : > { %6202 = vperm.xlu2 %10578, %v10757_v59   ;;  %v6981_v50 = vpop.f32.mrf.mxu0  ;;  %v13922_v59 = vpop.permute.xlu1 %4182 }
 0x637   : > { %10243 = vmatmul.msk.bf16.gmra.mxu0 %vm1147_vm2, %v6704_v27  ;;  %4254 = vperm.xlu1 %10577, %v13673_v15   ;;  %v13932_v27 = vpop.permute.xlu2 %4185 }
 0x639   : > { %v5004_v28 = vpop.f32.mrf.mxu2  ;;  %10611 = vset.pattern.permute.xlu0 %v16529_v37 }
 0x63a   : > { %v5322_v3 = vpack.c.bf16 %v5004_v28, %v5002_v9  ;;  %v13929_v9 = vld [vmem:[%s11025_s18 + $0x278] sm:$0xff]  ;;  %v6591_v28 = vsel %vm6463_vm11, 1.0, %v16352_v40  ;;  %vm4508_vm11 = vcmp.eq.s32.totalorder %v13899_v30, %v11235_v56 }
 0x63b   : > { %4335 = vperm.xlu0 %10611, %v13929_v9  }
 0x63c   : > { %10166 = vmatmul.msk.bf16.vlgmr.msrb.gmra.mxu3 %vm3042_vm6, %v5322_v3  ;;  %10579 = vset.pattern.permute.xlu2 %v16529_v37  ;;  %v6983_v45 = vpop.f32.mrf.mxu0  ;;  %v6140_v15 = vpop.permute.xlu1 %6139  ;;  %v4629_v3 = vsel %vm4501_vm12, 1.0, %v16352_v40 }
 0x63d   : > { %4257 = vperm.xlu2 %10579, %v10760_v61   ;;  %v7281_v31 = vpack.c.bf16 %v6983_v45, %v6981_v50  ;;  %vm6464_vm14 = vcmp.eq.s32.totalorder %v6140_v15, %v11235_v56 }
 0x63e   : > { %10103 = vmatmul.msk.bf16.gmra.mxu2 %vm1147_vm2, %v4746_v20  ;;  %v6592_v50 = vsel %vm6464_vm14, 1.0, %v16352_v40  ;;  %v4630_v20 = vsel %vm4502_vm13, 1.0, %v16352_v40  ;;  %vm4509_vm14 = vcmp.eq.s32.totalorder %v13922_v59, %v11235_v56 }
 0x63f   : > { %10307 = vmatmul.msk.bf16.gmra.mxu1 %vm3042_vm6, %v7281_v31  ;;  %10580 = vset.pattern.permute.xlu1 %v16531_v25  ;;  %v6705_v45 = vpack.c.bf16 %v6592_v50, %v6591_v28  ;;  %v4747_v15 = vpack.c.bf16 %v4630_v20, %v4629_v3  ;;  %v4637_v59 = vsel %vm4509_vm14, 1.0, %v16352_v40 }
 0x640   : > { %6211 = vperm.xlu1 %10580, %v10760_v61   ;;  %v13955_v61 = vpop.permute.xlu2 %4188 }
 0x641   : > { %v5007_v49 = vpop.f32.mrf.mxu2 }
 0x643   : > { %10615 = vset.pattern.permute.xlu0 %v16531_v25 }
 0x644   : > { %v6986_v46 = vpop.f32.mrf.mxu0  ;;  %6292 = vperm.xlu0 %10615, %v13949_v26  }
 0x645   : > { %4260 = vperm.xlu2 %10579, %v10762_v14  }
 0x647   : > { %10244 = vmatmul.msk.bf16.gmra.mxu0 %vm1147_vm2, %v6705_v45  ;;  %v4632_v45 = vsel %vm4504_vm1, 1.0, %v16352_v40 }
 0x648   : > { %6214 = vperm.xlu1 %10580, %v10762_v14   ;;  %v6146_v20 = vpop.permute.xlu2 %6145 }
 0x649   : > { %v5009_v31 = vpop.f32.mrf.mxu2  ;;  %vm6466_vm3 = vcmp.eq.s32.totalorder %v6146_v20, %v11235_v56  ;;  %v10767_v20 = vld [vmem:[%s11025_s18 + $0x1d0] sm:$0xff] }
 0x64a   : > { %v5323_v58 = vpack.c.bf16 %v5009_v31, %v5007_v49  ;;  %v6143_v31 = vpop.permute.xlu1 %6142 }
 0x64b   : > { %vm6465_vm15 = vcmp.eq.s32.totalorder %v6143_v31, %v11235_v56 }
 0x64c   : > { %10167 = vmatmul.msk.bf16.gmra.mxu3 %vm3042_vm6, %v5323_v58  ;;  %v6988_v50 = vpop.f32.mrf.mxu0  ;;  %6301 = vperm.xlu0 %10615, %v10764_v43   ;;  %v6593_v3 = vsel %vm6465_vm15, 1.0, %v16352_v40  ;;  %v4631_v43 = vsel %vm4503_vm0, 1.0, %v16352_v40  ;;  %v10765_v58 = vld [vmem:[%s11025_s18 + $0x1c8] sm:$0xff]  ;;  %vm4510_vm15 = vcmp.eq.s32.totalorder %v13932_v27, %v11235_v56 }
 0x64d   : > { %10582 = vset.pattern.permute.xlu2 %v16531_v25  ;;  %v7282_v49 = vpack.c.bf16 %v6988_v50, %v6986_v46  ;;  %v4748_v50 = vpack.c.bf16 %v4632_v45, %v4631_v43  ;;  %v10768_v43 = vld [vmem:[%s11025_s18 + $0x2b8] sm:$0xff]  ;;  %v4638_v27 = vsel %vm4510_vm15, 1.0, %v16352_v40 }
 0x64e   : > { %10104 = vmatmul.msk.bf16.gmra.mxu2 %vm1147_vm2, %v4747_v15  ;;  %6217 = vperm.xlu2 %10582, %v13695_v63   ;;  %v6594_v63 = vsel %vm6466_vm3, 1.0, %v16352_v40  ;;  %v10766_v15 = vld [vmem:[%s11025_s18 + $0x2a0] sm:$0xff]  ;;  %vm4511_vm3 = vcmp.eq.s32.totalorder %v13955_v61, %v11235_v56 }
 0x64f   : > { %10308 = vmatmul.msk.bf16.gmra.mxu1 %vm3042_vm6, %v7282_v49  ;;  %v6706_v14 = vpack.c.bf16 %v6594_v63, %v6593_v3 }
 0x650   : > { %10583 = vset.pattern.permute.xlu1 %v16529_v37  ;;  %v13986_v63 = vpop.permute.xlu2 %4197 }
 0x651   : > { %v5012_v28 = vpop.f32.mrf.mxu2  ;;  %4266 = vperm.xlu1 %10583, %v13718_v54   ;;  %v13981_v54 = vpop.permute.xlu0 %4191 }
 0x652   : > { %v13979_v49 = vpop.permute.xlu1 %4194 }
 0x654   : > { %v6991_v46 = vpop.f32.mrf.mxu0  ;;  %6304 = vperm.xlu0 %10615, %v10766_v15  }
 0x656   : > { %10584 = vset.pattern.permute.xlu2 %v16529_v37 }
 0x657   : > { %4269 = vperm.xlu2 %10584, %v10765_v58   ;;  %10245 = vmatmul.msk.bf16.gmra.mxu0 %vm1147_vm2, %v6706_v14 }
 0x659   : > { %v5014_v32 = vpop.f32.mrf.mxu2  ;;  %10586 = vset.pattern.permute.xlu1 %v16531_v25  ;;  %v6149_v14 = vpop.permute.xlu0 %6148 }
 0x65a   : > { %v5324_v23 = vpack.c.bf16 %v5014_v32, %v5012_v28  ;;  %6223 = vperm.xlu1 %10586, %v10765_v58   ;;  %v6152_v45 = vpop.permute.xlu1 %6151  ;;  %vm6467_vm8 = vcmp.eq.s32.totalorder %v6149_v14, %v11235_v56  ;;  %v4634_v58 = vsel %vm4506_vm5, 1.0, %v16352_v40 }
 0x65b   : > { %vm6468_vm7 = vcmp.eq.s32.totalorder %v6152_v45, %v11235_v56 }
 0x65c   : > { %10168 = vmatmul.msk.bf16.gmra.mxu3 %vm3042_vm6, %v5324_v23  ;;  %v6993_v31 = vpop.f32.mrf.mxu0  ;;  %10621 = vset.pattern.permute.xlu0 %v16529_v37  ;;  %v6596_v32 = vsel %vm6468_vm7, 1.0, %v16352_v40  ;;  %v4633_v23 = vsel %vm4505_vm4, 1.0, %v16352_v40  ;;  %vm4512_vm4 = vcmp.eq.s32.totalorder %v13981_v54, %v11235_v56  ;;  %vm4513_vm7 = vcmp.eq.s32.totalorder %v13979_v49, %v11235_v56 }
 0x65d   : > { %v7283_v3 = vpack.c.bf16 %v6993_v31, %v6991_v46  ;;  %4359 = vperm.xlu0 %10621, %v10768_v43   ;;  %v6595_v46 = vsel %vm6467_vm8, 1.0, %v16352_v40  ;;  %v4749_v31 = vpack.c.bf16 %v4634_v58, %v4633_v23  ;;  %v10769_v43 = vld [vmem:[%s11025_s18 + $0x2c0] sm:$0xff]  ;;  %v10771_v58 = vld [vmem:[%s11025_s18 + $0x2d8] sm:$0xff]  ;;  %vm4514_vm8 = vcmp.eq.s32.totalorder %v13986_v63, %v11235_v56 }
 0x65e   : > { %10105 = vmatmul.msk.bf16.gmra.mxu2 %vm1147_vm2, %v4748_v50  ;;  %v6707_v15 = vpack.c.bf16 %v6596_v32, %v6595_v46  ;;  %v10770_v46 = vld [vmem:[%s11025_s18 + $0x1e8] sm:$0xff] }
 0x65f   : > { %4272 = vperm.xlu2 %10584, %v10767_v20   ;;  %10309 = vmatmul.msk.bf16.gmra.mxu1 %vm3042_vm6, %v7283_v3  ;;  %v14007_v3 = vpop.permute.xlu2 %4200 }
 0x661   : > { %v5017_v28 = vpop.f32.mrf.mxu2  ;;  %v6158_v32 = vpop.permute.xlu0 %6157 }
 0x662   : > { %10587 = vset.pattern.permute.xlu1 %v16529_v37  ;;  %vm6470_vm9 = vcmp.eq.s32.totalorder %v6158_v32, %v11235_v56  ;;  %v10772_v32 = vld [vmem:[%s11025_s18 + $0x1f0] sm:$0xff] }
 0x663   : > { %4275 = vperm.xlu1 %10587, %v13738_v10  }
 0x664   : > { %v6996_v50 = vpop.f32.mrf.mxu0 }
 0x665   : > { %10625 = vset.pattern.permute.xlu0 %v16531_v25 }
 0x666   : > { %6316 = vperm.xlu0 %10625, %v10769_v43  }
 0x667   : > { %10588 = vset.pattern.permute.xlu2 %v16531_v25  ;;  %10246 = vmatmul.msk.bf16.gmra.mxu0 %vm1147_vm2, %v6707_v15  ;;  %v6155_v23 = vpop.permute.xlu2 %6154 }
 0x668   : > { %6226 = vperm.xlu2 %10588, %v10767_v20   ;;  %v14013_v20 = vpop.permute.xlu1 %4203  ;;  %vm6469_vm12 = vcmp.eq.s32.totalorder %v6155_v23, %v11235_v56  ;;  %v10773_v23 = vld [vmem:[%s11025_s18 + $0x2e0] sm:$0xff] }
 0x669   : > { %v5019_v19 = vpop.f32.mrf.mxu2  ;;  %v6597_v15 = vsel %vm6469_vm12, 1.0, %v16352_v40  ;;  %vm4516_vm12 = vcmp.eq.s32.totalorder %v14013_v20, %v11235_v56 }
 0x66a   : > { %v5325_v62 = vpack.c.bf16 %v5019_v19, %v5017_v28  ;;  %v14010_v14 = vpop.f32.mrf.mxu1  ;;  %v4635_v19 = vsel %vm4507_vm10, 1.0, %v16352_v40 }
 0x66b   : > { %4278 = vperm.xlu1 %10587, %v13757_v0   ;;  %v6598_v0 = vsel %vm6470_vm9, 1.0, %v16352_v40 }
 0x66c   : > { %10169 = vmatmul.msk.bf16.gmra.mxu3 %vm3042_vm6, %v5325_v62  ;;  %v6998_v10 = vpop.f32.mrf.mxu0  ;;  %v6708_v62 = vpack.c.bf16 %v6598_v0, %v6597_v15 }
 0x66d   : > { %v7284_v45 = vpack.c.bf16 %v6998_v10, %v6996_v50  ;;  %v4636_v50 = vsel %vm4508_vm11, 1.0, %v16352_v40  ;;  %vm4515_vm11 = vcmp.eq.s32.totalorder %v14007_v3, %v11235_v56 }
 0x66e   : > { %10106 = vmatmul.msk.bf16.gmra.mxu2 %vm1147_vm2, %v4749_v31  ;;  %6325 = vperm.xlu0 %10625, %v10771_v58   ;;  %v4750_v10 = vpack.c.bf16 %v4636_v50, %v4635_v19 }
 0x66f   : > { %10310 = vmatmul.msk.bf16.gmra.mxu1 %vm3042_vm6, %v7284_v45  ;;  %v14041_v19 = vpop.permute.xlu2 %4209 }
 0x670   : > { %10589 = vset.pattern.permute.xlu2 %v16529_v37  ;;  %v14035_v45 = vpop.permute.xlu1 %4206 }
 0x671   : > { %v5022_v28 = vpop.f32.mrf.mxu2  ;;  %4281 = vperm.xlu2 %10589, %v10770_v46   ;;  %vm4517_vm15 = vcmp.eq.s32.totalorder %v14035_v45, %v11235_v56 }
 0x672   : > { %v14029_v30 = vpop.f32.mrf.mxu1 }
 0x673   : > { %10590 = vset.pattern.permute.xlu1 %v16531_v25 }
 0x674   : > { %v7001_v31 = vpop.f32.mrf.mxu0  ;;  %6235 = vperm.xlu1 %10590, %v10770_v46   ;;  %v6161_v46 = vpop.permute.xlu0 %6160 }
 0x675   : > { %vm6471_vm13 = vcmp.eq.s32.totalorder %v6161_v46, %v11235_v56  ;;  %v10775_v46 = vld [vmem:[%s11025_s18 + $0x208] sm:$0xff] }
 0x676   : > { %6328 = vperm.xlu0 %10625, %v10773_v23  }
 0x677   : > { %10247 = vmatmul.msk.bf16.gmra.mxu0 %vm1147_vm2, %v6708_v62  ;;  %v6599_v62 = vsel %vm6471_vm13, 1.0, %v16352_v40 }
 0x678   : > { %v6164_v50 = vpop.permute.xlu1 %6163 }
 0x679   : > { %v5024_v55 = vpop.f32.mrf.mxu2  ;;  %4284 = vperm.xlu2 %10589, %v10772_v32   ;;  %vm6472_vm0 = vcmp.eq.s32.totalorder %v6164_v50, %v11235_v56 }
 0x67a   : > { %v5326_v43 = vpack.c.bf16 %v5024_v55, %v5022_v28  ;;  %v14039_v15 = vpop.f32.mrf.mxu1  ;;  %v6600_v55 = vsel %vm6472_vm0, 1.0, %v16352_v40  ;;  %vm4518_vm0 = vcmp.eq.s32.totalorder %v14041_v19, %v11235_v56 }
 0x67c   : > { %10170 = vmatmul.msk.bf16.gmra.mxu3 %vm3042_vm6, %v5326_v43  ;;  %v7003_v28 = vpop.f32.mrf.mxu0  ;;  %6238 = vperm.xlu1 %10590, %v10772_v32   ;;  %v6709_v43 = vpack.c.bf16 %v6600_v55, %v6599_v62 }
 0x67d   : > { %v7285_v58 = vpack.c.bf16 %v7003_v28, %v7001_v31  ;;  %v10774_v31 = vld [vmem:[%s11025_s18 + $0x2f8] sm:$0xff] }
 0x67e   : > { %10107 = vmatmul.msk.bf16.gmra.mxu2 %vm1147_vm2, %v4750_v10  ;;  %10631 = vset.pattern.permute.xlu0 %v16529_v37 }
 0x67f   : > { %10311 = vmatmul.msk.bf16.gmra.mxu1 %vm3042_vm6, %v7285_v58  ;;  %4383 = vperm.xlu0 %10631, %v10774_v31   ;;  %v4751_v58 = vpack.c.bf16 %v4638_v27, %v4637_v59 }
 0x680   : > { %v6167_v59 = vpop.permute.xlu1 %6166 }
 0x681   : > { %v5027_v0 = vpop.f32.mrf.mxu2  ;;  %10592 = vset.pattern.permute.xlu2 %v16531_v25  ;;  %vm6473_vm1 = vcmp.eq.s32.totalorder %v6167_v59, %v11235_v56 }
 0x682   : > { %6241 = vperm.xlu2 %10592, %v13779_v52   ;;  %v14058_v28 = vpop.f32.mrf.mxu1  ;;  %v14064_v52 = vpop.permute.xlu2 %4212 }
 0x684   : > { %v7006_v32 = vpop.f32.mrf.mxu0  ;;  %10593 = vset.pattern.permute.xlu1 %v16529_v37 }
 0x685   : > { %4290 = vperm.xlu1 %10593, %v13799_v11   ;;  %v6601_v11 = vsel %vm6473_vm1, 1.0, %v16352_v40 }
 0x687   : > { %10248 = vmatmul.msk.bf16.gmra.mxu0 %vm1147_vm2, %v6709_v43  ;;  %10635 = vset.pattern.permute.xlu0 %v16531_v25 }
 0x689   : > { %v5029_v10 = vpop.f32.mrf.mxu2 }
 0x68a   : > { %v5327_v23 = vpack.c.bf16 %v5029_v10, %v5027_v0  ;;  %10594 = vset.pattern.permute.xlu2 %v16529_v37  ;;  %v10776_v0 = vld [vmem:[%s11025_s18 + $0x300] sm:$0xff]  ;;  %v14071_v31 = vpop.f32.mrf.mxu1  ;;  %v6170_v27 = vpop.permute.xlu2 %6169  ;;  %v10777_v10 = vld [vmem:[%s11025_s18 + $0x210] sm:$0xff] }
 0x68b   : > { %4293 = vperm.xlu2 %10594, %v10775_v46   ;;  %6340 = vperm.xlu0 %10635, %v10776_v0   ;;  %vm6474_vm5 = vcmp.eq.s32.totalorder %v6170_v27, %v11235_v56 }
 0x68c   : > { %10171 = vmatmul.msk.bf16.gmra.mxu3 %vm3042_vm6, %v5327_v23  ;;  %v7008_v62 = vpop.f32.mrf.mxu0  ;;  %v6602_v43 = vsel %vm6474_vm5, 1.0, %v16352_v40  ;;  %v4640_v23 = vsel %vm4512_vm4, 1.0, %v16352_v40  ;;  %vm4519_vm4 = vcmp.eq.s32.totalorder %v14064_v52, %v11235_v56  ;;  %v3785_v52 = vadd.f32 %v11797_v35, %v12061_v57 }
 0x68d   : > { %v7286_v55 = vpack.c.bf16 %v7008_v62, %v7006_v32  ;;  %10596 = vset.pattern.permute.xlu1 %v16531_v25  ;;  %v4639_v32 = vsel %vm4511_vm3, 1.0, %v16352_v40  ;;  %v6710_v61 = vpack.c.bf16 %v6602_v43, %v6601_v11  ;;  %v14095_v11 = vpop.permute.xlu0 %4215 }
 0x68e   : > { %10108 = vmatmul.msk.bf16.gmra.mxu2 %vm1147_vm2, %v4751_v58  ;;  %6247 = vperm.xlu1 %10596, %v10775_v46   ;;  %v10778_v58 = vld [vmem:[%s11025_s18 + $0x318] sm:$0xff]  ;;  %v4752_v59 = vpack.c.bf16 %v4640_v23, %v4639_v32  ;;  %v14092_v46 = vpop.permute.xlu1 %4218  ;;  %vm4520_vm5 = vcmp.eq.s32.totalorder %v14095_v11, %v11235_v56  ;;  %v14227_v11 = vld [vmem:[%s16318_s3] ss:$0 sm:$0xff] }
 0x68f   : > { %10312 = vmatmul.msk.bf16.gmra.mxu1 %vm3042_vm6, %v7286_v55 }
 0x691   : > { %v5032_v50 = vpop.f32.mrf.mxu2 }
 0x692   : > { %v14087_v55 = vpop.f32.mrf.mxu1 }
 0x693   : > { %4296 = vperm.xlu2 %10594, %v10777_v10   ;;  %6349 = vperm.xlu0 %10635, %v10778_v58   ;;  %v4642_v58 = vsel %vm4514_vm8, 1.0, %v16352_v40 }
 0x694   : > { %v7011_v0 = vpop.f32.mrf.mxu0 }
 0x696   : > { %10597 = vset.pattern.permute.xlu1 %v16529_v37 }
 0x697   : > { %10249 = vmatmul.msk.bf16.gmra.mxu0 %vm1147_vm2, %v6710_v61  ;;  %4299 = vperm.xlu1 %10597, %v13821_v21   ;;  %v6176_v21 = vpop.permute.xlu1 %6175  ;;  %v14107_v61 = vpop.permute.xlu2 %4221 }
 0x698   : > { %vm6476_vm9 = vcmp.eq.s32.totalorder %v6176_v21, %v11235_v56 }
 0x699   : > { %v5034_v54 = vpop.f32.mrf.mxu2  ;;  %v6604_v63 = vsel %vm6476_vm9, 1.0, %v16352_v40  ;;  %vm9427_vm9 = vcmask 1041409  }
 0x69a   : > { %v5328_v62 = vpack.c.bf16 %v5034_v54, %v5032_v50  ;;  %v10779_v50 = vld [vmem:[%s11025_s18 + $0x320] sm:$0xff]  ;;  %v6173_v54 = vpop.permute.xlu0 %6172 }
 0x69b   : > { %10598 = vset.pattern.permute.xlu2 %v16531_v25  ;;  %6352 = vperm.xlu0 %10635, %v10779_v50   ;;  %vm6475_vm10 = vcmp.eq.s32.totalorder %v6173_v54, %v11235_v56 }
 0x69c   : > { %10172 = vmatmul.msk.bf16.gmra.mxu3 %vm3042_vm6, %v5328_v62  ;;  %6250 = vperm.xlu2 %10598, %v10777_v10   ;;  %v7013_v43 = vpop.f32.mrf.mxu0  ;;  %v14100_v23 = vpop.f32.mrf.mxu1  ;;  %v4641_v10 = vsel %vm4513_vm7, 1.0, %v16352_v40  ;;  %v10780_v62 = vld [vmem:[%s11025_s18 + $0x228] sm:$0xff]  ;;  %v6603_v50 = vsel %vm6475_vm10, 1.0, %v16352_v40  ;;  %vm4521_vm10 = vcmp.eq.s32.totalorder %v14092_v46, %v11235_v56 }
 0x69d   : > { %v7287_v32 = vpack.c.bf16 %v7013_v43, %v7011_v0  ;;  %v6711_v21 = vpack.c.bf16 %v6604_v63, %v6603_v50  ;;  %v14138_v63 = vpop.f32.mrf.mxu3  ;;  %v4644_v50 = vsel %vm4516_vm12, 1.0, %v16352_v40  ;;  %v4649_v46 = vsel %vm4521_vm10, 1.0, %v16352_v40 }
 0x69e   : > { %10109 = vmatmul.msk.bf16.gmra.mxu2 %vm1147_vm2, %v4752_v59  ;;  %16574 = vst [vmem:[#allocation205_spill] sm:$0xff] %v14138_v63  ;;  %v10784_v63 = vld [vmem:[%s11025_s18 + $0x358] sm:$0xff] }
 0x69f   : > { %10313 = vmatmul.msk.bf16.gmra.mxu1 %vm3042_vm6, %v7287_v32  ;;  %4302 = vperm.xlu1 %10597, %v13836_v6   ;;  %v10781_v6 = vld [vmem:[%s11025_s18 + $0x338] sm:$0xff]  ;;  %v4753_v32 = vpack.c.bf16 %v4642_v58, %v4641_v10  ;;  %v14125_v54 = vpop.permute.xlu2 %4224  ;;  %v10783_v58 = vld [vmem:[%s11025_s18 + $0x340] sm:$0xff] }
 0x6a1   : > { %v5037_v27 = vpop.f32.mrf.mxu2 }
 0x6a3   : > { %10641 = vset.pattern.permute.xlu0 %v16529_v37 }
 0x6a4   : > { %10599 = vset.pattern.permute.xlu2 %v16529_v37  ;;  %v7016_v0 = vpop.f32.mrf.mxu0  ;;  %4407 = vperm.xlu0 %10641, %v10781_v6   ;;  %v14120_v43 = vpop.f32.mrf.mxu1 }
 0x6a5   : > { %4305 = vperm.xlu2 %10599, %v10780_v62  }
 0x6a7   : > { %10250 = vmatmul.msk.bf16.gmra.mxu0 %vm1147_vm2, %v6711_v21  ;;  %10600 = vset.pattern.permute.xlu1 %v16531_v25 }
 0x6a8   : > { %6259 = vperm.xlu1 %10600, %v10780_v62   ;;  %v14140_v62 = vpop.permute.xlu1 %4227 }
 0x6a9   : > { %v5039_v49 = vpop.f32.mrf.mxu2 }
 0x6aa   : > { %v5329_v59 = vpack.c.bf16 %v5039_v49, %v5037_v27  ;;  %v10782_v49 = vld [vmem:[%s11025_s18 + $0x230] sm:$0xff] }
 0x6ac   : > { %10173 = vmatmul.msk.bf16.gmra.mxu3 %vm3042_vm6, %v5329_v59  ;;  %v7018_v27 = vpop.f32.mrf.mxu0  ;;  %10645 = vset.pattern.permute.xlu0 %v16531_v25  ;;  %v14130_v10 = vpop.f32.mrf.mxu1 }
 0x6ad   : > { %4308 = vperm.xlu2 %10599, %v10782_v49   ;;  %v7288_v41 = vpack.c.bf16 %v7018_v27, %v7016_v0  ;;  %6364 = vperm.xlu0 %10645, %v10783_v58   ;;  %v6179_v59 = vpop.permute.xlu2 %6178  ;;  %v4643_v0 = vsel %vm4515_vm11, 1.0, %v16352_v40  ;;  %vm4522_vm11 = vcmp.eq.s32.totalorder %v14107_v61, %v11235_v56 }
 0x6ae   : > { %10110 = vmatmul.msk.bf16.gmra.mxu2 %vm1147_vm2, %v4753_v32  ;;  %vm6477_vm13 = vcmp.eq.s32.totalorder %v6179_v59, %v11235_v56  ;;  %v6182_v32 = vpop.permute.xlu0 %6181  ;;  %v4754_v59 = vpack.c.bf16 %v4644_v50, %v4643_v0  ;;  %v4650_v61 = vsel %vm4522_vm11, 1.0, %v16352_v40 }
 0x6af   : > { %10314 = vmatmul.msk.bf16.gmra.mxu1 %vm3042_vm6, %v7288_v41  ;;  %v6605_v3 = vsel %vm6477_vm13, 1.0, %v16352_v40  ;;  %vm6478_vm14 = vcmp.eq.s32.totalorder %v6182_v32, %v11235_v56  ;;  %vm9430_vm13 = vcmask 1042434  }
 0x6b0   : > { %6262 = vperm.xlu1 %10600, %v10782_v49   ;;  %v6606_v27 = vsel %vm6478_vm14, 1.0, %v16352_v40  ;;  %v14158_v32 = vpop.permute.xlu1 %4230 }
 0x6b1   : > { %v5042_v6 = vpop.f32.mrf.mxu2  ;;  %v6712_v47 = vpack.c.bf16 %v6606_v27, %v6605_v3 }
 0x6b4   : > { %v7021_v20 = vpop.f32.mrf.mxu0  ;;  %v14149_v58 = vpop.f32.mrf.mxu1 }
 0x6b5   : > { %10602 = vset.pattern.permute.xlu2 %v16531_v25  ;;  %6373 = vperm.xlu0 %10645, %v10784_v63  }
 0x6b6   : > { %6265 = vperm.xlu2 %10602, %v13860_v22   ;;  %v14164_v22 = vld [vmem:[%s16319_s4] sm:$0xff]  ;;  %v6185_v45 = vpop.permute.xlu0 %6184 }
 0x6b7   : > { %10251 = vmatmul.msk.bf16.gmra.mxu0 %vm1147_vm2, %v6712_v47  ;;  %vm6479_vm3 = vcmp.eq.s32.totalorder %v6185_v45, %v11235_v56 }
 0x6b8   : > { %10603 = vset.pattern.permute.xlu1 %v16529_v37 }
 0x6b9   : > { %v5044_v41 = vpop.f32.mrf.mxu2  ;;  %4314 = vperm.xlu1 %10603, %v13884_v38   ;;  %v3780_v38 = vadd.f32 %v11765_v1, %v12029_v13 }
 0x6ba   : > { %v5330_v21 = vpack.c.bf16 %v5044_v41, %v5042_v6  ;;  %v3778_v6 = vadd.f32 %v11752_v33, %v12006_v16  ;;  %v10785_v33 = vld [vmem:[%s11025_s18 + $0x360] sm:$0xff]  ;;  %v10786_v16 = vld [vmem:[%s11025_s18 + $0x248] sm:$0xff] }
 0x6bc   : > { %10174 = vmatmul.msk.bf16.gmra.mxu3 %vm3042_vm6, %v5330_v21  ;;  %v7023_v0 = vpop.f32.mrf.mxu0  ;;  %v14168_v3 = vpop.f32.mrf.mxu1 }
 0x6bd   : > { %v7289_v50 = vpack.c.bf16 %v7023_v0, %v7021_v20  ;;  %6376 = vperm.xlu0 %10645, %v10785_v33   ;;  %v14185_v0 = vpop.permute.xlu2 %4233 }
 0x6be   : > { %10111 = vmatmul.msk.bf16.gmra.mxu2 %vm1147_vm2, %v4754_v59  ;;  %10604 = vset.pattern.permute.xlu2 %v16529_v37  ;;  %v6188_v59 = vpop.permute.xlu1 %6187  ;;  %vm4526_vm10 = vcmp.eq.s32.totalorder %v14185_v0, %v11235_v56 }
 0x6bf   : > { %v5603_v49 = vpop.f32.mrf.mxu3  ;;  %4317 = vperm.xlu2 %10604, %v10786_v16   ;;  %10315 = vmatmul.msk.bf16.gmra.mxu1 %vm3042_vm6, %v7289_v50  ;;  %vm6480_vm1 = vcmp.eq.s32.totalorder %v6188_v59, %v11235_v56  ;;  %v10787_v59 = vld [vmem:[%s11025_s18 + $0x250] sm:$0xff] }
 0x6c0   : > { %v5923_v41 = vadd.f32 %v5603_v49, %v3778_v6  ;;  %v4645_v6 = vsel %vm4517_vm15, 1.0, %v16352_v40  ;;  %v4646_v49 = vsel %vm4518_vm0, 1.0, %v16352_v40  ;;  %v6608_v1 = vsel %vm6480_vm1, 1.0, %v16352_v40 }
 0x6c1   : > { %v5047_v63 = vpop.f32.mrf.mxu2  ;;  %10606 = vset.pattern.permute.xlu1 %v16531_v25  ;;  %vm9433_vm15 = vcmask 1043459   ;;  %vm4523_vm0 = vcmp.eq.s32.totalorder %v14125_v54, %v11235_v56  ;;  %vm4524_vm1 = vcmp.eq.s32.totalorder %v14140_v62, %v11235_v56 }
 0x6c2   : > { %v7877_v47 = vadd.f32 %v14010_v14, %v5923_v41  ;;  %6271 = vperm.xlu1 %10606, %v10786_v16   ;;  %v4651_v54 = vsel %vm4523_vm0, 1.0, %v16352_v40  ;;  %vm9445_vm0 = vcmask 1047559  }
 0x6c4   : > { %v8006_v21 = vadd.f32 %v14164_v22, %v7877_v47  ;;  %v7026_v13 = vpop.f32.mrf.mxu0 }
 0x6c5   : > { %10651 = vset.pattern.permute.xlu0 %v16529_v37 }
 0x6c6   : > { %v8134_v14 = vsel %vm3042_vm6, %v8006_v21, -inf  ;;  %v6607_v21 = vsel %vm6479_vm3, 1.0, %v16352_v40  ;;  %4431 = vperm.xlu0 %10651, %v10788_v5   ;;  %vm9436_vm3 = vcmask 1044484  }
 0x6c7   : > { %v8135_v20 = vrot.slane %v8134_v14, 4  ;;  %v5605_v27 = vpop.f32.mrf.mxu3  ;;  %4320 = vperm.xlu2 %10604, %v10787_v59  }
 0x6c8   : > { %v5924_v41 = vadd.f32 %v5605_v27, %v3780_v38  ;;  %v14192_v38 = vpop.f32.mrf.mxu1  ;;  %v6713_v27 = vpack.c.bf16 %v6608_v1, %v6607_v21 }
 0x6c9   : > { %v8136_v19 = vmax.f32 %v8134_v14, %v8135_v20  ;;  %v5049_v47 = vpop.f32.mrf.mxu2  ;;  %v4755_v14 = vpack.c.bf16 %v4646_v49, %v4645_v6 }
 0x6ca   : > { %v7878_v50 = vadd.f32 %v14029_v30, %v5924_v41  ;;  %v5331_v33 = vpack.c.bf16 %v5049_v47, %v5047_v63  ;;  %10252 = vmatmul.msk.bf16.gmra.mxu0 %vm1147_vm2, %v6713_v27  ;;  %v3783_v30 = vadd.f32 %v11786_v36, %v12042_v51  ;;  %v14204_v47 = vpop.permute.xlu2 %4236  ;;  %10607 = vset.pattern.permute.xlu1 %v16529_v37 }
 0x6cb   : > { %v8137_v20 = vrot.slane %v8136_v19, 2  ;;  %4323 = vperm.xlu1 %10607, %v13896_v34  }
 0x6cc   : > { %v8007_v45 = vadd.f32 %v14164_v22, %v7878_v50  ;;  %10175 = vmatmul.msk.bf16.gmra.mxu3 %vm3042_vm6, %v5331_v33  ;;  %v7028_v50 = vpop.f32.mrf.mxu0 }
 0x6cd   : > { %v8138_v16 = vmax.f32 %v8136_v19, %v8137_v20  ;;  %v7290_v21 = vpack.c.bf16 %v7028_v50, %v7026_v13  ;;  %v4647_v13 = vsel %vm4519_vm4, 1.0, %v16352_v40  ;;  %v10789_v20 = vld [vmem:[%s11025_s18 + $0x380] sm:$0xff] }
 0x6ce   : > { %10112 = vmatmul.msk.bf16.gmra.mxu2 %vm1147_vm2, %v4755_v14  ;;  %v8141_v63 = vsel %vm3042_vm6, %v8007_v45, -inf  ;;  %10655 = vset.pattern.permute.xlu0 %v16531_v25 }
 0x6cf   : > { %v8142_v6 = vrot.slane %v8141_v63, 4  ;;  %v5608_v49 = vpop.f32.mrf.mxu3  ;;  %v8139_v36 = vrot.slane %v8138_v16, 1  ;;  %10608 = vset.pattern.permute.xlu2 %v16531_v25  ;;  %10316 = vmatmul.msk.bf16.gmra.mxu1 %vm3042_vm6, %v7290_v21 }
 0x6d0   : > { %v5925_v41 = vadd.f32 %v5608_v49, %v3783_v30  ;;  %v14207_v14 = vpop.f32.mrf.mxu1  ;;  %6274 = vperm.xlu2 %10608, %v10787_v59   ;;  %6388 = vperm.xlu0 %10655, %v10789_v20   ;;  %v4648_v59 = vsel %vm4520_vm5, 1.0, %v16352_v40 }
 0x6d1   : > { %v8143_v5 = vmax.f32 %v8141_v63, %v8142_v6  ;;  %v5052_v1 = vpop.f32.mrf.mxu2  ;;  %v8140_v27 = vmax.f32 %v8138_v16, %v8139_v36  ;;  %v6191_v6 = vpop.permute.xlu1 %6190  ;;  %v4756_v16 = vpack.c.bf16 %v4648_v59, %v4647_v13  ;;  %v3788_v59 = vadd.f32 %v11812_v48, %v12076_v18 }
 0x6d2   : > { %v7879_v33 = vadd.f32 %v14039_v15, %v5925_v41  ;;  %vm6481_vm7 = vcmp.eq.s32.totalorder %v6191_v6, %v11235_v56  ;;  %v6194_v35 = vpop.permute.xlu2 %6193 }
 0x6d3   : > { %v8144_v51 = vrot.slane %v8143_v5, 2  ;;  %v6609_v36 = vsel %vm6481_vm7, 1.0, %v16352_v40  ;;  %vm6482_vm8 = vcmp.eq.s32.totalorder %v6194_v35, %v11235_v56  ;;  %4326 = vperm.xlu1 %10607, %v13916_v44   ;;  %vm9439_vm7 = vcmask 1045509  }
 0x6d4   : > { %v8008_v15 = vadd.f32 %v14164_v22, %v7879_v33  ;;  %v7031_v50 = vpop.f32.mrf.mxu0 }
 0x6d5   : > { %v8145_v19 = vmax.f32 %v8143_v5, %v8144_v51 }
 0x6d6   : > { %v8148_v34 = vsel %vm3042_vm6, %v8008_v15, -inf  ;;  %v9034_v15 = vadd.f32 %v14227_v11, %v8140_v27  ;;  %v10790_v27 = vld [vmem:[%s11025_s18 + $0x268] sm:$0xff] }
 0x6d7   : > { %v8146_v45 = vrot.slane %v8145_v19, 1  ;;  %v8149_v30 = vrot.slane %v8148_v34, 4  ;;  %v5610_v63 = vpop.f32.mrf.mxu3 }
 0x6d8   : > { %v5926_v49 = vadd.f32 %v5610_v63, %v3785_v52  ;;  %v14233_v51 = vpop.f32.mrf.mxu1  ;;  %10609 = vset.pattern.permute.xlu2 %v16529_v37 }
 0x6d9   : > { %v8147_v57 = vmax.f32 %v8145_v19, %v8146_v45  ;;  %v8150_v41 = vmax.f32 %v8148_v34, %v8149_v30  ;;  %v5054_v5 = vpop.f32.mrf.mxu2  ;;  %4329 = vperm.xlu2 %10609, %v10790_v27   ;;  %v10791_v45 = vld [vmem:[%s11025_s18 + $0x398] sm:$0xff]  ;;  %v9162_v30 = vmax.f32 %v9034_v15, 0.0 }
 0x6da   : > { %v7880_v33 = vadd.f32 %v14058_v28, %v5926_v49  ;;  %v5332_v21 = vpack.c.bf16 %v5054_v5, %v5052_v1  ;;  %v6610_v28 = vsel %vm6482_vm8, 1.0, %v16352_v40  ;;  %6397 = vperm.xlu0 %10655, %v10791_v45   ;;  %v14252_v5 = vpop.permute.xlu0 %4239  ;;  %v10793_v45 = vld [vmem:[%s11025_s18 + $0x3a0] sm:$0xff]  ;;  %vm4525_vm8 = vcmp.eq.s32.totalorder %v14158_v32, %v11235_v56 }
 0x6db   : > { %v9035_v52 = vadd.f32 %v14227_v11, %v8147_v57  ;;  %v8151_v20 = vrot.slane %v8150_v41, 2  ;;  %v6714_v34 = vpack.c.bf16 %v6610_v28, %v6609_v36  ;;  %v14250_v57 = vpop.permute.xlu1 %4242  ;;  %10610 = vset.pattern.permute.xlu1 %v16531_v25 }
 0x6dc   : > { %v8009_v19 = vadd.f32 %v14164_v22, %v7880_v33  ;;  %10176 = vmatmul.msk.bf16.gmra.mxu3 %vm3042_vm6, %v5332_v21  ;;  %v7033_v18 = vpop.f32.mrf.mxu0  ;;  %6283 = vperm.xlu1 %10610, %v10790_v27  }
 0x6dd   : > { %v9163_v1 = vmax.f32 %v9035_v52, 0.0  ;;  %v8152_v13 = vmax.f32 %v8150_v41, %v8151_v20  ;;  %10253 = vmatmul.msk.bf16.gmra.mxu0 %vm1147_vm2, %v6714_v34  ;;  %v7291_v15 = vpack.c.bf16 %v7033_v18, %v7031_v50  ;;  %v16576_v34 = vld [vmem:[#allocation12_spill] sm:$0xff] }
 0x6de   : > { %10113 = vmatmul.msk.bf16.gmra.mxu2 %vm1147_vm2, %v4756_v16  ;;  %v8155_v44 = vsel %vm3042_vm6, %v8009_v19, -inf }
 0x6df   : > { %v9426_v63 = vrot.slane %v9163_v1, 7  ;;  %v8153_v6 = vrot.slane %v8152_v13, 1  ;;  %v8156_v49 = vrot.slane %v8155_v44, 4  ;;  %v5613_v35 = vpop.f32.mrf.mxu3  ;;  %10317 = vmatmul.msk.bf16.gmra.mxu1 %vm3042_vm6, %v7291_v15  ;;  %v10792_v1 = vld [vmem:[%s11025_s18 + $0x270] sm:$0xff] }
 0x6e0   : > { %v5927_v41 = vadd.f32 %v5613_v35, %v3788_v59  ;;  %v14256_v52 = vpop.f32.mrf.mxu1 }
 0x6e1   : > { %v8154_v16 = vmax.f32 %v8152_v13, %v8153_v6  ;;  %v8157_v33 = vmax.f32 %v8155_v44, %v8156_v49  ;;  %v5057_v48 = vpop.f32.mrf.mxu2  ;;  %v9428_v21 = vsel %vm9427_vm9, %v9426_v63, %v9162_v30  ;;  %4332 = vperm.xlu2 %10609, %v10792_v1   ;;  %v16575_v13 = vld [vmem:[#allocation24_spill] sm:$0xff] }
 0x6e2   : > { %v7881_v36 = vadd.f32 %v14071_v31, %v5927_v41  ;;  %v3790_v59 = vadd.f32 %v16576_v34, %v16575_v13  ;;  %6400 = vperm.xlu0 %10655, %v10793_v45   ;;  %v14274_v41 = vpop.permute.xlu2 %4245  ;;  %v4757_v34 = vpack.c.bf16 %v4650_v61, %v4649_v46  ;;  %v16578_v46 = vld [vmem:[#allocation6_spill] sm:$0xff] }
 0x6e3   : > { %v9036_v20 = vadd.f32 %v14227_v11, %v8154_v16  ;;  %v8158_v19 = vrot.slane %v8157_v33, 2  ;;  %v6200_v49 = vpop.permute.xlu1 %6199  ;;  %v6197_v16 = vpop.permute.xlu0 %6196 }
 0x6e4   : > { %v8010_v28 = vadd.f32 %v14164_v22, %v7881_v36  ;;  %vm6484_vm12 = vcmp.eq.s32.totalorder %v6200_v49, %v11235_v56  ;;  %vm6483_vm14 = vcmp.eq.s32.totalorder %v6197_v16, %v11235_v56  ;;  %6286 = vperm.xlu1 %10610, %v10792_v1  }
 0x6e5   : > { %v9164_v31 = vmax.f32 %v9036_v20, 0.0  ;;  %v8159_v50 = vmax.f32 %v8157_v33, %v8158_v19  ;;  %v6612_v15 = vsel %vm6484_vm12, 1.0, %v16352_v40  ;;  %v7036_v20 = vpop.f32.mrf.mxu0  ;;  %vm9442_vm12 = vcmask 1046534  }
 0x6e6   : > { %v8162_v44 = vsel %vm3042_vm6, %v8010_v28, -inf }
 0x6e7   : > { %v8160_v30 = vrot.slane %v8159_v50, 1  ;;  %v8163_v63 = vrot.slane %v8162_v44, 4  ;;  %v5615_v6 = vpop.f32.mrf.mxu3  ;;  %v9429_v27 = vrot.slane %v9164_v31, 6  ;;  %v6611_v31 = vsel %vm6483_vm14, 1.0, %v16352_v40 }
 0x6e8   : > { %v5928_v35 = vadd.f32 %v5615_v6, %v3790_v59  ;;  %v14280_v13 = vpop.f32.mrf.mxu1  ;;  %v6715_v6 = vpack.c.bf16 %v6612_v15, %v6611_v31 }
 0x6e9   : > { %v8161_v33 = vmax.f32 %v8159_v50, %v8160_v30  ;;  %v8164_v18 = vmax.f32 %v8162_v44, %v8163_v63  ;;  %v5059_v36 = vpop.f32.mrf.mxu2  ;;  %v9431_v44 = vsel %vm9430_vm13, %v9429_v27, %v9428_v21  ;;  %10612 = vset.pattern.permute.xlu2 %v16531_v25  ;;  %v10794_v27 = vld [vmem:[%s11025_s18 + $0x3b8] sm:$0xff] }
 0x6ea   : > { %v7882_v19 = vadd.f32 %v14087_v55, %v5928_v35  ;;  %v5333_v28 = vpack.c.bf16 %v5059_v36, %v5057_v48  ;;  %v16577_v48 = vld [vmem:[#allocation26_spill] sm:$0xff]  ;;  %6289 = vperm.xlu2 %10612, %v13929_v9   ;;  %10661 = vset.pattern.permute.xlu0 %v16529_v37 }
 0x6eb   : > { %v9037_v59 = vadd.f32 %v14227_v11, %v8161_v33  ;;  %v8165_v45 = vrot.slane %v8164_v18, 2  ;;  %v3793_v61 = vadd.f32 %v16578_v46, %v16577_v48  ;;  %4455 = vperm.xlu0 %10661, %v10794_v27   ;;  %v14295_v33 = vpop.permute.xlu2 %4248  ;;  %v6206_v27 = vpop.permute.xlu0 %6205 }
 0x6ec   : > { %v8011_v50 = vadd.f32 %v14164_v22, %v7882_v19  ;;  %10177 = vmatmul.msk.bf16.gmra.mxu3 %vm3042_vm6, %v5333_v28  ;;  %10613 = vset.pattern.permute.xlu1 %v16529_v37  ;;  %vm6486_vm5 = vcmp.eq.s32.totalorder %v6206_v27, %v11235_v56 }
 0x6ed   : > { %v9165_v30 = vmax.f32 %v9037_v59, 0.0  ;;  %v8166_v55 = vmax.f32 %v8164_v18, %v8165_v45  ;;  %10254 = vmatmul.msk.bf16.gmra.mxu0 %vm1147_vm2, %v6715_v6  ;;  %v7038_v19 = vpop.f32.mrf.mxu0  ;;  %4338 = vperm.xlu1 %10613, %v13949_v26  }
 0x6ee   : > { %10114 = vmatmul.msk.bf16.gmra.mxu2 %vm1147_vm2, %v4757_v34  ;;  %v8169_v63 = vsel %vm3042_vm6, %v8011_v50, -inf  ;;  %v7292_v31 = vpack.c.bf16 %v7038_v19, %v7036_v20  ;;  %v4652_v50 = vsel %vm4524_vm1, 1.0, %v16352_v40  ;;  %v16580_v20 = vld [vmem:[#allocation7_spill] sm:$0xff]  ;;  %vm4527_vm1 = vcmp.eq.s32.totalorder %v14204_v47, %v11235_v56 }
 0x6ef   : > { %v9432_v1 = vrot.slane %v9165_v30, 5  ;;  %v8167_v49 = vrot.slane %v8166_v55, 1  ;;  %v8170_v35 = vrot.slane %v8169_v63, 4  ;;  %v5618_v21 = vpop.f32.mrf.mxu3 }
 0x6f0   : > { %v5929_v16 = vadd.f32 %v5618_v21, %v3793_v61  ;;  %v14303_v34 = vpop.f32.mrf.mxu1  ;;  %10318 = vmatmul.msk.bf16.gmra.mxu1 %vm3042_vm6, %v7292_v31 }
 0x6f1   : > { %v8168_v18 = vmax.f32 %v8166_v55, %v8167_v49  ;;  %v8171_v36 = vmax.f32 %v8169_v63, %v8170_v35  ;;  %v5062_v15 = vpop.f32.mrf.mxu2  ;;  %v9434_v9 = vsel %vm9433_vm15, %v9432_v1, %v9431_v44  ;;  %v14316_v1 = vpop.permute.xlu1 %4251  ;;  %v10795_v49 = vld [vmem:[%s11025_s18 + $0x288] sm:$0xff]  ;;  %v4758_v35 = vpack.c.bf16 %v4652_v50, %v4651_v54 }
 0x6f2   : > { %v7883_v28 = vadd.f32 %v14100_v23, %v5929_v16  ;;  %v16579_v23 = vld [vmem:[#allocation28_spill] sm:$0xff]  ;;  %10614 = vset.pattern.permute.xlu2 %v16529_v37  ;;  %v10796_v16 = vld [vmem:[%s11025_s18 + $0x3c0] sm:$0xff] }
 0x6f3   : > { %v9038_v59 = vadd.f32 %v14227_v11, %v8168_v18  ;;  %v8172_v45 = vrot.slane %v8171_v36, 2  ;;  %v3795_v30 = vadd.f32 %v16580_v20, %v16579_v23  ;;  %4341 = vperm.xlu2 %10614, %v10795_v49   ;;  %10665 = vset.pattern.permute.xlu0 %v16531_v25  ;;  %v6203_v21 = vpop.permute.xlu2 %6202 }
 0x6f4   : > { %v8012_v6 = vadd.f32 %v14164_v22, %v7883_v28  ;;  %6412 = vperm.xlu0 %10665, %v10796_v16   ;;  %vm6485_vm4 = vcmp.eq.s32.totalorder %v6203_v21, %v11235_v56  ;;  %v10797_v21 = vld [vmem:[%s11025_s18 + $0x290] sm:$0xff]  ;;  %v10798_v16 = vld [vmem:[%s11025_s18 + $0x3d8] sm:$0xff] }
 0x6f5   : > { %v9166_v62 = vmax.f32 %v9038_v59, 0.0  ;;  %v8173_v44 = vmax.f32 %v8171_v36, %v8172_v45  ;;  %v7041_v28 = vpop.f32.mrf.mxu0  ;;  %v6613_v45 = vsel %vm6485_vm4, 1.0, %v16352_v40  ;;  %10616 = vset.pattern.permute.xlu1 %v16531_v25  ;;  %vm4528_vm4 = vcmp.eq.s32.totalorder %v14252_v5, %v11235_v56 }
 0x6f6   : > { %v8176_v55 = vsel %vm3042_vm6, %v8012_v6, -inf  ;;  %v6614_v6 = vsel %vm6486_vm5, 1.0, %v16352_v40  ;;  %6295 = vperm.xlu1 %10616, %v10795_v49   ;;  %v4656_v47 = vsel %vm4528_vm4, 1.0, %v16352_v40  ;;  %vm4531_vm4 = vcmp.eq.s32.totalorder %v14295_v33, %v11235_v56 }
 0x6f7   : > { %v9435_v48 = vrot.slane %v9166_v62, 4  ;;  %v8174_v46 = vrot.slane %v8173_v44, 1  ;;  %v8177_v61 = vrot.slane %v8176_v55, 4  ;;  %v5620_v63 = vpop.f32.mrf.mxu3  ;;  %v6716_v62 = vpack.c.bf16 %v6614_v6, %v6613_v45 }
 0x6f8   : > { %v5930_v26 = vadd.f32 %v5620_v63, %v3795_v30  ;;  %v14326_v54 = vpop.f32.mrf.mxu1 }
 0x6f9   : > { %v8175_v18 = vmax.f32 %v8173_v44, %v8174_v46  ;;  %v8178_v36 = vmax.f32 %v8176_v55, %v8177_v61  ;;  %v5064_v19 = vpop.f32.mrf.mxu2  ;;  %v9437_v23 = vsel %vm9436_vm3, %v9435_v48, %v9434_v9  ;;  %v16582_v55 = vld [vmem:[#allocation9_spill] sm:$0xff] }
 0x6fa   : > { %v7884_v31 = vadd.f32 %v14120_v43, %v5930_v26  ;;  %v5334_v59 = vpack.c.bf16 %v5064_v19, %v5062_v15  ;;  %v16581_v15 = vld [vmem:[#allocation30_spill] sm:$0xff]  ;;  %v14338_v26 = vpop.permute.xlu1 %4254 }
 0x6fb   : > { %v8179_v50 = vrot.slane %v8178_v36, 2  ;;  %v9039_v44 = vadd.f32 %v14227_v11, %v8175_v18  ;;  %v3798_v46 = vadd.f32 %v16582_v55, %v16581_v15  ;;  %4344 = vperm.xlu2 %10614, %v10797_v21   ;;  %v4653_v15 = vsel %vm4525_vm8, 1.0, %v16352_v40 }
 0x6fc   : > { %v8013_v20 = vadd.f32 %v14164_v22, %v7884_v31  ;;  %10178 = vmatmul.msk.bf16.gmra.mxu3 %vm3042_vm6, %v5334_v59  ;;  %6421 = vperm.xlu0 %10665, %v10798_v16   ;;  %v10800_v16 = vld [vmem:[%s11025_s18 + $0x3e0] sm:$0xff] }
 0x6fd   : > { %v8180_v30 = vmax.f32 %v8178_v36, %v8179_v50  ;;  %v9167_v43 = vmax.f32 %v9039_v44, 0.0  ;;  %10255 = vmatmul.msk.bf16.gmra.mxu0 %vm1147_vm2, %v6716_v62  ;;  %v7043_v31 = vpop.f32.mrf.mxu0 }
 0x6fe   : > { %10115 = vmatmul.msk.bf16.gmra.mxu2 %vm1147_vm2, %v4758_v35  ;;  %v8183_v61 = vsel %vm3042_vm6, %v8013_v20, -inf  ;;  %v7293_v45 = vpack.c.bf16 %v7043_v31, %v7041_v28  ;;  %v16584_v28 = vld [vmem:[#allocation8_spill] sm:$0xff]  ;;  %10617 = vset.pattern.permute.xlu1 %v16529_v37 }
 0x6ff   : > { %v8181_v9 = vrot.slane %v8180_v30, 1  ;;  %v8184_v48 = vrot.slane %v8183_v61, 4  ;;  %v5623_v63 = vpop.f32.mrf.mxu3  ;;  %v9438_v35 = vrot.slane %v9167_v43, 3 }
 0x700   : > { %v5931_v27 = vadd.f32 %v5623_v63, %v3798_v46  ;;  %v14344_v6 = vpop.f32.mrf.mxu1  ;;  %10319 = vmatmul.msk.bf16.gmra.mxu1 %vm3042_vm6, %v7293_v45 }
 0x701   : > { %v8182_v18 = vmax.f32 %v8180_v30, %v8181_v9  ;;  %v8185_v36 = vmax.f32 %v8183_v61, %v8184_v48  ;;  %v5067_v19 = vpop.f32.mrf.mxu2  ;;  %v9440_v49 = vsel %vm9439_vm7, %v9438_v35, %v9437_v23  ;;  %v10799_v9 = vld [vmem:[%s11025_s18 + $0x298] sm:$0xff]  ;;  %v4654_v48 = vsel %vm4526_vm10, 1.0, %v16352_v40  ;;  %v14362_v35 = vpop.permute.xlu2 %4257 }
 0x702   : > { %v7885_v59 = vadd.f32 %v14130_v10, %v5931_v27  ;;  %v16583_v10 = vld [vmem:[#allocation32_spill] sm:$0xff]  ;;  %v6212_v61 = vpop.permute.xlu1 %6211  ;;  %4347 = vperm.xlu1 %10617, %v10799_v9   ;;  %v6209_v27 = vpop.permute.xlu0 %6208  ;;  %vm4529_vm10 = vcmp.eq.s32.totalorder %v14250_v57, %v11235_v56 }
 0x703   : > { %v8186_v50 = vrot.slane %v8185_v36, 2  ;;  %v9040_v62 = vadd.f32 %v14227_v11, %v8182_v18  ;;  %v3800_v30 = vadd.f32 %v16584_v28, %v16583_v10  ;;  %10618 = vset.pattern.permute.xlu2 %v16531_v25  ;;  %vm6488_vm11 = vcmp.eq.s32.totalorder %v6212_v61, %v11235_v56 }
 0x704   : > { %v8014_v44 = vadd.f32 %v14164_v22, %v7885_v59  ;;  %6298 = vperm.xlu2 %10618, %v10797_v21   ;;  %6424 = vperm.xlu0 %10665, %v10800_v16   ;;  %v6616_v31 = vsel %vm6488_vm11, 1.0, %v16352_v40  ;;  %vm6487_vm14 = vcmp.eq.s32.totalorder %v6209_v27, %v11235_v56  ;;  %v4759_v21 = vpack.c.bf16 %v4654_v48, %v4653_v15 }
 0x705   : > { %v8187_v23 = vmax.f32 %v8185_v36, %v8186_v50  ;;  %v9168_v20 = vmax.f32 %v9040_v62, 0.0  ;;  %v7046_v59 = vpop.f32.mrf.mxu0  ;;  %v6615_v62 = vsel %vm6487_vm14, 1.0, %v16352_v40  ;;  %vm4530_vm11 = vcmp.eq.s32.totalorder %v14274_v41, %v11235_v56 }
 0x706   : > { %v8190_v43 = vsel %vm3042_vm6, %v8014_v44, -inf  ;;  %v6717_v28 = vpack.c.bf16 %v6616_v31, %v6615_v62  ;;  %v10803_v31 = vld [vmem:[%s11025_s18 + $0x3f8] sm:$0xff] }
 0x707   : > { %v8188_v32 = vrot.slane %v8187_v23, 1  ;;  %v8191_v55 = vrot.slane %v8190_v43, 4  ;;  %v5625_v46 = vpop.f32.mrf.mxu3  ;;  %v9441_v0 = vrot.slane %v9168_v20, 2 }
 0x708   : > { %v5932_v63 = vadd.f32 %v5625_v46, %v3800_v30  ;;  %v14369_v44 = vpop.f32.mrf.mxu1 }
 0x709   : > { %v8192_v18 = vmax.f32 %v8190_v43, %v8191_v55  ;;  %v5069_v36 = vpop.f32.mrf.mxu2  ;;  %v8189_v20 = vmax.f32 %v8187_v23, %v8188_v32  ;;  %v9443_v30 = vsel %vm9442_vm12, %v9441_v0, %v9440_v49  ;;  %v10801_v49 = vld [vmem:[%s11025_s18 + $0x2a0] sm:$0xff]  ;;  %v14381_v48 = vpop.permute.xlu2 %4260 }
 0x70a   : > { %v7886_v45 = vadd.f32 %v14149_v58, %v5932_v63  ;;  %v5335_v50 = vpack.c.bf16 %v5069_v36, %v5067_v19  ;;  %v16585_v58 = vld [vmem:[#allocation34_spill] sm:$0xff]  ;;  %4350 = vperm.xlu1 %10617, %v10801_v49   ;;  %v6215_v5 = vpop.permute.xlu1 %6214 }
 0x70b   : > { %v8193_v10 = vrot.slane %v8192_v18, 2  ;;  %v9041_v55 = vadd.f32 %v14227_v11, %v8189_v20  ;;  %v16586_v19 = vld [vmem:[#allocation10_spill] sm:$0xff]  ;;  %vm6489_vm5 = vcmp.eq.s32.totalorder %v6215_v5, %v11235_v56 }
 0x70c   : > { %v8015_v43 = vadd.f32 %v14164_v22, %v7886_v45  ;;  %10179 = vmatmul.msk.bf16.gmra.mxu3 %vm3042_vm6, %v5335_v50  ;;  %v3803_v46 = vadd.f32 %v16586_v19, %v16585_v58  ;;  %10619 = vset.pattern.permute.xlu2 %v16529_v37  ;;  %v4655_v58 = vsel %vm4527_vm1, 1.0, %v16352_v40 }
 0x70d   : > { %v9169_v23 = vmax.f32 %v9041_v55, 0.0  ;;  %v8194_v15 = vmax.f32 %v8192_v18, %v8193_v10  ;;  %10256 = vmatmul.msk.bf16.gmra.mxu0 %vm1147_vm2, %v6717_v28  ;;  %10671 = vset.pattern.permute.xlu0 %v16529_v37  ;;  %v7048_v36 = vpop.f32.mrf.mxu0  ;;  %v10802_v18 = vld [vmem:[%s11025_s18 + $0x2a8] sm:$0xff] }
 0x70e   : > { %10116 = vmatmul.msk.bf16.gmra.mxu2 %vm1147_vm2, %v4759_v21  ;;  %v8197_v61 = vsel %vm3042_vm6, %v8015_v43, -inf  ;;  %4353 = vperm.xlu2 %10619, %v10802_v18   ;;  %v7294_v50 = vpack.c.bf16 %v7048_v36, %v7046_v59  ;;  %v16588_v59 = vld [vmem:[#allocation11_spill] sm:$0xff] }
 0x70f   : > { %v8198_v32 = vrot.slane %v8197_v61, 4  ;;  %v5628_v9 = vpop.f32.mrf.mxu3  ;;  %v9444_v63 = vrot.slane %v9169_v23, 1  ;;  %4479 = vperm.xlu0 %10671, %v10803_v31   ;;  %v8195_v21 = vrot.slane %v8194_v15, 1  ;;  %v10804_v36 = vld [vmem:[%s11025_s18 + $0x2b0] sm:$0xff] }
 0x710   : > { %v5933_v0 = vadd.f32 %v5628_v9, %v3803_v46  ;;  %v14388_v62 = vpop.f32.mrf.mxu1  ;;  %10320 = vmatmul.msk.bf16.gmra.mxu1 %vm3042_vm6, %v7294_v50  ;;  %v6617_v50 = vsel %vm6489_vm5, 1.0, %v16352_v40  ;;  %vm4532_vm5 = vcmp.eq.s32.totalorder %v14316_v1, %v11235_v56 }
 0x711   : > { %v8199_v27 = vmax.f32 %v8197_v61, %v8198_v32  ;;  %v5072_v16 = vpop.f32.mrf.mxu2  ;;  %v14391_v20 = vsel %vm9445_vm0, %v9444_v63, %v9443_v30  ;;  %v8196_v19 = vmax.f32 %v8194_v15, %v8195_v21  ;;  %v6218_v9 = vpop.permute.xlu2 %6217  ;;  %v4760_v15 = vpack.c.bf16 %v4656_v47, %v4655_v58  ;;  %v16590_v58 = vld [vmem:[#allocation13_spill] sm:$0xff] }
 0x712   : > { %v7887_v45 = vadd.f32 %v14168_v3, %v5933_v0  ;;  %v16587_v3 = vld [vmem:[#allocation36_spill] sm:$0xff]  ;;  %10620 = vset.pattern.permute.xlu1 %v16531_v25  ;;  %vm6490_vm8 = vcmp.eq.s32.totalorder %v6218_v9, %v11235_v56  ;;  %v4660_v33 = vsel %vm4532_vm5, 1.0, %v16352_v40  ;;  %vm4535_vm5 = vcmp.eq.s32.totalorder %v14381_v48, %v11235_v56 }
 0x713   : > { %v8200_v10 = vrot.slane %v8199_v27, 2  ;;  %v3805_v55 = vadd.f32 %v16588_v59, %v16587_v3  ;;  %6307 = vperm.xlu1 %10620, %v10802_v18  }
 0x714   : > { %v8016_v28 = vadd.f32 %v14164_v22, %v7887_v45 }
 0x715   : > { %v8201_v43 = vmax.f32 %v8199_v27, %v8200_v10  ;;  %v7051_v27 = vpop.f32.mrf.mxu0  ;;  %v9042_v10 = vadd.f32 %v14227_v11, %v8196_v19 }
 0x716   : > { %v8204_v30 = vsel %vm3042_vm6, %v8016_v28, -inf  ;;  %4356 = vperm.xlu2 %10619, %v10804_v36  }
 0x717   : > { %v8202_v46 = vrot.slane %v8201_v43, 1  ;;  %v8205_v61 = vrot.slane %v8204_v30, 4  ;;  %v5630_v23 = vpop.f32.mrf.mxu3  ;;  %10674 = vset.pattern.permute.xlu0 %v16350_v2  ;;  %v9170_v47 = vmax.f32 %v9042_v10, 0.0 }
 0x718   : > { %v5934_v32 = vadd.f32 %v5630_v23, %v3805_v55  ;;  %v14409_v21 = vpop.f32.mrf.mxu1  ;;  %v16589_v55 = vld [vmem:[#allocation38_spill] sm:$0xff] }
 0x719   : > { %v8203_v49 = vmax.f32 %v8201_v43, %v8202_v46  ;;  %v8206_v0 = vmax.f32 %v8204_v30, %v8205_v61  ;;  %v5074_v63 = vpop.f32.mrf.mxu2  ;;  %v3808_v30 = vadd.f32 %v16590_v58, %v16589_v55  ;;  %v4657_v58 = vsel %vm4529_vm10, 1.0, %v16352_v40  ;;  %v14446_v41 = vpop.permute.xlu2 %4269 }
 0x71a   : > { %v7888_v31 = vadd.f32 %v14192_v38, %v5934_v32  ;;  %v5336_v45 = vpack.c.bf16 %v5074_v63, %v5072_v16  ;;  %v6618_v38 = vsel %vm6490_vm8, 1.0, %v16352_v40  ;;  %v14423_v32 = vpop.permute.xlu1 %4266 }
 0x71b   : > { %v9043_v18 = vadd.f32 %v14227_v11, %v8203_v49  ;;  %v8207_v28 = vrot.slane %v8206_v0, 2  ;;  %v6718_v59 = vpack.c.bf16 %v6618_v38, %v6617_v50  ;;  %v14425_v49 = vpop.permute.xlu0 %4263  ;;  %6310 = vperm.xlu1 %10620, %v10804_v36  }
 0x71c   : > { %v8017_v43 = vadd.f32 %v14164_v22, %v7888_v31  ;;  %10180 = vmatmul.msk.bf16.gmra.mxu3 %vm3042_vm6, %v5336_v45 }
 0x71d   : > { %v9171_v16 = vmax.f32 %v9043_v18, 0.0  ;;  %v8208_v3 = vmax.f32 %v8206_v0, %v8207_v28  ;;  %10257 = vmatmul.msk.bf16.gmra.mxu0 %vm1147_vm2, %v6718_v59  ;;  %v7053_v31 = vpop.f32.mrf.mxu0  ;;  %v10805_v28 = vld [vmem:[%s11025_s18 + $0x2b8] sm:$0xff] }
 0x71e   : > { %10117 = vmatmul.msk.bf16.gmra.mxu2 %vm1147_vm2, %v4760_v15  ;;  %v8211_v19 = vsel %vm3042_vm6, %v8017_v43, -inf  ;;  %10622 = vset.pattern.permute.xlu2 %v16531_v25  ;;  %v7295_v10 = vpack.c.bf16 %v7053_v31, %v7051_v27  ;;  %v16591_v27 = vld [vmem:[#allocation40_spill] sm:$0xff] }
 0x71f   : > { %v9447_v46 = vrot.slane %v9171_v16, 7  ;;  %v8209_v61 = vrot.slane %v8208_v3, 1  ;;  %v8212_v23 = vrot.slane %v8211_v19, 4  ;;  %v5633_v5 = vpop.f32.mrf.mxu3  ;;  %6313 = vperm.xlu2 %10622, %v10805_v28  }
 0x720   : > { %v5935_v9 = vadd.f32 %v5633_v5, %v3808_v30  ;;  %v14430_v18 = vpop.f32.mrf.mxu1  ;;  %10321 = vmatmul.msk.bf16.gmra.mxu1 %vm3042_vm6, %v7295_v10 }
 0x721   : > { %v8210_v0 = vmax.f32 %v8208_v3, %v8209_v61  ;;  %v8213_v63 = vmax.f32 %v8211_v19, %v8212_v23  ;;  %v5077_v15 = vpop.f32.mrf.mxu2  ;;  %v9448_v45 = vsel %vm9427_vm9, %v9447_v46, %v9170_v47  ;;  %v16592_v3 = vld [vmem:[#allocation14_spill] sm:$0xff]  ;;  %v4658_v46 = vsel %vm4530_vm11, 1.0, %v16352_v40 }
 0x722   : > { %v7889_v50 = vadd.f32 %v14207_v14, %v5935_v9  ;;  %v3810_v59 = vadd.f32 %v16592_v3, %v16591_v27  ;;  %v6224_v47 = vpop.permute.xlu1 %6223  ;;  %vm4533_vm11 = vcmp.eq.s32.totalorder %v14338_v26, %v11235_v56 }
 0x723   : > { %v9044_v43 = vadd.f32 %v14227_v11, %v8210_v0  ;;  %v8214_v38 = vrot.slane %v8213_v63, 2  ;;  %vm6492_vm14 = vcmp.eq.s32.totalorder %v6224_v47, %v11235_v56  ;;  %v6221_v5 = vpop.permute.xlu0 %6220  ;;  %10623 = vset.pattern.permute.xlu1 %v16529_v37  ;;  %v4661_v26 = vsel %vm4533_vm11, 1.0, %v16352_v40 }
 0x724   : > { %v8018_v36 = vadd.f32 %v14164_v22, %v7889_v50  ;;  %v6620_v31 = vsel %vm6492_vm14, 1.0, %v16352_v40  ;;  %vm6491_vm1 = vcmp.eq.s32.totalorder %v6221_v5, %v11235_v56  ;;  %v10806_v50 = vld [vmem:[%s11025_s18 + $0x2c0] sm:$0xff]  ;;  %vm4534_vm14 = vcmp.eq.s32.totalorder %v14362_v35, %v11235_v56 }
 0x725   : > { %v9172_v16 = vmax.f32 %v9044_v43, 0.0  ;;  %v8215_v14 = vmax.f32 %v8213_v63, %v8214_v38  ;;  %4362 = vperm.xlu1 %10623, %v10806_v50   ;;  %v6619_v43 = vsel %vm6491_vm1, 1.0, %v16352_v40  ;;  %v7056_v38 = vpop.f32.mrf.mxu0  ;;  %v4662_v35 = vsel %vm4534_vm14, 1.0, %v16352_v40 }
 0x726   : > { %v8218_v55 = vsel %vm3042_vm6, %v8018_v36, -inf  ;;  %v6719_v3 = vpack.c.bf16 %v6620_v31, %v6619_v43  ;;  %v14467_v31 = vpop.permute.xlu2 %4272  ;;  %vm4537_vm14 = vcmp.eq.s32.totalorder %v14423_v32, %v11235_v56 }
 0x727   : > { %v8216_v30 = vrot.slane %v8215_v14, 1  ;;  %v8219_v19 = vrot.slane %v8218_v55, 4  ;;  %v5635_v57 = vpop.f32.mrf.mxu3  ;;  %v9449_v61 = vrot.slane %v9172_v16, 6  ;;  %10624 = vset.pattern.permute.xlu2 %v16529_v37  ;;  %v4761_v16 = vpack.c.bf16 %v4658_v46, %v4657_v58 }
 0x728   : > { %v5936_v23 = vadd.f32 %v5635_v57, %v3810_v59  ;;  %v14454_v36 = vpop.f32.mrf.mxu1  ;;  %v10807_v59 = vld [vmem:[%s11025_s18 + $0x2c8] sm:$0xff]  ;;  %v4665_v32 = vsel %vm4537_vm14, 1.0, %v16352_v40 }
 0x729   : > { %v8217_v9 = vmax.f32 %v8215_v14, %v8216_v30  ;;  %v8220_v0 = vmax.f32 %v8218_v55, %v8219_v19  ;;  %v5079_v63 = vpop.f32.mrf.mxu2  ;;  %4365 = vperm.xlu2 %10624, %v10807_v59   ;;  %v16593_v19 = vld [vmem:[#allocation42_spill] sm:$0xff]  ;;  %v16594_v57 = vld [vmem:[#allocation15_spill] sm:$0xff] }
 0x72a   : > { %v7890_v10 = vadd.f32 %v14233_v51, %v5936_v23  ;;  %v5337_v28 = vpack.c.bf16 %v5079_v63, %v5077_v15  ;;  %v9450_v51 = vsel %vm9430_vm13, %v9449_v61, %v9448_v45  ;;  %v3813_v47 = vadd.f32 %v16594_v57, %v16593_v19 }
 0x72b   : > { %v9045_v14 = vadd.f32 %v14227_v11, %v8217_v9  ;;  %v8221_v27 = vrot.slane %v8220_v0, 2 }
 0x72c   : > { %v8019_v55 = vadd.f32 %v14164_v22, %v7890_v10  ;;  %10181 = vmatmul.msk.bf16.gmra.mxu3 %vm3042_vm6, %v5337_v28 }
 0x72d   : > { %v9173_v15 = vmax.f32 %v9045_v14, 0.0  ;;  %v8222_v30 = vmax.f32 %v8220_v0, %v8221_v27  ;;  %10258 = vmatmul.msk.bf16.gmra.mxu0 %vm1147_vm2, %v6719_v3  ;;  %10626 = vset.pattern.permute.xlu1 %v16531_v25  ;;  %v7058_v28 = vpop.f32.mrf.mxu0  ;;  %v10808_v3 = vld [vmem:[%s11025_s18 + $0x2d0] sm:$0xff] }
 0x72e   : > { %10118 = vmatmul.msk.bf16.gmra.mxu2 %vm1147_vm2, %v4761_v16  ;;  %v8225_v58 = vsel %vm3042_vm6, %v8019_v55, -inf  ;;  %6319 = vperm.xlu1 %10626, %v10807_v59   ;;  %v7296_v27 = vpack.c.bf16 %v7058_v28, %v7056_v38 }
 0x72f   : > { %v9451_v46 = vrot.slane %v9173_v15, 5  ;;  %v8223_v23 = vrot.slane %v8222_v30, 1  ;;  %v8226_v5 = vrot.slane %v8225_v58, 4  ;;  %v5638_v9 = vpop.f32.mrf.mxu3 }
 0x730   : > { %v5937_v63 = vadd.f32 %v5638_v9, %v3813_v47  ;;  %v14476_v43 = vpop.f32.mrf.mxu1  ;;  %10322 = vmatmul.msk.bf16.gmra.mxu1 %vm3042_vm6, %v7296_v27  ;;  %v6227_v9 = vpop.permute.xlu2 %6226 }
 0x731   : > { %v8224_v45 = vmax.f32 %v8222_v30, %v8223_v23  ;;  %v8227_v61 = vmax.f32 %v8225_v58, %v8226_v5  ;;  %v5082_v0 = vpop.f32.mrf.mxu2  ;;  %v9452_v50 = vsel %vm9433_vm15, %v9451_v46, %v9450_v51  ;;  %4368 = vperm.xlu2 %10624, %v10808_v3   ;;  %v4659_v51 = vsel %vm4531_vm4, 1.0, %v16352_v40  ;;  %v16596_v30 = vld [vmem:[#allocation16_spill] sm:$0xff]  ;;  %v14487_v46 = vpop.permute.xlu1 %4275 }
 0x732   : > { %v7891_v10 = vadd.f32 %v14256_v52, %v5937_v63  ;;  %v16595_v52 = vld [vmem:[#allocation44_spill] sm:$0xff]  ;;  %v4762_v23 = vpack.c.bf16 %v4660_v33, %v4659_v51  ;;  %v6230_v63 = vpop.permute.xlu0 %6229  ;;  %vm6493_vm8 = vcmp.eq.s32.totalorder %v6227_v9, %v11235_v56 }
 0x733   : > { %v9046_v16 = vadd.f32 %v14227_v11, %v8224_v45  ;;  %v8228_v14 = vrot.slane %v8227_v61, 2  ;;  %v3815_v19 = vadd.f32 %v16596_v30, %v16595_v52  ;;  %vm6494_vm10 = vcmp.eq.s32.totalorder %v6230_v63, %v11235_v56 }
 0x734   : > { %v8020_v55 = vadd.f32 %v14164_v22, %v7891_v10  ;;  %v6622_v27 = vsel %vm6494_vm10, 1.0, %v16352_v40 }
 0x735   : > { %v9174_v15 = vmax.f32 %v9046_v16, 0.0  ;;  %v8229_v1 = vmax.f32 %v8227_v61, %v8228_v14  ;;  %v6621_v14 = vsel %vm6493_vm8, 1.0, %v16352_v40  ;;  %vm4536_vm8 = vcmp.eq.s32.totalorder %v14425_v49, %v11235_v56 }
 0x736   : > { %v8232_v59 = vsel %vm3042_vm6, %v8020_v55, -inf  ;;  %v7061_v55 = vpop.f32.mrf.mxu0  ;;  %10627 = vset.pattern.permute.xlu1 %v16529_v37  ;;  %v4664_v49 = vsel %vm4536_vm8, 1.0, %v16352_v40  ;;  %vm4539_vm8 = vcmp.eq.s32.totalorder %v14467_v31, %v11235_v56 }
 0x737   : > { %v9453_v57 = vrot.slane %v9174_v15, 4  ;;  %v8230_v47 = vrot.slane %v8229_v1, 1  ;;  %v8233_v38 = vrot.slane %v8232_v59, 4  ;;  %v5640_v58 = vpop.f32.mrf.mxu3  ;;  %v6720_v15 = vpack.c.bf16 %v6622_v27, %v6621_v14 }
 0x738   : > { %v5938_v5 = vadd.f32 %v5640_v58, %v3815_v19  ;;  %v14494_v51 = vpop.f32.mrf.mxu1 }
 0x739   : > { %v8231_v45 = vmax.f32 %v8229_v1, %v8230_v47  ;;  %v8234_v61 = vmax.f32 %v8232_v59, %v8233_v38  ;;  %v5084_v10 = vpop.f32.mrf.mxu2  ;;  %v10809_v1 = vld [vmem:[%s11025_s18 + $0x2d8] sm:$0xff]  ;;  %10628 = vset.pattern.permute.xlu2 %v16531_v25  ;;  %v16597_v59 = vld [vmem:[#allocation46_spill] sm:$0xff] }
 0x73a   : > { %v7892_v28 = vadd.f32 %v14280_v13, %v5938_v5  ;;  %v5338_v16 = vpack.c.bf16 %v5084_v10, %v5082_v0  ;;  %4371 = vperm.xlu1 %10627, %v10809_v1   ;;  %v9454_v13 = vsel %vm9436_vm3, %v9453_v57, %v9452_v50  ;;  %6322 = vperm.xlu2 %10628, %v10808_v3   ;;  %v16598_v47 = vld [vmem:[#allocation17_spill] sm:$0xff]  ;;  %v14508_v50 = vpop.permute.xlu1 %4278 }
 0x73b   : > { %v8235_v33 = vrot.slane %v8234_v61, 2  ;;  %v9047_v52 = vadd.f32 %v14227_v11, %v8231_v45  ;;  %v3818_v38 = vadd.f32 %v16598_v47, %v16597_v59  ;;  %v14519_v1 = vld [vmem:[%s16319_s4] sm:$0xff] }
 0x73c   : > { %v8021_v0 = vadd.f32 %v14164_v22, %v7892_v28  ;;  %10182 = vmatmul.msk.bf16.gmra.mxu3 %vm3042_vm6, %v5338_v16 }
 0x73d   : > { %v8236_v30 = vmax.f32 %v8234_v61, %v8235_v33  ;;  %v9175_v19 = vmax.f32 %v9047_v52, 0.0  ;;  %10259 = vmatmul.msk.bf16.gmra.mxu0 %vm1147_vm2, %v6720_v15  ;;  %v10810_v33 = vld [vmem:[%s11025_s18 + $0x2e0] sm:$0xff] }
 0x73e   : > { %10119 = vmatmul.msk.bf16.gmra.mxu2 %vm1147_vm2, %v4762_v23  ;;  %v8239_v58 = vsel %vm3042_vm6, %v8021_v0, -inf  ;;  %v7063_v28 = vpop.f32.mrf.mxu0  ;;  %v16599_v0 = vld [vmem:[#allocation48_spill] sm:$0xff] }
 0x73f   : > { %v8237_v5 = vrot.slane %v8236_v30, 1  ;;  %v8240_v9 = vrot.slane %v8239_v58, 4  ;;  %v5643_v63 = vpop.f32.mrf.mxu3  ;;  %v9455_v22 = vrot.slane %v9175_v19, 3  ;;  %v7297_v27 = vpack.c.bf16 %v7063_v28, %v7061_v55  ;;  %v10812_v55 = vld [vmem:[%s11025_s18 + $0x2e8] sm:$0xff] }
 0x740   : > { %v5939_v57 = vadd.f32 %v5643_v63, %v3818_v38  ;;  %v14512_v16 = vpop.f32.mrf.mxu1 }
 0x741   : > { %v8238_v3 = vmax.f32 %v8236_v30, %v8237_v5  ;;  %v8241_v45 = vmax.f32 %v8239_v58, %v8240_v9  ;;  %v5087_v61 = vpop.f32.mrf.mxu2  ;;  %v9456_v23 = vsel %vm9439_vm7, %v9455_v22, %v9454_v13  ;;  %10323 = vmatmul.msk.bf16.gmra.mxu1 %vm3042_vm6, %v7297_v27  ;;  %v16600_v30 = vld [vmem:[#allocation18_spill] sm:$0xff]  ;;  %v14535_v22 = vpop.permute.xlu2 %4281 }
 0x742   : > { %v7893_v10 = vadd.f32 %v14303_v34, %v5939_v57  ;;  %4374 = vperm.xlu1 %10627, %v10810_v33   ;;  %10629 = vset.pattern.permute.xlu2 %v16529_v37  ;;  %v3820_v19 = vadd.f32 %v16600_v30, %v16599_v0  ;;  %v6236_v5 = vpop.permute.xlu1 %6235  ;;  %v6233_v57 = vpop.permute.xlu0 %6232 }
 0x743   : > { %v8242_v14 = vrot.slane %v8241_v45, 2  ;;  %v9048_v15 = vadd.f32 %v14227_v11, %v8238_v3  ;;  %4377 = vperm.xlu2 %10629, %v10812_v55   ;;  %vm6496_vm1 = vcmp.eq.s32.totalorder %v6236_v5, %v11235_v56  ;;  %vm6495_vm4 = vcmp.eq.s32.totalorder %v6233_v57, %v11235_v56 }
 0x744   : > { %v8022_v52 = vadd.f32 %v14519_v1, %v7893_v10  ;;  %v6624_v10 = vsel %vm6496_vm1, 1.0, %v16352_v40  ;;  %v6623_v27 = vsel %vm6495_vm4, 1.0, %v16352_v40  ;;  %vm4538_vm1 = vcmp.eq.s32.totalorder %v14446_v41, %v11235_v56 }
 0x745   : > { %v8243_v34 = vmax.f32 %v8241_v45, %v8242_v14  ;;  %v9176_v13 = vmax.f32 %v9048_v15, 0.0  ;;  %v6721_v30 = vpack.c.bf16 %v6624_v10, %v6623_v27 }
 0x746   : > { %v8246_v59 = vsel %vm3042_vm6, %v8022_v52, -inf }
 0x747   : > { %v8244_v47 = vrot.slane %v8243_v34, 1  ;;  %v8247_v38 = vrot.slane %v8246_v59, 4  ;;  %v5645_v58 = vpop.f32.mrf.mxu3  ;;  %v9457_v9 = vrot.slane %v9176_v13, 2  ;;  %v7066_v33 = vpop.f32.mrf.mxu0  ;;  %v4763_v13 = vpack.c.bf16 %v4662_v35, %v4661_v26 }
 0x748   : > { %v5940_v63 = vadd.f32 %v5645_v58, %v3820_v19  ;;  %v14541_v15 = vpop.f32.mrf.mxu1 }
 0x749   : > { %v8248_v3 = vmax.f32 %v8246_v59, %v8247_v38  ;;  %v5089_v45 = vpop.f32.mrf.mxu2  ;;  %v8245_v52 = vmax.f32 %v8243_v34, %v8244_v47  ;;  %v9458_v19 = vsel %vm9442_vm12, %v9457_v9, %v9456_v23  ;;  %v16601_v38 = vld [vmem:[#allocation50_spill] sm:$0xff]  ;;  %v16602_v34 = vld [vmem:[#allocation19_spill] sm:$0xff] }
 0x74a   : > { %v7894_v28 = vadd.f32 %v14326_v54, %v5940_v63  ;;  %v5339_v14 = vpack.c.bf16 %v5089_v45, %v5087_v61  ;;  %10630 = vset.pattern.permute.xlu1 %v16531_v25  ;;  %v10813_v61 = vld [vmem:[%s11025_s18 + $0x2f0] sm:$0xff]  ;;  %v3823_v47 = vadd.f32 %v16602_v34, %v16601_v38  ;;  %v14554_v63 = vpop.permute.xlu2 %4284 }
 0x74b   : > { %v8249_v0 = vrot.slane %v8248_v3, 2  ;;  %6331 = vperm.xlu1 %10630, %v10812_v55   ;;  %v9049_v54 = vadd.f32 %v14227_v11, %v8245_v52  ;;  %4380 = vperm.xlu2 %10629, %v10813_v61  }
 0x74c   : > { %v8023_v59 = vadd.f32 %v14519_v1, %v7894_v28  ;;  %10183 = vmatmul.msk.bf16.gmra.mxu3 %vm3042_vm6, %v5339_v14 }
 0x74d   : > { %v9177_v5 = vmax.f32 %v9049_v54, 0.0  ;;  %v8250_v26 = vmax.f32 %v8248_v3, %v8249_v0  ;;  %10260 = vmatmul.msk.bf16.gmra.mxu0 %vm1147_vm2, %v6721_v30  ;;  %v16603_v0 = vld [vmem:[#allocation52_spill] sm:$0xff] }
 0x74e   : > { %10120 = vmatmul.msk.bf16.gmra.mxu2 %vm1147_vm2, %v4763_v13  ;;  %v8253_v58 = vsel %vm3042_vm6, %v8023_v59, -inf  ;;  %v16604_v30 = vld [vmem:[#allocation20_spill] sm:$0xff]  ;;  %v4663_v59 = vsel %vm4535_vm5, 1.0, %v16352_v40 }
 0x74f   : > { %v8254_v35 = vrot.slane %v8253_v58, 4  ;;  %v5648_v23 = vpop.f32.mrf.mxu3  ;;  %v9459_v55 = vrot.slane %v9177_v5, 1  ;;  %v7068_v10 = vpop.f32.mrf.mxu0  ;;  %v8251_v3 = vrot.slane %v8250_v26, 1  ;;  %v10814_v54 = vld [vmem:[%s11025_s18 + $0x2f8] sm:$0xff] }
 0x750   : > { %v5941_v9 = vadd.f32 %v5648_v23, %v3823_v47  ;;  %v14557_v28 = vpop.f32.mrf.mxu1  ;;  %v7298_v52 = vpack.c.bf16 %v7068_v10, %v7066_v33  ;;  %v6239_v47 = vpop.permute.xlu1 %6238 }
 0x751   : > { %v8255_v11 = vmax.f32 %v8253_v58, %v8254_v35  ;;  %v5092_v57 = vpop.f32.mrf.mxu2  ;;  %v14560_v14 = vsel %vm9445_vm0, %v9459_v55, %v9458_v19  ;;  %v3825_v19 = vadd.f32 %v16604_v30, %v16603_v0  ;;  %v8252_v33 = vmax.f32 %v8250_v26, %v8251_v3  ;;  %v14583_v3 = vld [vmem:[%s16318_s3] ss:$0 sm:$0xff] }
 0x752   : > { %v7895_v45 = vadd.f32 %v14344_v6, %v5941_v9  ;;  %10324 = vmatmul.msk.bf16.gmra.mxu1 %vm3042_vm6, %v7298_v52  ;;  %vm6497_vm10 = vcmp.eq.s32.totalorder %v6239_v47, %v11235_v56  ;;  %v6242_v5 = vpop.permute.xlu2 %6241  ;;  %v4764_v55 = vpack.c.bf16 %v4664_v49, %v4663_v59  ;;  %v10816_v59 = vld [vmem:[%s11025_s18 + $0x300] sm:$0xff] }
 0x753   : > { %v8256_v27 = vrot.slane %v8255_v11, 2  ;;  %6334 = vperm.xlu1 %10630, %v10813_v61   ;;  %10632 = vset.pattern.permute.xlu2 %v16531_v25  ;;  %v6625_v10 = vsel %vm6497_vm10, 1.0, %v16352_v40  ;;  %vm6498_vm11 = vcmp.eq.s32.totalorder %v6242_v5, %v11235_v56  ;;  %vm4540_vm10 = vcmp.eq.s32.totalorder %v14487_v46, %v11235_v56  ;;  %v16612_v46 = vld [vmem:[#allocation25_spill] sm:$0xff] }
 0x754   : > { %v8024_v13 = vadd.f32 %v14519_v1, %v7895_v45  ;;  %6337 = vperm.xlu2 %10632, %v10814_v54   ;;  %v16606_v54 = vld [vmem:[#allocation21_spill] sm:$0xff] }
 0x755   : > { %v8257_v6 = vmax.f32 %v8255_v11, %v8256_v27  ;;  %v9050_v27 = vadd.f32 %v14583_v3, %v8252_v33 }
 0x756   : > { %v8260_v48 = vsel %vm3042_vm6, %v8024_v13, -inf }
 0x757   : > { %v8258_v38 = vrot.slane %v8257_v6, 1  ;;  %v8261_v34 = vrot.slane %v8260_v48, 4  ;;  %v5650_v61 = vpop.f32.mrf.mxu3 }
 0x758   : > { %v5942_v58 = vadd.f32 %v5650_v61, %v3825_v19  ;;  %v14578_v26 = vpop.f32.mrf.mxu1  ;;  %v14599_v5 = vpop.permute.xlu1 %4290 }
 0x759   : > { %v8259_v35 = vmax.f32 %v8257_v6, %v8258_v38  ;;  %v8262_v23 = vmax.f32 %v8260_v48, %v8261_v34  ;;  %v5094_v9 = vpop.f32.mrf.mxu2  ;;  %v16605_v48 = vld [vmem:[#allocation54_spill] sm:$0xff]  ;;  %v9178_v38 = vmax.f32 %v9050_v27, 0.0 }
 0x75a   : > { %v7896_v11 = vadd.f32 %v14369_v44, %v5942_v58  ;;  %v5340_v45 = vpack.c.bf16 %v5094_v9, %v5092_v57  ;;  %v6626_v57 = vsel %vm6498_vm11, 1.0, %v16352_v40  ;;  %v7071_v6 = vpop.f32.mrf.mxu0  ;;  %v3828_v33 = vadd.f32 %v16606_v54, %v16605_v48  ;;  %v14602_v9 = vpop.permute.xlu0 %4287  ;;  %v16608_v48 = vld [vmem:[#allocation22_spill] sm:$0xff] }
 0x75b   : > { %v9051_v52 = vadd.f32 %v14583_v3, %v8259_v35  ;;  %v8263_v13 = vrot.slane %v8262_v23, 2  ;;  %10633 = vset.pattern.permute.xlu1 %v16529_v37  ;;  %v6722_v19 = vpack.c.bf16 %v6626_v57, %v6625_v10  ;;  %v10817_v35 = vld [vmem:[%s11025_s18 + $0x308] sm:$0xff] }
 0x75c   : > { %v8025_v44 = vadd.f32 %v14519_v1, %v7896_v11  ;;  %10184 = vmatmul.msk.bf16.gmra.mxu3 %vm3042_vm6, %v5340_v45  ;;  %4386 = vperm.xlu1 %10633, %v10816_v59  }
 0x75d   : > { %v9179_v0 = vmax.f32 %v9051_v52, 0.0  ;;  %v8264_v30 = vmax.f32 %v8262_v23, %v8263_v13  ;;  %10634 = vset.pattern.permute.xlu2 %v16529_v37  ;;  %10261 = vmatmul.msk.bf16.gmra.mxu0 %vm1147_vm2, %v6722_v19 }
 0x75e   : > { %10121 = vmatmul.msk.bf16.gmra.mxu2 %vm1147_vm2, %v4764_v55  ;;  %v8267_v49 = vsel %vm3042_vm6, %v8025_v44, -inf  ;;  %4389 = vperm.xlu2 %10634, %v10817_v35  }
 0x75f   : > { %v9461_v34 = vrot.slane %v9179_v0, 7  ;;  %v8265_v61 = vrot.slane %v8264_v30, 1  ;;  %v8268_v47 = vrot.slane %v8267_v49, 4  ;;  %v5653_v58 = vpop.f32.mrf.mxu3 }
 0x760   : > { %v5943_v23 = vadd.f32 %v5653_v58, %v3828_v33  ;;  %v14606_v52 = vpop.f32.mrf.mxu1 }
 0x761   : > { %v8266_v55 = vmax.f32 %v8264_v30, %v8265_v61  ;;  %v8269_v11 = vmax.f32 %v8267_v49, %v8268_v47  ;;  %v5097_v45 = vpop.f32.mrf.mxu2  ;;  %v9462_v10 = vsel %vm9427_vm9, %v9461_v34, %v9178_v38  ;;  %v6248_v61 = vpop.permute.xlu1 %6247  ;;  %v10818_v47 = vld [vmem:[%s11025_s18 + $0x310] sm:$0xff] }
 0x762   : > { %v7897_v27 = vadd.f32 %v14388_v62, %v5943_v23  ;;  %v7073_v0 = vpop.f32.mrf.mxu0  ;;  %v16607_v62 = vld [vmem:[#allocation56_spill] sm:$0xff]  ;;  %vm6500_vm4 = vcmp.eq.s32.totalorder %v6248_v61, %v11235_v56 }
 0x763   : > { %v9052_v13 = vadd.f32 %v14583_v3, %v8266_v55  ;;  %v8270_v44 = vrot.slane %v8269_v11, 2  ;;  %v7299_v59 = vpack.c.bf16 %v7073_v0, %v7071_v6  ;;  %v3830_v54 = vadd.f32 %v16608_v48, %v16607_v62  ;;  %v6245_v55 = vpop.permute.xlu0 %6244 }
 0x764   : > { %v8026_v57 = vadd.f32 %v14519_v1, %v7897_v27  ;;  %10636 = vset.pattern.permute.xlu1 %v16531_v25  ;;  %v4666_v6 = vsel %vm4538_vm1, 1.0, %v16352_v40  ;;  %vm6499_vm5 = vcmp.eq.s32.totalorder %v6245_v55, %v11235_v56  ;;  %vm4541_vm1 = vcmp.eq.s32.totalorder %v14508_v50, %v11235_v56 }
 0x765   : > { %v9180_v30 = vmax.f32 %v9052_v13, 0.0  ;;  %v8271_v19 = vmax.f32 %v8269_v11, %v8270_v44  ;;  %6343 = vperm.xlu1 %10636, %v10817_v35   ;;  %10325 = vmatmul.msk.bf16.gmra.mxu1 %vm3042_vm6, %v7299_v59  ;;  %v14626_v35 = vpop.permute.xlu2 %4293  ;;  %v6628_v44 = vsel %vm6500_vm4, 1.0, %v16352_v40  ;;  %v6627_v41 = vsel %vm6499_vm5, 1.0, %v16352_v40 }
 0x766   : > { %v8274_v33 = vsel %vm3042_vm6, %v8026_v57, -inf  ;;  %4392 = vperm.xlu2 %10634, %v10818_v47   ;;  %vm4542_vm4 = vcmp.eq.s32.totalorder %v14535_v22, %v11235_v56 }
 0x767   : > { %v8272_v49 = vrot.slane %v8271_v19, 1  ;;  %v8275_v38 = vrot.slane %v8274_v33, 4  ;;  %v5655_v34 = vpop.f32.mrf.mxu3  ;;  %v9463_v58 = vrot.slane %v9180_v30, 6  ;;  %v4765_v30 = vpack.c.bf16 %v4666_v6, %v4665_v32 }
 0x768   : > { %v5944_v23 = vadd.f32 %v5655_v34, %v3830_v54  ;;  %v14632_v59 = vpop.f32.mrf.mxu1  ;;  %v6723_v54 = vpack.c.bf16 %v6628_v44, %v6627_v41  ;;  %v16610_v34 = vld [vmem:[#allocation23_spill] sm:$0xff] }
 0x769   : > { %v8273_v11 = vmax.f32 %v8271_v19, %v8272_v49  ;;  %v8276_v27 = vmax.f32 %v8274_v33, %v8275_v38  ;;  %v5099_v13 = vpop.f32.mrf.mxu2  ;;  %v9464_v49 = vsel %vm9430_vm13, %v9463_v58, %v9462_v10 }
 0x76a   : > { %v7898_v57 = vadd.f32 %v14409_v21, %v5944_v23  ;;  %v5341_v0 = vpack.c.bf16 %v5099_v13, %v5097_v45  ;;  %v7076_v33 = vpop.f32.mrf.mxu0  ;;  %v16609_v45 = vld [vmem:[#allocation57_spill] sm:$0xff] }
 0x76b   : > { %v9053_v62 = vadd.f32 %v14583_v3, %v8273_v11  ;;  %v8277_v48 = vrot.slane %v8276_v27, 2  ;;  %v3833_v61 = vadd.f32 %v16610_v34, %v16609_v45  ;;  %v10819_v13 = vld [vmem:[%s11025_s18 + $0x318] sm:$0xff]  ;;  %v16611_v45 = vld [vmem:[#allocation59_spill] sm:$0xff] }
 0x76c   : > { %v8027_v19 = vadd.f32 %v14519_v1, %v7898_v57  ;;  %10185 = vmatmul.msk.bf16.gmra.mxu3 %vm3042_vm6, %v5341_v0  ;;  %v3835_v34 = vadd.f32 %v16612_v46, %v16611_v45 }
 0x76d   : > { %v9181_v38 = vmax.f32 %v9053_v62, 0.0  ;;  %v8278_v21 = vmax.f32 %v8276_v27, %v8277_v48  ;;  %10637 = vset.pattern.permute.xlu1 %v16529_v37  ;;  %10262 = vmatmul.msk.bf16.gmra.mxu0 %vm1147_vm2, %v6723_v54  ;;  %v14645_v58 = vpop.permute.xlu2 %4296  ;;  %v4667_v54 = vsel %vm4539_vm8, 1.0, %v16352_v40 }
 0x76e   : > { %10122 = vmatmul.msk.bf16.gmra.mxu2 %vm1147_vm2, %v4765_v30  ;;  %v8281_v32 = vsel %vm3042_vm6, %v8027_v19, -inf  ;;  %4395 = vperm.xlu1 %10637, %v10819_v13  }
 0x76f   : > { %v9465_v6 = vrot.slane %v9181_v38, 5  ;;  %v8279_v23 = vrot.slane %v8278_v21, 1  ;;  %v8282_v55 = vrot.slane %v8281_v32, 4  ;;  %v5658_v11 = vpop.f32.mrf.mxu3  ;;  %10638 = vset.pattern.permute.xlu2 %v16531_v25 }
 0x770   : > { %v5945_v10 = vadd.f32 %v5658_v11, %v3833_v61  ;;  %6346 = vperm.xlu2 %10638, %v10818_v47   ;;  %v14654_v30 = vpop.f32.mrf.mxu1  ;;  %v4668_v47 = vsel %vm4540_vm10, 1.0, %v16352_v40  ;;  %v10820_v11 = vld [vmem:[%s11025_s18 + $0x320] sm:$0xff]  ;;  %vm4543_vm10 = vcmp.eq.s32.totalorder %v14554_v63, %v11235_v56 }
 0x771   : > { %v8280_v27 = vmax.f32 %v8278_v21, %v8279_v23  ;;  %v8283_v44 = vmax.f32 %v8281_v32, %v8282_v55  ;;  %v5102_v57 = vpop.f32.mrf.mxu2  ;;  %v9466_v0 = vsel %vm9433_vm15, %v9465_v6, %v9464_v49  ;;  %v14664_v55 = vpop.permute.xlu1 %4299  ;;  %v4766_v13 = vpack.c.bf16 %v4668_v47, %v4667_v54  ;;  %v10821_v47 = vld [vmem:[%s11025_s18 + $0x328] sm:$0xff] }
 0x772   : > { %v7899_v41 = vadd.f32 %v14430_v18, %v5945_v10  ;;  %v7078_v19 = vpop.f32.mrf.mxu0 }
 0x773   : > { %v9054_v62 = vadd.f32 %v14583_v3, %v8280_v27  ;;  %v8284_v48 = vrot.slane %v8283_v44, 2  ;;  %v7300_v21 = vpack.c.bf16 %v7078_v19, %v7076_v33  ;;  %v6254_v33 = vpop.permute.xlu0 %6253 }
 0x774   : > { %v8028_v31 = vadd.f32 %v14519_v1, %v7899_v41  ;;  %vm6502_vm14 = vcmp.eq.s32.totalorder %v6254_v33, %v11235_v56 }
 0x775   : > { %v9182_v38 = vmax.f32 %v9054_v62, 0.0  ;;  %v8285_v49 = vmax.f32 %v8283_v44, %v8284_v48  ;;  %10326 = vmatmul.msk.bf16.gmra.mxu1 %vm3042_vm6, %v7300_v21  ;;  %v6251_v27 = vpop.permute.xlu2 %6250 }
 0x776   : > { %v8288_v18 = vsel %vm3042_vm6, %v8028_v31, -inf  ;;  %4398 = vperm.xlu1 %10637, %v10820_v11   ;;  %vm6501_vm11 = vcmp.eq.s32.totalorder %v6251_v27, %v11235_v56 }
 0x777   : > { %v9467_v61 = vrot.slane %v9182_v38, 4  ;;  %v8286_v32 = vrot.slane %v8285_v49, 1  ;;  %v8289_v6 = vrot.slane %v8288_v18, 4  ;;  %v5660_v23 = vpop.f32.mrf.mxu3  ;;  %v6629_v19 = vsel %vm6501_vm11, 1.0, %v16352_v40 }
 0x778   : > { %v5946_v10 = vadd.f32 %v5660_v23, %v3835_v34  ;;  %10639 = vset.pattern.permute.xlu2 %v16529_v37  ;;  %v6630_v38 = vsel %vm6502_vm14, 1.0, %v16352_v40  ;;  %v14673_v54 = vpop.f32.mrf.mxu1  ;;  %vm4544_vm11 = vcmp.eq.s32.totalorder %v14602_v9, %v11235_v56 }
 0x779   : > { %v8287_v44 = vmax.f32 %v8285_v49, %v8286_v32  ;;  %v8290_v41 = vmax.f32 %v8288_v18, %v8289_v6  ;;  %v5104_v62 = vpop.f32.mrf.mxu2  ;;  %4401 = vperm.xlu2 %10639, %v10821_v47   ;;  %v6724_v21 = vpack.c.bf16 %v6630_v38, %v6629_v19  ;;  %v9468_v46 = vsel %vm9436_vm3, %v9467_v61, %v9466_v0  ;;  %v16613_v32 = vld [vmem:[#allocation61_spill] sm:$0xff]  ;;  %v16614_v6 = vld [vmem:[#allocation27_spill] sm:$0xff]  ;;  %v14685_v0 = vpop.permute.xlu1 %4302 }
 0x77a   : > { %v7900_v48 = vadd.f32 %v14454_v36, %v5946_v10  ;;  %v5342_v31 = vpack.c.bf16 %v5104_v62, %v5102_v57  ;;  %v7081_v36 = vpop.f32.mrf.mxu0  ;;  %v3838_v23 = vadd.f32 %v16614_v6, %v16613_v32  ;;  %v10822_v38 = vld [vmem:[%s11025_s18 + $0x330] sm:$0xff] }
 0x77b   : > { %v8291_v49 = vrot.slane %v8290_v41, 2  ;;  %v9055_v45 = vadd.f32 %v14583_v3, %v8287_v44 }
 0x77c   : > { %v8029_v34 = vadd.f32 %v14519_v1, %v7900_v48  ;;  %10186 = vmatmul.msk.bf16.gmra.mxu3 %vm3042_vm6, %v5342_v31 }
 0x77d   : > { %v8292_v57 = vmax.f32 %v8290_v41, %v8291_v49  ;;  %v9183_v18 = vmax.f32 %v9055_v45, 0.0  ;;  %10263 = vmatmul.msk.bf16.gmra.mxu0 %vm1147_vm2, %v6724_v21 }
 0x77e   : > { %10123 = vmatmul.msk.bf16.gmra.mxu2 %vm1147_vm2, %v4766_v13  ;;  %v8295_v11 = vsel %vm3042_vm6, %v8029_v34, -inf  ;;  %10640 = vset.pattern.permute.xlu1 %v16531_v25 }
 0x77f   : > { %v8293_v10 = vrot.slane %v8292_v57, 1  ;;  %v8296_v27 = vrot.slane %v8295_v11, 4  ;;  %v5663_v33 = vpop.f32.mrf.mxu3  ;;  %v9469_v61 = vrot.slane %v9183_v18, 3  ;;  %6355 = vperm.xlu1 %10640, %v10821_v47   ;;  %v16616_v18 = vld [vmem:[#allocation29_spill] sm:$0xff] }
 0x780   : > { %v5947_v44 = vadd.f32 %v5663_v33, %v3838_v23  ;;  %v14690_v19 = vpop.f32.mrf.mxu1  ;;  %v4669_v33 = vsel %vm4541_vm1, 1.0, %v16352_v40 }
 0x781   : > { %v8294_v13 = vmax.f32 %v8292_v57, %v8293_v10  ;;  %v8297_v41 = vmax.f32 %v8295_v11, %v8296_v27  ;;  %v5107_v62 = vpop.f32.mrf.mxu2  ;;  %v9470_v48 = vsel %vm9439_vm7, %v9469_v61, %v9468_v46  ;;  %4404 = vperm.xlu2 %10639, %v10822_v38   ;;  %v6260_v50 = vpop.permute.xlu1 %6259  ;;  %v4670_v61 = vsel %vm4542_vm4, 1.0, %v16352_v40 }
 0x782   : > { %v7901_v31 = vadd.f32 %v14476_v43, %v5947_v44  ;;  %v7083_v47 = vpop.f32.mrf.mxu0  ;;  %v16615_v43 = vld [vmem:[#allocation63_spill] sm:$0xff]  ;;  %vm6504_vm5 = vcmp.eq.s32.totalorder %v6260_v50, %v11235_v56  ;;  %v6257_v44 = vpop.permute.xlu0 %6256  ;;  %vm4545_vm4 = vcmp.eq.s32.totalorder %v14599_v5, %v11235_v56 }
 0x783   : > { %v8298_v49 = vrot.slane %v8297_v41, 2  ;;  %v9056_v21 = vadd.f32 %v14583_v3, %v8294_v13  ;;  %v7301_v46 = vpack.c.bf16 %v7083_v47, %v7081_v36  ;;  %v3840_v32 = vadd.f32 %v16616_v18, %v16615_v43  ;;  %v14706_v36 = vpop.permute.xlu2 %4305 }
 0x784   : > { %v8030_v45 = vadd.f32 %v14519_v1, %v7901_v31  ;;  %v6632_v31 = vsel %vm6504_vm5, 1.0, %v16352_v40  ;;  %vm6503_vm8 = vcmp.eq.s32.totalorder %v6257_v44, %v11235_v56  ;;  %vm4546_vm5 = vcmp.eq.s32.totalorder %v14626_v35, %v11235_v56 }
 0x785   : > { %v8299_v34 = vmax.f32 %v8297_v41, %v8298_v49  ;;  %v9184_v57 = vmax.f32 %v9056_v21, 0.0  ;;  %10327 = vmatmul.msk.bf16.gmra.mxu1 %vm3042_vm6, %v7301_v46 }
 0x786   : > { %v8302_v6 = vsel %vm3042_vm6, %v8030_v45, -inf  ;;  %v6631_v45 = vsel %vm6503_vm8, 1.0, %v16352_v40 }
 0x787   : > { %v8300_v23 = vrot.slane %v8299_v34, 1  ;;  %v8303_v11 = vrot.slane %v8302_v6, 4  ;;  %v5665_v10 = vpop.f32.mrf.mxu3  ;;  %v9471_v27 = vrot.slane %v9184_v57, 2  ;;  %6358 = vperm.xlu1 %10640, %v10822_v38   ;;  %v4767_v57 = vpack.c.bf16 %v4670_v61, %v4669_v33  ;;  %v10823_v38 = vld [vmem:[%s11025_s18 + $0x338] sm:$0xff] }
 0x788   : > { %v5948_v22 = vadd.f32 %v5665_v10, %v3840_v32  ;;  %v14712_v47 = vpop.f32.mrf.mxu1  ;;  %v6725_v18 = vpack.c.bf16 %v6632_v31, %v6631_v45  ;;  %v16618_v10 = vld [vmem:[#allocation31_spill] sm:$0xff] }
 0x789   : > { %v8304_v13 = vmax.f32 %v8302_v6, %v8303_v11  ;;  %v5109_v41 = vpop.f32.mrf.mxu2  ;;  %10642 = vset.pattern.permute.xlu2 %v16531_v25  ;;  %v8301_v46 = vmax.f32 %v8299_v34, %v8300_v23  ;;  %v9472_v32 = vsel %vm9442_vm12, %v9471_v27, %v9470_v48  ;;  %v16617_v11 = vld [vmem:[#allocation65_spill] sm:$0xff] }
 0x78a   : > { %v7902_v49 = vadd.f32 %v14494_v51, %v5948_v22  ;;  %v5343_v21 = vpack.c.bf16 %v5109_v41, %v5107_v62  ;;  %6361 = vperm.xlu2 %10642, %v10823_v38   ;;  %v7086_v51 = vpop.f32.mrf.mxu0  ;;  %v3843_v34 = vadd.f32 %v16618_v10, %v16617_v11  ;;  %v10825_v38 = vld [vmem:[%s11025_s18 + $0x348] sm:$0xff]  ;;  %v4671_v10 = vsel %vm4543_vm10, 1.0, %v16352_v40 }
 0x78b   : > { %v8305_v43 = vrot.slane %v8304_v13, 2  ;;  %v9057_v62 = vadd.f32 %v14583_v3, %v8301_v46  ;;  %v14725_v27 = vpop.permute.xlu2 %4308 }
 0x78c   : > { %v8031_v6 = vadd.f32 %v14519_v1, %v7902_v49  ;;  %10187 = vmatmul.msk.bf16.gmra.mxu3 %vm3042_vm6, %v5343_v21  ;;  %v10824_v49 = vld [vmem:[%s11025_s18 + $0x340] sm:$0xff] }
 0x78d   : > { %v9185_v50 = vmax.f32 %v9057_v62, 0.0  ;;  %v8306_v33 = vmax.f32 %v8304_v13, %v8305_v43  ;;  %10264 = vmatmul.msk.bf16.gmra.mxu0 %vm1147_vm2, %v6725_v18  ;;  %v16619_v62 = vld [vmem:[#allocation66_spill] sm:$0xff] }
 0x78e   : > { %10124 = vmatmul.msk.bf16.gmra.mxu2 %vm1147_vm2, %v4767_v57  ;;  %v8309_v23 = vsel %vm3042_vm6, %v8031_v6, -inf }
 0x78f   : > { %v8310_v61 = vrot.slane %v8309_v23, 4  ;;  %v5668_v22 = vpop.f32.mrf.mxu3  ;;  %10643 = vset.pattern.permute.xlu1 %v16529_v37  ;;  %v9473_v44 = vrot.slane %v9185_v50, 1  ;;  %v8307_v46 = vrot.slane %v8306_v33, 1 }
 0x790   : > { %v5949_v48 = vadd.f32 %v5668_v22, %v3843_v34  ;;  %4410 = vperm.xlu1 %10643, %v10824_v49   ;;  %v14730_v45 = vpop.f32.mrf.mxu1  ;;  %v6263_v22 = vpop.permute.xlu1 %6262 }
 0x791   : > { %v8311_v41 = vmax.f32 %v8309_v23, %v8310_v61  ;;  %v5112_v31 = vpop.f32.mrf.mxu2  ;;  %v14733_v13 = vsel %vm9445_vm0, %v9473_v44, %v9472_v32  ;;  %v16620_v32 = vld [vmem:[#allocation33_spill] sm:$0xff]  ;;  %v8308_v34 = vmax.f32 %v8306_v33, %v8307_v46  ;;  %v4672_v23 = vsel %vm4544_vm11, 1.0, %v16352_v40 }
 0x792   : > { %v7903_v21 = vadd.f32 %v14512_v16, %v5949_v48  ;;  %10644 = vset.pattern.permute.xlu2 %v16529_v37  ;;  %v7088_v18 = vpop.f32.mrf.mxu0  ;;  %v3845_v11 = vadd.f32 %v16620_v32, %v16619_v62  ;;  %vm6505_vm14 = vcmp.eq.s32.totalorder %v6263_v22, %v11235_v56  ;;  %vm4547_vm11 = vcmp.eq.s32.totalorder %v14645_v58, %v11235_v56 }
 0x793   : > { %v8312_v57 = vrot.slane %v8311_v41, 2  ;;  %4413 = vperm.xlu2 %10644, %v10825_v38   ;;  %v7302_v6 = vpack.c.bf16 %v7088_v18, %v7086_v51  ;;  %v6266_v51 = vpop.permute.xlu2 %6265  ;;  %v9058_v18 = vadd.f32 %v14583_v3, %v8308_v34  ;;  %v16622_v34 = vld [vmem:[#allocation35_spill] sm:$0xff]  ;;  %v4675_v58 = vsel %vm4547_vm11, 1.0, %v16352_v40 }
 0x794   : > { %v8032_v43 = vadd.f32 %v14519_v1, %v7903_v21  ;;  %v4768_v21 = vpack.c.bf16 %v4672_v23, %v4671_v10  ;;  %vm6506_vm1 = vcmp.eq.s32.totalorder %v6266_v51, %v11235_v56 }
 0x795   : > { %v8313_v16 = vmax.f32 %v8311_v41, %v8312_v57  ;;  %10328 = vmatmul.msk.bf16.gmra.mxu1 %vm3042_vm6, %v7302_v6  ;;  %v6633_v57 = vsel %vm6505_vm14, 1.0, %v16352_v40  ;;  %v6634_v32 = vsel %vm6506_vm1, 1.0, %v16352_v40  ;;  %vm4548_vm14 = vcmp.eq.s32.totalorder %v14664_v55, %v11235_v56 }
 0x796   : > { %v8316_v63 = vsel %vm3042_vm6, %v8032_v43, -inf }
 0x797   : > { %v8314_v50 = vrot.slane %v8313_v16, 1  ;;  %v8317_v61 = vrot.slane %v8316_v63, 4  ;;  %v5670_v9 = vpop.f32.mrf.mxu3 }
 0x798   : > { %v5950_v48 = vadd.f32 %v5670_v9, %v3845_v11  ;;  %10646 = vset.pattern.permute.xlu1 %v16531_v25  ;;  %v14752_v43 = vpop.f32.mrf.mxu1 }
 0x799   : > { %v8315_v44 = vmax.f32 %v8313_v16, %v8314_v50  ;;  %v8318_v41 = vmax.f32 %v8316_v63, %v8317_v61  ;;  %v5114_v49 = vpop.f32.mrf.mxu2  ;;  %6367 = vperm.xlu1 %10646, %v10825_v38   ;;  %v6726_v38 = vpack.c.bf16 %v6634_v32, %v6633_v57  ;;  %v16621_v63 = vld [vmem:[#allocation68_spill] sm:$0xff]  ;;  %v9186_v61 = vmax.f32 %v9058_v18, 0.0 }
 0x79a   : > { %v7904_v33 = vadd.f32 %v14541_v15, %v5950_v48  ;;  %v5344_v46 = vpack.c.bf16 %v5114_v49, %v5112_v31  ;;  %v7091_v15 = vpop.f32.mrf.mxu0  ;;  %v10826_v31 = vld [vmem:[%s11025_s18 + $0x350] sm:$0xff]  ;;  %v3848_v23 = vadd.f32 %v16622_v34, %v16621_v63  ;;  %v10827_v32 = vld [vmem:[%s11025_s18 + $0x358] sm:$0xff]  ;;  %v16623_v34 = vld [vmem:[#allocation70_spill] sm:$0xff] }
 0x79b   : > { %v9059_v6 = vadd.f32 %v14583_v3, %v8315_v44  ;;  %v8319_v62 = vrot.slane %v8318_v41, 2  ;;  %4416 = vperm.xlu2 %10644, %v10826_v31   ;;  %v14766_v44 = vpop.permute.xlu1 %4314 }
 0x79c   : > { %v8033_v16 = vadd.f32 %v14519_v1, %v7904_v33  ;;  %10188 = vmatmul.msk.bf16.gmra.mxu3 %vm3042_vm6, %v5344_v46 }
 0x79d   : > { %v9187_v11 = vmax.f32 %v9059_v6, 0.0  ;;  %v8320_v10 = vmax.f32 %v8318_v41, %v8319_v62  ;;  %10265 = vmatmul.msk.bf16.gmra.mxu0 %vm1147_vm2, %v6726_v38  ;;  %v14768_v41 = vpop.permute.xlu0 %4311 }
 0x79e   : > { %10125 = vmatmul.msk.bf16.gmra.mxu2 %vm1147_vm2, %v4768_v21  ;;  %v8323_v50 = vsel %vm3042_vm6, %v8033_v16, -inf }
 0x79f   : > { %v9475_v9 = vrot.slane %v9187_v11, 7  ;;  %v8321_v22 = vrot.slane %v8320_v10, 1  ;;  %v8324_v48 = vrot.slane %v8323_v50, 4  ;;  %v5673_v51 = vpop.f32.mrf.mxu3 }
 0x7a0   : > { %v5951_v49 = vadd.f32 %v5673_v51, %v3848_v23  ;;  %v14772_v18 = vpop.f32.mrf.mxu1  ;;  %v16624_v23 = vld [vmem:[#allocation37_spill] sm:$0xff] }
 0x7a1   : > { %v8322_v21 = vmax.f32 %v8320_v10, %v8321_v22  ;;  %v8325_v33 = vmax.f32 %v8323_v50, %v8324_v48  ;;  %v5117_v46 = vpop.f32.mrf.mxu2  ;;  %v9476_v57 = vsel %vm9427_vm9, %v9475_v9, %v9186_v61  ;;  %10647 = vset.pattern.permute.xlu1 %v16529_v37  ;;  %v3850_v50 = vadd.f32 %v16624_v23, %v16623_v34 }
 0x7a2   : > { %v7905_v6 = vadd.f32 %v14557_v28, %v5951_v49  ;;  %4419 = vperm.xlu1 %10647, %v10827_v32   ;;  %v7093_v10 = vpop.f32.mrf.mxu0  ;;  %v4673_v9 = vsel %vm4545_vm4, 1.0, %v16352_v40  ;;  %v4674_v49 = vsel %vm4546_vm5, 1.0, %v16352_v40  ;;  %vm4549_vm5 = vcmp.eq.s32.totalorder %v14685_v0, %v11235_v56 }
 0x7a3   : > { %v9060_v62 = vadd.f32 %v14583_v3, %v8322_v21  ;;  %v8326_v16 = vrot.slane %v8325_v33, 2  ;;  %10648 = vset.pattern.permute.xlu2 %v16531_v25  ;;  %v7303_v63 = vpack.c.bf16 %v7093_v10, %v7091_v15  ;;  %v6272_v51 = vpop.permute.xlu1 %6271  ;;  %v14790_v15 = vpop.permute.xlu2 %4317 }
 0x7a4   : > { %v8034_v11 = vadd.f32 %v14519_v1, %v7905_v6  ;;  %6370 = vperm.xlu2 %10648, %v10826_v31   ;;  %vm6508_vm8 = vcmp.eq.s32.totalorder %v6272_v51, %v11235_v56 }
 0x7a5   : > { %v9188_v28 = vmax.f32 %v9060_v62, 0.0  ;;  %v8327_v38 = vmax.f32 %v8325_v33, %v8326_v16  ;;  %10329 = vmatmul.msk.bf16.gmra.mxu1 %vm3042_vm6, %v7303_v63  ;;  %v6269_v31 = vpop.permute.xlu0 %6268  ;;  %v6636_v16 = vsel %vm6508_vm8, 1.0, %v16352_v40  ;;  %v4769_v63 = vpack.c.bf16 %v4674_v49, %v4673_v9  ;;  %v16625_v9 = vld [vmem:[#allocation72_spill] sm:$0xff] }
 0x7a6   : > { %v8330_v61 = vsel %vm3042_vm6, %v8034_v11, -inf  ;;  %vm6507_vm10 = vcmp.eq.s32.totalorder %v6269_v31, %v11235_v56  ;;  %vm4550_vm8 = vcmp.eq.s32.totalorder %v14706_v36, %v11235_v56 }
 0x7a7   : > { %v8328_v5 = vrot.slane %v8327_v38, 1  ;;  %v8331_v22 = vrot.slane %v8330_v61, 4  ;;  %v5675_v48 = vpop.f32.mrf.mxu3  ;;  %v9477_v35 = vrot.slane %v9188_v28, 6  ;;  %v6635_v10 = vsel %vm6507_vm10, 1.0, %v16352_v40 }
 0x7a8   : > { %v5952_v21 = vadd.f32 %v5675_v48, %v3850_v50  ;;  %v14796_v28 = vpop.f32.mrf.mxu1  ;;  %v6727_v50 = vpack.c.bf16 %v6636_v16, %v6635_v10  ;;  %v16626_v48 = vld [vmem:[#allocation39_spill] sm:$0xff] }
 0x7a9   : > { %v8329_v33 = vmax.f32 %v8327_v38, %v8328_v5  ;;  %v8332_v6 = vmax.f32 %v8330_v61, %v8331_v22  ;;  %v5119_v62 = vpop.f32.mrf.mxu2  ;;  %v10828_v38 = vld [vmem:[%s11025_s18 + $0x360] sm:$0xff]  ;;  %v3853_v51 = vadd.f32 %v16626_v48, %v16625_v9 }
 0x7aa   : > { %v7906_v32 = vadd.f32 %v14578_v26, %v5952_v21  ;;  %v5345_v11 = vpack.c.bf16 %v5119_v62, %v5117_v46  ;;  %4422 = vperm.xlu1 %10647, %v10828_v38   ;;  %v7096_v5 = vpop.f32.mrf.mxu0  ;;  %v9478_v26 = vsel %vm9430_vm13, %v9477_v35, %v9476_v57  ;;  %v10829_v21 = vld [vmem:[%s11025_s18 + $0x368] sm:$0xff] }
 0x7ab   : > { %v9061_v34 = vadd.f32 %v14583_v3, %v8329_v33  ;;  %v8333_v23 = vrot.slane %v8332_v6, 2  ;;  %v14810_v35 = vpop.permute.xlu2 %4320  ;;  %v16627_v9 = vld [vmem:[#allocation74_spill] sm:$0xff] }
 0x7ac   : > { %v8035_v61 = vadd.f32 %v14519_v1, %v7906_v32  ;;  %10189 = vmatmul.msk.bf16.gmra.mxu3 %vm3042_vm6, %v5345_v11  ;;  %10649 = vset.pattern.permute.xlu2 %v16529_v37 }
 0x7ad   : > { %v9189_v46 = vmax.f32 %v9061_v34, 0.0  ;;  %v8334_v22 = vmax.f32 %v8332_v6, %v8333_v23  ;;  %4425 = vperm.xlu2 %10649, %v10829_v21   ;;  %10266 = vmatmul.msk.bf16.gmra.mxu0 %vm1147_vm2, %v6727_v50 }
 0x7ae   : > { %10126 = vmatmul.msk.bf16.gmra.mxu2 %vm1147_vm2, %v4769_v63  ;;  %v8337_v49 = vsel %vm3042_vm6, %v8035_v61, -inf }
 0x7af   : > { %v9479_v31 = vrot.slane %v9189_v46, 5  ;;  %v8335_v33 = vrot.slane %v8334_v22, 1  ;;  %v8338_v62 = vrot.slane %v8337_v49, 4  ;;  %v5678_v16 = vpop.f32.mrf.mxu3 }
 0x7b0   : > { %v5953_v57 = vadd.f32 %v5678_v16, %v3853_v51  ;;  %v14818_v34 = vpop.f32.mrf.mxu1 }
 0x7b1   : > { %v8336_v6 = vmax.f32 %v8334_v22, %v8335_v33  ;;  %v8339_v32 = vmax.f32 %v8337_v49, %v8338_v62  ;;  %v5122_v11 = vpop.f32.mrf.mxu2  ;;  %v9480_v10 = vsel %vm9433_vm15, %v9479_v31, %v9478_v26  ;;  %v4676_v26 = vsel %vm4548_vm14, 1.0, %v16352_v40  ;;  %v10830_v49 = vld [vmem:[%s11025_s18 + $0x370] sm:$0xff] }
 0x7b2   : > { %v7907_v63 = vadd.f32 %v14606_v52, %v5953_v57  ;;  %10650 = vset.pattern.permute.xlu1 %v16531_v25  ;;  %v7098_v61 = vpop.f32.mrf.mxu0  ;;  %v16628_v52 = vld [vmem:[#allocation41_spill] sm:$0xff]  ;;  %v14830_v57 = vpop.permute.xlu1 %4323  ;;  %vm4551_vm14 = vcmp.eq.s32.totalorder %v14725_v27, %v11235_v56 }
 0x7b3   : > { %v9062_v23 = vadd.f32 %v14583_v3, %v8336_v6  ;;  %v8340_v50 = vrot.slane %v8339_v32, 2  ;;  %6379 = vperm.xlu1 %10650, %v10829_v21   ;;  %v7304_v22 = vpack.c.bf16 %v7098_v61, %v7096_v5  ;;  %v3855_v48 = vadd.f32 %v16628_v52, %v16627_v9 }
 0x7b4   : > { %v8036_v38 = vadd.f32 %v14519_v1, %v7907_v63  ;;  %v4770_v21 = vpack.c.bf16 %v4676_v26, %v4675_v58  ;;  %v6275_v63 = vpop.permute.xlu2 %6274 }
 0x7b5   : > { %v9190_v46 = vmax.f32 %v9062_v23, 0.0  ;;  %v8341_v55 = vmax.f32 %v8339_v32, %v8340_v50  ;;  %4428 = vperm.xlu2 %10649, %v10830_v49   ;;  %10330 = vmatmul.msk.bf16.gmra.mxu1 %vm3042_vm6, %v7304_v22  ;;  %v6278_v32 = vpop.permute.xlu0 %6277  ;;  %vm6509_vm1 = vcmp.eq.s32.totalorder %v6275_v63, %v11235_v56 }
 0x7b6   : > { %v8344_v51 = vsel %vm3042_vm6, %v8036_v38, -inf  ;;  %vm6510_vm4 = vcmp.eq.s32.totalorder %v6278_v32, %v11235_v56 }
 0x7b7   : > { %v9481_v31 = vrot.slane %v9190_v46, 4  ;;  %v8342_v33 = vrot.slane %v8341_v55, 1  ;;  %v8345_v62 = vrot.slane %v8344_v51, 4  ;;  %v5680_v16 = vpop.f32.mrf.mxu3  ;;  %v6637_v46 = vsel %vm6509_vm1, 1.0, %v16352_v40 }
 0x7b8   : > { %v5954_v6 = vadd.f32 %v5680_v16, %v3855_v48  ;;  %v6638_v22 = vsel %vm6510_vm4, 1.0, %v16352_v40  ;;  %v14837_v9 = vpop.f32.mrf.mxu1  ;;  %vm4552_vm1 = vcmp.eq.s32.totalorder %v14768_v41, %v11235_v56 }
 0x7b9   : > { %v8343_v5 = vmax.f32 %v8341_v55, %v8342_v33  ;;  %v8346_v23 = vmax.f32 %v8344_v51, %v8345_v62  ;;  %v5124_v50 = vpop.f32.mrf.mxu2  ;;  %v6728_v26 = vpack.c.bf16 %v6638_v22, %v6637_v46  ;;  %v9482_v55 = vsel %vm9436_vm3, %v9481_v31, %v9480_v10  ;;  %v16629_v33 = vld [vmem:[#allocation75_spill] sm:$0xff] }
 0x7ba   : > { %v7908_v38 = vadd.f32 %v14632_v59, %v5954_v6  ;;  %v5346_v61 = vpack.c.bf16 %v5124_v50, %v5122_v11  ;;  %v7101_v51 = vpop.f32.mrf.mxu0  ;;  %v16630_v62 = vld [vmem:[#allocation43_spill] sm:$0xff]  ;;  %v14849_v32 = vpop.permute.xlu1 %4326 }
 0x7bb   : > { %v8347_v58 = vrot.slane %v8346_v23, 2  ;;  %v9063_v52 = vadd.f32 %v14583_v3, %v8343_v5  ;;  %6382 = vperm.xlu1 %10650, %v10830_v49   ;;  %v3858_v16 = vadd.f32 %v16630_v62, %v16629_v33  ;;  %v10831_v5 = vld [vmem:[%s11025_s18 + $0x378] sm:$0xff] }
 0x7bc   : > { %v8037_v48 = vadd.f32 %v14519_v1, %v7908_v38  ;;  %10190 = vmatmul.msk.bf16.gmra.mxu3 %vm3042_vm6, %v5346_v61  ;;  %v16631_v33 = vld [vmem:[#allocation77_spill] sm:$0xff] }
 0x7bd   : > { %v8348_v59 = vmax.f32 %v8346_v23, %v8347_v58  ;;  %v9191_v11 = vmax.f32 %v9063_v52, 0.0  ;;  %10652 = vset.pattern.permute.xlu2 %v16531_v25  ;;  %10267 = vmatmul.msk.bf16.gmra.mxu0 %vm1147_vm2, %v6728_v26  ;;  %v16632_v62 = vld [vmem:[#allocation45_spill] sm:$0xff] }
 0x7be   : > { %10127 = vmatmul.msk.bf16.gmra.mxu2 %vm1147_vm2, %v4770_v21  ;;  %v8351_v6 = vsel %vm3042_vm6, %v8037_v48, -inf  ;;  %6385 = vperm.xlu2 %10652, %v10831_v5  }
 0x7bf   : > { %v8349_v63 = vrot.slane %v8348_v59, 1  ;;  %v8352_v10 = vrot.slane %v8351_v6, 4  ;;  %v5683_v31 = vpop.f32.mrf.mxu3  ;;  %v9483_v49 = vrot.slane %v9191_v11, 3  ;;  %v10832_v11 = vld [vmem:[%s11025_s18 + $0x380] sm:$0xff] }
 0x7c0   : > { %v5955_v23 = vadd.f32 %v5683_v31, %v3858_v16  ;;  %v14854_v22 = vpop.f32.mrf.mxu1  ;;  %v3860_v16 = vadd.f32 %v16632_v62, %v16631_v33 }
 0x7c1   : > { %v8350_v21 = vmax.f32 %v8348_v59, %v8349_v63  ;;  %v8353_v50 = vmax.f32 %v8351_v6, %v8352_v10  ;;  %v5127_v38 = vpop.f32.mrf.mxu2  ;;  %v9484_v61 = vsel %vm9439_vm7, %v9483_v49, %v9482_v55  ;;  %v4678_v49 = vsel %vm4550_vm8, 1.0, %v16352_v40 }
 0x7c2   : > { %v7909_v46 = vadd.f32 %v14654_v30, %v5955_v23  ;;  %v7103_v48 = vpop.f32.mrf.mxu0  ;;  %v6284_v31 = vpop.permute.xlu1 %6283  ;;  %vm4553_vm8 = vcmp.eq.s32.totalorder %v14766_v44, %v11235_v56 }
 0x7c3   : > { %v8354_v58 = vrot.slane %v8353_v50, 2  ;;  %v9064_v52 = vadd.f32 %v14583_v3, %v8350_v21  ;;  %10653 = vset.pattern.permute.xlu1 %v16529_v37  ;;  %v7305_v55 = vpack.c.bf16 %v7103_v48, %v7101_v51  ;;  %v4677_v51 = vsel %vm4549_vm5, 1.0, %v16352_v40  ;;  %v14878_v21 = vpop.permute.xlu2 %4329 }
 0x7c4   : > { %v8038_v26 = vadd.f32 %v14519_v1, %v7909_v46  ;;  %4434 = vperm.xlu1 %10653, %v10832_v11   ;;  %vm6512_vm10 = vcmp.eq.s32.totalorder %v6284_v31, %v11235_v56  ;;  %v10833_v46 = vld [vmem:[%s11025_s18 + $0x388] sm:$0xff] }
 0x7c5   : > { %v8355_v59 = vmax.f32 %v8353_v50, %v8354_v58  ;;  %v9192_v30 = vmax.f32 %v9064_v52, 0.0  ;;  %10331 = vmatmul.msk.bf16.gmra.mxu1 %vm3042_vm6, %v7305_v55  ;;  %v6281_v50 = vpop.permute.xlu0 %6280 }
 0x7c6   : > { %v8358_v6 = vsel %vm3042_vm6, %v8038_v26, -inf  ;;  %10654 = vset.pattern.permute.xlu2 %v16529_v37  ;;  %v6640_v26 = vsel %vm6512_vm10, 1.0, %v16352_v40  ;;  %vm6511_vm11 = vcmp.eq.s32.totalorder %v6281_v50, %v11235_v56  ;;  %vm4554_vm10 = vcmp.eq.s32.totalorder %v14790_v15, %v11235_v56 }
 0x7c7   : > { %v8356_v63 = vrot.slane %v8355_v59, 1  ;;  %v8359_v10 = vrot.slane %v8358_v6, 4  ;;  %v5685_v1 = vpop.f32.mrf.mxu3  ;;  %v9485_v5 = vrot.slane %v9192_v30, 2  ;;  %4437 = vperm.xlu2 %10654, %v10833_v46   ;;  %v6639_v36 = vsel %vm6511_vm11, 1.0, %v16352_v40 }
 0x7c8   : > { %v5956_v23 = vadd.f32 %v5685_v1, %v3860_v16  ;;  %v14885_v55 = vpop.f32.mrf.mxu1  ;;  %v4771_v30 = vpack.c.bf16 %v4678_v49, %v4677_v51  ;;  %v6729_v62 = vpack.c.bf16 %v6640_v26, %v6639_v36  ;;  %v4682_v15 = vsel %vm4554_vm10, 1.0, %v16352_v40 }
 0x7c9   : > { %v8360_v58 = vmax.f32 %v8358_v6, %v8359_v10  ;;  %v5129_v52 = vpop.f32.mrf.mxu2  ;;  %v8357_v11 = vmax.f32 %v8355_v59, %v8356_v63  ;;  %v9486_v16 = vsel %vm9442_vm12, %v9485_v5, %v9484_v61  ;;  %v14891_v6 = vld [vmem:[%s16319_s4] sm:$0xff]  ;;  %v16633_v59 = vld [vmem:[#allocation79_spill] sm:$0xff]  ;;  %vm4557_vm10 = vcmp.eq.s32.totalorder %v14849_v32, %v11235_v56 }
 0x7ca   : > { %v7910_v0 = vadd.f32 %v14673_v54, %v5956_v23  ;;  %v5347_v48 = vpack.c.bf16 %v5129_v52, %v5127_v38  ;;  %v7106_v54 = vpop.f32.mrf.mxu0  ;;  %v16634_v63 = vld [vmem:[#allocation47_spill] sm:$0xff] }
 0x7cb   : > { %v8361_v33 = vrot.slane %v8360_v58, 2  ;;  %v9065_v38 = vadd.f32 %v14583_v3, %v8357_v11  ;;  %v3863_v61 = vadd.f32 %v16634_v63, %v16633_v59  ;;  %v14902_v50 = vpop.permute.xlu2 %4332  ;;  %v10835_v52 = vld [vmem:[%s11025_s18 + $0x390] sm:$0xff]  ;;  %v16636_v59 = vld [vmem:[#allocation49_spill] sm:$0xff] }
 0x7cc   : > { %v8039_v10 = vadd.f32 %v14891_v6, %v7910_v0  ;;  %10191 = vmatmul.msk.bf16.gmra.mxu3 %vm3042_vm6, %v5347_v48  ;;  %10656 = vset.pattern.permute.xlu1 %v16531_v25 }
 0x7cd   : > { %6391 = vperm.xlu1 %10656, %v10833_v46   ;;  %v9193_v31 = vmax.f32 %v9065_v38, 0.0  ;;  %v8362_v5 = vmax.f32 %v8360_v58, %v8361_v33  ;;  %10268 = vmatmul.msk.bf16.gmra.mxu0 %vm1147_vm2, %v6729_v62 }
 0x7ce   : > { %10128 = vmatmul.msk.bf16.gmra.mxu2 %vm1147_vm2, %v4771_v30  ;;  %v8365_v1 = vsel %vm3042_vm6, %v8039_v10, -inf }
 0x7cf   : > { %v8366_v51 = vrot.slane %v8365_v1, 4  ;;  %v5688_v49 = vpop.f32.mrf.mxu3  ;;  %4440 = vperm.xlu2 %10654, %v10835_v52   ;;  %v9487_v26 = vrot.slane %v9193_v31, 1  ;;  %v8363_v58 = vrot.slane %v8362_v5, 1 }
 0x7d0   : > { %v5957_v23 = vadd.f32 %v5688_v49, %v3863_v61  ;;  %v14906_v11 = vpop.f32.mrf.mxu1  ;;  %v6287_v49 = vpop.permute.xlu1 %6286 }
 0x7d1   : > { %v8367_v0 = vmax.f32 %v8365_v1, %v8366_v51  ;;  %v5132_v48 = vpop.f32.mrf.mxu2  ;;  %v14909_v46 = vsel %vm9445_vm0, %v9487_v26, %v9486_v16  ;;  %v4679_v16 = vsel %vm4551_vm14, 1.0, %v16352_v40  ;;  %v8364_v27 = vmax.f32 %v8362_v5, %v8363_v58 }
 0x7d2   : > { %v7911_v36 = vadd.f32 %v14690_v19, %v5957_v23  ;;  %v7108_v62 = vpop.f32.mrf.mxu0  ;;  %v16635_v19 = vld [vmem:[#allocation81_spill] sm:$0xff]  ;;  %v4680_v1 = vsel %vm4552_vm1, 1.0, %v16352_v40  ;;  %vm6513_vm4 = vcmp.eq.s32.totalorder %v6287_v49, %v11235_v56  ;;  %vm4555_vm1 = vcmp.eq.s32.totalorder %v14810_v35, %v11235_v56 }
 0x7d3   : > { %v8368_v30 = vrot.slane %v8367_v0, 2  ;;  %v7306_v38 = vpack.c.bf16 %v7108_v62, %v7106_v54  ;;  %v3865_v63 = vadd.f32 %v16636_v59, %v16635_v19  ;;  %v10836_v23 = vld [vmem:[%s11025_s18 + $0x398] sm:$0xff]  ;;  %v6290_v26 = vpop.permute.xlu2 %6289  ;;  %v4772_v5 = vpack.c.bf16 %v4680_v1, %v4679_v16  ;;  %v14934_v59 = vld [vmem:[%s16318_s3] ss:$0 sm:$0xff]  ;;  %v16638_v1 = vld [vmem:[#allocation51_spill] sm:$0xff] }
 0x7d4   : > { %v8040_v33 = vadd.f32 %v14891_v6, %v7911_v36  ;;  %v6641_v62 = vsel %vm6513_vm4, 1.0, %v16352_v40  ;;  %v9066_v19 = vadd.f32 %v14583_v3, %v8364_v27  ;;  %vm6514_vm5 = vcmp.eq.s32.totalorder %v6290_v26, %v11235_v56  ;;  %v16637_v27 = vld [vmem:[#allocation83_spill] sm:$0xff] }
 0x7d5   : > { %v8369_v10 = vmax.f32 %v8367_v0, %v8368_v30  ;;  %10657 = vset.pattern.permute.xlu1 %v16529_v37  ;;  %10332 = vmatmul.msk.bf16.gmra.mxu1 %vm3042_vm6, %v7306_v38  ;;  %vm4556_vm4 = vcmp.eq.s32.totalorder %v14830_v57, %v11235_v56 }
 0x7d6   : > { %v8372_v61 = vsel %vm3042_vm6, %v8040_v33, -inf  ;;  %4443 = vperm.xlu1 %10657, %v10836_v23  }
 0x7d7   : > { %v8370_v31 = vrot.slane %v8369_v10, 1  ;;  %v8373_v41 = vrot.slane %v8372_v61, 4  ;;  %v5690_v51 = vpop.f32.mrf.mxu3  ;;  %10658 = vset.pattern.permute.xlu2 %v16531_v25 }
 0x7d8   : > { %v5958_v54 = vadd.f32 %v5690_v51, %v3865_v63  ;;  %6394 = vperm.xlu2 %10658, %v10835_v52   ;;  %v14928_v38 = vpop.f32.mrf.mxu1  ;;  %v9194_v51 = vmax.f32 %v9066_v19, 0.0 }
 0x7d9   : > { %v8371_v0 = vmax.f32 %v8369_v10, %v8370_v31  ;;  %v8374_v36 = vmax.f32 %v8372_v61, %v8373_v41  ;;  %v5134_v30 = vpop.f32.mrf.mxu2  ;;  %v3868_v31 = vadd.f32 %v16638_v1, %v16637_v27 }
 0x7da   : > { %v7912_v58 = vadd.f32 %v14712_v47, %v5958_v54  ;;  %v5348_v33 = vpack.c.bf16 %v5134_v30, %v5132_v48  ;;  %v6642_v47 = vsel %vm6514_vm5, 1.0, %v16352_v40  ;;  %v7111_v48 = vpop.f32.mrf.mxu0  ;;  %v10838_v30 = vld [vmem:[%s11025_s18 + $0x3a0] sm:$0xff] }
 0x7db   : > { %v9067_v10 = vadd.f32 %v14934_v59, %v8371_v0  ;;  %v8375_v63 = vrot.slane %v8374_v36, 2  ;;  %v6730_v61 = vpack.c.bf16 %v6642_v47, %v6641_v62  ;;  %v14946_v0 = vpop.permute.xlu1 %4338 }
 0x7dc   : > { %v8041_v52 = vadd.f32 %v14891_v6, %v7912_v58  ;;  %10192 = vmatmul.msk.bf16.gmra.mxu3 %vm3042_vm6, %v5348_v33 }
 0x7dd   : > { %v9195_v16 = vmax.f32 %v9067_v10, 0.0  ;;  %v8376_v3 = vmax.f32 %v8374_v36, %v8375_v63  ;;  %10269 = vmatmul.msk.bf16.gmra.mxu0 %vm1147_vm2, %v6730_v61  ;;  %v10839_v63 = vld [vmem:[%s11025_s18 + $0x3a8] sm:$0xff] }
 0x7de   : > { %10129 = vmatmul.msk.bf16.gmra.mxu2 %vm1147_vm2, %v4772_v5  ;;  %v8379_v41 = vsel %vm3042_vm6, %v8041_v52, -inf  ;;  %4446 = vperm.xlu1 %10657, %v10838_v30   ;;  %v14949_v5 = vpop.permute.xlu0 %4335 }
 0x7df   : > { %v9489_v49 = vrot.slane %v9195_v16, 7  ;;  %v8377_v23 = vrot.slane %v8376_v3, 1  ;;  %v8380_v54 = vrot.slane %v8379_v41, 4  ;;  %v5693_v26 = vpop.f32.mrf.mxu3 }
 0x7e0   : > { %v5959_v36 = vadd.f32 %v5693_v26, %v3868_v31  ;;  %10659 = vset.pattern.permute.xlu2 %v16529_v37 }
 0x7e1   : > { %v8378_v58 = vmax.f32 %v8376_v3, %v8377_v23  ;;  %v8381_v33 = vmax.f32 %v8379_v41, %v8380_v54  ;;  %v5137_v62 = vpop.f32.mrf.mxu2  ;;  %v9490_v19 = vsel %vm9427_vm9, %v9489_v49, %v9194_v51  ;;  %4449 = vperm.xlu2 %10659, %v10839_v63   ;;  %v16640_v41 = vld [vmem:[#allocation53_spill] sm:$0xff]  ;;  %v4681_v23 = vsel %vm4553_vm8, 1.0, %v16352_v40 }
 0x7e2   : > { %v7913_v10 = vadd.f32 %v14730_v45, %v5959_v36  ;;  %v7113_v61 = vpop.f32.mrf.mxu0  ;;  %v14959_v3 = vpop.f32.mrf.mxu1  ;;  %v16639_v45 = vld [vmem:[#allocation84_spill] sm:$0xff] }
 0x7e3   : > { %v9068_v52 = vadd.f32 %v14934_v59, %v8378_v58  ;;  %v8382_v47 = vrot.slane %v8381_v33, 2  ;;  %v7307_v31 = vpack.c.bf16 %v7113_v61, %v7111_v48  ;;  %v3870_v51 = vadd.f32 %v16640_v41, %v16639_v45  ;;  %v6296_v30 = vpop.permute.xlu1 %6295  ;;  %v14971_v58 = vpop.permute.xlu2 %4341 }
 0x7e4   : > { %v8042_v16 = vadd.f32 %v14891_v6, %v7913_v10  ;;  %vm6516_vm11 = vcmp.eq.s32.totalorder %v6296_v30, %v11235_v56  ;;  %v4773_v41 = vpack.c.bf16 %v4682_v15, %v4681_v23 }
 0x7e5   : > { %v9196_v27 = vmax.f32 %v9068_v52, 0.0  ;;  %v8383_v1 = vmax.f32 %v8381_v33, %v8382_v47  ;;  %10333 = vmatmul.msk.bf16.gmra.mxu1 %vm3042_vm6, %v7307_v31 }
 0x7e6   : > { %v8386_v49 = vsel %vm3042_vm6, %v8042_v16, -inf  ;;  %10660 = vset.pattern.permute.xlu1 %v16531_v25  ;;  %v6293_v33 = vpop.permute.xlu0 %6292  ;;  %v6644_v16 = vsel %vm6516_vm11, 1.0, %v16352_v40  ;;  %vm4558_vm11 = vcmp.eq.s32.totalorder %v14878_v21, %v11235_v56  ;;  %v4685_v21 = vsel %vm4557_vm10, 1.0, %v16352_v40 }
 0x7e7   : > { %v8384_v54 = vrot.slane %v8383_v1, 1  ;;  %v8387_v44 = vrot.slane %v8386_v49, 4  ;;  %v5695_v26 = vpop.f32.mrf.mxu3  ;;  %v9491_v36 = vrot.slane %v9196_v27, 6  ;;  %6403 = vperm.xlu1 %10660, %v10839_v63   ;;  %vm6515_vm14 = vcmp.eq.s32.totalorder %v6293_v33, %v11235_v56  ;;  %v10840_v27 = vld [vmem:[%s11025_s18 + $0x3b0] sm:$0xff] }
 0x7e8   : > { %v5960_v48 = vadd.f32 %v5695_v26, %v3870_v51  ;;  %v6643_v45 = vsel %vm6515_vm14, 1.0, %v16352_v40 }
 0x7e9   : > { %v8385_v10 = vmax.f32 %v8383_v1, %v8384_v54  ;;  %v8388_v52 = vmax.f32 %v8386_v49, %v8387_v44  ;;  %v5139_v47 = vpop.f32.mrf.mxu2  ;;  %4452 = vperm.xlu2 %10659, %v10840_v27   ;;  %v6731_v30 = vpack.c.bf16 %v6644_v16, %v6643_v45  ;;  %v9492_v54 = vsel %vm9430_vm13, %v9491_v36, %v9490_v19  ;;  %v16641_v44 = vld [vmem:[#allocation86_spill] sm:$0xff] }
 0x7ea   : > { %v7914_v61 = vadd.f32 %v14752_v43, %v5960_v48  ;;  %v5349_v31 = vpack.c.bf16 %v5139_v47, %v5137_v62  ;;  %v7116_v1 = vpop.f32.mrf.mxu0  ;;  %v14981_v49 = vpop.f32.mrf.mxu1  ;;  %v16642_v48 = vld [vmem:[#allocation55_spill] sm:$0xff] }
 0x7eb   : > { %v9069_v51 = vadd.f32 %v14934_v59, %v8385_v10  ;;  %v8389_v26 = vrot.slane %v8388_v52, 2  ;;  %v3873_v23 = vadd.f32 %v16642_v48, %v16641_v44  ;;  %v16644_v48 = vld [vmem:[#allocation58_spill] sm:$0xff] }
 0x7ec   : > { %v8043_v63 = vadd.f32 %v14891_v6, %v7914_v61  ;;  %10193 = vmatmul.msk.bf16.gmra.mxu3 %vm3042_vm6, %v5349_v31  ;;  %v14989_v31 = vpop.permute.xlu2 %4344 }
 0x7ed   : > { %v9197_v43 = vmax.f32 %v9069_v51, 0.0  ;;  %v8390_v62 = vmax.f32 %v8388_v52, %v8389_v26  ;;  %10270 = vmatmul.msk.bf16.gmra.mxu0 %vm1147_vm2, %v6731_v30  ;;  %v10841_v30 = vld [vmem:[%s11025_s18 + $0x3b8] sm:$0xff] }
 0x7ee   : > { %10130 = vmatmul.msk.bf16.gmra.mxu2 %vm1147_vm2, %v4773_v41  ;;  %v8393_v15 = vsel %vm3042_vm6, %v8043_v63, -inf }
 0x7ef   : > { %v9493_v33 = vrot.slane %v9197_v43, 5  ;;  %v8391_v10 = vrot.slane %v8390_v62, 1  ;;  %v8394_v47 = vrot.slane %v8393_v15, 4  ;;  %v5698_v16 = vpop.f32.mrf.mxu3  ;;  %6406 = vperm.xlu1 %10660, %v10840_v27   ;;  %v4683_v27 = vsel %vm4555_vm1, 1.0, %v16352_v40 }
 0x7f0   : > { %v5961_v61 = vadd.f32 %v5698_v16, %v3873_v23 }
 0x7f1   : > { %v8392_v19 = vmax.f32 %v8390_v62, %v8391_v10  ;;  %v8395_v36 = vmax.f32 %v8393_v15, %v8394_v47  ;;  %v5142_v52 = vpop.f32.mrf.mxu2  ;;  %v9494_v45 = vsel %vm9433_vm15, %v9493_v33, %v9492_v54  ;;  %10662 = vset.pattern.permute.xlu2 %v16531_v25  ;;  %v4684_v54 = vsel %vm4556_vm4, 1.0, %v16352_v40 }
 0x7f2   : > { %v7915_v41 = vadd.f32 %v14772_v18, %v5961_v61  ;;  %6409 = vperm.xlu2 %10662, %v10841_v30   ;;  %v7118_v63 = vpop.f32.mrf.mxu0  ;;  %v15002_v43 = vpop.f32.mrf.mxu1  ;;  %v16643_v18 = vld [vmem:[#allocation88_spill] sm:$0xff]  ;;  %vm4559_vm4 = vcmp.eq.s32.totalorder %v14902_v50, %v11235_v56 }
 0x7f3   : > { %v9070_v51 = vadd.f32 %v14934_v59, %v8392_v19  ;;  %v8396_v26 = vrot.slane %v8395_v36, 2  ;;  %v7308_v44 = vpack.c.bf16 %v7118_v63, %v7116_v1  ;;  %v3875_v23 = vadd.f32 %v16644_v48, %v16643_v18  ;;  %v15009_v61 = vpop.permute.xlu1 %4347 }
 0x7f4   : > { %v8044_v35 = vadd.f32 %v14891_v6, %v7915_v41  ;;  %v4774_v19 = vpack.c.bf16 %v4684_v54, %v4683_v27  ;;  %v6299_v30 = vpop.permute.xlu2 %6298  ;;  %v4687_v50 = vsel %vm4559_vm4, 1.0, %v16352_v40 }
 0x7f5   : > { %v9198_v62 = vmax.f32 %v9070_v51, 0.0  ;;  %v8397_v57 = vmax.f32 %v8395_v36, %v8396_v26  ;;  %10334 = vmatmul.msk.bf16.gmra.mxu1 %vm3042_vm6, %v7308_v44  ;;  %v6302_v51 = vpop.permute.xlu0 %6301  ;;  %vm6517_vm5 = vcmp.eq.s32.totalorder %v6299_v30, %v11235_v56 }
 0x7f6   : > { %v8400_v15 = vsel %vm3042_vm6, %v8044_v35, -inf  ;;  %vm6518_vm8 = vcmp.eq.s32.totalorder %v6302_v51, %v11235_v56  ;;  %v10842_v35 = vld [vmem:[%s11025_s18 + $0x3c0] sm:$0xff]  ;;  %v6645_v27 = vsel %vm6517_vm5, 1.0, %v16352_v40  ;;  %vm4560_vm5 = vcmp.eq.s32.totalorder %v14949_v5, %v11235_v56 }
 0x7f7   : > { %v9495_v33 = vrot.slane %v9198_v62, 4  ;;  %v8398_v10 = vrot.slane %v8397_v57, 1  ;;  %v8401_v47 = vrot.slane %v8400_v15, 4  ;;  %v5700_v16 = vpop.f32.mrf.mxu3  ;;  %10663 = vset.pattern.permute.xlu1 %v16529_v37  ;;  %v6646_v54 = vsel %vm6518_vm8, 1.0, %v16352_v40 }
 0x7f8   : > { %v5962_v41 = vadd.f32 %v5700_v16, %v3875_v23  ;;  %4458 = vperm.xlu1 %10663, %v10842_v35   ;;  %v6732_v18 = vpack.c.bf16 %v6646_v54, %v6645_v27  ;;  %v16645_v16 = vld [vmem:[#allocation90_spill] sm:$0xff]  ;;  %v4688_v5 = vsel %vm4560_vm5, 1.0, %v16352_v40  ;;  %vm4563_vm5 = vcmp.eq.s32.totalorder %v14989_v31, %v11235_v56 }
 0x7f9   : > { %v8399_v1 = vmax.f32 %v8397_v57, %v8398_v10  ;;  %v8402_v36 = vmax.f32 %v8400_v15, %v8401_v47  ;;  %v5144_v26 = vpop.f32.mrf.mxu2  ;;  %v9496_v48 = vsel %vm9436_vm3, %v9495_v33, %v9494_v45 }
 0x7fa   : > { %v7916_v63 = vadd.f32 %v14796_v28, %v5962_v41  ;;  %v5350_v62 = vpack.c.bf16 %v5144_v26, %v5142_v52  ;;  %10664 = vset.pattern.permute.xlu2 %v16529_v37  ;;  %v7121_v15 = vpop.f32.mrf.mxu0  ;;  %v15023_v10 = vpop.f32.mrf.mxu1  ;;  %v10843_v28 = vld [vmem:[%s11025_s18 + $0x3c8] sm:$0xff]  ;;  %v16646_v41 = vld [vmem:[#allocation60_spill] sm:$0xff] }
 0x7fb   : > { %v8403_v44 = vrot.slane %v8402_v36, 2  ;;  %v9071_v57 = vadd.f32 %v14934_v59, %v8399_v1  ;;  %4461 = vperm.xlu2 %10664, %v10843_v28   ;;  %v3878_v30 = vadd.f32 %v16646_v41, %v16645_v16  ;;  %v15031_v26 = vpop.permute.xlu1 %4350  ;;  %v16648_v41 = vld [vmem:[#allocation62_spill] sm:$0xff] }
 0x7fc   : > { %v8045_v23 = vadd.f32 %v14891_v6, %v7916_v63  ;;  %10194 = vmatmul.msk.bf16.gmra.mxu3 %vm3042_vm6, %v5350_v62 }
 0x7fd   : > { %v8404_v52 = vmax.f32 %v8402_v36, %v8403_v44  ;;  %v9199_v47 = vmax.f32 %v9071_v57, 0.0  ;;  %10271 = vmatmul.msk.bf16.gmra.mxu0 %vm1147_vm2, %v6732_v18 }
 0x7fe   : > { %10131 = vmatmul.msk.bf16.gmra.mxu2 %vm1147_vm2, %v4774_v19  ;;  %v8407_v51 = vsel %vm3042_vm6, %v8045_v23, -inf }
 0x7ff   : > { %v8405_v1 = vrot.slane %v8404_v52, 1  ;;  %v8408_v45 = vrot.slane %v8407_v51, 4  ;;  %v5703_v33 = vpop.f32.mrf.mxu3  ;;  %v9497_v35 = vrot.slane %v9199_v47, 3 }
 0x800   : > { %v5963_v63 = vadd.f32 %v5703_v33, %v3878_v30  ;;  %10666 = vset.pattern.permute.xlu1 %v16531_v25 }
 0x801   : > { %v8406_v62 = vmax.f32 %v8404_v52, %v8405_v1  ;;  %v8409_v36 = vmax.f32 %v8407_v51, %v8408_v45  ;;  %v5147_v27 = vpop.f32.mrf.mxu2  ;;  %v9498_v19 = vsel %vm9439_vm7, %v9497_v35, %v9496_v48  ;;  %6415 = vperm.xlu1 %10666, %v10843_v28   ;;  %v10844_v52 = vld [vmem:[%s11025_s18 + $0x3d0] sm:$0xff] }
 0x802   : > { %v7917_v54 = vadd.f32 %v14818_v34, %v5963_v63  ;;  %v7123_v23 = vpop.f32.mrf.mxu0  ;;  %v15040_v47 = vpop.f32.mrf.mxu1  ;;  %v16647_v28 = vld [vmem:[#allocation92_spill] sm:$0xff] }
 0x803   : > { %v8410_v44 = vrot.slane %v8409_v36, 2  ;;  %v9072_v57 = vadd.f32 %v14934_v59, %v8406_v62  ;;  %4464 = vperm.xlu2 %10664, %v10844_v52   ;;  %v7309_v16 = vpack.c.bf16 %v7123_v23, %v7121_v15  ;;  %v3880_v30 = vadd.f32 %v16648_v41, %v16647_v28  ;;  %v6308_v35 = vpop.permute.xlu1 %6307 }
 0x804   : > { %v8046_v18 = vadd.f32 %v14891_v6, %v7917_v54  ;;  %v4686_v15 = vsel %vm4558_vm11, 1.0, %v16352_v40  ;;  %vm6520_vm14 = vcmp.eq.s32.totalorder %v6308_v35, %v11235_v56  ;;  %v6305_v54 = vpop.permute.xlu0 %6304  ;;  %vm4561_vm11 = vcmp.eq.s32.totalorder %v14946_v0, %v11235_v56 }
 0x805   : > { %v8411_v48 = vmax.f32 %v8409_v36, %v8410_v44  ;;  %v9200_v34 = vmax.f32 %v9072_v57, 0.0  ;;  %10335 = vmatmul.msk.bf16.gmra.mxu1 %vm3042_vm6, %v7309_v16  ;;  %v15055_v36 = vpop.permute.xlu2 %4353  ;;  %vm6519_vm1 = vcmp.eq.s32.totalorder %v6305_v54, %v11235_v56  ;;  %v4775_v28 = vpack.c.bf16 %v4686_v15, %v4685_v21 }
 0x806   : > { %v8414_v51 = vsel %vm3042_vm6, %v8046_v18, -inf  ;;  %v6648_v18 = vsel %vm6520_vm14, 1.0, %v16352_v40  ;;  %v6647_v32 = vsel %vm6519_vm1, 1.0, %v16352_v40  ;;  %vm4562_vm14 = vcmp.eq.s32.totalorder %v14971_v58, %v11235_v56 }
 0x807   : > { %v8412_v1 = vrot.slane %v8411_v48, 1  ;;  %v8415_v45 = vrot.slane %v8414_v51, 4  ;;  %v5705_v33 = vpop.f32.mrf.mxu3  ;;  %v9499_v63 = vrot.slane %v9200_v34, 2  ;;  %v4689_v0 = vsel %vm4561_vm11, 1.0, %v16352_v40 }
 0x808   : > { %v5964_v62 = vadd.f32 %v5705_v33, %v3880_v30  ;;  %v6733_v30 = vpack.c.bf16 %v6648_v18, %v6647_v32  ;;  %v10845_v33 = vld [vmem:[%s11025_s18 + $0x3d8] sm:$0xff]  ;;  %v4690_v58 = vsel %vm4562_vm14, 1.0, %v16352_v40  ;;  %vm4565_vm14 = vcmp.eq.s32.totalorder %v15031_v26, %v11235_v56 }
 0x809   : > { %v8416_v44 = vmax.f32 %v8414_v51, %v8415_v45  ;;  %v5149_v57 = vpop.f32.mrf.mxu2  ;;  %10667 = vset.pattern.permute.xlu1 %v16529_v37  ;;  %v8413_v34 = vmax.f32 %v8411_v48, %v8412_v1  ;;  %v9500_v51 = vsel %vm9442_vm12, %v9499_v63, %v9498_v19  ;;  %v16650_v48 = vld [vmem:[#allocation64_spill] sm:$0xff] }
 0x80a   : > { %v7918_v23 = vadd.f32 %v14837_v9, %v5964_v62  ;;  %v5351_v16 = vpack.c.bf16 %v5149_v57, %v5147_v27  ;;  %4467 = vperm.xlu1 %10667, %v10845_v33   ;;  %v7126_v35 = vpop.f32.mrf.mxu0  ;;  %v15066_v54 = vpop.f32.mrf.mxu1  ;;  %v16649_v27 = vld [vmem:[#allocation93_spill] sm:$0xff] }
 0x80b   : > { %v8417_v41 = vrot.slane %v8416_v44, 2  ;;  %10668 = vset.pattern.permute.xlu2 %v16531_v25  ;;  %v9073_v9 = vadd.f32 %v14934_v59, %v8413_v34  ;;  %v3883_v1 = vadd.f32 %v16650_v48, %v16649_v27  ;;  %v16652_v27 = vld [vmem:[#allocation67_spill] sm:$0xff] }
 0x80c   : > { %v8047_v45 = vadd.f32 %v14891_v6, %v7918_v23  ;;  %10195 = vmatmul.msk.bf16.gmra.mxu3 %vm3042_vm6, %v5351_v16  ;;  %6418 = vperm.xlu2 %10668, %v10844_v52  }
 0x80d   : > { %v9201_v19 = vmax.f32 %v9073_v9, 0.0  ;;  %v8418_v63 = vmax.f32 %v8416_v44, %v8417_v41  ;;  %10272 = vmatmul.msk.bf16.gmra.mxu0 %vm1147_vm2, %v6733_v30  ;;  %v15075_v18 = vpop.permute.xlu2 %4356  ;;  %v10846_v41 = vld [vmem:[%s11025_s18 + $0x3e0] sm:$0xff] }
 0x80e   : > { %10132 = vmatmul.msk.bf16.gmra.mxu2 %vm1147_vm2, %v4775_v28  ;;  %v8421_v21 = vsel %vm3042_vm6, %v8047_v45, -inf }
 0x80f   : > { %v8422_v15 = vrot.slane %v8421_v21, 4  ;;  %v5708_v62 = vpop.f32.mrf.mxu3  ;;  %v9501_v23 = vrot.slane %v9201_v19, 1  ;;  %v8419_v44 = vrot.slane %v8418_v63, 1 }
 0x810   : > { %v5965_v57 = vadd.f32 %v5708_v62, %v3883_v1 }
 0x811   : > { %v8423_v16 = vmax.f32 %v8421_v21, %v8422_v15  ;;  %v5152_v32 = vpop.f32.mrf.mxu2  ;;  %v15079_v34 = vsel %vm9445_vm0, %v9501_v23, %v9500_v51  ;;  %v16651_v51 = vld [vmem:[#allocation95_spill] sm:$0xff]  ;;  %v8420_v19 = vmax.f32 %v8418_v63, %v8419_v44 }
 0x812   : > { %v7919_v52 = vadd.f32 %v14854_v22, %v5965_v57  ;;  %4470 = vperm.xlu1 %10667, %v10846_v41   ;;  %v7128_v33 = vpop.f32.mrf.mxu0  ;;  %v15087_v45 = vpop.f32.mrf.mxu1  ;;  %v3885_v48 = vadd.f32 %v16652_v27, %v16651_v51  ;;  %v10847_v21 = vld [vmem:[%s11025_s18 + $0x3e8] sm:$0xff]  ;;  %v4776_v41 = vpack.c.bf16 %v4688_v5, %v4687_v50  ;;  %v16654_v5 = vld [vmem:[#allocation69_spill] sm:$0xff] }
 0x813   : > { %v8424_v28 = vrot.slane %v8423_v16, 2  ;;  %v7310_v9 = vpack.c.bf16 %v7128_v33, %v7126_v35  ;;  %v6311_v35 = vpop.permute.xlu1 %6310  ;;  %v9074_v44 = vadd.f32 %v14934_v59, %v8420_v19  ;;  %v16653_v19 = vld [vmem:[#allocation97_spill] sm:$0xff] }
 0x814   : > { %v8048_v30 = vadd.f32 %v14891_v6, %v7919_v52  ;;  %10669 = vset.pattern.permute.xlu2 %v16529_v37  ;;  %vm6521_vm8 = vcmp.eq.s32.totalorder %v6311_v35, %v11235_v56 }
 0x815   : > { %v8425_v22 = vmax.f32 %v8423_v16, %v8424_v28  ;;  %4473 = vperm.xlu2 %10669, %v10847_v21   ;;  %10336 = vmatmul.msk.bf16.gmra.mxu1 %vm3042_vm6, %v7310_v9  ;;  %v6314_v37 = vpop.permute.xlu2 %6313  ;;  %v6649_v63 = vsel %vm6521_vm8, 1.0, %v16352_v40  ;;  %v9202_v35 = vmax.f32 %v9074_v44, 0.0  ;;  %vm4564_vm8 = vcmp.eq.s32.totalorder %v15009_v61, %v11235_v56 }
 0x816   : > { %v8428_v1 = vsel %vm3042_vm6, %v8048_v30, -inf  ;;  %vm6522_vm10 = vcmp.eq.s32.totalorder %v6314_v37, %v11235_v56  ;;  %v4692_v31 = vsel %vm4564_vm8, 1.0, %v16352_v40  ;;  %vm4567_vm8 = vcmp.eq.s32.totalorder %v15075_v18, %v11235_v56 }
 0x817   : > { %v8426_v15 = vrot.slane %v8425_v22, 1  ;;  %v8429_v62 = vrot.slane %v8428_v1, 4  ;;  %v5710_v57 = vpop.f32.mrf.mxu3  ;;  %v6650_v27 = vsel %vm6522_vm10, 1.0, %v16352_v40 }
 0x818   : > { %v5966_v23 = vadd.f32 %v5710_v57, %v3885_v48  ;;  %v10848_v57 = vld [vmem:[%s11025_s18 + $0x3f0] sm:$0xff] }
 0x819   : > { %v8427_v16 = vmax.f32 %v8425_v22, %v8426_v15  ;;  %v8430_v52 = vmax.f32 %v8428_v1, %v8429_v62  ;;  %v5154_v28 = vpop.f32.mrf.mxu2  ;;  %v6734_v1 = vpack.c.bf16 %v6650_v27, %v6649_v63  ;;  %v3888_v15 = vadd.f32 %v16654_v5, %v16653_v19 }
 0x81a   : > { %v7920_v30 = vadd.f32 %v14885_v55, %v5966_v23  ;;  %v5352_v33 = vpack.c.bf16 %v5154_v28, %v5152_v32  ;;  %10670 = vset.pattern.permute.xlu1 %v16531_v25  ;;  %v7131_v55 = vpop.f32.mrf.mxu0  ;;  %v15107_v32 = vpop.f32.mrf.mxu1 }
 0x81b   : > { %v9075_v51 = vadd.f32 %v14934_v59, %v8427_v16  ;;  %v8431_v9 = vrot.slane %v8430_v52, 2  ;;  %6427 = vperm.xlu1 %10670, %v10847_v21   ;;  %v15115_v21 = vpop.permute.xlu1 %4362 }
 0x81c   : > { %v8049_v22 = vadd.f32 %v14891_v6, %v7920_v30  ;;  %10196 = vmatmul.msk.bf16.gmra.mxu3 %vm3042_vm6, %v5352_v33  ;;  %v15117_v30 = vpop.permute.xlu0 %4359 }
 0x81d   : > { %v9203_v48 = vmax.f32 %v9075_v51, 0.0  ;;  %v8432_v50 = vmax.f32 %v8430_v52, %v8431_v9  ;;  %4476 = vperm.xlu2 %10669, %v10848_v57   ;;  %10273 = vmatmul.msk.bf16.gmra.mxu0 %vm1147_vm2, %v6734_v1 }
 0x81e   : > { %10133 = vmatmul.msk.bf16.gmra.mxu2 %vm1147_vm2, %v4776_v41  ;;  %v8435_v62 = vsel %vm3042_vm6, %v8049_v22, -inf }
 0x81f   : > { %v9503_v23 = vrot.slane %v9203_v48, 7  ;;  %v8433_v37 = vrot.slane %v8432_v50, 1  ;;  %v8436_v16 = vrot.slane %v8435_v62, 4  ;;  %v5713_v28 = vpop.f32.mrf.mxu3 }
 0x820   : > { %v5967_v52 = vadd.f32 %v5713_v28, %v3888_v15  ;;  %v16656_v15 = vld [vmem:[#allocation71_spill] sm:$0xff]  ;;  %v10849_v28 = vld [vmem:[%s11025_s18 + $0x3f8] sm:$0xff] }
 0x821   : > { %v8434_v41 = vmax.f32 %v8432_v50, %v8433_v37  ;;  %v8437_v33 = vmax.f32 %v8435_v62, %v8436_v16  ;;  %v5157_v63 = vpop.f32.mrf.mxu2  ;;  %v9504_v51 = vsel %vm9427_vm9, %v9503_v23, %v9202_v35 }
 0x822   : > { %v7921_v9 = vadd.f32 %v14906_v11, %v5967_v52  ;;  %v7133_v48 = vpop.f32.mrf.mxu0  ;;  %v15125_v1 = vpop.f32.mrf.mxu1  ;;  %v16655_v11 = vld [vmem:[#allocation99_spill] sm:$0xff] }
 0x823   : > { %v9076_v44 = vadd.f32 %v14934_v59, %v8434_v41  ;;  %v8438_v22 = vrot.slane %v8437_v33, 2  ;;  %6430 = vperm.xlu1 %10670, %v10848_v57   ;;  %v7311_v5 = vpack.c.bf16 %v7133_v48, %v7131_v55  ;;  %v3890_v62 = vadd.f32 %v16656_v15, %v16655_v11  ;;  %v6320_v57 = vpop.permute.xlu1 %6319  ;;  %v15138_v41 = vpop.permute.xlu2 %4365 }
 0x824   : > { %v8050_v27 = vadd.f32 %v14891_v6, %v7921_v9  ;;  %vm6524_vm1 = vcmp.eq.s32.totalorder %v6320_v57, %v11235_v56  ;;  %v4777_v11 = vpack.c.bf16 %v4690_v58, %v4689_v0  ;;  %v16657_v0 = vld [vmem:[#allocation101_spill] sm:$0xff] }
 0x825   : > { %v9204_v50 = vmax.f32 %v9076_v44, 0.0  ;;  %v8439_v19 = vmax.f32 %v8437_v33, %v8438_v22  ;;  %10672 = vset.pattern.permute.xlu2 %v16531_v25  ;;  %10337 = vmatmul.msk.bf16.gmra.mxu1 %vm3042_vm6, %v7311_v5  ;;  %v6317_v33 = vpop.permute.xlu0 %6316  ;;  %v6652_v22 = vsel %vm6524_vm1, 1.0, %v16352_v40  ;;  %vm4566_vm1 = vcmp.eq.s32.totalorder %v15055_v36, %v11235_v56 }
 0x826   : > { %v8442_v35 = vsel %vm3042_vm6, %v8050_v27, -inf  ;;  %6433 = vperm.xlu2 %10672, %v10849_v28   ;;  %vm6523_vm4 = vcmp.eq.s32.totalorder %v6317_v33, %v11235_v56  ;;  %v4693_v36 = vsel %vm4565_vm14, 1.0, %v16352_v40 }
 0x827   : > { %v8440_v23 = vrot.slane %v8439_v19, 1  ;;  %v8443_v37 = vrot.slane %v8442_v35, 4  ;;  %v5715_v16 = vpop.f32.mrf.mxu3  ;;  %v9505_v55 = vrot.slane %v9204_v50, 6  ;;  %v6651_v5 = vsel %vm6523_vm4, 1.0, %v16352_v40 }
 0x828   : > { %v5968_v52 = vadd.f32 %v5715_v16, %v3890_v62  ;;  %v6735_v62 = vpack.c.bf16 %v6652_v22, %v6651_v5 }
 0x829   : > { %v8441_v25 = vmax.f32 %v8439_v19, %v8440_v23  ;;  %v8444_v9 = vmax.f32 %v8442_v35, %v8443_v37  ;;  %v5159_v44 = vpop.f32.mrf.mxu2  ;;  %v9506_v23 = vsel %vm9430_vm13, %v9505_v55, %v9504_v51  ;;  %v16658_v37 = vld [vmem:[#allocation73_spill] sm:$0xff] }
 0x82a   : > { %v7922_v27 = vadd.f32 %v14928_v38, %v5968_v52  ;;  %v5353_v48 = vpack.c.bf16 %v5159_v44, %v5157_v63  ;;  %v7136_v19 = vpop.f32.mrf.mxu0  ;;  %v15147_v35 = vpop.f32.mrf.mxu1  ;;  %v3893_v57 = vadd.f32 %v16658_v37, %v16657_v0  ;;  %v16660_v0 = vld [vmem:[#allocation76_spill] sm:$0xff] }
 0x82b   : > { %v9077_v50 = vadd.f32 %v14934_v59, %v8441_v25  ;;  %v8445_v15 = vrot.slane %v8444_v9, 2  ;;  %10673 = vset.pattern.permute.xlu1 %v16350_v2  ;;  %v15156_v22 = vpop.permute.xlu2 %4368 }
 0x82c   : > { %v8051_v16 = vadd.f32 %v14891_v6, %v7922_v27  ;;  %10197 = vmatmul.msk.bf16.gmra.mxu3 %vm3042_vm6, %v5353_v48 }
 0x82d   : > { %v9205_v38 = vmax.f32 %v9077_v50, 0.0  ;;  %v8446_v63 = vmax.f32 %v8444_v9, %v8445_v15  ;;  %10274 = vmatmul.msk.bf16.gmra.mxu0 %vm1147_vm2, %v6735_v62 }
 0x82e   : > { %10134 = vmatmul.msk.bf16.gmra.mxu2 %vm1147_vm2, %v4777_v11  ;;  %v8449_v28 = vsel %vm3042_vm6, %v8051_v16, -inf  ;;  %v4691_v11 = vsel %vm4563_vm5, 1.0, %v16352_v40 }
 0x82f   : > { %v9507_v58 = vrot.slane %v9205_v38, 5  ;;  %v8447_v52 = vrot.slane %v8446_v63, 1  ;;  %v8450_v33 = vrot.slane %v8449_v28, 4  ;;  %v5718_v25 = vpop.f32.mrf.mxu3 }
 0x830   : > { %v5969_v44 = vadd.f32 %v5718_v25, %v3893_v57 }
 0x831   : > { %v8448_v2 = vmax.f32 %v8446_v63, %v8447_v52  ;;  %v8451_v51 = vmax.f32 %v8449_v28, %v8450_v33  ;;  %v5162_v55 = vpop.f32.mrf.mxu2  ;;  %v9508_v9 = vsel %vm9433_vm15, %v9507_v58, %v9506_v23  ;;  %v16659_v63 = vld [vmem:[#allocation102_spill] sm:$0xff]  ;;  %v15174_v52 = vpop.permute.xlu1 %4371  ;;  %v4778_v33 = vpack.c.bf16 %v4692_v31, %v4691_v11 }
 0x832   : > { %v7923_v27 = vadd.f32 %v14959_v3, %v5969_v44  ;;  %v7138_v15 = vpop.f32.mrf.mxu0  ;;  %v15167_v62 = vpop.f32.mrf.mxu1  ;;  %v3895_v61 = vadd.f32 %v16660_v0, %v16659_v63 }
 0x833   : > { %v9078_v48 = vadd.f32 %v14934_v59, %v8448_v2  ;;  %v8452_v5 = vrot.slane %v8451_v51, 2  ;;  %v7312_v23 = vpack.c.bf16 %v7138_v15, %v7136_v19  ;;  %v6323_v44 = vpop.permute.xlu2 %6322  ;;  %v6326_v2 = vpop.permute.xlu0 %6325 }
 0x834   : > { %v8052_v50 = vadd.f32 %v14891_v6, %v7923_v27  ;;  %vm6525_vm10 = vcmp.eq.s32.totalorder %v6323_v44, %v11235_v56  ;;  %vm6526_vm11 = vcmp.eq.s32.totalorder %v6326_v2, %v11235_v56 }
 0x835   : > { %v9206_v16 = vmax.f32 %v9078_v48, 0.0  ;;  %v8453_v38 = vmax.f32 %v8451_v51, %v8452_v5  ;;  %10338 = vmatmul.msk.bf16.gmra.mxu1 %vm3042_vm6, %v7312_v23  ;;  %v6654_v15 = vsel %vm6526_vm11, 1.0, %v16352_v40 }
 0x836   : > { %v8456_v3 = vsel %vm3042_vm6, %v8052_v50, -inf  ;;  %v6653_v50 = vsel %vm6525_vm10, 1.0, %v16352_v40  ;;  %vm4568_vm10 = vcmp.eq.s32.totalorder %v15117_v30, %v11235_v56 }
 0x837   : > { %v9509_v37 = vrot.slane %v9206_v16, 4  ;;  %v8454_v57 = vrot.slane %v8453_v38, 1  ;;  %v8457_v28 = vrot.slane %v8456_v3, 4  ;;  %v5720_v58 = vpop.f32.mrf.mxu3  ;;  %v6736_v23 = vpack.c.bf16 %v6654_v15, %v6653_v50 }
 0x838   : > { %v5970_v25 = vadd.f32 %v5720_v58, %v3895_v61 }
 0x839   : > { %v8455_v27 = vmax.f32 %v8453_v38, %v8454_v57  ;;  %v8458_v51 = vmax.f32 %v8456_v3, %v8457_v28  ;;  %v5164_v19 = vpop.f32.mrf.mxu2  ;;  %v9510_v31 = vsel %vm9436_vm3, %v9509_v37, %v9508_v9  ;;  %v16662_v3 = vld [vmem:[#allocation78_spill] sm:$0xff]  ;;  %v15192_v9 = vpop.permute.xlu1 %4374 }
 0x83a   : > { %v7924_v48 = vadd.f32 %v14981_v49, %v5970_v25  ;;  %v5354_v5 = vpack.c.bf16 %v5164_v19, %v5162_v55  ;;  %v7141_v63 = vpop.f32.mrf.mxu0  ;;  %v15185_v0 = vpop.f32.mrf.mxu1  ;;  %v16661_v55 = vld [vmem:[#allocation104_spill] sm:$0xff] }
 0x83b   : > { %v8459_v16 = vrot.slane %v8458_v51, 2  ;;  %v9079_v11 = vadd.f32 %v14934_v59, %v8455_v27  ;;  %v3898_v57 = vadd.f32 %v16662_v3, %v16661_v55 }
 0x83c   : > { %v8053_v38 = vadd.f32 %v14891_v6, %v7924_v48  ;;  %10198 = vmatmul.msk.bf16.gmra.mxu3 %vm3042_vm6, %v5354_v5 }
 0x83d   : > { %v8460_v61 = vmax.f32 %v8458_v51, %v8459_v16  ;;  %v9207_v49 = vmax.f32 %v9079_v11, 0.0  ;;  %10275 = vmatmul.msk.bf16.gmra.mxu0 %vm1147_vm2, %v6736_v23 }
 0x83e   : > { %10135 = vmatmul.msk.bf16.gmra.mxu2 %vm1147_vm2, %v4778_v33  ;;  %v8463_v28 = vsel %vm3042_vm6, %v8053_v38, -inf }
 0x83f   : > { %v8461_v58 = vrot.slane %v8460_v61, 1  ;;  %v8464_v25 = vrot.slane %v8463_v28, 4  ;;  %v5723_v44 = vpop.f32.mrf.mxu3  ;;  %v9511_v37 = vrot.slane %v9207_v49, 3  ;;  %v16664_v49 = vld [vmem:[#allocation80_spill] sm:$0xff] }
 0x840   : > { %v5971_v2 = vadd.f32 %v5723_v44, %v3898_v57 }
 0x841   : > { %v8462_v27 = vmax.f32 %v8460_v61, %v8461_v58  ;;  %v8465_v19 = vmax.f32 %v8463_v28, %v8464_v25  ;;  %v5167_v51 = vpop.f32.mrf.mxu2  ;;  %v9512_v33 = vsel %vm9439_vm7, %v9511_v37, %v9510_v31  ;;  %v16663_v31 = vld [vmem:[#allocation106_spill] sm:$0xff]  ;;  %v6332_v58 = vpop.permute.xlu1 %6331 }
 0x842   : > { %v7925_v48 = vadd.f32 %v15002_v43, %v5971_v2  ;;  %v7143_v16 = vpop.f32.mrf.mxu0  ;;  %v15200_v23 = vpop.f32.mrf.mxu1  ;;  %v3900_v43 = vadd.f32 %v16664_v49, %v16663_v31  ;;  %vm6528_vm4 = vcmp.eq.s32.totalorder %v6332_v58, %v11235_v56 }
 0x843   : > { %v8466_v5 = vrot.slane %v8465_v19, 2  ;;  %v9080_v50 = vadd.f32 %v14934_v59, %v8462_v27  ;;  %v7313_v38 = vpack.c.bf16 %v7143_v16, %v7141_v63  ;;  %v4694_v63 = vsel %vm4566_vm1, 1.0, %v16352_v40  ;;  %v15214_v37 = vpop.permute.xlu2 %4377  ;;  %v6329_v2 = vpop.permute.xlu0 %6328 }
 0x844   : > { %v8054_v15 = vadd.f32 %v14891_v6, %v7925_v48  ;;  %v6656_v48 = vsel %vm6528_vm4, 1.0, %v16352_v40  ;;  %vm6527_vm5 = vcmp.eq.s32.totalorder %v6329_v2, %v11235_v56  ;;  %v4779_v16 = vpack.c.bf16 %v4694_v63, %v4693_v36 }
 0x845   : > { %v8467_v11 = vmax.f32 %v8465_v19, %v8466_v5  ;;  %v9208_v61 = vmax.f32 %v9080_v50, 0.0  ;;  %10339 = vmatmul.msk.bf16.gmra.mxu1 %vm3042_vm6, %v7313_v38  ;;  %v6655_v26 = vsel %vm6527_vm5, 1.0, %v16352_v40  ;;  %vm4569_vm1 = vcmp.eq.s32.totalorder %v15115_v21, %v11235_v56 }
 0x846   : > { %v8470_v55 = vsel %vm3042_vm6, %v8054_v15, -inf  ;;  %vm4570_vm4 = vcmp.eq.s32.totalorder %v15138_v41, %v11235_v56 }
 0x847   : > { %v8468_v3 = vrot.slane %v8467_v11, 1  ;;  %v8471_v57 = vrot.slane %v8470_v55, 4  ;;  %v5725_v28 = vpop.f32.mrf.mxu3  ;;  %v9513_v25 = vrot.slane %v9208_v61, 2  ;;  %v6737_v61 = vpack.c.bf16 %v6656_v48, %v6655_v26 }
 0x848   : > { %v5972_v44 = vadd.f32 %v5725_v28, %v3900_v43 }
 0x849   : > { %v8472_v27 = vmax.f32 %v8470_v55, %v8471_v57  ;;  %v5169_v19 = vpop.f32.mrf.mxu2  ;;  %v8469_v15 = vmax.f32 %v8467_v11, %v8468_v3  ;;  %v9514_v31 = vsel %vm9442_vm12, %v9513_v25, %v9512_v33 }
 0x84a   : > { %v7926_v5 = vadd.f32 %v15023_v10, %v5972_v44  ;;  %v5355_v50 = vpack.c.bf16 %v5169_v19, %v5167_v51  ;;  %v7146_v43 = vpop.f32.mrf.mxu0  ;;  %v15223_v55 = vpop.f32.mrf.mxu1  ;;  %v16665_v10 = vld [vmem:[#allocation108_spill] sm:$0xff]  ;;  %v16666_v51 = vld [vmem:[#allocation82_spill] sm:$0xff] }
 0x84b   : > { %v8473_v38 = vrot.slane %v8472_v27, 2  ;;  %v9081_v57 = vadd.f32 %v14934_v59, %v8469_v15  ;;  %v3903_v28 = vadd.f32 %v16666_v51, %v16665_v10  ;;  %v15231_v25 = vpop.permute.xlu2 %4380  ;;  %v4696_v10 = vsel %vm4568_vm10, 1.0, %v16352_v40 }
 0x84c   : > { %v8055_v49 = vadd.f32 %v14891_v6, %v7926_v5  ;;  %10199 = vmatmul.msk.bf16.gmra.mxu3 %vm3042_vm6, %v5355_v50  ;;  %v15244_v50 = vld [vmem:[%s16319_s4] sm:$0xff]  ;;  %vm4571_vm10 = vcmp.eq.s32.totalorder %v15156_v22, %v11235_v56 }
 0x84d   : > { %v9209_v3 = vmax.f32 %v9081_v57, 0.0  ;;  %v8474_v58 = vmax.f32 %v8472_v27, %v8473_v38  ;;  %10276 = vmatmul.msk.bf16.gmra.mxu0 %vm1147_vm2, %v6737_v61  ;;  %v16667_v61 = vld [vmem:[#allocation110_spill] sm:$0xff] }
 0x84e   : > { %10136 = vmatmul.msk.bf16.gmra.mxu2 %vm1147_vm2, %v4779_v16  ;;  %v8477_v11 = vsel %vm3042_vm6, %v8055_v49, -inf  ;;  %v4695_v49 = vsel %vm4567_vm8, 1.0, %v16352_v40 }
 0x84f   : > { %v8478_v36 = vrot.slane %v8477_v11, 4  ;;  %v5728_v33 = vpop.f32.mrf.mxu3  ;;  %v9515_v63 = vrot.slane %v9209_v3, 1  ;;  %v8475_v5 = vrot.slane %v8474_v58, 1  ;;  %v6335_v3 = vpop.permute.xlu1 %6334 }
 0x850   : > { %v5973_v6 = vadd.f32 %v5728_v33, %v3903_v28  ;;  %vm6529_vm11 = vcmp.eq.s32.totalorder %v6335_v3, %v11235_v56 }
 0x851   : > { %v8479_v44 = vmax.f32 %v8477_v11, %v8478_v36  ;;  %v5172_v2 = vpop.f32.mrf.mxu2  ;;  %v15235_v48 = vsel %vm9445_vm0, %v9515_v63, %v9514_v31  ;;  %v16668_v31 = vld [vmem:[#allocation85_spill] sm:$0xff]  ;;  %v8476_v30 = vmax.f32 %v8474_v58, %v8475_v5  ;;  %v6657_v58 = vsel %vm6529_vm11, 1.0, %v16352_v40 }
 0x852   : > { %v7927_v19 = vadd.f32 %v15040_v47, %v5973_v6  ;;  %v7148_v15 = vpop.f32.mrf.mxu0  ;;  %v15247_v47 = vpop.f32.mrf.mxu1  ;;  %v3905_v18 = vadd.f32 %v16668_v31, %v16667_v61  ;;  %vm4572_vm11 = vcmp.eq.s32.totalorder %v15174_v52, %v11235_v56 }
 0x853   : > { %v8480_v27 = vrot.slane %v8479_v44, 2  ;;  %v7314_v38 = vpack.c.bf16 %v7148_v15, %v7146_v43  ;;  %v6338_v43 = vpop.permute.xlu2 %6337  ;;  %v9082_v5 = vadd.f32 %v14934_v59, %v8476_v30  ;;  %v4700_v22 = vsel %vm4572_vm11, 1.0, %v16352_v40 }
 0x854   : > { %v8056_v26 = vadd.f32 %v15244_v50, %v7927_v19  ;;  %vm6530_vm14 = vcmp.eq.s32.totalorder %v6338_v43, %v11235_v56  ;;  %vm4575_vm11 = vcmp.eq.s32.totalorder %v15231_v25, %v11235_v56 }
 0x855   : > { %v8481_v16 = vmax.f32 %v8479_v44, %v8480_v27  ;;  %10340 = vmatmul.msk.bf16.gmra.mxu1 %vm3042_vm6, %v7314_v38  ;;  %v4780_v44 = vpack.c.bf16 %v4696_v10, %v4695_v49  ;;  %v16669_v49 = vld [vmem:[#allocation111_spill] sm:$0xff]  ;;  %v9210_v10 = vmax.f32 %v9082_v5, 0.0 }
 0x856   : > { %v8484_v57 = vsel %vm3042_vm6, %v8056_v26, -inf }
 0x857   : > { %v8482_v51 = vrot.slane %v8481_v16, 1  ;;  %v8485_v28 = vrot.slane %v8484_v57, 4  ;;  %v5730_v11 = vpop.f32.mrf.mxu3 }
 0x858   : > { %v5974_v36 = vadd.f32 %v5730_v11, %v3905_v18 }
 0x859   : > { %v8483_v33 = vmax.f32 %v8481_v16, %v8482_v51  ;;  %v8486_v6 = vmax.f32 %v8484_v57, %v8485_v28  ;;  %v5174_v63 = vpop.f32.mrf.mxu2  ;;  %v6658_v16 = vsel %vm6530_vm14, 1.0, %v16352_v40  ;;  %v16670_v57 = vld [vmem:[#allocation87_spill] sm:$0xff] }
 0x85a   : > { %v7928_v19 = vadd.f32 %v15066_v54, %v5974_v36  ;;  %v5356_v27 = vpack.c.bf16 %v5174_v63, %v5172_v2  ;;  %v7151_v61 = vpop.f32.mrf.mxu0  ;;  %v15264_v31 = vpop.f32.mrf.mxu1  ;;  %v6738_v18 = vpack.c.bf16 %v6658_v16, %v6657_v58  ;;  %v15280_v58 = vld [vmem:[%s16318_s3] ss:$0 sm:$0xff] }
 0x85b   : > { %v9083_v26 = vadd.f32 %v14934_v59, %v8483_v33  ;;  %v8487_v15 = vrot.slane %v8486_v6, 2  ;;  %v3908_v59 = vadd.f32 %v16670_v57, %v16669_v49  ;;  %v15271_v36 = vpop.permute.xlu1 %4386  ;;  %v15273_v33 = vpop.permute.xlu0 %4383  ;;  %v16672_v49 = vld [vmem:[#allocation89_spill] sm:$0xff] }
 0x85c   : > { %v8057_v38 = vadd.f32 %v15244_v50, %v7928_v19  ;;  %10200 = vmatmul.msk.bf16.gmra.mxu3 %vm3042_vm6, %v5356_v27 }
 0x85d   : > { %v9211_v54 = vmax.f32 %v9083_v26, 0.0  ;;  %v8488_v2 = vmax.f32 %v8486_v6, %v8487_v15  ;;  %10277 = vmatmul.msk.bf16.gmra.mxu0 %vm1147_vm2, %v6738_v18  ;;  %v16671_v18 = vld [vmem:[#allocation113_spill] sm:$0xff] }
 0x85e   : > { %10137 = vmatmul.msk.bf16.gmra.mxu2 %vm1147_vm2, %v4780_v44  ;;  %v8491_v30 = vsel %vm3042_vm6, %v8057_v38, -inf  ;;  %v3910_v57 = vadd.f32 %v16672_v49, %v16671_v18 }
 0x85f   : > { %v9517_v51 = vrot.slane %v9211_v54, 7  ;;  %v8489_v28 = vrot.slane %v8488_v2, 1  ;;  %v8492_v11 = vrot.slane %v8491_v30, 4  ;;  %v5733_v3 = vpop.f32.mrf.mxu3 }
 0x860   : > { %v5975_v43 = vadd.f32 %v5733_v3, %v3908_v59 }
 0x861   : > { %v8490_v6 = vmax.f32 %v8488_v2, %v8489_v28  ;;  %v8493_v63 = vmax.f32 %v8491_v30, %v8492_v11  ;;  %v5177_v44 = vpop.f32.mrf.mxu2  ;;  %v9518_v19 = vsel %vm9427_vm9, %v9517_v51, %v9210_v10  ;;  %v4697_v30 = vsel %vm4569_vm1, 1.0, %v16352_v40 }
 0x862   : > { %v7929_v27 = vadd.f32 %v15087_v45, %v5975_v43  ;;  %v7153_v38 = vpop.f32.mrf.mxu0  ;;  %v15286_v16 = vpop.f32.mrf.mxu1  ;;  %v4698_v11 = vsel %vm4570_vm4, 1.0, %v16352_v40  ;;  %vm4573_vm4 = vcmp.eq.s32.totalorder %v15192_v9, %v11235_v56 }
 0x863   : > { %v9084_v5 = vadd.f32 %v15280_v58, %v8490_v6  ;;  %v8494_v26 = vrot.slane %v8493_v63, 2  ;;  %v7315_v2 = vpack.c.bf16 %v7153_v38, %v7151_v61  ;;  %v6344_v28 = vpop.permute.xlu1 %6343  ;;  %v15297_v61 = vpop.permute.xlu2 %4389 }
 0x864   : > { %v8058_v15 = vadd.f32 %v15244_v50, %v7929_v27  ;;  %vm6532_vm5 = vcmp.eq.s32.totalorder %v6344_v28, %v11235_v56  ;;  %v6341_v43 = vpop.permute.xlu0 %6340 }
 0x865   : > { %v9212_v45 = vmax.f32 %v9084_v5, 0.0  ;;  %v8495_v54 = vmax.f32 %v8493_v63, %v8494_v26  ;;  %10341 = vmatmul.msk.bf16.gmra.mxu1 %vm3042_vm6, %v7315_v2  ;;  %v6660_v5 = vsel %vm6532_vm5, 1.0, %v16352_v40  ;;  %vm6531_vm8 = vcmp.eq.s32.totalorder %v6341_v43, %v11235_v56 }
 0x866   : > { %v8498_v59 = vsel %vm3042_vm6, %v8058_v15, -inf  ;;  %v6659_v38 = vsel %vm6531_vm8, 1.0, %v16352_v40  ;;  %v4781_v2 = vpack.c.bf16 %v4698_v11, %v4697_v30  ;;  %vm4574_vm5 = vcmp.eq.s32.totalorder %v15214_v37, %v11235_v56 }
 0x867   : > { %v8496_v10 = vrot.slane %v8495_v54, 1  ;;  %v8499_v21 = vrot.slane %v8498_v59, 4  ;;  %v5735_v51 = vpop.f32.mrf.mxu3  ;;  %v9519_v3 = vrot.slane %v9212_v45, 6  ;;  %v6739_v49 = vpack.c.bf16 %v6660_v5, %v6659_v38 }
 0x868   : > { %v5976_v41 = vadd.f32 %v5735_v51, %v3910_v57  ;;  %v4701_v37 = vsel %vm4573_vm4, 1.0, %v16352_v40 }
 0x869   : > { %v8497_v6 = vmax.f32 %v8495_v54, %v8496_v10  ;;  %v8500_v63 = vmax.f32 %v8498_v59, %v8499_v21  ;;  %v5179_v27 = vpop.f32.mrf.mxu2  ;;  %v9520_v10 = vsel %vm9430_vm13, %v9519_v3, %v9518_v19 }
 0x86a   : > { %v7930_v26 = vadd.f32 %v15107_v32, %v5976_v41  ;;  %v5357_v15 = vpack.c.bf16 %v5179_v27, %v5177_v44  ;;  %v7156_v54 = vpop.f32.mrf.mxu0  ;;  %v15306_v59 = vpop.f32.mrf.mxu1  ;;  %v16673_v32 = vld [vmem:[#allocation115_spill] sm:$0xff] }
 0x86b   : > { %v9085_v45 = vadd.f32 %v15280_v58, %v8497_v6  ;;  %v8501_v18 = vrot.slane %v8500_v63, 2  ;;  %v16674_v44 = vld [vmem:[#allocation91_spill] sm:$0xff]  ;;  %v15314_v5 = vpop.permute.xlu2 %4392 }
 0x86c   : > { %v8059_v57 = vadd.f32 %v15244_v50, %v7930_v26  ;;  %10201 = vmatmul.msk.bf16.gmra.mxu3 %vm3042_vm6, %v5357_v15  ;;  %v3913_v30 = vadd.f32 %v16674_v44, %v16673_v32  ;;  %v16675_v32 = vld [vmem:[#allocation117_spill] sm:$0xff]  ;;  %v16676_v44 = vld [vmem:[#allocation94_spill] sm:$0xff] }
 0x86d   : > { %v9213_v21 = vmax.f32 %v9085_v45, 0.0  ;;  %v8502_v51 = vmax.f32 %v8500_v63, %v8501_v18  ;;  %10278 = vmatmul.msk.bf16.gmra.mxu0 %vm1147_vm2, %v6739_v49  ;;  %v4699_v45 = vsel %vm4571_vm10, 1.0, %v16352_v40  ;;  %v3915_v52 = vadd.f32 %v16676_v44, %v16675_v32 }
 0x86e   : > { %10138 = vmatmul.msk.bf16.gmra.mxu2 %vm1147_vm2, %v4781_v2  ;;  %v8505_v28 = vsel %vm3042_vm6, %v8059_v57, -inf }
 0x86f   : > { %v9521_v11 = vrot.slane %v9213_v21, 5  ;;  %v8503_v41 = vrot.slane %v8502_v51, 1  ;;  %v8506_v43 = vrot.slane %v8505_v28, 4  ;;  %v5738_v6 = vpop.f32.mrf.mxu3 }
 0x870   : > { %v5977_v27 = vadd.f32 %v5738_v6, %v3913_v30  ;;  %v4782_v6 = vpack.c.bf16 %v4700_v22, %v4699_v45 }
 0x871   : > { %v8504_v19 = vmax.f32 %v8502_v51, %v8503_v41  ;;  %v8507_v3 = vmax.f32 %v8505_v28, %v8506_v43  ;;  %v5182_v63 = vpop.f32.mrf.mxu2  ;;  %v9522_v26 = vsel %vm9433_vm15, %v9521_v11, %v9520_v10  ;;  %v15332_v43 = vpop.permute.xlu1 %4395 }
 0x872   : > { %v7931_v15 = vadd.f32 %v15125_v1, %v5977_v27  ;;  %v7158_v49 = vpop.f32.mrf.mxu0  ;;  %v15325_v57 = vpop.f32.mrf.mxu1 }
 0x873   : > { %v9086_v38 = vadd.f32 %v15280_v58, %v8504_v19  ;;  %v8508_v2 = vrot.slane %v8507_v3, 2  ;;  %v7316_v10 = vpack.c.bf16 %v7158_v49, %v7156_v54  ;;  %v6347_v19 = vpop.permute.xlu2 %6346 }
 0x874   : > { %v8060_v18 = vadd.f32 %v15244_v50, %v7931_v15  ;;  %v6350_v15 = vpop.permute.xlu0 %6349  ;;  %vm6533_vm14 = vcmp.eq.s32.totalorder %v6347_v19, %v11235_v56 }
 0x875   : > { %v9214_v21 = vmax.f32 %v9086_v38, 0.0  ;;  %v8509_v51 = vmax.f32 %v8507_v3, %v8508_v2  ;;  %10342 = vmatmul.msk.bf16.gmra.mxu1 %vm3042_vm6, %v7316_v10  ;;  %vm6534_vm1 = vcmp.eq.s32.totalorder %v6350_v15, %v11235_v56  ;;  %v6661_v49 = vsel %vm6533_vm14, 1.0, %v16352_v40 }
 0x876   : > { %v8512_v1 = vsel %vm3042_vm6, %v8060_v18, -inf  ;;  %vm4576_vm14 = vcmp.eq.s32.totalorder %v15273_v33, %v11235_v56 }
 0x877   : > { %v9523_v30 = vrot.slane %v9214_v21, 4  ;;  %v8510_v28 = vrot.slane %v8509_v51, 1  ;;  %v8513_v11 = vrot.slane %v8512_v1, 4  ;;  %v5740_v41 = vpop.f32.mrf.mxu3  ;;  %v6662_v21 = vsel %vm6534_vm1, 1.0, %v16352_v40 }
 0x878   : > { %v5978_v27 = vadd.f32 %v5740_v41, %v3915_v52  ;;  %v6740_v32 = vpack.c.bf16 %v6662_v21, %v6661_v49 }
 0x879   : > { %v8511_v38 = vmax.f32 %v8509_v51, %v8510_v28  ;;  %v8514_v3 = vmax.f32 %v8512_v1, %v8513_v11  ;;  %v5184_v54 = vpop.f32.mrf.mxu2  ;;  %v9524_v22 = vsel %vm9436_vm3, %v9523_v30, %v9522_v26  ;;  %v16678_v28 = vld [vmem:[#allocation96_spill] sm:$0xff]  ;;  %v15350_v26 = vpop.permute.xlu1 %4398 }
 0x87a   : > { %v7932_v2 = vadd.f32 %v15147_v35, %v5978_v27  ;;  %v5358_v18 = vpack.c.bf16 %v5184_v54, %v5182_v63  ;;  %v7161_v44 = vpop.f32.mrf.mxu0  ;;  %v15343_v52 = vpop.f32.mrf.mxu1  ;;  %v16677_v63 = vld [vmem:[#allocation119_spill] sm:$0xff] }
 0x87b   : > { %v8515_v10 = vrot.slane %v8514_v3, 2  ;;  %v9087_v45 = vadd.f32 %v15280_v58, %v8511_v38  ;;  %v3918_v11 = vadd.f32 %v16678_v28, %v16677_v63 }
 0x87c   : > { %v8061_v51 = vadd.f32 %v15244_v50, %v7932_v2  ;;  %10202 = vmatmul.msk.bf16.gmra.mxu3 %vm3042_vm6, %v5358_v18 }
 0x87d   : > { %v8516_v1 = vmax.f32 %v8514_v3, %v8515_v10  ;;  %v9215_v35 = vmax.f32 %v9087_v45, 0.0  ;;  %10279 = vmatmul.msk.bf16.gmra.mxu0 %vm1147_vm2, %v6740_v32 }
 0x87e   : > { %10139 = vmatmul.msk.bf16.gmra.mxu2 %vm1147_vm2, %v4782_v6  ;;  %v8519_v41 = vsel %vm3042_vm6, %v8061_v51, -inf }
 0x87f   : > { %v8517_v27 = vrot.slane %v8516_v1, 1  ;;  %v8520_v19 = vrot.slane %v8519_v41, 4  ;;  %v5743_v15 = vpop.f32.mrf.mxu3  ;;  %v9525_v30 = vrot.slane %v9215_v35, 3 }
 0x880   : > { %v5979_v38 = vadd.f32 %v5743_v15, %v3918_v11 }
 0x881   : > { %v8518_v54 = vmax.f32 %v8516_v1, %v8517_v27  ;;  %v8521_v2 = vmax.f32 %v8519_v41, %v8520_v19  ;;  %v5187_v3 = vpop.f32.mrf.mxu2  ;;  %v9526_v6 = vsel %vm9439_vm7, %v9525_v30, %v9524_v22  ;;  %v16679_v22 = vld [vmem:[#allocation98_spill] sm:$0xff]  ;;  %v6356_v27 = vpop.permute.xlu1 %6355 }
 0x882   : > { %v7933_v18 = vadd.f32 %v15167_v62, %v5979_v38  ;;  %v7163_v32 = vpop.f32.mrf.mxu0  ;;  %v15358_v45 = vpop.f32.mrf.mxu1  ;;  %v3920_v62 = vadd.f32 %v16679_v22, %v12897_v12  ;;  %vm6536_vm8 = vcmp.eq.s32.totalorder %v6356_v27, %v11235_v56 }
 0x883   : > { %v8522_v49 = vrot.slane %v8521_v2, 2  ;;  %v9088_v21 = vadd.f32 %v15280_v58, %v8518_v54  ;;  %v7317_v1 = vpack.c.bf16 %v7163_v32, %v7161_v44  ;;  %v4702_v44 = vsel %vm4574_vm5, 1.0, %v16352_v40  ;;  %v15372_v12 = vpop.permute.xlu2 %4401  ;;  %v6353_v30 = vpop.permute.xlu0 %6352 }
 0x884   : > { %v8062_v10 = vadd.f32 %v15244_v50, %v7933_v18  ;;  %vm6535_vm10 = vcmp.eq.s32.totalorder %v6353_v30, %v11235_v56  ;;  %vm4577_vm5 = vcmp.eq.s32.totalorder %v15271_v36, %v11235_v56 }
 0x885   : > { %v8523_v51 = vmax.f32 %v8521_v2, %v8522_v49  ;;  %v9216_v35 = vmax.f32 %v9088_v21, 0.0  ;;  %10343 = vmatmul.msk.bf16.gmra.mxu1 %vm3042_vm6, %v7317_v1  ;;  %v6664_v2 = vsel %vm6536_vm8, 1.0, %v16352_v40  ;;  %v6663_v9 = vsel %vm6535_vm10, 1.0, %v16352_v40 }
 0x886   : > { %v8526_v63 = vsel %vm3042_vm6, %v8062_v10, -inf  ;;  %v4783_v10 = vpack.c.bf16 %v4702_v44, %v4701_v37  ;;  %v6741_v1 = vpack.c.bf16 %v6664_v2, %v6663_v9  ;;  %vm4578_vm8 = vcmp.eq.s32.totalorder %v15297_v61, %v11235_v56 }
 0x887   : > { %v8524_v28 = vrot.slane %v8523_v51, 1  ;;  %v8527_v11 = vrot.slane %v8526_v63, 4  ;;  %v5745_v41 = vpop.f32.mrf.mxu3  ;;  %v9527_v19 = vrot.slane %v9216_v35, 2 }
 0x888   : > { %v5980_v15 = vadd.f32 %v5745_v41, %v3920_v62 }
 0x889   : > { %v8528_v38 = vmax.f32 %v8526_v63, %v8527_v11  ;;  %v5189_v54 = vpop.f32.mrf.mxu2  ;;  %v8525_v21 = vmax.f32 %v8523_v51, %v8524_v28  ;;  %v9528_v35 = vsel %vm9442_vm12, %v9527_v19, %v9526_v6 }
 0x88a   : > { %v7934_v18 = vadd.f32 %v15185_v0, %v5980_v15  ;;  %v5359_v49 = vpack.c.bf16 %v5189_v54, %v5187_v3  ;;  %v7166_v62 = vpop.f32.mrf.mxu0  ;;  %v15381_v63 = vpop.f32.mrf.mxu1  ;;  %v16680_v0 = vld [vmem:[#allocation100_spill] sm:$0xff] }
 0x88b   : > { %v8529_v32 = vrot.slane %v8528_v38, 2  ;;  %v9089_v11 = vadd.f32 %v15280_v58, %v8525_v21  ;;  %v3923_v3 = vadd.f32 %v16680_v0, %v12918_v17  ;;  %v15389_v37 = vpop.permute.xlu2 %4404 }
 0x88c   : > { %v8063_v22 = vadd.f32 %v15244_v50, %v7934_v18  ;;  %10203 = vmatmul.msk.bf16.gmra.mxu3 %vm3042_vm6, %v5359_v49 }
 0x88d   : > { %v9217_v28 = vmax.f32 %v9089_v11, 0.0  ;;  %v8530_v41 = vmax.f32 %v8528_v38, %v8529_v32  ;;  %10280 = vmatmul.msk.bf16.gmra.mxu0 %vm1147_vm2, %v6741_v1  ;;  %v4703_v1 = vsel %vm4575_vm11, 1.0, %v16352_v40 }
 0x88e   : > { %10140 = vmatmul.msk.bf16.gmra.mxu2 %vm1147_vm2, %v4783_v10  ;;  %v8533_v51 = vsel %vm3042_vm6, %v8063_v22, -inf  ;;  %v4704_v22 = vsel %vm4576_vm14, 1.0, %v16352_v40  ;;  %vm4579_vm14 = vcmp.eq.s32.totalorder %v15314_v5, %v11235_v56 }
 0x88f   : > { %v8534_v27 = vrot.slane %v8533_v51, 4  ;;  %v5748_v6 = vpop.f32.mrf.mxu3  ;;  %v9529_v44 = vrot.slane %v9217_v28, 1  ;;  %v8531_v17 = vrot.slane %v8530_v41, 1 }
 0x890   : > { %v5981_v19 = vadd.f32 %v5748_v6, %v3923_v3  ;;  %v6359_v3 = vpop.permute.xlu1 %6358  ;;  %v4784_v6 = vpack.c.bf16 %v4704_v22, %v4703_v1 }
 0x891   : > { %v8535_v15 = vmax.f32 %v8533_v51, %v8534_v27  ;;  %v5192_v30 = vpop.f32.mrf.mxu2  ;;  %v15393_v2 = vsel %vm9445_vm0, %v9529_v44, %v9528_v35  ;;  %v8532_v25 = vmax.f32 %v8530_v41, %v8531_v17  ;;  %vm6537_vm1 = vcmp.eq.s32.totalorder %v6359_v3, %v11235_v56 }
 0x892   : > { %v7935_v54 = vadd.f32 %v15200_v23, %v5981_v19  ;;  %v7168_v49 = vpop.f32.mrf.mxu0  ;;  %v15400_v9 = vpop.f32.mrf.mxu1  ;;  %v16681_v23 = vld [vmem:[#allocation103_spill] sm:$0xff]  ;;  %v6665_v41 = vsel %vm6537_vm1, 1.0, %v16352_v40  ;;  %vm4580_vm1 = vcmp.eq.s32.totalorder %v15332_v43, %v11235_v56 }
 0x893   : > { %v8536_v38 = vrot.slane %v8535_v15, 2  ;;  %v7318_v10 = vpack.c.bf16 %v7168_v49, %v7166_v62  ;;  %v3925_v32 = vadd.f32 %v16681_v23, %v12932_v53  ;;  %v6362_v62 = vpop.permute.xlu2 %6361  ;;  %v16682_v23 = vld [vmem:[#allocation105_spill] sm:$0xff]  ;;  %v4708_v5 = vsel %vm4580_vm1, 1.0, %v16352_v40 }
 0x894   : > { %v8064_v18 = vadd.f32 %v15244_v50, %v7935_v54  ;;  %vm6538_vm4 = vcmp.eq.s32.totalorder %v6362_v62, %v11235_v56  ;;  %vm4583_vm1 = vcmp.eq.s32.totalorder %v15389_v37, %v11235_v56 }
 0x895   : > { %v8537_v21 = vmax.f32 %v8535_v15, %v8536_v38  ;;  %10344 = vmatmul.msk.bf16.gmra.mxu1 %vm3042_vm6, %v7318_v10  ;;  %v9090_v15 = vadd.f32 %v15280_v58, %v8532_v25 }
 0x896   : > { %v8540_v35 = vsel %vm3042_vm6, %v8064_v18, -inf  ;;  %v6666_v18 = vsel %vm6538_vm4, 1.0, %v16352_v40 }
 0x897   : > { %v8538_v11 = vrot.slane %v8537_v21, 1  ;;  %v8541_v0 = vrot.slane %v8540_v35, 4  ;;  %v5750_v33 = vpop.f32.mrf.mxu3  ;;  %v6742_v10 = vpack.c.bf16 %v6666_v18, %v6665_v41  ;;  %v16683_v18 = vld [vmem:[#allocation107_spill] sm:$0xff] }
 0x898   : > { %v5982_v51 = vadd.f32 %v5750_v33, %v3925_v32  ;;  %v3928_v32 = vadd.f32 %v16682_v23, %v12948_v8  ;;  %v15424_v33 = vpop.permute.xlu1 %4410 }
 0x899   : > { %v8539_v28 = vmax.f32 %v8537_v21, %v8538_v11  ;;  %v8542_v27 = vmax.f32 %v8540_v35, %v8541_v0  ;;  %v5194_v53 = vpop.f32.mrf.mxu2  ;;  %v9218_v35 = vmax.f32 %v9090_v15, 0.0 }
 0x89a   : > { %v7936_v19 = vadd.f32 %v15223_v55, %v5982_v51  ;;  %v5360_v44 = vpack.c.bf16 %v5194_v53, %v5192_v30  ;;  %v7171_v49 = vpop.f32.mrf.mxu0  ;;  %v15417_v21 = vpop.f32.mrf.mxu1 }
 0x89b   : > { %v9091_v54 = vadd.f32 %v15280_v58, %v8539_v28  ;;  %v8543_v17 = vrot.slane %v8542_v27, 2  ;;  %v15426_v51 = vpop.permute.xlu0 %4407 }
 0x89c   : > { %v8065_v38 = vadd.f32 %v15244_v50, %v7936_v19  ;;  %10204 = vmatmul.msk.bf16.gmra.mxu3 %vm3042_vm6, %v5360_v44 }
 0x89d   : > { %v9219_v55 = vmax.f32 %v9091_v54, 0.0  ;;  %v8544_v30 = vmax.f32 %v8542_v27, %v8543_v17  ;;  %10281 = vmatmul.msk.bf16.gmra.mxu0 %vm1147_vm2, %v6742_v10 }
 0x89e   : > { %10141 = vmatmul.msk.bf16.gmra.mxu2 %vm1147_vm2, %v4784_v6  ;;  %v8547_v1 = vsel %vm3042_vm6, %v8065_v38, -inf }
 0x89f   : > { %v9531_v25 = vrot.slane %v9219_v55, 7  ;;  %v8545_v22 = vrot.slane %v8544_v30, 1  ;;  %v8548_v11 = vrot.slane %v8547_v1, 4  ;;  %v5753_v0 = vpop.f32.mrf.mxu3 }
 0x8a0   : > { %v5983_v3 = vadd.f32 %v5753_v0, %v3928_v32  ;;  %v6368_v32 = vpop.permute.xlu1 %6367 }
 0x8a1   : > { %v8546_v62 = vmax.f32 %v8544_v30, %v8545_v22  ;;  %v8549_v28 = vmax.f32 %v8547_v1, %v8548_v11  ;;  %v5197_v27 = vpop.f32.mrf.mxu2  ;;  %v9532_v53 = vsel %vm9427_vm9, %v9531_v25, %v9218_v35  ;;  %v4705_v30 = vsel %vm4577_vm5, 1.0, %v16352_v40 }
 0x8a2   : > { %v7937_v8 = vadd.f32 %v15247_v47, %v5983_v3  ;;  %v7173_v41 = vpop.f32.mrf.mxu0  ;;  %v15434_v15 = vpop.f32.mrf.mxu1  ;;  %v3930_v47 = vadd.f32 %v16683_v18, %v12960_v24  ;;  %v4706_v1 = vsel %vm4578_vm8, 1.0, %v16352_v40  ;;  %vm6540_vm10 = vcmp.eq.s32.totalorder %v6368_v32, %v11235_v56 }
 0x8a3   : > { %v9092_v6 = vadd.f32 %v15280_v58, %v8546_v62  ;;  %v8550_v19 = vrot.slane %v8549_v28, 2  ;;  %v7319_v38 = vpack.c.bf16 %v7173_v41, %v7171_v49  ;;  %v15445_v49 = vpop.permute.xlu2 %4413  ;;  %v6365_v25 = vpop.permute.xlu0 %6364  ;;  %v6668_v0 = vsel %vm6540_vm10, 1.0, %v16352_v40 }
 0x8a4   : > { %v8066_v44 = vadd.f32 %v15244_v50, %v7937_v8  ;;  %vm6539_vm11 = vcmp.eq.s32.totalorder %v6365_v25, %v11235_v56  ;;  %v4785_v8 = vpack.c.bf16 %v4706_v1, %v4705_v30  ;;  %vm4581_vm8 = vcmp.eq.s32.totalorder %v15350_v26, %v11235_v56 }
 0x8a5   : > { %v9220_v54 = vmax.f32 %v9092_v6, 0.0  ;;  %v8551_v17 = vmax.f32 %v8549_v28, %v8550_v19  ;;  %10345 = vmatmul.msk.bf16.gmra.mxu1 %vm3042_vm6, %v7319_v38  ;;  %v6667_v28 = vsel %vm6539_vm11, 1.0, %v16352_v40  ;;  %vm4582_vm10 = vcmp.eq.s32.totalorder %v15372_v12, %v11235_v56 }
 0x8a6   : > { %v8554_v55 = vsel %vm3042_vm6, %v8066_v44, -inf  ;;  %v6743_v44 = vpack.c.bf16 %v6668_v0, %v6667_v28  ;;  %v4709_v12 = vsel %vm4581_vm8, 1.0, %v16352_v40 }
 0x8a7   : > { %v8552_v10 = vrot.slane %v8551_v17, 1  ;;  %v8555_v36 = vrot.slane %v8554_v55, 4  ;;  %v5755_v23 = vpop.f32.mrf.mxu3  ;;  %v9533_v35 = vrot.slane %v9220_v54, 6 }
 0x8a8   : > { %v5984_v61 = vadd.f32 %v5755_v23, %v3930_v47 }
 0x8a9   : > { %v8553_v24 = vmax.f32 %v8551_v17, %v8552_v10  ;;  %v8556_v22 = vmax.f32 %v8554_v55, %v8555_v36  ;;  %v5199_v11 = vpop.f32.mrf.mxu2  ;;  %v9534_v38 = vsel %vm9430_vm13, %v9533_v35, %v9532_v53 }
 0x8aa   : > { %v7938_v3 = vadd.f32 %v15264_v31, %v5984_v61  ;;  %v5361_v62 = vpack.c.bf16 %v5199_v11, %v5197_v27  ;;  %v7176_v54 = vpop.f32.mrf.mxu0  ;;  %v15454_v17 = vpop.f32.mrf.mxu1  ;;  %v16684_v31 = vld [vmem:[#allocation109_spill] sm:$0xff]  ;;  %v4707_v11 = vsel %vm4579_vm14, 1.0, %v16352_v40 }
 0x8ab   : > { %v9093_v6 = vadd.f32 %v15280_v58, %v8553_v24  ;;  %v8557_v19 = vrot.slane %v8556_v22, 2  ;;  %v3933_v27 = vadd.f32 %v16684_v31, %v12975_v42  ;;  %v15462_v1 = vpop.permute.xlu2 %4416  ;;  %v4786_v31 = vpack.c.bf16 %v4708_v5, %v4707_v11 }
 0x8ac   : > { %v8067_v41 = vadd.f32 %v15244_v50, %v7938_v3  ;;  %10205 = vmatmul.msk.bf16.gmra.mxu3 %vm3042_vm6, %v5361_v62 }
 0x8ad   : > { %v9221_v18 = vmax.f32 %v9093_v6, 0.0  ;;  %v8558_v47 = vmax.f32 %v8556_v22, %v8557_v19  ;;  %10282 = vmatmul.msk.bf16.gmra.mxu0 %vm1147_vm2, %v6743_v44  ;;  %v16685_v19 = vld [vmem:[#allocation112_spill] sm:$0xff] }
 0x8ae   : > { %10142 = vmatmul.msk.bf16.gmra.mxu2 %vm1147_vm2, %v4785_v8  ;;  %v8561_v55 = vsel %vm3042_vm6, %v8067_v41, -inf  ;;  %v3935_v43 = vadd.f32 %v16685_v19, %v12989_v7 }
 0x8af   : > { %v9535_v30 = vrot.slane %v9221_v18, 5  ;;  %v8559_v10 = vrot.slane %v8558_v47, 1  ;;  %v8562_v36 = vrot.slane %v8561_v55, 4  ;;  %v5758_v23 = vpop.f32.mrf.mxu3 }
 0x8b0   : > { %v5985_v32 = vadd.f32 %v5758_v23, %v3933_v27 }
 0x8b1   : > { %v8560_v53 = vmax.f32 %v8558_v47, %v8559_v10  ;;  %v8563_v35 = vmax.f32 %v8561_v55, %v8562_v36  ;;  %v5202_v61 = vpop.f32.mrf.mxu2  ;;  %v9536_v25 = vsel %vm9433_vm15, %v9535_v30, %v9534_v38  ;;  %v15480_v47 = vpop.permute.xlu1 %4419 }
 0x8b2   : > { %v7939_v42 = vadd.f32 %v15286_v16, %v5985_v32  ;;  %v7178_v3 = vpop.f32.mrf.mxu0  ;;  %v15473_v62 = vpop.f32.mrf.mxu1 }
 0x8b3   : > { %v9094_v24 = vadd.f32 %v15280_v58, %v8560_v53  ;;  %v8564_v22 = vrot.slane %v8563_v35, 2  ;;  %v7320_v6 = vpack.c.bf16 %v7178_v3, %v7176_v54  ;;  %v6371_v55 = vpop.permute.xlu2 %6370  ;;  %v6374_v30 = vpop.permute.xlu0 %6373 }
 0x8b4   : > { %v8068_v0 = vadd.f32 %v15244_v50, %v7939_v42  ;;  %vm6541_vm4 = vcmp.eq.s32.totalorder %v6371_v55, %v11235_v56  ;;  %vm6542_vm5 = vcmp.eq.s32.totalorder %v6374_v30, %v11235_v56 }
 0x8b5   : > { %v9222_v28 = vmax.f32 %v9094_v24, 0.0  ;;  %v8565_v8 = vmax.f32 %v8563_v35, %v8564_v22  ;;  %10346 = vmatmul.msk.bf16.gmra.mxu1 %vm3042_vm6, %v7320_v6  ;;  %v6669_v32 = vsel %vm6541_vm4, 1.0, %v16352_v40  ;;  %v6670_v53 = vsel %vm6542_vm5, 1.0, %v16352_v40 }
 0x8b6   : > { %v8568_v16 = vsel %vm3042_vm6, %v8068_v0, -inf  ;;  %v6744_v42 = vpack.c.bf16 %v6670_v53, %v6669_v32  ;;  %v16687_v32 = vld [vmem:[#allocation116_spill] sm:$0xff]  ;;  %vm4584_vm4 = vcmp.eq.s32.totalorder %v15426_v51, %v11235_v56 }
 0x8b7   : > { %v9537_v44 = vrot.slane %v9222_v28, 4  ;;  %v8566_v41 = vrot.slane %v8565_v8, 1  ;;  %v8569_v38 = vrot.slane %v8568_v16, 4  ;;  %v5760_v18 = vpop.f32.mrf.mxu3 }
 0x8b8   : > { %v5986_v27 = vadd.f32 %v5760_v18, %v3935_v43 }
 0x8b9   : > { %v8567_v10 = vmax.f32 %v8565_v8, %v8566_v41  ;;  %v8570_v36 = vmax.f32 %v8568_v16, %v8569_v38  ;;  %v5204_v54 = vpop.f32.mrf.mxu2  ;;  %v9538_v22 = vsel %vm9436_vm3, %v9537_v44, %v9536_v25  ;;  %v15498_v25 = vpop.permute.xlu1 %4422 }
 0x8ba   : > { %v7940_v7 = vadd.f32 %v15306_v59, %v5986_v27  ;;  %v5362_v23 = vpack.c.bf16 %v5204_v54, %v5202_v61  ;;  %v7181_v0 = vpop.f32.mrf.mxu0  ;;  %v15491_v3 = vpop.f32.mrf.mxu1  ;;  %v16686_v61 = vld [vmem:[#allocation114_spill] sm:$0xff] }
 0x8bb   : > { %v8571_v35 = vrot.slane %v8570_v36, 2  ;;  %v9095_v24 = vadd.f32 %v15280_v58, %v8567_v10  ;;  %v3938_v28 = vadd.f32 %v16686_v61, %v13006_v39 }
 0x8bc   : > { %v8069_v11 = vadd.f32 %v15244_v50, %v7940_v7  ;;  %10206 = vmatmul.msk.bf16.gmra.mxu3 %vm3042_vm6, %v5362_v23 }
 0x8bd   : > { %v8572_v5 = vmax.f32 %v8570_v36, %v8571_v35  ;;  %v9223_v59 = vmax.f32 %v9095_v24, 0.0  ;;  %10283 = vmatmul.msk.bf16.gmra.mxu0 %vm1147_vm2, %v6744_v42 }
 0x8be   : > { %10143 = vmatmul.msk.bf16.gmra.mxu2 %vm1147_vm2, %v4786_v31  ;;  %v8575_v8 = vsel %vm3042_vm6, %v8069_v11, -inf }
 0x8bf   : > { %v8573_v6 = vrot.slane %v8572_v5, 1  ;;  %v8576_v19 = vrot.slane %v8575_v8, 4  ;;  %v5763_v43 = vpop.f32.mrf.mxu3  ;;  %v9539_v16 = vrot.slane %v9223_v59, 3  ;;  %v6377_v59 = vpop.permute.xlu0 %6376 }
 0x8c0   : > { %v5987_v44 = vadd.f32 %v5763_v43, %v3938_v28  ;;  %vm6543_vm14 = vcmp.eq.s32.totalorder %v6377_v59, %v11235_v56 }
 0x8c1   : > { %v8574_v41 = vmax.f32 %v8572_v5, %v8573_v6  ;;  %v8577_v38 = vmax.f32 %v8575_v8, %v8576_v19  ;;  %v5207_v18 = vpop.f32.mrf.mxu2  ;;  %v9540_v31 = vsel %vm9439_vm7, %v9539_v16, %v9538_v22  ;;  %v6380_v22 = vpop.permute.xlu1 %6379  ;;  %v6671_v26 = vsel %vm6543_vm14, 1.0, %v16352_v40 }
 0x8c2   : > { %v7941_v27 = vadd.f32 %v15325_v57, %v5987_v44  ;;  %v7183_v10 = vpop.f32.mrf.mxu0  ;;  %v15506_v36 = vpop.f32.mrf.mxu1  ;;  %v3940_v57 = vadd.f32 %v16687_v32, %v13016_v4  ;;  %vm6544_vm11 = vcmp.eq.s32.totalorder %v6380_v22, %v11235_v56 }
 0x8c3   : > { %v8578_v55 = vrot.slane %v8577_v38, 2  ;;  %v9096_v39 = vadd.f32 %v15280_v58, %v8574_v41  ;;  %v7321_v7 = vpack.c.bf16 %v7183_v10, %v7181_v0  ;;  %v4710_v0 = vsel %vm4582_vm10, 1.0, %v16352_v40  ;;  %v15520_v4 = vpop.permute.xlu2 %4425 }
 0x8c4   : > { %v8070_v30 = vadd.f32 %v15244_v50, %v7941_v27  ;;  %v6672_v8 = vsel %vm6544_vm11, 1.0, %v16352_v40  ;;  %v4787_v16 = vpack.c.bf16 %v4710_v0, %v4709_v12  ;;  %vm4585_vm10 = vcmp.eq.s32.totalorder %v15424_v33, %v11235_v56 }
 0x8c5   : > { %v8579_v54 = vmax.f32 %v8577_v38, %v8578_v55  ;;  %v9224_v23 = vmax.f32 %v9096_v39, 0.0  ;;  %10347 = vmatmul.msk.bf16.gmra.mxu1 %vm3042_vm6, %v7321_v7  ;;  %v6745_v41 = vpack.c.bf16 %v6672_v8, %v6671_v26  ;;  %v4711_v8 = vsel %vm4583_vm1, 1.0, %v16352_v40 }
 0x8c6   : > { %v8582_v53 = vsel %vm3042_vm6, %v8070_v30, -inf  ;;  %vm4586_vm11 = vcmp.eq.s32.totalorder %v15445_v49, %v11235_v56 }
 0x8c7   : > { %v8580_v35 = vrot.slane %v8579_v54, 1  ;;  %v8583_v42 = vrot.slane %v8582_v53, 4  ;;  %v5765_v24 = vpop.f32.mrf.mxu3  ;;  %v9541_v11 = vrot.slane %v9224_v23, 2 }
 0x8c8   : > { %v5988_v5 = vadd.f32 %v5765_v24, %v3940_v57 }
 0x8c9   : > { %v8584_v61 = vmax.f32 %v8582_v53, %v8583_v42  ;;  %v5209_v28 = vpop.f32.mrf.mxu2  ;;  %v8581_v43 = vmax.f32 %v8579_v54, %v8580_v35  ;;  %v9542_v38 = vsel %vm9442_vm12, %v9541_v11, %v9540_v31 }
 0x8ca   : > { %v7942_v6 = vadd.f32 %v15343_v52, %v5988_v5  ;;  %v5363_v19 = vpack.c.bf16 %v5209_v28, %v5207_v18  ;;  %v7186_v55 = vpop.f32.mrf.mxu0  ;;  %v15529_v39 = vpop.f32.mrf.mxu1  ;;  %v16688_v52 = vld [vmem:[#allocation118_spill] sm:$0xff] }
 0x8cb   : > { %v8585_v44 = vrot.slane %v8584_v61, 2  ;;  %v9097_v30 = vadd.f32 %v15280_v58, %v8581_v43  ;;  %v3943_v18 = vadd.f32 %v16688_v52, %v13029_v60  ;;  %v15537_v57 = vpop.permute.xlu2 %4428 }
 0x8cc   : > { %v8071_v27 = vadd.f32 %v15244_v50, %v7942_v6  ;;  %10207 = vmatmul.msk.bf16.gmra.mxu3 %vm3042_vm6, %v5363_v19  ;;  %v4712_v19 = vsel %vm4584_vm4, 1.0, %v16352_v40  ;;  %vm4587_vm4 = vcmp.eq.s32.totalorder %v15462_v1, %v11235_v56 }
 0x8cd   : > { %v9225_v54 = vmax.f32 %v9097_v30, 0.0  ;;  %v8586_v7 = vmax.f32 %v8584_v61, %v8585_v44  ;;  %10284 = vmatmul.msk.bf16.gmra.mxu0 %vm1147_vm2, %v6745_v41  ;;  %v4715_v1 = vsel %vm4587_vm4, 1.0, %v16352_v40 }
 0x8ce   : > { %10144 = vmatmul.msk.bf16.gmra.mxu2 %vm1147_vm2, %v4787_v16  ;;  %v8589_v10 = vsel %vm3042_vm6, %v8071_v27, -inf  ;;  %v6383_v16 = vpop.permute.xlu1 %6382 }
 0x8cf   : > { %v8590_v23 = vrot.slane %v8589_v10, 4  ;;  %v5768_v31 = vpop.f32.mrf.mxu3  ;;  %v9543_v53 = vrot.slane %v9225_v54, 1  ;;  %v8587_v60 = vrot.slane %v8586_v7, 1  ;;  %vm6545_vm5 = vcmp.eq.s32.totalorder %v6383_v16, %v11235_v56 }
 0x8d0   : > { %v5989_v32 = vadd.f32 %v5768_v31, %v3943_v18  ;;  %v6673_v18 = vsel %vm6545_vm5, 1.0, %v16352_v40  ;;  %vm4588_vm5 = vcmp.eq.s32.totalorder %v15480_v47, %v11235_v56 }
 0x8d1   : > { %v8591_v35 = vmax.f32 %v8589_v10, %v8590_v23  ;;  %v5212_v42 = vpop.f32.mrf.mxu2  ;;  %v15541_v22 = vsel %vm9445_vm0, %v9543_v53, %v9542_v38  ;;  %v8588_v37 = vmax.f32 %v8586_v7, %v8587_v60  ;;  %v16691_v60 = vld [vmem:[#allocation121_spill] sm:$0xff] }
 0x8d2   : > { %v7943_v24 = vadd.f32 %v15358_v45, %v5989_v32  ;;  %v7188_v0 = vpop.f32.mrf.mxu0  ;;  %v15548_v5 = vpop.f32.mrf.mxu1  ;;  %v16689_v45 = vld [vmem:[#allocation120_spill] sm:$0xff] }
 0x8d3   : > { %v8592_v11 = vrot.slane %v8591_v35, 2  ;;  %v7322_v61 = vpack.c.bf16 %v7188_v0, %v7186_v55  ;;  %v3945_v28 = vadd.f32 %v16689_v45, %v13041_v29  ;;  %v6386_v41 = vpop.permute.xlu2 %6385  ;;  %v4788_v55 = vpack.c.bf16 %v4712_v19, %v4711_v8 }
 0x8d4   : > { %v8072_v12 = vadd.f32 %v15244_v50, %v7943_v24  ;;  %v9098_v10 = vadd.f32 %v15280_v58, %v8588_v37  ;;  %vm6546_vm8 = vcmp.eq.s32.totalorder %v6386_v41, %v11235_v56  ;;  %v16690_v24 = vld [vmem:[#allocation129_spill] sm:$0xff] }
 0x8d5   : > { %v8593_v59 = vmax.f32 %v8591_v35, %v8592_v11  ;;  %10348 = vmatmul.msk.bf16.gmra.mxu1 %vm3042_vm6, %v7322_v61  ;;  %v6674_v31 = vsel %vm6546_vm8, 1.0, %v16352_v40  ;;  %v3948_v11 = vadd.f32 %v16691_v60, %v16690_v24  ;;  %v15584_v41 = vld [vmem:[%s16319_s4] sm:$0xff] }
 0x8d6   : > { %v8596_v6 = vsel %vm3042_vm6, %v8072_v12, -inf  ;;  %v9226_v0 = vmax.f32 %v9098_v10, 0.0 }
 0x8d7   : > { %v8594_v26 = vrot.slane %v8593_v59, 1  ;;  %v8597_v43 = vrot.slane %v8596_v6, 4  ;;  %v5770_v51 = vpop.f32.mrf.mxu3 }
 0x8d8   : > { %v5990_v44 = vadd.f32 %v5770_v51, %v3945_v28  ;;  %v15572_v28 = vpop.permute.xlu1 %4434 }
 0x8d9   : > { %v8595_v38 = vmax.f32 %v8593_v59, %v8594_v26  ;;  %v8598_v27 = vmax.f32 %v8596_v6, %v8597_v43  ;;  %v5214_v29 = vpop.f32.mrf.mxu2  ;;  %v15574_v6 = vpop.permute.xlu0 %4431 }
 0x8da   : > { %v7944_v30 = vadd.f32 %v15381_v63, %v5990_v44  ;;  %v5364_v52 = vpack.c.bf16 %v5214_v29, %v5212_v42  ;;  %v7191_v32 = vpop.f32.mrf.mxu0  ;;  %v15565_v53 = vpop.f32.mrf.mxu1  ;;  %v6746_v42 = vpack.c.bf16 %v6674_v31, %v6673_v18  ;;  %v16693_v18 = vld [vmem:[#allocation122_spill] sm:$0xff] }
 0x8db   : > { %v9099_v54 = vadd.f32 %v15280_v58, %v8595_v38  ;;  %v8599_v7 = vrot.slane %v8598_v27, 2 }
 0x8dc   : > { %v8073_v23 = vadd.f32 %v15244_v50, %v7944_v30  ;;  %10208 = vmatmul.msk.bf16.gmra.mxu3 %vm3042_vm6, %v5364_v52  ;;  %v16692_v52 = vld [vmem:[#allocation131_spill] sm:$0xff] }
 0x8dd   : > { %v9227_v63 = vmax.f32 %v9099_v54, 0.0  ;;  %v8600_v35 = vmax.f32 %v8598_v27, %v8599_v7  ;;  %10285 = vmatmul.msk.bf16.gmra.mxu0 %vm1147_vm2, %v6746_v42  ;;  %v3950_v10 = vadd.f32 %v16693_v18, %v16692_v52  ;;  %v4713_v54 = vsel %vm4585_vm10, 1.0, %v16352_v40 }
 0x8de   : > { %10145 = vmatmul.msk.bf16.gmra.mxu2 %vm1147_vm2, %v4788_v55  ;;  %v8603_v12 = vsel %vm3042_vm6, %v8073_v23, -inf }
 0x8df   : > { %v9545_v59 = vrot.slane %v9227_v63, 7  ;;  %v8601_v50 = vrot.slane %v8600_v35, 1  ;;  %v8604_v61 = vrot.slane %v8603_v12, 4  ;;  %v5773_v45 = vpop.f32.mrf.mxu3 }
 0x8e0   : > { %v5991_v8 = vadd.f32 %v5773_v45, %v3948_v11  ;;  %v6392_v63 = vpop.permute.xlu1 %6391 }
 0x8e1   : > { %v8602_v37 = vmax.f32 %v8600_v35, %v8601_v50  ;;  %v8605_v19 = vmax.f32 %v8603_v12, %v8604_v61  ;;  %v5217_v26 = vpop.f32.mrf.mxu2  ;;  %v9546_v43 = vsel %vm9427_vm9, %v9545_v59, %v9226_v0  ;;  %v4714_v35 = vsel %vm4586_vm11, 1.0, %v16352_v40  ;;  %v6389_v24 = vpop.permute.xlu0 %6388 }
 0x8e2   : > { %v7945_v51 = vadd.f32 %v15400_v9, %v5991_v8  ;;  %v7193_v27 = vpop.f32.mrf.mxu0  ;;  %v15587_v29 = vpop.f32.mrf.mxu1  ;;  %vm6548_vm14 = vcmp.eq.s32.totalorder %v6392_v63, %v11235_v56  ;;  %vm6547_vm1 = vcmp.eq.s32.totalorder %v6389_v24, %v11235_v56  ;;  %v4789_v45 = vpack.c.bf16 %v4714_v35, %v4713_v54  ;;  %v15626_v35 = vld [vmem:[%s16318_s3] ss:$0 sm:$0xff] }
 0x8e3   : > { %v9100_v16 = vadd.f32 %v15280_v58, %v8602_v37  ;;  %v8606_v44 = vrot.slane %v8605_v19, 2  ;;  %v7323_v30 = vpack.c.bf16 %v7193_v27, %v7191_v32  ;;  %v15598_v32 = vpop.permute.xlu2 %4437  ;;  %v6676_v0 = vsel %vm6548_vm14, 1.0, %v16352_v40 }
 0x8e4   : > { %v8074_v38 = vadd.f32 %v15584_v41, %v7945_v51  ;;  %v6675_v61 = vsel %vm6547_vm1, 1.0, %v16352_v40  ;;  %vm4589_vm11 = vcmp.eq.s32.totalorder %v15498_v25, %v11235_v56  ;;  %vm4590_vm14 = vcmp.eq.s32.totalorder %v15520_v4, %v11235_v56 }
 0x8e5   : > { %v9228_v9 = vmax.f32 %v9100_v16, 0.0  ;;  %v8607_v55 = vmax.f32 %v8605_v19, %v8606_v44  ;;  %10349 = vmatmul.msk.bf16.gmra.mxu1 %vm3042_vm6, %v7323_v30  ;;  %v6747_v19 = vpack.c.bf16 %v6676_v0, %v6675_v61  ;;  %v4717_v4 = vsel %vm4589_vm11, 1.0, %v16352_v40 }
 0x8e6   : > { %v8610_v33 = vsel %vm3042_vm6, %v8074_v38, -inf }
 0x8e7   : > { %v8608_v7 = vrot.slane %v8607_v55, 1  ;;  %v8611_v23 = vrot.slane %v8610_v33, 4  ;;  %v5775_v31 = vpop.f32.mrf.mxu3  ;;  %v9547_v42 = vrot.slane %v9228_v9, 6 }
 0x8e8   : > { %v5992_v49 = vadd.f32 %v5775_v31, %v3950_v10 }
 0x8e9   : > { %v8609_v60 = vmax.f32 %v8607_v55, %v8608_v7  ;;  %v8612_v11 = vmax.f32 %v8610_v33, %v8611_v23  ;;  %v5219_v12 = vpop.f32.mrf.mxu2  ;;  %v9548_v38 = vsel %vm9430_vm13, %v9547_v42, %v9546_v43 }
 0x8ea   : > { %v7946_v59 = vadd.f32 %v15417_v21, %v5992_v49  ;;  %v5365_v50 = vpack.c.bf16 %v5219_v12, %v5217_v26  ;;  %v7196_v16 = vpop.f32.mrf.mxu0  ;;  %v15607_v44 = vpop.f32.mrf.mxu1  ;;  %v16694_v21 = vld [vmem:[#allocation133_spill] sm:$0xff]  ;;  %v16695_v26 = vld [vmem:[#allocation123_spill] sm:$0xff]  ;;  %v4716_v12 = vsel %vm4588_vm5, 1.0, %v16352_v40  ;;  %vm4591_vm5 = vcmp.eq.s32.totalorder %v15537_v57, %v11235_v56 }
 0x8eb   : > { %v9101_v8 = vadd.f32 %v15280_v58, %v8609_v60  ;;  %v8613_v37 = vrot.slane %v8612_v11, 2  ;;  %v3953_v55 = vadd.f32 %v16695_v26, %v16694_v21  ;;  %v15615_v54 = vpop.permute.xlu2 %4440  ;;  %v6398_v26 = vpop.permute.xlu0 %6397 }
 0x8ec   : > { %v8075_v51 = vadd.f32 %v15584_v41, %v7946_v59  ;;  %10209 = vmatmul.msk.bf16.gmra.mxu3 %vm3042_vm6, %v5365_v50  ;;  %v16696_v59 = vld [vmem:[#allocation135_spill] sm:$0xff]  ;;  %v16697_v50 = vld [vmem:[#allocation124_spill] sm:$0xff]  ;;  %vm6550_vm10 = vcmp.eq.s32.totalorder %v6398_v26, %v11235_v56 }
 0x8ed   : > { %v9229_v27 = vmax.f32 %v9101_v8, 0.0  ;;  %v8614_v9 = vmax.f32 %v8612_v11, %v8613_v37  ;;  %10286 = vmatmul.msk.bf16.gmra.mxu0 %vm1147_vm2, %v6747_v19  ;;  %v3955_v61 = vadd.f32 %v16697_v50, %v16696_v59 }
 0x8ee   : > { %10146 = vmatmul.msk.bf16.gmra.mxu2 %vm1147_vm2, %v4789_v45  ;;  %v8617_v58 = vsel %vm3042_vm6, %v8075_v51, -inf }
 0x8ef   : > { %v9549_v30 = vrot.slane %v9229_v27, 5  ;;  %v8615_v52 = vrot.slane %v8614_v9, 1  ;;  %v8618_v18 = vrot.slane %v8617_v58, 4  ;;  %v5778_v10 = vpop.f32.mrf.mxu3  ;;  %v4790_v27 = vpack.c.bf16 %v4716_v12, %v4715_v1 }
 0x8f0   : > { %v5993_v33 = vadd.f32 %v5778_v10, %v3953_v55  ;;  %v6678_v10 = vsel %vm6550_vm10, 1.0, %v16352_v40 }
 0x8f1   : > { %v8616_v43 = vmax.f32 %v8614_v9, %v8615_v52  ;;  %v8619_v7 = vmax.f32 %v8617_v58, %v8618_v18  ;;  %v5222_v23 = vpop.f32.mrf.mxu2  ;;  %v9550_v31 = vsel %vm9433_vm15, %v9549_v30, %v9548_v38  ;;  %v15638_v38 = vpop.permute.xlu1 %4443 }
 0x8f2   : > { %v7947_v63 = vadd.f32 %v15434_v15, %v5993_v33  ;;  %v7198_v60 = vpop.f32.mrf.mxu0  ;;  %v15631_v11 = vpop.f32.mrf.mxu1 }
 0x8f3   : > { %v9102_v42 = vadd.f32 %v15626_v35, %v8616_v43  ;;  %v8620_v49 = vrot.slane %v8619_v7, 2  ;;  %v7324_v15 = vpack.c.bf16 %v7198_v60, %v7196_v16  ;;  %v6395_v21 = vpop.permute.xlu2 %6394  ;;  %v16699_v60 = vld [vmem:[#allocation125_spill] sm:$0xff] }
 0x8f4   : > { %v8076_v24 = vadd.f32 %v15584_v41, %v7947_v63  ;;  %vm6549_vm8 = vcmp.eq.s32.totalorder %v6395_v21, %v11235_v56 }
 0x8f5   : > { %v9230_v47 = vmax.f32 %v9102_v42, 0.0  ;;  %v8621_v0 = vmax.f32 %v8619_v7, %v8620_v49  ;;  %10350 = vmatmul.msk.bf16.gmra.mxu1 %vm3042_vm6, %v7324_v15  ;;  %v6677_v18 = vsel %vm6549_vm8, 1.0, %v16352_v40  ;;  %vm4592_vm8 = vcmp.eq.s32.totalorder %v15574_v6, %v11235_v56 }
 0x8f6   : > { %v8624_v45 = vsel %vm3042_vm6, %v8076_v24, -inf  ;;  %v6748_v43 = vpack.c.bf16 %v6678_v10, %v6677_v18  ;;  %v16701_v18 = vld [vmem:[#allocation126_spill] sm:$0xff] }
 0x8f7   : > { %v9551_v8 = vrot.slane %v9230_v47, 4  ;;  %v8622_v37 = vrot.slane %v8621_v0, 1  ;;  %v8625_v19 = vrot.slane %v8624_v45, 4  ;;  %v5780_v51 = vpop.f32.mrf.mxu3 }
 0x8f8   : > { %v5994_v9 = vadd.f32 %v5780_v51, %v3955_v61 }
 0x8f9   : > { %v8623_v55 = vmax.f32 %v8621_v0, %v8622_v37  ;;  %v8626_v58 = vmax.f32 %v8624_v45, %v8625_v19  ;;  %v5224_v16 = vpop.f32.mrf.mxu2  ;;  %v9552_v63 = vsel %vm9436_vm3, %v9551_v8, %v9550_v31  ;;  %v15656_v31 = vpop.permute.xlu1 %4446 }
 0x8fa   : > { %v7948_v30 = vadd.f32 %v15454_v17, %v5994_v9  ;;  %v5366_v52 = vpack.c.bf16 %v5224_v16, %v5222_v23  ;;  %v7201_v49 = vpop.f32.mrf.mxu0  ;;  %v15649_v1 = vpop.f32.mrf.mxu1  ;;  %v16698_v23 = vld [vmem:[#allocation137_spill] sm:$0xff] }
 0x8fb   : > { %v8627_v33 = vrot.slane %v8626_v58, 2  ;;  %v9103_v7 = vadd.f32 %v15626_v35, %v8623_v55  ;;  %v3958_v12 = vadd.f32 %v16699_v60, %v16698_v23  ;;  %v6401_v23 = vpop.permute.xlu0 %6400 }
 0x8fc   : > { %v8077_v42 = vadd.f32 %v15584_v41, %v7948_v30  ;;  %10210 = vmatmul.msk.bf16.gmra.mxu3 %vm3042_vm6, %v5366_v52  ;;  %v16700_v52 = vld [vmem:[#allocation139_spill] sm:$0xff]  ;;  %vm6551_vm4 = vcmp.eq.s32.totalorder %v6401_v23, %v11235_v56 }
 0x8fd   : > { %v8628_v24 = vmax.f32 %v8626_v58, %v8627_v33  ;;  %v9231_v17 = vmax.f32 %v9103_v7, 0.0  ;;  %10287 = vmatmul.msk.bf16.gmra.mxu0 %vm1147_vm2, %v6748_v43  ;;  %v6679_v25 = vsel %vm6551_vm4, 1.0, %v16352_v40 }
 0x8fe   : > { %10147 = vmatmul.msk.bf16.gmra.mxu2 %vm1147_vm2, %v4790_v27  ;;  %v8631_v47 = vsel %vm3042_vm6, %v8077_v42, -inf }
 0x8ff   : > { %v8629_v0 = vrot.slane %v8628_v24, 1  ;;  %v8632_v15 = vrot.slane %v8631_v47, 4  ;;  %v5783_v59 = vpop.f32.mrf.mxu3  ;;  %v9553_v50 = vrot.slane %v9231_v17, 3  ;;  %v15678_v17 = vpop.permute.xlu2 %4449 }
 0x900   : > { %v5995_v61 = vadd.f32 %v5783_v59, %v3958_v12 }
 0x901   : > { %v8630_v45 = vmax.f32 %v8628_v24, %v8629_v0  ;;  %v8633_v8 = vmax.f32 %v8631_v47, %v8632_v15  ;;  %v5227_v37 = vpop.f32.mrf.mxu2  ;;  %v9554_v19 = vsel %vm9439_vm7, %v9553_v50, %v9552_v63  ;;  %v6404_v63 = vpop.permute.xlu1 %6403 }
 0x902   : > { %v7949_v51 = vadd.f32 %v15473_v62, %v5995_v61  ;;  %v7203_v26 = vpop.f32.mrf.mxu0  ;;  %v15664_v55 = vpop.f32.mrf.mxu1  ;;  %v3960_v62 = vadd.f32 %v16701_v18, %v16700_v52  ;;  %vm6552_vm1 = vcmp.eq.s32.totalorder %v6404_v63, %v11235_v56 }
 0x903   : > { %v8634_v27 = vrot.slane %v8633_v8, 2  ;;  %v9104_v9 = vadd.f32 %v15626_v35, %v8630_v45  ;;  %v7325_v16 = vpack.c.bf16 %v7203_v26, %v7201_v49  ;;  %v4718_v49 = vsel %vm4590_vm14, 1.0, %v16352_v40 }
 0x904   : > { %v8078_v21 = vadd.f32 %v15584_v41, %v7949_v51  ;;  %v6680_v47 = vsel %vm6552_vm1, 1.0, %v16352_v40  ;;  %v4791_v50 = vpack.c.bf16 %v4718_v49, %v4717_v4  ;;  %vm4593_vm14 = vcmp.eq.s32.totalorder %v15572_v28, %v11235_v56 }
 0x905   : > { %v8635_v58 = vmax.f32 %v8633_v8, %v8634_v27  ;;  %v9232_v30 = vmax.f32 %v9104_v9, 0.0  ;;  %10351 = vmatmul.msk.bf16.gmra.mxu1 %vm3042_vm6, %v7325_v16  ;;  %v6749_v45 = vpack.c.bf16 %v6680_v47, %v6679_v25  ;;  %v16704_v47 = vld [vmem:[#allocation141_spill] sm:$0xff]  ;;  %vm4594_vm1 = vcmp.eq.s32.totalorder %v15598_v32, %v11235_v56 }
 0x906   : > { %v8638_v10 = vsel %vm3042_vm6, %v8078_v21, -inf }
 0x907   : > { %v8636_v33 = vrot.slane %v8635_v58, 1  ;;  %v8639_v43 = vrot.slane %v8638_v10, 4  ;;  %v5785_v7 = vpop.f32.mrf.mxu3  ;;  %v9555_v42 = vrot.slane %v9232_v30, 2 }
 0x908   : > { %v5996_v24 = vadd.f32 %v5785_v7, %v3960_v62  ;;  %v15695_v62 = vpop.permute.xlu2 %4452 }
 0x909   : > { %v8640_v60 = vmax.f32 %v8638_v10, %v8639_v43  ;;  %v5229_v12 = vpop.f32.mrf.mxu2  ;;  %v8637_v59 = vmax.f32 %v8635_v58, %v8636_v33  ;;  %v9556_v8 = vsel %vm9442_vm12, %v9555_v42, %v9554_v19 }
 0x90a   : > { %v7950_v0 = vadd.f32 %v15491_v3, %v5996_v24  ;;  %v5367_v15 = vpack.c.bf16 %v5229_v12, %v5227_v37  ;;  %v7206_v27 = vpop.f32.mrf.mxu0  ;;  %v15687_v9 = vpop.f32.mrf.mxu1  ;;  %v16702_v3 = vld [vmem:[#allocation140_spill] sm:$0xff]  ;;  %v16703_v37 = vld [vmem:[#allocation127_spill] sm:$0xff] }
 0x90b   : > { %v8641_v61 = vrot.slane %v8640_v60, 2  ;;  %v9105_v21 = vadd.f32 %v15626_v35, %v8637_v59  ;;  %v3963_v26 = vadd.f32 %v16703_v37, %v16702_v3  ;;  %v4720_v59 = vsel %vm4592_vm8, 1.0, %v16352_v40 }
 0x90c   : > { %v8079_v51 = vadd.f32 %v15584_v41, %v7950_v0  ;;  %10211 = vmatmul.msk.bf16.gmra.mxu3 %vm3042_vm6, %v5367_v15  ;;  %v4719_v15 = vsel %vm4591_vm5, 1.0, %v16352_v40  ;;  %vm4595_vm8 = vcmp.eq.s32.totalorder %v15615_v54, %v11235_v56 }
 0x90d   : > { %v9233_v16 = vmax.f32 %v9105_v21, 0.0  ;;  %v8642_v30 = vmax.f32 %v8640_v60, %v8641_v61  ;;  %10288 = vmatmul.msk.bf16.gmra.mxu0 %vm1147_vm2, %v6749_v45  ;;  %v6407_v45 = vpop.permute.xlu1 %6406  ;;  %v4792_v37 = vpack.c.bf16 %v4720_v59, %v4719_v15  ;;  %v15732_v59 = vpop.permute.xlu0 %4455 }
 0x90e   : > { %10148 = vmatmul.msk.bf16.gmra.mxu2 %vm1147_vm2, %v4791_v50  ;;  %v8645_v58 = vsel %vm3042_vm6, %v8079_v51, -inf  ;;  %vm6553_vm10 = vcmp.eq.s32.totalorder %v6407_v45, %v11235_v56 }
 0x90f   : > { %v8646_v52 = vrot.slane %v8645_v58, 4  ;;  %v5788_v19 = vpop.f32.mrf.mxu3  ;;  %v9557_v10 = vrot.slane %v9233_v16, 1  ;;  %v8643_v42 = vrot.slane %v8642_v30, 1  ;;  %v6681_v16 = vsel %vm6553_vm10, 1.0, %v16352_v40 }
 0x910   : > { %v5997_v18 = vadd.f32 %v5788_v19, %v3963_v26  ;;  %v6410_v51 = vpop.permute.xlu2 %6409  ;;  %vm4596_vm10 = vcmp.eq.s32.totalorder %v15638_v38, %v11235_v56 }
 0x911   : > { %v8647_v33 = vmax.f32 %v8645_v58, %v8646_v52  ;;  %v5232_v43 = vpop.f32.mrf.mxu2  ;;  %v15699_v63 = vsel %vm9445_vm0, %v9557_v10, %v9556_v8  ;;  %v8644_v57 = vmax.f32 %v8642_v30, %v8643_v42  ;;  %vm6554_vm11 = vcmp.eq.s32.totalorder %v6410_v51, %v11235_v56 }
 0x912   : > { %v7951_v7 = vadd.f32 %v15506_v36, %v5997_v18  ;;  %v7208_v24 = vpop.f32.mrf.mxu0  ;;  %v15706_v23 = vpop.f32.mrf.mxu1  ;;  %v16705_v36 = vld [vmem:[#allocation128_spill] sm:$0xff]  ;;  %v6682_v10 = vsel %vm6554_vm11, 1.0, %v16352_v40  ;;  %v4724_v54 = vsel %vm4596_vm10, 1.0, %v16352_v40  ;;  %vm4599_vm10 = vcmp.eq.s32.totalorder %v15695_v62, %v11235_v56  ;;  %v16718_v62 = vld [vmem:[#allocation149_spill] sm:$0xff] }
 0x913   : > { %v8648_v4 = vrot.slane %v8647_v33, 2  ;;  %v7326_v12 = vpack.c.bf16 %v7208_v24, %v7206_v27  ;;  %v3965_v0 = vadd.f32 %v16705_v36, %v16704_v47  ;;  %v9106_v30 = vadd.f32 %v15626_v35, %v8644_v57 }
 0x914   : > { %v8080_v49 = vadd.f32 %v15584_v41, %v7951_v7  ;;  %v6750_v42 = vpack.c.bf16 %v6682_v10, %v6681_v16 }
 0x915   : > { %v8649_v60 = vmax.f32 %v8647_v33, %v8648_v4  ;;  %10352 = vmatmul.msk.bf16.gmra.mxu1 %vm3042_vm6, %v7326_v12  ;;  %v16706_v4 = vld [vmem:[#allocation142_spill] sm:$0xff]  ;;  %v9234_v12 = vmax.f32 %v9106_v30, 0.0  ;;  %v16708_v30 = vld [vmem:[#allocation143_spill] sm:$0xff] }
 0x916   : > { %v8652_v25 = vsel %vm3042_vm6, %v8080_v49, -inf  ;;  %v16707_v49 = vld [vmem:[#allocation130_spill] sm:$0xff] }
 0x917   : > { %v8650_v50 = vrot.slane %v8649_v60, 1  ;;  %v8653_v61 = vrot.slane %v8652_v25, 4  ;;  %v5790_v6 = vpop.f32.mrf.mxu3  ;;  %v3968_v24 = vadd.f32 %v16707_v49, %v16706_v4  ;;  %v6413_v49 = vpop.permute.xlu0 %6412 }
 0x918   : > { %v5998_v8 = vadd.f32 %v5790_v6, %v3965_v0  ;;  %vm6555_vm5 = vcmp.eq.s32.totalorder %v6413_v49, %v11235_v56 }
 0x919   : > { %v8651_v27 = vmax.f32 %v8649_v60, %v8650_v50  ;;  %v8654_v21 = vmax.f32 %v8652_v25, %v8653_v61  ;;  %v5234_v3 = vpop.f32.mrf.mxu2  ;;  %v15730_v25 = vpop.permute.xlu1 %4458 }
 0x91a   : > { %v7952_v26 = vadd.f32 %v15529_v39, %v5998_v8  ;;  %v5368_v58 = vpack.c.bf16 %v5234_v3, %v5232_v43  ;;  %v7211_v33 = vpop.f32.mrf.mxu0  ;;  %v15723_v7 = vpop.f32.mrf.mxu1 }
 0x91b   : > { %v9107_v52 = vadd.f32 %v15626_v35, %v8651_v27  ;;  %v8655_v19 = vrot.slane %v8654_v21, 2 }
 0x91c   : > { %v8081_v18 = vadd.f32 %v15584_v41, %v7952_v26  ;;  %10212 = vmatmul.msk.bf16.gmra.mxu3 %vm3042_vm6, %v5368_v58 }
 0x91d   : > { %v9235_v39 = vmax.f32 %v9107_v52, 0.0  ;;  %v8656_v43 = vmax.f32 %v8654_v21, %v8655_v19  ;;  %10289 = vmatmul.msk.bf16.gmra.mxu0 %vm1147_vm2, %v6750_v42  ;;  %v16709_v52 = vld [vmem:[#allocation132_spill] sm:$0xff]  ;;  %v4722_v42 = vsel %vm4594_vm1, 1.0, %v16352_v40  ;;  %vm4597_vm1 = vcmp.eq.s32.totalorder %v15656_v31, %v11235_v56 }
 0x91e   : > { %10149 = vmatmul.msk.bf16.gmra.mxu2 %vm1147_vm2, %v4792_v37  ;;  %v8659_v60 = vsel %vm3042_vm6, %v8081_v18, -inf  ;;  %v4721_v18 = vsel %vm4593_vm14, 1.0, %v16352_v40  ;;  %v4725_v31 = vsel %vm4597_vm1, 1.0, %v16352_v40 }
 0x91f   : > { %v9559_v47 = vrot.slane %v9235_v39, 7  ;;  %v8657_v36 = vrot.slane %v8656_v43, 1  ;;  %v8660_v0 = vrot.slane %v8659_v60, 4  ;;  %v5793_v15 = vpop.f32.mrf.mxu3 }
 0x920   : > { %v5999_v57 = vadd.f32 %v5793_v15, %v3968_v24  ;;  %v6683_v15 = vsel %vm6555_vm5, 1.0, %v16352_v40 }
 0x921   : > { %v8658_v50 = vmax.f32 %v8656_v43, %v8657_v36  ;;  %v8661_v61 = vmax.f32 %v8659_v60, %v8660_v0  ;;  %v5237_v6 = vpop.f32.mrf.mxu2  ;;  %v9560_v45 = vsel %vm9427_vm9, %v9559_v47, %v9234_v12  ;;  %v6416_v43 = vpop.permute.xlu1 %6415 }
 0x922   : > { %v7953_v8 = vadd.f32 %v15548_v5, %v5999_v57  ;;  %v7213_v3 = vpop.f32.mrf.mxu0  ;;  %v15740_v37 = vpop.f32.mrf.mxu1  ;;  %v3970_v5 = vadd.f32 %v16709_v52, %v16708_v30  ;;  %vm6556_vm4 = vcmp.eq.s32.totalorder %v6416_v43, %v11235_v56  ;;  %v4793_v57 = vpack.c.bf16 %v4722_v42, %v4721_v18 }
 0x923   : > { %v9108_v51 = vadd.f32 %v15626_v35, %v8658_v50  ;;  %v8662_v27 = vrot.slane %v8661_v61, 2  ;;  %v7327_v16 = vpack.c.bf16 %v7213_v3, %v7211_v33  ;;  %v15751_v33 = vpop.permute.xlu2 %4461  ;;  %v6684_v47 = vsel %vm6556_vm4, 1.0, %v16352_v40 }
 0x924   : > { %v8082_v21 = vadd.f32 %v15584_v41, %v7953_v8  ;;  %v6751_v8 = vpack.c.bf16 %v6684_v47, %v6683_v15  ;;  %vm4598_vm4 = vcmp.eq.s32.totalorder %v15678_v17, %v11235_v56  ;;  %vm4602_vm1 = vcmp.eq.s32.totalorder %v15751_v33, %v11235_v56 }
 0x925   : > { %v9236_v26 = vmax.f32 %v9108_v51, 0.0  ;;  %v8663_v58 = vmax.f32 %v8661_v61, %v8662_v27  ;;  %10353 = vmatmul.msk.bf16.gmra.mxu1 %vm3042_vm6, %v7327_v16 }
 0x926   : > { %v8666_v19 = vsel %vm3042_vm6, %v8082_v21, -inf }
 0x927   : > { %v8664_v10 = vrot.slane %v8663_v58, 1  ;;  %v8667_v28 = vrot.slane %v8666_v19, 4  ;;  %v5795_v39 = vpop.f32.mrf.mxu3  ;;  %v9561_v4 = vrot.slane %v9236_v26, 6 }
 0x928   : > { %v6000_v32 = vadd.f32 %v5795_v39, %v3970_v5 }
 0x929   : > { %v8665_v24 = vmax.f32 %v8663_v58, %v8664_v10  ;;  %v8668_v60 = vmax.f32 %v8666_v19, %v8667_v28  ;;  %v5239_v12 = vpop.f32.mrf.mxu2  ;;  %v9562_v3 = vsel %vm9430_vm13, %v9561_v4, %v9560_v45 }
 0x92a   : > { %v7954_v36 = vadd.f32 %v15565_v53, %v6000_v32  ;;  %v5369_v0 = vpack.c.bf16 %v5239_v12, %v5237_v6  ;;  %v7216_v27 = vpop.f32.mrf.mxu0  ;;  %v15760_v21 = vpop.f32.mrf.mxu1  ;;  %v16710_v53 = vld [vmem:[#allocation144_spill] sm:$0xff]  ;;  %v16711_v6 = vld [vmem:[#allocation134_spill] sm:$0xff] }
 0x92b   : > { %v9109_v50 = vadd.f32 %v15626_v35, %v8665_v24  ;;  %v8669_v61 = vrot.slane %v8668_v60, 2  ;;  %v3973_v16 = vadd.f32 %v16711_v6, %v16710_v53  ;;  %v15768_v28 = vpop.permute.xlu2 %4464  ;;  %v4723_v24 = vsel %vm4595_vm8, 1.0, %v16352_v40 }
 0x92c   : > { %v8083_v51 = vadd.f32 %v15584_v41, %v7954_v36  ;;  %10213 = vmatmul.msk.bf16.gmra.mxu3 %vm3042_vm6, %v5369_v0 }
 0x92d   : > { %v9237_v26 = vmax.f32 %v9109_v50, 0.0  ;;  %v8670_v58 = vmax.f32 %v8668_v60, %v8669_v61  ;;  %10290 = vmatmul.msk.bf16.gmra.mxu0 %vm1147_vm2, %v6751_v8  ;;  %v16713_v50 = vld [vmem:[#allocation136_spill] sm:$0xff] }
 0x92e   : > { %10150 = vmatmul.msk.bf16.gmra.mxu2 %vm1147_vm2, %v4793_v57  ;;  %v8673_v30 = vsel %vm3042_vm6, %v8083_v51, -inf  ;;  %v16712_v57 = vld [vmem:[#allocation145_spill] sm:$0xff] }
 0x92f   : > { %v9563_v52 = vrot.slane %v9237_v26, 5  ;;  %v8671_v5 = vrot.slane %v8670_v58, 1  ;;  %v8674_v19 = vrot.slane %v8673_v30, 4  ;;  %v5798_v18 = vpop.f32.mrf.mxu3  ;;  %v3975_v38 = vadd.f32 %v16713_v50, %v16712_v57  ;;  %v15786_v26 = vpop.permute.xlu1 %4467 }
 0x930   : > { %v6001_v10 = vadd.f32 %v5798_v18, %v3973_v16  ;;  %v6422_v16 = vpop.permute.xlu0 %6421 }
 0x931   : > { %v8672_v45 = vmax.f32 %v8670_v58, %v8671_v5  ;;  %v8675_v39 = vmax.f32 %v8673_v30, %v8674_v19  ;;  %v5242_v43 = vpop.f32.mrf.mxu2  ;;  %v9564_v42 = vsel %vm9433_vm15, %v9563_v52, %v9562_v3  ;;  %v4794_v58 = vpack.c.bf16 %v4724_v54, %v4723_v24 }
 0x932   : > { %v7955_v4 = vadd.f32 %v15587_v29, %v6001_v10  ;;  %v7218_v12 = vpop.f32.mrf.mxu0  ;;  %v15779_v47 = vpop.f32.mrf.mxu1  ;;  %vm6558_vm14 = vcmp.eq.s32.totalorder %v6422_v16, %v11235_v56 }
 0x933   : > { %v9110_v32 = vadd.f32 %v15626_v35, %v8672_v45  ;;  %v8676_v49 = vrot.slane %v8675_v39, 2  ;;  %v7328_v15 = vpack.c.bf16 %v7218_v12, %v7216_v27  ;;  %v6419_v6 = vpop.permute.xlu2 %6418  ;;  %v6686_v10 = vsel %vm6558_vm14, 1.0, %v16352_v40  ;;  %v16715_v12 = vld [vmem:[#allocation138_spill] sm:$0xff] }
 0x934   : > { %v8084_v60 = vadd.f32 %v15584_v41, %v7955_v4  ;;  %vm6557_vm11 = vcmp.eq.s32.totalorder %v6419_v6, %v11235_v56  ;;  %vm4601_vm14 = vcmp.eq.s32.totalorder %v15730_v25, %v11235_v56 }
 0x935   : > { %v9238_v36 = vmax.f32 %v9110_v32, 0.0  ;;  %v8677_v0 = vmax.f32 %v8675_v39, %v8676_v49  ;;  %10354 = vmatmul.msk.bf16.gmra.mxu1 %vm3042_vm6, %v7328_v15  ;;  %v6685_v18 = vsel %vm6557_vm11, 1.0, %v16352_v40  ;;  %vm4600_vm11 = vcmp.eq.s32.totalorder %v15732_v59, %v11235_v56 }
 0x936   : > { %v8680_v29 = vsel %vm3042_vm6, %v8084_v60, -inf  ;;  %v6752_v39 = vpack.c.bf16 %v6686_v10, %v6685_v18 }
 0x937   : > { %v9565_v61 = vrot.slane %v9238_v36, 4  ;;  %v8678_v8 = vrot.slane %v8677_v0, 1  ;;  %v8681_v51 = vrot.slane %v8680_v29, 4  ;;  %v5800_v3 = vpop.f32.mrf.mxu3 }
 0x938   : > { %v6002_v53 = vadd.f32 %v5800_v3, %v3975_v38  ;;  %v6425_v17 = vpop.permute.xlu0 %6424 }
 0x939   : > { %v8679_v30 = vmax.f32 %v8677_v0, %v8678_v8  ;;  %v8682_v52 = vmax.f32 %v8680_v29, %v8681_v51  ;;  %v5244_v27 = vpop.f32.mrf.mxu2  ;;  %v9566_v32 = vsel %vm9436_vm3, %v9565_v61, %v9564_v42  ;;  %v15804_v42 = vpop.permute.xlu1 %4470  ;;  %vm6559_vm8 = vcmp.eq.s32.totalorder %v6425_v17, %v11235_v56 }
 0x93a   : > { %v7956_v5 = vadd.f32 %v15607_v44, %v6002_v53  ;;  %v5370_v19 = vpack.c.bf16 %v5244_v27, %v5242_v43  ;;  %v7221_v24 = vpop.f32.mrf.mxu0  ;;  %v16714_v43 = vld [vmem:[#allocation146_spill] sm:$0xff]  ;;  %v15801_v0 = vpop.f32.mrf.mxu1 }
 0x93b   : > { %v8683_v45 = vrot.slane %v8682_v52, 2  ;;  %v9111_v4 = vadd.f32 %v15626_v35, %v8679_v30  ;;  %v3978_v54 = vadd.f32 %v16715_v12, %v16714_v43 }
 0x93c   : > { %v8085_v49 = vadd.f32 %v15584_v41, %v7956_v5  ;;  %10214 = vmatmul.msk.bf16.gmra.mxu3 %vm3042_vm6, %v5370_v19 }
 0x93d   : > { %v8684_v60 = vmax.f32 %v8682_v52, %v8683_v45  ;;  %v9239_v44 = vmax.f32 %v9111_v4, 0.0  ;;  %10291 = vmatmul.msk.bf16.gmra.mxu0 %vm1147_vm2, %v6752_v39  ;;  %v4726_v4 = vsel %vm4598_vm4, 1.0, %v16352_v40 }
 0x93e   : > { %10151 = vmatmul.msk.bf16.gmra.mxu2 %vm1147_vm2, %v4794_v58  ;;  %v8687_v36 = vsel %vm3042_vm6, %v8085_v49, -inf }
 0x93f   : > { %v8685_v15 = vrot.slane %v8684_v60, 1  ;;  %v8688_v57 = vrot.slane %v8687_v36, 4  ;;  %v5803_v50 = vpop.f32.mrf.mxu3  ;;  %v9567_v38 = vrot.slane %v9239_v44, 3 }
 0x940   : > { %v6003_v29 = vadd.f32 %v5803_v50, %v3978_v54 }
 0x941   : > { %v8686_v61 = vmax.f32 %v8684_v60, %v8685_v15  ;;  %v8689_v8 = vmax.f32 %v8687_v36, %v8688_v57  ;;  %v5247_v51 = vpop.f32.mrf.mxu2  ;;  %v9568_v3 = vsel %vm9439_vm7, %v9567_v38, %v9566_v32  ;;  %v6428_v45 = vpop.permute.xlu1 %6427  ;;  %v16716_v32 = vld [vmem:[#allocation147_spill] sm:$0xff]  ;;  %v6687_v36 = vsel %vm6559_vm8, 1.0, %v16352_v40 }
 0x942   : > { %v7957_v58 = vadd.f32 %v15631_v11, %v6003_v29  ;;  %v7223_v30 = vpop.f32.mrf.mxu0  ;;  %v15819_v60 = vpop.f32.mrf.mxu1  ;;  %vm6560_vm5 = vcmp.eq.s32.totalorder %v6428_v45, %v11235_v56  ;;  %v4795_v57 = vpack.c.bf16 %v4726_v4, %v4725_v31  ;;  %vm4603_vm8 = vcmp.eq.s32.totalorder %v15768_v28, %v11235_v56 }
 0x943   : > { %v8690_v53 = vrot.slane %v8689_v8, 2  ;;  %v9112_v6 = vadd.f32 %v15626_v35, %v8686_v61  ;;  %v7329_v27 = vpack.c.bf16 %v7223_v30, %v7221_v24  ;;  %v6688_v43 = vsel %vm6560_vm5, 1.0, %v16352_v40  ;;  %v16717_v30 = vld [vmem:[#allocation148_spill] sm:$0xff] }
 0x944   : > { %v8086_v16 = vadd.f32 %v15584_v41, %v7957_v58  ;;  %v6753_v38 = vpack.c.bf16 %v6688_v43, %v6687_v36  ;;  %v15847_v43 = vpop.permute.xlu2 %4473 }
 0x945   : > { %v8691_v52 = vmax.f32 %v8689_v8, %v8690_v53  ;;  %v9240_v5 = vmax.f32 %v9112_v6, 0.0  ;;  %10355 = vmatmul.msk.bf16.gmra.mxu1 %vm3042_vm6, %v7329_v27 }
 0x946   : > { %v8694_v19 = vsel %vm3042_vm6, %v8086_v16, -inf }
 0x947   : > { %v8692_v18 = vrot.slane %v8691_v52, 1  ;;  %v8695_v10 = vrot.slane %v8694_v19, 4  ;;  %v5805_v11 = vpop.f32.mrf.mxu3  ;;  %v9569_v39 = vrot.slane %v9240_v5, 2 }
 0x948   : > { %v6004_v49 = vadd.f32 %v5805_v11, %v16716_v32 }
 0x949   : > { %v8696_v24 = vmax.f32 %v8694_v19, %v8695_v10  ;;  %v5249_v44 = vpop.f32.mrf.mxu2  ;;  %v8693_v15 = vmax.f32 %v8691_v52, %v8692_v18  ;;  %v9570_v29 = vsel %vm9442_vm12, %v9569_v39, %v9568_v3  ;;  %v6431_v25 = vpop.permute.xlu1 %6430 }
 0x94a   : > { %v7958_v12 = vadd.f32 %v15649_v1, %v6004_v49  ;;  %v5371_v54 = vpack.c.bf16 %v5249_v44, %v5247_v51  ;;  %v7226_v8 = vpop.f32.mrf.mxu0  ;;  %v15835_v18 = vpop.f32.mrf.mxu1  ;;  %vm6561_vm4 = vcmp.eq.s32.totalorder %v6431_v25, %v11235_v56 }
 0x94b   : > { %v8697_v50 = vrot.slane %v8696_v24, 2  ;;  %v9113_v58 = vadd.f32 %v15626_v35, %v8693_v15 }
 0x94c   : > { %v8087_v61 = vadd.f32 %v15584_v41, %v7958_v12  ;;  %10215 = vmatmul.msk.bf16.gmra.mxu3 %vm3042_vm6, %v5371_v54  ;;  %v4727_v12 = vsel %vm4599_vm10, 1.0, %v16352_v40  ;;  %v4728_v54 = vsel %vm4600_vm11, 1.0, %v16352_v40  ;;  %vm4604_vm10 = vcmp.eq.s32.totalorder %v15786_v26, %v11235_v56 }
 0x94d   : > { %v9241_v51 = vmax.f32 %v9113_v58, 0.0  ;;  %v8698_v53 = vmax.f32 %v8696_v24, %v8697_v50  ;;  %10292 = vmatmul.msk.bf16.gmra.mxu0 %vm1147_vm2, %v6753_v38  ;;  %v4732_v28 = vsel %vm4604_vm10, 1.0, %v16352_v40  ;;  %vm4605_vm11 = vcmp.eq.s32.totalorder %v15804_v42, %v11235_v56 }
 0x94e   : > { %10152 = vmatmul.msk.bf16.gmra.mxu2 %vm1147_vm2, %v4795_v57  ;;  %v8701_v1 = vsel %vm3042_vm6, %v8087_v61, -inf  ;;  %v4796_v61 = vpack.c.bf16 %v4728_v54, %v4727_v12  ;;  %v4733_v42 = vsel %vm4605_vm11, 1.0, %v16352_v40 }
 0x94f   : > { %v8702_v6 = vrot.slane %v8701_v1, 4  ;;  %v5808_v16 = vpop.f32.mrf.mxu3  ;;  %v9571_v3 = vrot.slane %v9241_v51, 1  ;;  %v8699_v11 = vrot.slane %v8698_v53, 1 }
 0x950   : > { %v6005_v52 = vadd.f32 %v5808_v16, %v16717_v30 }
 0x951   : > { %v8703_v27 = vmax.f32 %v8701_v1, %v8702_v6  ;;  %v5252_v5 = vpop.f32.mrf.mxu2  ;;  %v15838_v10 = vsel %vm9445_vm0, %v9571_v3, %v9570_v29  ;;  %v8700_v49 = vmax.f32 %v8698_v53, %v8699_v11  ;;  %v16719_v11 = vld [vmem:[#allocation150_spill] sm:$0xff] }
 0x952   : > { %v7959_v19 = vadd.f32 %v15664_v55, %v6005_v52  ;;  %v7228_v31 = vpop.f32.mrf.mxu0  ;;  %v15857_v51 = vpop.f32.mrf.mxu1 }
 0x953   : > { %v8704_v45 = vrot.slane %v8703_v27, 2  ;;  %v7330_v32 = vpack.c.bf16 %v7228_v31, %v7226_v8  ;;  %v9114_v29 = vadd.f32 %v15626_v35, %v8700_v49 }
 0x954   : > { %v8088_v39 = vadd.f32 %v15584_v41, %v7959_v19  ;;  %v15861_v19 = vpop.permute.xlu2 %4476 }
 0x955   : > { %v8705_v4 = vmax.f32 %v8703_v27, %v8704_v45  ;;  %10356 = vmatmul.msk.bf16.gmra.mxu1 %vm3042_vm6, %v7330_v32  ;;  %v9242_v30 = vmax.f32 %v9114_v29, 0.0 }
 0x956   : > { %v8708_v55 = vsel %vm3042_vm6, %v8088_v39, -inf }
 0x957   : > { %v8706_v17 = vrot.slane %v8705_v4, 1  ;;  %v8709_v24 = vrot.slane %v8708_v55, 4  ;;  %v5810_v44 = vpop.f32.mrf.mxu3 }
 0x958   : > { %v6006_v36 = vadd.f32 %v5810_v44, %v16718_v62 }
 0x959   : > { %v8707_v15 = vmax.f32 %v8705_v4, %v8706_v17  ;;  %v8710_v59 = vmax.f32 %v8708_v55, %v8709_v24  ;;  %v5254_v57 = vpop.f32.mrf.mxu2 }
 0x95a   : > { %v7960_v50 = vadd.f32 %v15687_v9, %v6006_v36  ;;  %v5372_v38 = vpack.c.bf16 %v5254_v57, %v5252_v5  ;;  %v7231_v53 = vpop.f32.mrf.mxu0 }
 0x95b   : > { %v9115_v8 = vadd.f32 %v15626_v35, %v8707_v15  ;;  %v8711_v58 = vrot.slane %v8710_v59, 2  ;;  %v15873_v15 = vpop.f32.mrf.mxu1 }
 0x95c   : > { %v8089_v1 = vadd.f32 %v15584_v41, %v7960_v50  ;;  %10216 = vmatmul.msk.bf16.gmra.mxu3 %vm3042_vm6, %v5372_v38  ;;  %v4730_v38 = vsel %vm4602_vm1, 1.0, %v16352_v40  ;;  %vm4607_vm1 = vcmp.eq.s32.totalorder %v15861_v19, %v11235_v56 }
 0x95d   : > { %v9243_v6 = vmax.f32 %v9115_v8, 0.0  ;;  %v8712_v16 = vmax.f32 %v8710_v59, %v8711_v58  ;;  %v6434_v8 = vpop.permute.xlu2 %6433 }
 0x95e   : > { %10153 = vmatmul.msk.bf16.gmra.mxu2 %vm1147_vm2, %v4796_v61  ;;  %v8715_v9 = vsel %vm3042_vm6, %v8089_v1, -inf  ;;  %v16720_v61 = vld [vmem:[#allocation151_spill] sm:$0xff]  ;;  %vm6562_vm5 = vcmp.eq.s32.totalorder %v6434_v8, %v11235_v56 }
 0x95f   : > { %v9573_v52 = vrot.slane %v9243_v6, 7  ;;  %v8713_v3 = vrot.slane %v8712_v16, 1  ;;  %v8716_v27 = vrot.slane %v8715_v9, 4  ;;  %v5813_v5 = vpop.f32.mrf.mxu3  ;;  %v6689_v6 = vsel %vm6561_vm4, 1.0, %v16352_v40 }
 0x960   : > { %v6007_v45 = vadd.f32 %v5813_v5, %v16719_v11 }
 0x961   : > { %v8714_v39 = vmax.f32 %v8712_v16, %v8713_v3  ;;  %v8717_v31 = vmax.f32 %v8715_v9, %v8716_v27  ;;  %v5257_v4 = vpop.f32.mrf.mxu2  ;;  %v9574_v32 = vsel %vm9427_vm9, %v9573_v52, %v9242_v30  ;;  %v6690_v30 = vsel %vm6562_vm5, 1.0, %v16352_v40 }
 0x962   : > { %v7961_v55 = vadd.f32 %v15706_v23, %v6007_v45  ;;  %v7233_v44 = vpop.f32.mrf.mxu0  ;;  %v4729_v23 = vsel %vm4601_vm14, 1.0, %v16352_v40  ;;  %v6754_v5 = vpack.c.bf16 %v6690_v30, %v6689_v6  ;;  %v4731_v6 = vsel %vm4603_vm8, 1.0, %v16352_v40 }
 0x963   : > { %v9116_v49 = vadd.f32 %v15626_v35, %v8714_v39  ;;  %v8718_v17 = vrot.slane %v8717_v31, 2  ;;  %v7331_v62 = vpack.c.bf16 %v7233_v44, %v7231_v53  ;;  %v4797_v52 = vpack.c.bf16 %v4730_v38, %v4729_v23  ;;  %v16721_v44 = vld [vmem:[#allocation152_spill] sm:$0xff]  ;;  %v15892_v23 = vpop.f32.mrf.mxu1 }
 0x964   : > { %v8090_v24 = vadd.f32 %v15584_v41, %v7961_v55  ;;  %10293 = vmatmul.msk.bf16.gmra.mxu0 %vm1147_vm2, %v6754_v5  ;;  %v4798_v5 = vpack.c.bf16 %v4732_v28, %v4731_v6  ;;  %vm4606_vm14 = vcmp.eq.s32.totalorder %v15847_v43, %v11235_v56 }
 0x965   : > { %v9244_v12 = vmax.f32 %v9116_v49, 0.0  ;;  %v8719_v54 = vmax.f32 %v8717_v31, %v8718_v17  ;;  %10357 = vmatmul.msk.bf16.gmra.mxu1 %vm3042_vm6, %v7331_v62 }
 0x966   : > { %v8722_v36 = vsel %vm3042_vm6, %v8090_v24, -inf }
 0x967   : > { %v8720_v59 = vrot.slane %v8719_v54, 1  ;;  %v8723_v57 = vrot.slane %v8722_v36, 4  ;;  %v5815_v50 = vpop.f32.mrf.mxu3  ;;  %v9575_v29 = vrot.slane %v9244_v12, 6 }
 0x968   : > { %v6008_v33 = vadd.f32 %v5815_v50, %v16720_v61 }
 0x969   : > { %v8721_v58 = vmax.f32 %v8719_v54, %v8720_v59  ;;  %v8724_v1 = vmax.f32 %v8722_v36, %v8723_v57  ;;  %v5259_v53 = vpop.f32.mrf.mxu2  ;;  %v9576_v39 = vsel %vm9430_vm13, %v9575_v29, %v9574_v32 }
 0x96a   : > { %v7962_v16 = vadd.f32 %v15723_v7, %v6008_v33  ;;  %v5373_v9 = vpack.c.bf16 %v5259_v53, %v5257_v4  ;;  %v7236_v45 = vpop.f32.mrf.mxu0 }
 0x96b   : > { %v9117_v3 = vadd.f32 %v15626_v35, %v8721_v58  ;;  %v8725_v27 = vrot.slane %v8724_v1, 2 }
 0x96c   : > { %v8091_v11 = vadd.f32 %v15584_v41, %v7962_v16  ;;  %10217 = vmatmul.msk.bf16.gmra.mxu3 %vm3042_vm6, %v5373_v9 }
 0x96d   : > { %v9245_v31 = vmax.f32 %v9117_v3, 0.0  ;;  %v8726_v55 = vmax.f32 %v8724_v1, %v8725_v27 }
 0x96e   : > { %10154 = vmatmul.msk.bf16.gmra.mxu2 %vm1147_vm2, %v4797_v52  ;;  %v8729_v7 = vsel %vm3042_vm6, %v8091_v11, -inf }
 0x96f   : > { %v9577_v4 = vrot.slane %v9245_v31, 5  ;;  %v8727_v49 = vrot.slane %v8726_v55, 1  ;;  %v8730_v17 = vrot.slane %v8729_v7, 4  ;;  %v5818_v24 = vpop.f32.mrf.mxu3  ;;  %v15915_v31 = vld [vmem:[%s16319_s4] sm:$0xff] }
 0x970   : > { %v6009_v12 = vadd.f32 %v5818_v24, %v16721_v44 }
 0x971   : > { %v8728_v54 = vmax.f32 %v8726_v55, %v8727_v49  ;;  %v8731_v62 = vmax.f32 %v8729_v7, %v8730_v17  ;;  %v5262_v36 = vpop.f32.mrf.mxu2  ;;  %v9578_v32 = vsel %vm9433_vm15, %v9577_v4, %v9576_v39 }
 0x972   : > { %v7963_v59 = vadd.f32 %v15740_v37, %v6009_v12  ;;  %v7238_v38 = vpop.f32.mrf.mxu0 }
 0x973   : > { %v9118_v57 = vadd.f32 %v15626_v35, %v8728_v54  ;;  %v8732_v50 = vrot.slane %v8731_v62, 2  ;;  %v7332_v33 = vpack.c.bf16 %v7238_v38, %v7236_v45  ;;  %v15909_v45 = vpop.f32.mrf.mxu1  ;;  %v16723_v54 = vld [vmem:[#allocation154_spill] sm:$0xff] }
 0x974   : > { %v8092_v25 = vadd.f32 %v15584_v41, %v7963_v59  ;;  %v16722_v41 = vld [vmem:[#allocation153_spill] sm:$0xff] }
 0x975   : > { %v9246_v29 = vmax.f32 %v9118_v57, 0.0  ;;  %v8733_v61 = vmax.f32 %v8731_v62, %v8732_v50  ;;  %10358 = vmatmul.msk.bf16.gmra.mxu1 %vm3042_vm6, %v7332_v33 }
 0x976   : > { %v8736_v8 = vsel %vm3042_vm6, %v8092_v25, -inf }
 0x977   : > { %v9579_v58 = vrot.slane %v9246_v29, 4  ;;  %v8734_v1 = vrot.slane %v8733_v61, 1  ;;  %v8737_v37 = vrot.slane %v8736_v8, 4  ;;  %v5820_v53 = vpop.f32.mrf.mxu3 }
 0x978   : > { %v6010_v16 = vadd.f32 %v5820_v53, %v16722_v41  ;;  %v4734_v41 = vsel %vm4606_vm14, 1.0, %v16352_v40 }
 0x979   : > { %v8735_v9 = vmax.f32 %v8733_v61, %v8734_v1  ;;  %v8738_v30 = vmax.f32 %v8736_v8, %v8737_v37  ;;  %v5264_v26 = vpop.f32.mrf.mxu2  ;;  %v9580_v52 = vsel %vm9436_vm3, %v9579_v58, %v9578_v32 }
 0x97a   : > { %v7964_v3 = vadd.f32 %v15760_v21, %v6010_v16  ;;  %v5374_v27 = vpack.c.bf16 %v5264_v26, %v5262_v36  ;;  %v7241_v7 = vpop.f32.mrf.mxu0  ;;  %v16724_v16 = vld [vmem:[#allocation155_spill] sm:$0xff] }
 0x97b   : > { %v8739_v11 = vrot.slane %v8738_v30, 2  ;;  %v9119_v39 = vadd.f32 %v15626_v35, %v8735_v9  ;;  %v15930_v8 = vpop.f32.mrf.mxu1 }
 0x97c   : > { %v8093_v55 = vadd.f32 %v15915_v31, %v7964_v3  ;;  %10218 = vmatmul.msk.bf16.gmra.mxu3 %vm3042_vm6, %v5374_v27 }
 0x97d   : > { %v8740_v4 = vmax.f32 %v8738_v30, %v8739_v11  ;;  %v9247_v21 = vmax.f32 %v9119_v39, 0.0 }
 0x97e   : > { %10155 = vmatmul.msk.bf16.gmra.mxu2 %vm1147_vm2, %v4798_v5  ;;  %v8743_v49 = vsel %vm3042_vm6, %v8093_v55, -inf  ;;  %v4799_v5 = vpack.c.bf16 %v4734_v41, %v4733_v42 }
 0x97f   : > { %v8741_v17 = vrot.slane %v8740_v4, 1  ;;  %v8744_v24 = vrot.slane %v8743_v49, 4  ;;  %v5823_v44 = vpop.f32.mrf.mxu3  ;;  %v9581_v12 = vrot.slane %v9247_v21, 3 }
 0x980   : > { %v6011_v62 = vadd.f32 %v5823_v44, %v16723_v54 }
 0x981   : > { %v8742_v36 = vmax.f32 %v8740_v4, %v8741_v17  ;;  %v8745_v32 = vmax.f32 %v8743_v49, %v8744_v24  ;;  %v5267_v59 = vpop.f32.mrf.mxu2  ;;  %v9582_v57 = vsel %vm9439_vm7, %v9581_v12, %v9580_v52  ;;  %v16725_v12 = vld [vmem:[#allocation156_spill] sm:$0xff] }
 0x982   : > { %v7965_v50 = vadd.f32 %v15779_v47, %v6011_v62  ;;  %v7243_v61 = vpop.f32.mrf.mxu0 }
 0x983   : > { %v8746_v25 = vrot.slane %v8745_v32, 2  ;;  %v9120_v38 = vadd.f32 %v15626_v35, %v8742_v36  ;;  %v7333_v58 = vpack.c.bf16 %v7243_v61, %v7241_v7  ;;  %v15944_v44 = vpop.f32.mrf.mxu1 }
 0x984   : > { %v8094_v29 = vadd.f32 %v15915_v31, %v7965_v50 }
 0x985   : > { %v8747_v33 = vmax.f32 %v8745_v32, %v8746_v25  ;;  %v9248_v1 = vmax.f32 %v9120_v38, 0.0  ;;  %10359 = vmatmul.msk.bf16.gmra.mxu1 %vm3042_vm6, %v7333_v58  ;;  %v4480_v32 = vpop.permute.xlu0 %4479 }
 0x986   : > { %v8750_v37 = vsel %vm3042_vm6, %v8094_v29, -inf  ;;  %vm4608_vm4 = vcmp.eq.s32.totalorder %v4480_v32, %v11235_v56 }
 0x987   : > { %v8748_v47 = vrot.slane %v8747_v33, 1  ;;  %v8751_v53 = vrot.slane %v8750_v37, 4  ;;  %v5825_v6 = vpop.f32.mrf.mxu3  ;;  %v9583_v28 = vrot.slane %v9248_v1, 2 }
 0x988   : > { %v6012_v9 = vadd.f32 %v5825_v6, %v16724_v16  ;;  %v16726_v6 = vld [vmem:[#allocation157_spill] sm:$0xff] }
 0x989   : > { %v8752_v43 = vmax.f32 %v8750_v37, %v8751_v53  ;;  %v5269_v30 = vpop.f32.mrf.mxu2  ;;  %v8749_v26 = vmax.f32 %v8747_v33, %v8748_v47  ;;  %v9584_v52 = vsel %vm9442_vm12, %v9583_v28, %v9582_v57  ;;  %v4736_v53 = vsel %vm4608_vm4, 1.0, %v16352_v40 }
 0x98a   : > { %v7966_v3 = vadd.f32 %v15801_v0, %v6012_v9  ;;  %v5375_v27 = vpack.c.bf16 %v5269_v30, %v5267_v59  ;;  %v7246_v7 = vpop.f32.mrf.mxu0 }
 0x98b   : > { %v8753_v11 = vrot.slane %v8752_v43, 2  ;;  %v9121_v39 = vadd.f32 %v15626_v35, %v8749_v26  ;;  %v15960_v16 = vpop.f32.mrf.mxu1 }
 0x98c   : > { %v8095_v55 = vadd.f32 %v15915_v31, %v7966_v3  ;;  %10219 = vmatmul.msk.bf16.gmra.mxu3 %vm3042_vm6, %v5375_v27 }
 0x98d   : > { %v9249_v4 = vmax.f32 %v9121_v39, 0.0  ;;  %v8754_v49 = vmax.f32 %v8752_v43, %v8753_v11  ;;  %v15966_v43 = vld [vmem:[%s16318_s3] ss:$0 sm:$0xff] }
 0x98e   : > { %10156 = vmatmul.msk.bf16.gmra.mxu2 %vm1147_vm2, %v4799_v5  ;;  %v8757_v21 = vsel %vm3042_vm6, %v8095_v55, -inf }
 0x98f   : > { %v8758_v17 = vrot.slane %v8757_v21, 4  ;;  %v5828_v24 = vpop.f32.mrf.mxu3  ;;  %v9585_v0 = vrot.slane %v9249_v4, 1  ;;  %v8755_v57 = vrot.slane %v8754_v49, 1 }
 0x990   : > { %v6013_v54 = vadd.f32 %v5828_v24, %v16725_v12 }
 0x991   : > { %v8759_v62 = vmax.f32 %v8757_v21, %v8758_v17  ;;  %v5272_v35 = vpop.f32.mrf.mxu2  ;;  %v15948_v36 = vsel %vm9445_vm0, %v9585_v0, %v9584_v52  ;;  %v8756_v58 = vmax.f32 %v8754_v49, %v8755_v57  ;;  %v16727_v49 = vld [vmem:[#allocation158_spill] sm:$0xff] }
 0x992   : > { %v7967_v59 = vadd.f32 %v15819_v60, %v6013_v54  ;;  %v7248_v38 = vpop.f32.mrf.mxu0  ;;  %v4735_v60 = vsel %vm4607_vm1, 1.0, %v16352_v40 }
 0x993   : > { %v8760_v50 = vrot.slane %v8759_v62, 2  ;;  %v7334_v61 = vpack.c.bf16 %v7248_v38, %v7246_v7  ;;  %v9122_v30 = vadd.f32 %v15966_v43, %v8756_v58  ;;  %v4800_v40 = vpack.c.bf16 %v4736_v53, %v4735_v60 }
 0x994   : > { %v8096_v25 = vadd.f32 %v15915_v31, %v7967_v59  ;;  %v15978_v59 = vpop.f32.mrf.mxu1 }
 0x995   : > { %v8761_v29 = vmax.f32 %v8759_v62, %v8760_v50  ;;  %10360 = vmatmul.msk.bf16.gmra.mxu1 %vm3042_vm6, %v7334_v61  ;;  %v9250_v39 = vmax.f32 %v9122_v30, 0.0 }
 0x996   : > { %v8764_v33 = vsel %vm3042_vm6, %v8096_v25, -inf }
 0x997   : > { %v8762_v1 = vrot.slane %v8761_v29, 1  ;;  %v8765_v37 = vrot.slane %v8764_v33, 4  ;;  %v5830_v47 = vpop.f32.mrf.mxu3 }
 0x998   : > { %v6014_v28 = vadd.f32 %v5830_v47, %v16726_v6 }
 0x999   : > { %v8763_v42 = vmax.f32 %v8761_v29, %v8762_v1  ;;  %v8766_v19 = vmax.f32 %v8764_v33, %v8765_v37  ;;  %v5274_v41 = vpop.f32.mrf.mxu2 }
 0x99a   : > { %v7968_v56 = vadd.f32 %v15835_v18, %v6014_v28  ;;  %v5376_v9 = vpack.c.bf16 %v5274_v41, %v5272_v35  ;;  %v7251_v27 = vpop.f32.mrf.mxu0 }
 0x99b   : > { %v9123_v26 = vadd.f32 %v15966_v43, %v8763_v42  ;;  %v8767_v52 = vrot.slane %v8766_v19, 2 }
 0x99c   : > { %v8097_v3 = vadd.f32 %v15915_v31, %v7968_v56  ;;  %10220 = vmatmul.msk.bf16.gmra.mxu3 %vm3042_vm6, %v5376_v9 }
 0x99d   : > { %v9251_v5 = vmax.f32 %v9123_v26, 0.0  ;;  %v8768_v11 = vmax.f32 %v8766_v19, %v8767_v52  ;;  %v15989_v52 = vpop.f32.mrf.mxu1 }
 0x99e   : > { %10157 = vmatmul.msk.bf16.gmra.mxu2 %vm1147_vm2, %v4800_v40  ;;  %v8771_v18 = vsel %vm3042_vm6, %v8097_v3, -inf }
 0x99f   : > { %v9587_v55 = vrot.slane %v9251_v5, 7  ;;  %v8769_v7 = vrot.slane %v8768_v11, 1  ;;  %v8772_v4 = vrot.slane %v8771_v18, 4  ;;  %v5833_v21 = vpop.f32.mrf.mxu3 }
 0x9a0   : > { %v6015_v17 = vadd.f32 %v5833_v21, %v16727_v49 }
 0x9a1   : > { %v8770_v24 = vmax.f32 %v8768_v11, %v8769_v7  ;;  %v8773_v0 = vmax.f32 %v8771_v18, %v8772_v4  ;;  %v5277_v12 = vpop.f32.mrf.mxu2  ;;  %v9588_v54 = vsel %vm9427_vm9, %v9587_v55, %v9250_v39 }
 0x9a2   : > { %v7969_v62 = vadd.f32 %v15857_v51, %v6015_v17  ;;  %v7253_v50 = vpop.f32.mrf.mxu0  ;;  %v16728_v51 = vld [vmem:[#allocation159_spill] sm:$0xff] }
 0x9a3   : > { %v9124_v35 = vadd.f32 %v15966_v43, %v8770_v24  ;;  %v8774_v32 = vrot.slane %v8773_v0, 2  ;;  %v7335_v29 = vpack.c.bf16 %v7253_v50, %v7251_v27 }
 0x9a4   : > { %v8098_v57 = vadd.f32 %v15915_v31, %v7969_v62 }
 0x9a5   : > { %v9252_v25 = vmax.f32 %v9124_v35, 0.0  ;;  %v8775_v38 = vmax.f32 %v8773_v0, %v8774_v32  ;;  %10361 = vmatmul.msk.bf16.gmra.mxu1 %vm3042_vm6, %v7335_v29  ;;  %v15998_v29 = vpop.f32.mrf.mxu1 }
 0x9a6   : > { %v8778_v61 = vsel %vm3042_vm6, %v8098_v57, -inf }
 0x9a7   : > { %v9589_v33 = vrot.slane %v9252_v25, 6  ;;  %v8776_v58 = vrot.slane %v8775_v38, 1  ;;  %v8779_v1 = vrot.slane %v8778_v61, 4  ;;  %v5835_v37 = vpop.f32.mrf.mxu3 }
 0x9a8   : > { %v6016_v47 = vadd.f32 %v5835_v37, %v16728_v51 }
 0x9a9   : > { %v8777_v60 = vmax.f32 %v8775_v38, %v8776_v58  ;;  %v8780_v53 = vmax.f32 %v8778_v61, %v8779_v1  ;;  %v5279_v6 = vpop.f32.mrf.mxu2  ;;  %v9590_v28 = vsel %vm9430_vm13, %v9589_v33, %v9588_v54 }
 0x9aa   : > { %v7970_v42 = vadd.f32 %v15873_v15, %v6016_v47  ;;  %v5377_v19 = vpack.c.bf16 %v5279_v6, %v5277_v12  ;;  %v7256_v30 = vpop.f32.mrf.mxu0  ;;  %v16729_v15 = vld [vmem:[#allocation160_spill] sm:$0xff] }
 0x9ab   : > { %v9125_v41 = vadd.f32 %v15966_v43, %v8777_v60  ;;  %v8781_v56 = vrot.slane %v8780_v53, 2 }
 0x9ac   : > { %v8099_v9 = vadd.f32 %v15915_v31, %v7970_v42  ;;  %10221 = vmatmul.msk.bf16.gmra.mxu3 %vm3042_vm6, %v5377_v19 }
 0x9ad   : > { %v9253_v26 = vmax.f32 %v9125_v41, 0.0  ;;  %v8782_v40 = vmax.f32 %v8780_v53, %v8781_v56 }
 0x9ae   : > { %v8785_v3 = vsel %vm3042_vm6, %v8099_v9, -inf }
 0x9af   : > { %v9591_v27 = vrot.slane %v9253_v26, 5  ;;  %v8783_v5 = vrot.slane %v8782_v40, 1  ;;  %v8786_v11 = vrot.slane %v8785_v3, 4  ;;  %v5838_v18 = vpop.f32.mrf.mxu3 }
 0x9b0   : > { %v6017_v39 = vadd.f32 %v5838_v18, %v16729_v15 }
 0x9b1   : > { %v8784_v55 = vmax.f32 %v8782_v40, %v8783_v5  ;;  %v8787_v7 = vmax.f32 %v8785_v3, %v8786_v11  ;;  %v5282_v4 = vpop.f32.mrf.mxu2  ;;  %v9592_v21 = vsel %vm9433_vm15, %v9591_v27, %v9590_v28  ;;  %v16731_v40 = vld [vmem:[#allocation162_spill] sm:$0xff]  ;;  %v16009_v11 = vpop.f32.mrf.mxu1 }
 0x9b2   : > { %v7971_v49 = vadd.f32 %v15892_v23, %v6017_v39  ;;  %v7258_v12 = vpop.f32.mrf.mxu0  ;;  %v16730_v23 = vld [vmem:[#allocation161_spill] sm:$0xff] }
 0x9b3   : > { %v9126_v17 = vadd.f32 %v15966_v43, %v8784_v55  ;;  %v8788_v24 = vrot.slane %v8787_v7, 2  ;;  %v7336_v35 = vpack.c.bf16 %v7258_v12, %v7256_v30 }
 0x9b4   : > { %v8100_v0 = vadd.f32 %v15915_v31, %v7971_v49 }
 0x9b5   : > { %v9254_v54 = vmax.f32 %v9126_v17, 0.0  ;;  %v8789_v62 = vmax.f32 %v8787_v7, %v8788_v24  ;;  %10362 = vmatmul.msk.bf16.gmra.mxu1 %vm3042_vm6, %v7336_v35  ;;  %v16732_v35 = vld [vmem:[#allocation163_spill] sm:$0xff] }
 0x9b6   : > { %v8792_v32 = vsel %vm3042_vm6, %v8100_v0, -inf }
 0x9b7   : > { %v9593_v57 = vrot.slane %v9254_v54, 4  ;;  %v8790_v50 = vrot.slane %v8789_v62, 1  ;;  %v8793_v25 = vrot.slane %v8792_v32, 4  ;;  %v5840_v38 = vpop.f32.mrf.mxu3 }
 0x9b8   : > { %v6018_v61 = vadd.f32 %v5840_v38, %v16730_v23 }
 0x9b9   : > { %v8791_v33 = vmax.f32 %v8789_v62, %v8790_v50  ;;  %v8794_v58 = vmax.f32 %v8792_v32, %v8793_v25  ;;  %v5284_v1 = vpop.f32.mrf.mxu2  ;;  %v9594_v37 = vsel %vm9436_vm3, %v9593_v57, %v9592_v21 }
 0x9ba   : > { %v7972_v51 = vadd.f32 %v15909_v45, %v6018_v61  ;;  %v5378_v47 = vpack.c.bf16 %v5284_v1, %v5282_v4  ;;  %v7261_v28 = vpop.f32.mrf.mxu0 }
 0x9bb   : > { %v8795_v60 = vrot.slane %v8794_v58, 2  ;;  %v9127_v53 = vadd.f32 %v15966_v43, %v8791_v33  ;;  %v16020_v33 = vpop.f32.mrf.mxu1 }
 0x9bc   : > { %v8101_v6 = vadd.f32 %v15915_v31, %v7972_v51  ;;  %10222 = vmatmul.msk.bf16.gmra.mxu3 %vm3042_vm6, %v5378_v47 }
 0x9bd   : > { %v8796_v42 = vmax.f32 %v8794_v58, %v8795_v60  ;;  %v9255_v19 = vmax.f32 %v9127_v53, 0.0 }
 0x9be   : > { %v8799_v41 = vsel %vm3042_vm6, %v8101_v6, -inf }
 0x9bf   : > { %v8797_v56 = vrot.slane %v8796_v42, 1  ;;  %v8800_v9 = vrot.slane %v8799_v41, 4  ;;  %v5843_v30 = vpop.f32.mrf.mxu3  ;;  %v9595_v26 = vrot.slane %v9255_v19, 3 }
 0x9c0   : > { %v6019_v3 = vadd.f32 %v5843_v30, %v16731_v40 }
 0x9c1   : > { %v8798_v45 = vmax.f32 %v8796_v42, %v8797_v56  ;;  %v8801_v27 = vmax.f32 %v8799_v41, %v8800_v9  ;;  %v5287_v5 = vpop.f32.mrf.mxu2  ;;  %v9596_v18 = vsel %vm9439_vm7, %v9595_v26, %v9594_v37  ;;  %v16733_v42 = vld [vmem:[#allocation164_spill] sm:$0xff] }
 0x9c2   : > { %v7973_v15 = vadd.f32 %v15930_v8, %v6019_v3  ;;  %v7263_v4 = vpop.f32.mrf.mxu0 }
 0x9c3   : > { %v8802_v39 = vrot.slane %v8801_v27, 2  ;;  %v9128_v55 = vadd.f32 %v15966_v43, %v8798_v45  ;;  %v7337_v49 = vpack.c.bf16 %v7263_v4, %v7261_v28  ;;  %v16734_v4 = vld [vmem:[#allocation165_spill] sm:$0xff] }
 0x9c4   : > { %v8102_v7 = vadd.f32 %v15915_v31, %v7973_v15 }
 0x9c5   : > { %v8803_v21 = vmax.f32 %v8801_v27, %v8802_v39  ;;  %v9256_v17 = vmax.f32 %v9128_v55, 0.0  ;;  %10363 = vmatmul.msk.bf16.gmra.mxu1 %vm3042_vm6, %v7337_v49  ;;  %v16032_v27 = vpop.f32.mrf.mxu1 }
 0x9c6   : > { %v8806_v24 = vsel %vm3042_vm6, %v8102_v7, -inf }
 0x9c7   : > { %v8804_v0 = vrot.slane %v8803_v21, 1  ;;  %v8807_v12 = vrot.slane %v8806_v24, 4  ;;  %v5845_v54 = vpop.f32.mrf.mxu3  ;;  %v9597_v62 = vrot.slane %v9256_v17, 2 }
 0x9c8   : > { %v6020_v32 = vadd.f32 %v5845_v54, %v16732_v35 }
 0x9c9   : > { %v8808_v8 = vmax.f32 %v8806_v24, %v8807_v12  ;;  %v5289_v57 = vpop.f32.mrf.mxu2  ;;  %v8805_v50 = vmax.f32 %v8803_v21, %v8804_v0  ;;  %v9598_v25 = vsel %vm9442_vm12, %v9597_v62, %v9596_v18 }
 0x9ca   : > { %v7974_v38 = vadd.f32 %v15944_v44, %v6020_v32  ;;  %v5379_v23 = vpack.c.bf16 %v5289_v57, %v5287_v5  ;;  %v7266_v37 = vpop.f32.mrf.mxu0 }
 0x9cb   : > { %v8809_v61 = vrot.slane %v8808_v8, 2  ;;  %v9129_v58 = vadd.f32 %v15966_v43, %v8805_v50 }
 0x9cc   : > { %v8103_v1 = vadd.f32 %v15915_v31, %v7974_v38  ;;  %10223 = vmatmul.msk.bf16.gmra.mxu3 %vm3042_vm6, %v5379_v23 }
 0x9cd   : > { %v9257_v51 = vmax.f32 %v9129_v58, 0.0  ;;  %v8810_v60 = vmax.f32 %v8808_v8, %v8809_v61  ;;  %v16043_v61 = vpop.f32.mrf.mxu1  ;;  %v16735_v58 = vld [vmem:[#allocation167_spill] sm:$0xff] }
 0x9ce   : > { %v8813_v47 = vsel %vm3042_vm6, %v8103_v1, -inf }
 0x9cf   : > { %v8814_v53 = vrot.slane %v8813_v47, 4  ;;  %v5848_v6 = vpop.f32.mrf.mxu3  ;;  %v9599_v28 = vrot.slane %v9257_v51, 1  ;;  %v8811_v30 = vrot.slane %v8810_v60, 1 }
 0x9d0   : > { %v6021_v44 = vadd.f32 %v5848_v6, %v16733_v42 }
 0x9d1   : > { %v8815_v19 = vmax.f32 %v8813_v47, %v8814_v53  ;;  %v5292_v41 = vpop.f32.mrf.mxu2  ;;  %v16028_v56 = vsel %vm9445_vm0, %v9599_v28, %v9598_v25  ;;  %v8812_v15 = vmax.f32 %v8810_v60, %v8811_v30 }
 0x9d2   : > { %v7975_v9 = vadd.f32 %v15960_v16, %v6021_v44  ;;  %v7268_v3 = vpop.f32.mrf.mxu0 }
 0x9d3   : > { %v8816_v26 = vrot.slane %v8815_v19, 2  ;;  %v7338_v5 = vpack.c.bf16 %v7268_v3, %v7266_v37  ;;  %v9130_v12 = vadd.f32 %v15966_v43, %v8812_v15  ;;  %v16736_v3 = vld [vmem:[#allocation168_spill] sm:$0xff] }
 0x9d4   : > { %v8104_v40 = vadd.f32 %v15915_v31, %v7975_v9 }
 0x9d5   : > { %v8817_v45 = vmax.f32 %v8815_v19, %v8816_v26  ;;  %10364 = vmatmul.msk.bf16.gmra.mxu1 %vm3042_vm6, %v7338_v5  ;;  %v9258_v50 = vmax.f32 %v9130_v12, 0.0  ;;  %v16052_v15 = vpop.f32.mrf.mxu1 }
 0x9d6   : > { %v8820_v18 = vsel %vm3042_vm6, %v8104_v40, -inf }
 0x9d7   : > { %v8818_v39 = vrot.slane %v8817_v45, 1  ;;  %v8821_v55 = vrot.slane %v8820_v18, 4  ;;  %v5850_v7 = vpop.f32.mrf.mxu3 }
 0x9d8   : > { %v6022_v21 = vadd.f32 %v5850_v7, %v16734_v4 }
 0x9d9   : > { %v8819_v16 = vmax.f32 %v8817_v45, %v8818_v39  ;;  %v8822_v49 = vmax.f32 %v8820_v18, %v8821_v55  ;;  %v5294_v17 = vpop.f32.mrf.mxu2 }
 0x9da   : > { %v7976_v24 = vadd.f32 %v15978_v59, %v6022_v21  ;;  %v5380_v0 = vpack.c.bf16 %v5294_v17, %v5292_v41 }
 0x9db   : > { %v9131_v54 = vadd.f32 %v15966_v43, %v8819_v16  ;;  %v8823_v62 = vrot.slane %v8822_v49, 2 }
 0x9dc   : > { %v8105_v35 = vadd.f32 %v15915_v31, %v7976_v24  ;;  %10224 = vmatmul.msk.bf16.gmra.mxu3 %vm3042_vm6, %v5380_v0 }
 0x9dd   : > { %v9259_v32 = vmax.f32 %v9131_v54, 0.0  ;;  %v8824_v8 = vmax.f32 %v8822_v49, %v8823_v62 }
 0x9de   : > { %v8827_v57 = vsel %vm3042_vm6, %v8105_v35, -inf }
 0x9df   : > { %v9601_v25 = vrot.slane %v9259_v32, 7  ;;  %v8825_v38 = vrot.slane %v8824_v8, 1  ;;  %v8828_v23 = vrot.slane %v8827_v57, 4  ;;  %v5853_v59 = vpop.f32.mrf.mxu3  ;;  %v16737_v32 = vld [vmem:[#allocation169_spill] sm:$0xff] }
 0x9e0   : > { %v6023_v1 = vadd.f32 %v5853_v59, %v16735_v58 }
 0x9e1   : > { %v8826_v37 = vmax.f32 %v8824_v8, %v8825_v38  ;;  %v8829_v51 = vmax.f32 %v8827_v57, %v8828_v23  ;;  %v5297_v47 = vpop.f32.mrf.mxu2  ;;  %v9602_v60 = vsel %vm9427_vm9, %v9601_v25, %v9258_v50  ;;  %v7271_v4 = vpop.f32.mrf.mxu0 }
 0x9e2   : > { %v7977_v53 = vadd.f32 %v15989_v52, %v6023_v1  ;;  %v16064_v1 = vpop.f32.mrf.mxu1 }
 0x9e3   : > { %v9132_v6 = vadd.f32 %v15966_v43, %v8826_v37  ;;  %v8830_v28 = vrot.slane %v8829_v51, 2 }
 0x9e4   : > { %v8106_v42 = vadd.f32 %v15915_v31, %v7977_v53 }
 0x9e5   : > { %v9260_v44 = vmax.f32 %v9132_v6, 0.0  ;;  %v8831_v19 = vmax.f32 %v8829_v51, %v8830_v28 }
 0x9e6   : > { %v8834_v41 = vsel %vm3042_vm6, %v8106_v42, -inf }
 0x9e7   : > { %v9603_v9 = vrot.slane %v9260_v44, 6  ;;  %v8832_v30 = vrot.slane %v8831_v19, 1  ;;  %v8835_v26 = vrot.slane %v8834_v41, 4  ;;  %v5855_v40 = vpop.f32.mrf.mxu3 }
 0x9e8   : > { %v6024_v45 = vadd.f32 %v5855_v40, %v16736_v3 }
 0x9e9   : > { %v8833_v5 = vmax.f32 %v8831_v19, %v8832_v30  ;;  %v8836_v18 = vmax.f32 %v8834_v41, %v8835_v26  ;;  %v5299_v52 = vpop.f32.mrf.mxu2  ;;  %v9604_v39 = vsel %vm9430_vm13, %v9603_v9, %v9602_v60  ;;  %v7273_v23 = vpop.f32.mrf.mxu0 }
 0x9ea   : > { %v7978_v55 = vadd.f32 %v15998_v29, %v6024_v45  ;;  %v5381_v7 = vpack.c.bf16 %v5299_v52, %v5297_v47  ;;  %v7339_v37 = vpack.c.bf16 %v7273_v23, %v7271_v4 }
 0x9eb   : > { %v9133_v21 = vadd.f32 %v15966_v43, %v8833_v5  ;;  %v8837_v16 = vrot.slane %v8836_v18, 2 }
 0x9ec   : > { %v8107_v49 = vadd.f32 %v15915_v31, %v7978_v55  ;;  %10225 = vmatmul.msk.bf16.gmra.mxu3 %vm3042_vm6, %v5381_v7  ;;  %10365 = vmatmul.msk.bf16.gmra.mxu1 %vm3042_vm6, %v7339_v37 }
 0x9ed   : > { %v9261_v17 = vmax.f32 %v9133_v21, 0.0  ;;  %v8838_v24 = vmax.f32 %v8836_v18, %v8837_v16 }
 0x9ee   : > { %v8841_v0 = vsel %vm3042_vm6, %v8107_v49, -inf }
 0x9ef   : > { %v9605_v12 = vrot.slane %v9261_v17, 5  ;;  %v8839_v54 = vrot.slane %v8838_v24, 1  ;;  %v8842_v62 = vrot.slane %v8841_v0, 4  ;;  %v5858_v35 = vpop.f32.mrf.mxu3  ;;  %v16739_v17 = vld [vmem:[#allocation172_spill] sm:$0xff] }
 0x9f0   : > { %v6025_v8 = vadd.f32 %v5858_v35, %v16737_v32 }
 0x9f1   : > { %v8840_v29 = vmax.f32 %v8838_v24, %v8839_v54  ;;  %v8843_v57 = vmax.f32 %v8841_v0, %v8842_v62  ;;  %v5302_v50 = vpop.f32.mrf.mxu2  ;;  %v9606_v25 = vsel %vm9433_vm15, %v9605_v12, %v9604_v39  ;;  %v16075_v39 = vpop.f32.mrf.mxu1 }
 0x9f2   : > { %v7979_v38 = vadd.f32 %v16009_v11, %v6025_v8  ;;  %v16738_v11 = vld [vmem:[#allocation171_spill] sm:$0xff] }
 0x9f3   : > { %v9134_v59 = vadd.f32 %v15966_v43, %v8840_v29  ;;  %v8844_v58 = vrot.slane %v8843_v57, 2 }
 0x9f4   : > { %v8108_v51 = vadd.f32 %v15915_v31, %v7979_v38 }
 0x9f5   : > { %v9262_v47 = vmax.f32 %v9134_v59, 0.0  ;;  %v8845_v60 = vmax.f32 %v8843_v57, %v8844_v58 }
 0x9f6   : > { %v8848_v53 = vsel %vm3042_vm6, %v8108_v51, -inf }
 0x9f7   : > { %v9607_v6 = vrot.slane %v9262_v47, 4  ;;  %v8846_v28 = vrot.slane %v8845_v60, 1  ;;  %v8849_v42 = vrot.slane %v8848_v53, 4  ;;  %v5860_v44 = vpop.f32.mrf.mxu3 }
 0x9f8   : > { %v6026_v19 = vadd.f32 %v5860_v44, %v16738_v11 }
 0x9f9   : > { %v8847_v41 = vmax.f32 %v8845_v60, %v8846_v28  ;;  %v8850_v9 = vmax.f32 %v8848_v53, %v8849_v42  ;;  %v5304_v30 = vpop.f32.mrf.mxu2  ;;  %v9608_v26 = vsel %vm9436_vm3, %v9607_v6, %v9606_v25  ;;  %v16741_v25 = vld [vmem:[#allocation166_spill] sm:$0xff]  ;;  %v16086_v58 = vpop.f32.mrf.mxu1 }
 0x9fa   : > { %v7980_v40 = vadd.f32 %v16020_v33, %v6026_v19  ;;  %v5382_v3 = vpack.c.bf16 %v5304_v30, %v5302_v50  ;;  %v16740_v50 = vld [vmem:[#allocation174_spill] sm:$0xff] }
 0x9fb   : > { %v8851_v45 = vrot.slane %v8850_v9, 2  ;;  %v9135_v5 = vadd.f32 %v15966_v43, %v8847_v41  ;;  %v4040_v38 = vadd.f32 %v16741_v25, %v16740_v50 }
 0x9fc   : > { %v8109_v18 = vadd.f32 %v15915_v31, %v7980_v40  ;;  %10226 = vmatmul.msk.bf16.gmra.mxu3 %vm3042_vm6, %v5382_v3 }
 0x9fd   : > { %v8852_v52 = vmax.f32 %v8850_v9, %v8851_v45  ;;  %v9263_v55 = vmax.f32 %v9135_v5, 0.0  ;;  %v16742_v5 = vld [vmem:[#allocation175_spill] sm:$0xff] }
 0x9fe   : > { %v8855_v7 = vsel %vm3042_vm6, %v8109_v18, -inf }
 0x9ff   : > { %v8853_v4 = vrot.slane %v8852_v52, 1  ;;  %v8856_v21 = vrot.slane %v8855_v7, 4  ;;  %v5863_v16 = vpop.f32.mrf.mxu3  ;;  %v9609_v49 = vrot.slane %v9263_v55, 3 }
 0xa00   : > { %v6027_v33 = vadd.f32 %v5863_v16, %v16739_v17 }
 0xa01   : > { %v8854_v24 = vmax.f32 %v8852_v52, %v8853_v4  ;;  %v8857_v0 = vmax.f32 %v8855_v7, %v8856_v21  ;;  %v5307_v12 = vpop.f32.mrf.mxu2  ;;  %v9610_v54 = vsel %vm9439_vm7, %v9609_v49, %v9608_v26  ;;  %v16095_v52 = vpop.f32.mrf.mxu1 }
 0xa02   : > { %v7981_v62 = vadd.f32 %v16032_v27, %v6027_v33  ;;  %v16743_v33 = vld [vmem:[#allocation176_spill] sm:$0xff] }
 0xa03   : > { %v8858_v35 = vrot.slane %v8857_v0, 2  ;;  %v9136_v32 = vadd.f32 %v15966_v43, %v8854_v24  ;;  %v16744_v24 = vld [vmem:[#allocation170_spill] sm:$0xff] }
 0xa04   : > { %v8110_v8 = vadd.f32 %v15915_v31, %v7981_v62 }
 0xa05   : > { %v8859_v29 = vmax.f32 %v8857_v0, %v8858_v35  ;;  %v9264_v57 = vmax.f32 %v9136_v32, 0.0  ;;  %v4045_v0 = vadd.f32 %v16744_v24, %v16743_v33 }
 0xa06   : > { %v8862_v23 = vsel %vm3042_vm6, %v8110_v8, -inf }
 0xa07   : > { %v8860_v59 = vrot.slane %v8859_v29, 1  ;;  %v8863_v37 = vrot.slane %v8862_v23, 4  ;;  %v5865_v51 = vpop.f32.mrf.mxu3  ;;  %v9611_v47 = vrot.slane %v9264_v57, 2 }
 0xa08   : > { %v6028_v60 = vadd.f32 %v5865_v51, %v4040_v38 }
 0xa09   : > { %v8864_v27 = vmax.f32 %v8862_v23, %v8863_v37  ;;  %v5309_v53 = vpop.f32.mrf.mxu2  ;;  %v8861_v6 = vmax.f32 %v8859_v29, %v8860_v59  ;;  %v9612_v28 = vsel %vm9442_vm12, %v9611_v47, %v9610_v54  ;;  %v16108_v59 = vpop.f32.mrf.mxu1 }
 0xa0a   : > { %v7982_v42 = vadd.f32 %v16043_v61, %v6028_v60  ;;  %v5383_v44 = vpack.c.bf16 %v5309_v53, %v5307_v12 }
 0xa0b   : > { %v8865_v11 = vrot.slane %v8864_v27, 2  ;;  %v9137_v19 = vadd.f32 %v15966_v43, %v8861_v6 }
 0xa0c   : > { %v8111_v41 = vadd.f32 %v15915_v31, %v7982_v42  ;;  %10227 = vmatmul.msk.bf16.gmra.mxu3 %vm3042_vm6, %v5383_v44  ;;  %v16745_v44 = vld [vmem:[#allocation178_spill] sm:$0xff] }
 0xa0d   : > { %v9265_v9 = vmax.f32 %v9137_v19, 0.0  ;;  %v8866_v26 = vmax.f32 %v8864_v27, %v8865_v11 }
 0xa0e   : > { %v8869_v30 = vsel %vm3042_vm6, %v8111_v41, -inf }
 0xa0f   : > { %v8870_v40 = vrot.slane %v8869_v30, 4  ;;  %v5868_v3 = vpop.f32.mrf.mxu3  ;;  %v9613_v45 = vrot.slane %v9265_v9, 1  ;;  %v8867_v21 = vrot.slane %v8866_v26, 1 }
 0xa10   : > { %v6029_v18 = vadd.f32 %v5868_v3, %v16742_v5 }
 0xa11   : > { %v8871_v61 = vmax.f32 %v8869_v30, %v8870_v40  ;;  %v5312_v55 = vpop.f32.mrf.mxu2  ;;  %v16098_v7 = vsel %vm9445_vm0, %v9613_v45, %v9612_v28  ;;  %v8868_v54 = vmax.f32 %v8866_v26, %v8867_v21 }
 0xa12   : > { %v7983_v4 = vadd.f32 %v16052_v15, %v6029_v18  ;;  %v16118_v18 = vpop.f32.mrf.mxu1 }
 0xa13   : > { %v8872_v16 = vrot.slane %v8871_v61, 2  ;;  %v9138_v38 = vadd.f32 %v15966_v43, %v8868_v54 }
 0xa14   : > { %v8112_v49 = vadd.f32 %v15915_v31, %v7983_v4  ;;  %v16747_v4 = vld [vmem:[#allocation173_spill] sm:$0xff] }
 0xa15   : > { %v8873_v17 = vmax.f32 %v8871_v61, %v8872_v16  ;;  %v9266_v53 = vmax.f32 %v9138_v38, 0.0 }
 0xa16   : > { %v8876_v12 = vsel %vm3042_vm6, %v8112_v49, -inf }
 0xa17   : > { %v8874_v62 = vrot.slane %v8873_v17, 1  ;;  %v8877_v35 = vrot.slane %v8876_v12, 4  ;;  %v5870_v32 = vpop.f32.mrf.mxu3 }
 0xa18   : > { %v6030_v8 = vadd.f32 %v5870_v32, %v4045_v0 }
 0xa19   : > { %v8875_v29 = vmax.f32 %v8873_v17, %v8874_v62  ;;  %v8878_v57 = vmax.f32 %v8876_v12, %v8877_v35  ;;  %v5314_v50 = vpop.f32.mrf.mxu2 }
 0xa1a   : > { %v7984_v15 = vadd.f32 %v16064_v1, %v6030_v8  ;;  %v5384_v25 = vpack.c.bf16 %v5314_v50, %v5312_v55  ;;  %v16746_v55 = vld [vmem:[#allocation179_spill] sm:$0xff] }
 0xa1b   : > { %v9139_v23 = vadd.f32 %v15966_v43, %v8875_v29  ;;  %v8879_v37 = vrot.slane %v8878_v57, 2  ;;  %v4050_v21 = vadd.f32 %v16747_v4, %v16746_v55 }
 0xa1c   : > { %v8113_v51 = vadd.f32 %v15915_v31, %v7984_v15  ;;  %10228 = vmatmul.msk.bf16.gmra.mxu3 %vm3042_vm6, %v5384_v25 }
 0xa1d   : > { %v9267_v47 = vmax.f32 %v9139_v23, 0.0  ;;  %v8880_v60 = vmax.f32 %v8878_v57, %v8879_v37  ;;  %v7839_v23 = vpop.f32.mrf.mxu1 }
 0xa1e   : > { %v8883_v27 = vsel %vm3042_vm6, %v8113_v51, -inf }
 0xa1f   : > { %v9615_v6 = vrot.slane %v9267_v47, 7  ;;  %v8881_v28 = vrot.slane %v8880_v60, 1  ;;  %v8884_v1 = vrot.slane %v8883_v27, 4  ;;  %v5873_v42 = vpop.f32.mrf.mxu3 }
 0xa20   : > { %v6031_v11 = vadd.f32 %v5873_v42, %v16745_v44 }
 0xa21   : > { %v8882_v19 = vmax.f32 %v8880_v60, %v8881_v28  ;;  %v8885_v41 = vmax.f32 %v8883_v27, %v8884_v1  ;;  %v5317_v9 = vpop.f32.mrf.mxu2  ;;  %v9616_v30 = vsel %vm9427_vm9, %v9615_v6, %v9266_v53  ;;  %v16748_v60 = vld [vmem:[#allocation181_spill] sm:$0xff] }
 0xa22   : > { %v7985_v26 = vadd.f32 %v16075_v39, %v6031_v11 }
 0xa23   : > { %v9140_v40 = vadd.f32 %v15966_v43, %v8882_v19  ;;  %v8886_v3 = vrot.slane %v8885_v41, 2 }
 0xa24   : > { %v8114_v45 = vadd.f32 %v15915_v31, %v7985_v26 }
 0xa25   : > { %v9268_v5 = vmax.f32 %v9140_v40, 0.0  ;;  %v8887_v61 = vmax.f32 %v8885_v41, %v8886_v3  ;;  %v16749_v41 = vld [vmem:[#allocation182_spill] sm:$0xff]  ;;  %v7842_v55 = vpop.f32.mrf.mxu1 }
 0xa26   : > { %v8890_v16 = vsel %vm3042_vm6, %v8114_v45, -inf }
 0xa27   : > { %v9617_v49 = vrot.slane %v9268_v5, 6  ;;  %v8888_v17 = vrot.slane %v8887_v61, 1  ;;  %v8891_v33 = vrot.slane %v8890_v16, 4  ;;  %v5875_v24 = vpop.f32.mrf.mxu3 }
 0xa28   : > { %v6032_v0 = vadd.f32 %v5875_v24, %v4050_v21 }
 0xa29   : > { %v8889_v39 = vmax.f32 %v8887_v61, %v8888_v17  ;;  %v8892_v12 = vmax.f32 %v8890_v16, %v8891_v33  ;;  %v5319_v54 = vpop.f32.mrf.mxu2  ;;  %v9618_v62 = vsel %vm9430_vm13, %v9617_v49, %v9616_v30 }
 0xa2a   : > { %v7986_v35 = vadd.f32 %v16086_v58, %v6032_v0  ;;  %v5385_v32 = vpack.c.bf16 %v5319_v54, %v5317_v9  ;;  %v16750_v9 = vld [vmem:[#allocation177_spill] sm:$0xff] }
 0xa2b   : > { %v9141_v8 = vadd.f32 %v15966_v43, %v8889_v39  ;;  %v8893_v29 = vrot.slane %v8892_v12, 2  ;;  %v4055_v30 = vadd.f32 %v16750_v9, %v16749_v41 }
 0xa2c   : > { %v8115_v57 = vadd.f32 %v15915_v31, %v7986_v35  ;;  %10229 = vmatmul.msk.bf16.gmra.mxu3 %vm3042_vm6, %v5385_v32  ;;  %v16751_v32 = vld [vmem:[#allocation183_spill] sm:$0xff] }
 0xa2d   : > { %v9269_v50 = vmax.f32 %v9141_v8, 0.0  ;;  %v8894_v15 = vmax.f32 %v8892_v12, %v8893_v29 }
 0xa2e   : > { %v8897_v25 = vsel %vm3042_vm6, %v8115_v57, -inf }
 0xa2f   : > { %v9619_v38 = vrot.slane %v9269_v50, 5  ;;  %v8895_v37 = vrot.slane %v8894_v15, 1  ;;  %v8898_v51 = vrot.slane %v8897_v25, 4  ;;  %v5878_v47 = vpop.f32.mrf.mxu3 }
 0xa30   : > { %v6033_v27 = vadd.f32 %v5878_v47, %v16748_v60  ;;  %v16752_v60 = vld [vmem:[#allocation185_spill] sm:$0xff] }
 0xa31   : > { %v8896_v58 = vmax.f32 %v8894_v15, %v8895_v37  ;;  %v8899_v53 = vmax.f32 %v8897_v25, %v8898_v51  ;;  %v9620_v6 = vsel %vm9433_vm15, %v9619_v38, %v9618_v62  ;;  %v7844_v15 = vpop.f32.mrf.mxu1 }
 0xa32   : > { %v7987_v28 = vadd.f32 %v16095_v52, %v6033_v27  ;;  %v16753_v27 = vld [vmem:[#allocation180_spill] sm:$0xff] }
 0xa33   : > { %v9142_v1 = vadd.f32 %v15966_v43, %v8896_v58  ;;  %v8900_v42 = vrot.slane %v8899_v53, 2  ;;  %v4060_v58 = vadd.f32 %v16753_v27, %v16752_v60 }
 0xa34   : > { %v8116_v44 = vadd.f32 %v15915_v31, %v7987_v28 }
 0xa35   : > { %v9270_v11 = vmax.f32 %v9142_v1, 0.0  ;;  %v8901_v19 = vmax.f32 %v8899_v53, %v8900_v42 }
 0xa36   : > { %v8904_v26 = vsel %vm3042_vm6, %v8116_v44, -inf }
 0xa37   : > { %v9621_v40 = vrot.slane %v9270_v11, 4  ;;  %v8902_v3 = vrot.slane %v8901_v19, 1  ;;  %v8905_v45 = vrot.slane %v8904_v26, 4  ;;  %v5880_v5 = vpop.f32.mrf.mxu3 }
 0xa38   : > { %v6034_v61 = vadd.f32 %v5880_v5, %v4055_v30 }
 0xa39   : > { %v8903_v4 = vmax.f32 %v8901_v19, %v8902_v3  ;;  %v8906_v52 = vmax.f32 %v8904_v26, %v8905_v45  ;;  %v9622_v21 = vsel %vm9436_vm3, %v9621_v40, %v9620_v6  ;;  %v7847_v40 = vpop.f32.mrf.mxu1 }
 0xa3a   : > { %v7988_v16 = vadd.f32 %v16108_v59, %v6034_v61 }
 0xa3b   : > { %v8907_v49 = vrot.slane %v8906_v52, 2  ;;  %v9143_v17 = vadd.f32 %v15966_v43, %v8903_v4 }
 0xa3c   : > { %v8117_v33 = vadd.f32 %v15915_v31, %v7988_v16 }
 0xa3d   : > { %v8908_v24 = vmax.f32 %v8906_v52, %v8907_v49  ;;  %v9271_v0 = vmax.f32 %v9143_v17, 0.0 }
 0xa3e   : > { %v8911_v39 = vsel %vm3042_vm6, %v8117_v33, -inf }
 0xa3f   : > { %v8909_v12 = vrot.slane %v8908_v24, 1  ;;  %v8912_v54 = vrot.slane %v8911_v39, 4  ;;  %v5883_v62 = vpop.f32.mrf.mxu3  ;;  %v9623_v35 = vrot.slane %v9271_v0, 3 }
 0xa40   : > { %v6035_v8 = vadd.f32 %v5883_v62, %v16751_v32 }
 0xa41   : > { %v8910_v29 = vmax.f32 %v8908_v24, %v8909_v12  ;;  %v8913_v57 = vmax.f32 %v8911_v39, %v8912_v54  ;;  %v9624_v50 = vsel %vm9439_vm7, %v9623_v35, %v9622_v21  ;;  %v16754_v21 = vld [vmem:[#allocation186_spill] sm:$0xff]  ;;  %v16755_v12 = vld [vmem:[#allocation188_spill] sm:$0xff]  ;;  %v7849_v32 = vpop.f32.mrf.mxu1 }
 0xa42   : > { %v7989_v59 = vadd.f32 %v16118_v18, %v6035_v8  ;;  %v16756_v54 = vld [vmem:[#allocation184_spill] sm:$0xff] }
 0xa43   : > { %v8914_v25 = vrot.slane %v8913_v57, 2  ;;  %v9144_v38 = vadd.f32 %v15966_v43, %v8910_v29  ;;  %v4065_v62 = vadd.f32 %v16756_v54, %v16755_v12 }
 0xa44   : > { %v8118_v37 = vadd.f32 %v15915_v31, %v7989_v59 }
 0xa45   : > { %v8915_v51 = vmax.f32 %v8913_v57, %v8914_v25  ;;  %v9272_v47 = vmax.f32 %v9144_v38, 0.0 }
 0xa46   : > { %v8918_v53 = vsel %vm3042_vm6, %v8118_v37, -inf }
 0xa47   : > { %v8916_v6 = vrot.slane %v8915_v51, 1  ;;  %v8919_v28 = vrot.slane %v8918_v53, 4  ;;  %v5885_v1 = vpop.f32.mrf.mxu3  ;;  %v9625_v42 = vrot.slane %v9272_v47, 2  ;;  %v16167_v47 = vld [vmem:[%s16319_s4] sm:$0xff] }
 0xa48   : > { %v6036_v44 = vadd.f32 %v5885_v1, %v4060_v58 }
 0xa49   : > { %v8920_v11 = vmax.f32 %v8918_v53, %v8919_v28  ;;  %v8917_v18 = vmax.f32 %v8915_v51, %v8916_v6  ;;  %v9626_v19 = vsel %vm9442_vm12, %v9625_v42, %v9624_v50 }
 0xa4a   : > { %v7990_v41 = vadd.f32 %v7839_v23, %v6036_v44  ;;  %v16757_v44 = vld [vmem:[#allocation189_spill] sm:$0xff] }
 0xa4b   : > { %v8921_v9 = vrot.slane %v8920_v11, 2  ;;  %v9145_v30 = vadd.f32 %v15966_v43, %v8917_v18  ;;  %v7852_v18 = vpop.f32.mrf.mxu1 }
 0xa4c   : > { %v8119_v26 = vadd.f32 %v15915_v31, %v7990_v41 }
 0xa4d   : > { %v9273_v3 = vmax.f32 %v9145_v30, 0.0  ;;  %v8922_v5 = vmax.f32 %v8920_v11, %v8921_v9 }
 0xa4e   : > { %v8925_v45 = vsel %vm3042_vm6, %v8119_v26, -inf }
 0xa4f   : > { %v8926_v61 = vrot.slane %v8925_v45, 4  ;;  %v5888_v4 = vpop.f32.mrf.mxu3  ;;  %v9627_v52 = vrot.slane %v9273_v3, 1  ;;  %v8923_v33 = vrot.slane %v8922_v5, 1 }
 0xa50   : > { %v6037_v16 = vadd.f32 %v5888_v4, %v16754_v21  ;;  %v16758_v4 = vld [vmem:[#allocation190_spill] sm:$0xff] }
 0xa51   : > { %v8927_v49 = vmax.f32 %v8925_v45, %v8926_v61  ;;  %v16156_v17 = vsel %vm9445_vm0, %v9627_v52, %v9626_v19  ;;  %v8924_v8 = vmax.f32 %v8922_v5, %v8923_v33  ;;  %v16759_v52 = vld [vmem:[#allocation187_spill] sm:$0xff] }
 0xa52   : > { %v7991_v23 = vadd.f32 %v7842_v55, %v6037_v16  ;;  %v4070_v21 = vadd.f32 %v16759_v52, %v16758_v4 }
 0xa53   : > { %v8928_v24 = vrot.slane %v8927_v49, 2  ;;  %v9146_v55 = vadd.f32 %v15966_v43, %v8924_v8 }
 0xa54   : > { %v8120_v0 = vadd.f32 %v15915_v31, %v7991_v23 }
 0xa55   : > { %v8929_v39 = vmax.f32 %v8927_v49, %v8928_v24  ;;  %v9274_v6 = vmax.f32 %v9146_v55, 0.0 }
 0xa56   : > { %v8932_v35 = vsel %vm3042_vm6, %v8120_v0, -inf }
 0xa57   : > { %v8930_v29 = vrot.slane %v8929_v39, 1  ;;  %v8933_v57 = vrot.slane %v8932_v35, 4  ;;  %v5890_v50 = vpop.f32.mrf.mxu3 }
 0xa58   : > { %v6038_v59 = vadd.f32 %v5890_v50, %v4065_v62  ;;  %v7854_v62 = vpop.f32.mrf.mxu1 }
 0xa59   : > { %v8931_v25 = vmax.f32 %v8929_v39, %v8930_v29  ;;  %v8934_v38 = vmax.f32 %v8932_v35, %v8933_v57 }
 0xa5a   : > { %v7992_v37 = vadd.f32 %v7844_v15, %v6038_v59 }
 0xa5b   : > { %v9147_v51 = vadd.f32 %v15966_v43, %v8931_v25  ;;  %v8935_v31 = vrot.slane %v8934_v38, 2 }
 0xa5c   : > { %v8121_v60 = vadd.f32 %v16167_v47, %v7992_v37 }
 0xa5d   : > { %v9275_v27 = vmax.f32 %v9147_v51, 0.0  ;;  %v8936_v58 = vmax.f32 %v8934_v38, %v8935_v31  ;;  %v16760_v51 = vld [vmem:[#allocation192_spill] sm:$0xff] }
 0xa5e   : > { %v8939_v53 = vsel %vm3042_vm6, %v8121_v60, -inf }
 0xa5f   : > { %v9629_v28 = vrot.slane %v9275_v27, 7  ;;  %v8937_v1 = vrot.slane %v8936_v58, 1  ;;  %v8940_v15 = vrot.slane %v8939_v53, 4  ;;  %v5893_v42 = vpop.f32.mrf.mxu3 }
 0xa60   : > { %v6039_v11 = vadd.f32 %v5893_v42, %v16757_v44  ;;  %v16761_v44 = vld [vmem:[#allocation193_spill] sm:$0xff] }
 0xa61   : > { %v8938_v19 = vmax.f32 %v8936_v58, %v8937_v1  ;;  %v8941_v41 = vmax.f32 %v8939_v53, %v8940_v15  ;;  %v9630_v9 = vsel %vm9427_vm9, %v9629_v28, %v9274_v6  ;;  %v7857_v1 = vpop.f32.mrf.mxu1 }
 0xa62   : > { %v7993_v30 = vadd.f32 %v7847_v40, %v6039_v11  ;;  %v16762_v11 = vld [vmem:[#allocation191_spill] sm:$0xff] }
 0xa63   : > { %v9148_v26 = vadd.f32 %v15966_v43, %v8938_v19  ;;  %v8942_v3 = vrot.slane %v8941_v41, 2  ;;  %v4075_v19 = vadd.f32 %v16762_v11, %v16761_v44 }
 0xa64   : > { %v8122_v45 = vadd.f32 %v16167_v47, %v7993_v30 }
 0xa65   : > { %v9276_v5 = vmax.f32 %v9148_v26, 0.0  ;;  %v8943_v61 = vmax.f32 %v8941_v41, %v8942_v3 }
 0xa66   : > { %v8946_v16 = vsel %vm3042_vm6, %v8122_v45, -inf }
 0xa67   : > { %v9631_v49 = vrot.slane %v9276_v5, 6  ;;  %v8944_v23 = vrot.slane %v8943_v61, 1  ;;  %v8947_v33 = vrot.slane %v8946_v16, 4  ;;  %v5895_v24 = vpop.f32.mrf.mxu3 }
 0xa68   : > { %v6040_v0 = vadd.f32 %v5895_v24, %v4070_v21 }
 0xa69   : > { %v8945_v39 = vmax.f32 %v8943_v61, %v8944_v23  ;;  %v8948_v12 = vmax.f32 %v8946_v16, %v8947_v33  ;;  %v9632_v40 = vsel %vm9430_vm13, %v9631_v49, %v9630_v9  ;;  %v7859_v24 = vpop.f32.mrf.mxu1 }
 0xa6a   : > { %v7994_v54 = vadd.f32 %v7849_v32, %v6040_v0 }
 0xa6b   : > { %v9149_v35 = vadd.f32 %v15966_v43, %v8945_v39  ;;  %v8949_v8 = vrot.slane %v8948_v12, 2 }
 0xa6c   : > { %v8123_v29 = vadd.f32 %v16167_v47, %v7994_v54  ;;  %v16763_v54 = vld [vmem:[#allocation195_spill] sm:$0xff] }
 0xa6d   : > { %v9277_v57 = vmax.f32 %v9149_v35, 0.0  ;;  %v8950_v50 = vmax.f32 %v8948_v12, %v8949_v8 }
 0xa6e   : > { %v8953_v59 = vsel %vm3042_vm6, %v8123_v29, -inf }
 0xa6f   : > { %v9633_v25 = vrot.slane %v9277_v57, 5  ;;  %v8951_v38 = vrot.slane %v8950_v50, 1  ;;  %v8954_v37 = vrot.slane %v8953_v59, 4  ;;  %v5898_v55 = vpop.f32.mrf.mxu3 }
 0xa70   : > { %v6041_v31 = vadd.f32 %v5898_v55, %v16760_v51  ;;  %v16764_v55 = vld [vmem:[#allocation196_spill] sm:$0xff]  ;;  %v16765_v51 = vld [vmem:[#allocation194_spill] sm:$0xff] }
 0xa71   : > { %v8952_v60 = vmax.f32 %v8950_v50, %v8951_v38  ;;  %v8955_v27 = vmax.f32 %v8953_v59, %v8954_v37  ;;  %v9634_v32 = vsel %vm9433_vm15, %v9633_v25, %v9632_v40 }
 0xa72   : > { %v7995_v58 = vadd.f32 %v7852_v18, %v6041_v31  ;;  %v4080_v31 = vadd.f32 %v16765_v51, %v16764_v55 }
 0xa73   : > { %v9150_v53 = vadd.f32 %v15966_v43, %v8952_v60  ;;  %v8956_v6 = vrot.slane %v8955_v27, 2 }
 0xa74   : > { %v8124_v28 = vadd.f32 %v16167_v47, %v7995_v58 }
 0xa75   : > { %v9278_v15 = vmax.f32 %v9150_v53, 0.0  ;;  %v8957_v42 = vmax.f32 %v8955_v27, %v8956_v6 }
 0xa76   : > { %v8960_v41 = vsel %vm3042_vm6, %v8124_v28, -inf  ;;  %v7862_v28 = vpop.f32.mrf.mxu1 }
 0xa77   : > { %v9635_v9 = vrot.slane %v9278_v15, 4  ;;  %v8958_v30 = vrot.slane %v8957_v42, 1  ;;  %v8961_v26 = vrot.slane %v8960_v41, 4  ;;  %v5900_v3 = vpop.f32.mrf.mxu3 }
 0xa78   : > { %v6042_v45 = vadd.f32 %v5900_v3, %v4075_v19 }
 0xa79   : > { %v8959_v5 = vmax.f32 %v8957_v42, %v8958_v30  ;;  %v8962_v18 = vmax.f32 %v8960_v41, %v8961_v26  ;;  %v9636_v61 = vsel %vm9436_vm3, %v9635_v9, %v9634_v32 }
 0xa7a   : > { %v7996_v4 = vadd.f32 %v7854_v62, %v6042_v45 }
 0xa7b   : > { %v8963_v52 = vrot.slane %v8962_v18, 2  ;;  %v9151_v21 = vadd.f32 %v15966_v43, %v8959_v5  ;;  %v16198_v43 = vld [vmem:[%s16318_s3] ss:$0 sm:$0xff] }
 0xa7c   : > { %v8125_v16 = vadd.f32 %v16167_v47, %v7996_v4 }
 0xa7d   : > { %v8964_v49 = vmax.f32 %v8962_v18, %v8963_v52  ;;  %v9279_v23 = vmax.f32 %v9151_v21, 0.0  ;;  %v16766_v18 = vld [vmem:[#allocation198_spill] sm:$0xff] }
 0xa7e   : > { %v8967_v33 = vsel %vm3042_vm6, %v8125_v16, -inf  ;;  %v7864_v16 = vpop.f32.mrf.mxu1 }
 0xa7f   : > { %v8965_v0 = vrot.slane %v8964_v49, 1  ;;  %v8968_v39 = vrot.slane %v8967_v33, 4  ;;  %v5903_v12 = vpop.f32.mrf.mxu3  ;;  %v9637_v40 = vrot.slane %v9279_v23, 3 }
 0xa80   : > { %v6043_v35 = vadd.f32 %v5903_v12, %v16763_v54 }
 0xa81   : > { %v8966_v8 = vmax.f32 %v8964_v49, %v8965_v0  ;;  %v8969_v29 = vmax.f32 %v8967_v33, %v8968_v39  ;;  %v9638_v62 = vsel %vm9439_vm7, %v9637_v40, %v9636_v61  ;;  %v16767_v0 = vld [vmem:[#allocation199_spill] sm:$0xff]  ;;  %v16768_v39 = vld [vmem:[#allocation197_spill] sm:$0xff] }
 0xa82   : > { %v7997_v57 = vadd.f32 %v7857_v1, %v6043_v35  ;;  %v4085_v12 = vadd.f32 %v16768_v39, %v16767_v0 }
 0xa83   : > { %v8970_v50 = vrot.slane %v8969_v29, 2  ;;  %v9152_v59 = vadd.f32 %v16198_v43, %v8966_v8 }
 0xa84   : > { %v8126_v25 = vadd.f32 %v16167_v47, %v7997_v57 }
 0xa85   : > { %v8971_v38 = vmax.f32 %v8969_v29, %v8970_v50  ;;  %v9280_v37 = vmax.f32 %v9152_v59, 0.0 }
 0xa86   : > { %v8974_v60 = vsel %vm3042_vm6, %v8126_v25, -inf  ;;  %v7867_v51 = vpop.f32.mrf.mxu1 }
 0xa87   : > { %v8972_v27 = vrot.slane %v8971_v38, 1  ;;  %v8975_v32 = vrot.slane %v8974_v60, 4  ;;  %v5905_v58 = vpop.f32.mrf.mxu3  ;;  %v9639_v53 = vrot.slane %v9280_v37, 2 }
 0xa88   : > { %v6044_v6 = vadd.f32 %v5905_v58, %v4080_v31 }
 0xa89   : > { %v8976_v1 = vmax.f32 %v8974_v60, %v8975_v32  ;;  %v8973_v15 = vmax.f32 %v8971_v38, %v8972_v27  ;;  %v9640_v42 = vsel %vm9442_vm12, %v9639_v53, %v9638_v62 }
 0xa8a   : > { %v7998_v44 = vadd.f32 %v7859_v24, %v6044_v6 }
 0xa8b   : > { %v8977_v11 = vrot.slane %v8976_v1, 2  ;;  %v9153_v19 = vadd.f32 %v16198_v43, %v8973_v15 }
 0xa8c   : > { %v8127_v41 = vadd.f32 %v16167_v47, %v7998_v44 }
 0xa8d   : > { %v9281_v9 = vmax.f32 %v9153_v19, 0.0  ;;  %v8978_v26 = vmax.f32 %v8976_v1, %v8977_v11  ;;  %v16769_v1 = vld [vmem:[#allocation200_spill] sm:$0xff] }
 0xa8e   : > { %v8981_v30 = vsel %vm3042_vm6, %v8127_v41, -inf }
 0xa8f   : > { %v8982_v3 = vrot.slane %v8981_v30, 4  ;;  %v5908_v45 = vpop.f32.mrf.mxu3  ;;  %v9641_v5 = vrot.slane %v9281_v9, 1  ;;  %v8979_v49 = vrot.slane %v8978_v26, 1 }
 0xa90   : > { %v6045_v61 = vadd.f32 %v5908_v45, %v16766_v18  ;;  %v16770_v45 = vld [vmem:[#allocation202_spill] sm:$0xff] }
 0xa91   : > { %v8983_v4 = vmax.f32 %v8981_v30, %v8982_v3  ;;  %v16211_v52 = vsel %vm9445_vm0, %v9641_v5, %v9640_v42  ;;  %v8980_v54 = vmax.f32 %v8978_v26, %v8979_v49  ;;  %v16771_v5 = vld [vmem:[#allocation201_spill] sm:$0xff] }
 0xa92   : > { %v7999_v21 = vadd.f32 %v7862_v28, %v6045_v61  ;;  %v4090_v18 = vadd.f32 %v16771_v5, %v16770_v45 }
 0xa93   : > { %v8984_v23 = vrot.slane %v8983_v4, 2  ;;  %v9154_v25 = vadd.f32 %v16198_v43, %v8980_v54 }
 0xa94   : > { %v8128_v33 = vadd.f32 %v16167_v47, %v7999_v21 }
 0xa95   : > { %v8985_v24 = vmax.f32 %v8983_v4, %v8984_v23  ;;  %v9282_v32 = vmax.f32 %v9154_v25, 0.0  ;;  %v7869_v4 = vpop.f32.mrf.mxu1 }
 0xa96   : > { %v8988_v40 = vsel %vm3042_vm6, %v8128_v33, -inf }
 0xa97   : > { %v8986_v35 = vrot.slane %v8985_v24, 1  ;;  %v8989_v8 = vrot.slane %v8988_v40, 4  ;;  %v5910_v29 = vpop.f32.mrf.mxu3 }
 0xa98   : > { %v6046_v62 = vadd.f32 %v5910_v29, %v4085_v12 }
 0xa99   : > { %v8987_v57 = vmax.f32 %v8985_v24, %v8986_v35  ;;  %v8990_v50 = vmax.f32 %v8988_v40, %v8989_v8 }
 0xa9a   : > { %v8000_v59 = vadd.f32 %v7864_v16, %v6046_v62 }
 0xa9b   : > { %v9155_v38 = vadd.f32 %v16198_v43, %v8987_v57  ;;  %v8991_v37 = vrot.slane %v8990_v50, 2 }
 0xa9c   : > { %v8129_v55 = vadd.f32 %v16167_v47, %v8000_v59 }
 0xa9d   : > { %v9283_v31 = vmax.f32 %v9155_v38, 0.0  ;;  %v8992_v60 = vmax.f32 %v8990_v50, %v8991_v37  ;;  %v7872_v57 = vpop.f32.mrf.mxu1  ;;  %v16772_v37 = vld [vmem:[#allocation203_spill] sm:$0xff] }
 0xa9e   : > { %v8995_v27 = vsel %vm3042_vm6, %v8129_v55, -inf }
 0xa9f   : > { %v9643_v58 = vrot.slane %v9283_v31, 7  ;;  %v8993_v53 = vrot.slane %v8992_v60, 1  ;;  %v8996_v6 = vrot.slane %v8995_v27, 4  ;;  %v5913_v28 = vpop.f32.mrf.mxu3 }
 0xaa0   : > { %v6047_v15 = vadd.f32 %v5913_v28, %v16769_v1  ;;  %v16773_v1 = vld [vmem:[#allocation204_spill] sm:$0xff] }
 0xaa1   : > { %v9644_v42 = vsel %vm9427_vm9, %v9643_v58, %v9282_v32  ;;  %v8994_v44 = vmax.f32 %v8992_v60, %v8993_v53  ;;  %v8997_v11 = vmax.f32 %v8995_v27, %v8996_v6 }
 0xaa2   : > { %v8001_v19 = vadd.f32 %v7867_v51, %v6047_v15  ;;  %v16774_v15 = vld [vmem:[#allocation205_spill] sm:$0xff] }
 0xaa3   : > { %v9156_v41 = vadd.f32 %v16198_v43, %v8994_v44  ;;  %v8998_v9 = vrot.slane %v8997_v11, 2 }
 0xaa4   : > { %v8130_v30 = vadd.f32 %v16167_v47, %v8001_v19 }
 0xaa5   : > { %v9284_v26 = vmax.f32 %v9156_v41, 0.0  ;;  %v8999_v3 = vmax.f32 %v8997_v11, %v8998_v9 }
 0xaa6   : > { %v9002_v61 = vsel %vm3042_vm6, %v8130_v30, -inf }
 0xaa7   : > { %v9645_v21 = vrot.slane %v9284_v26, 6  ;;  %v9000_v16 = vrot.slane %v8999_v3, 1  ;;  %v9003_v49 = vrot.slane %v9002_v61, 4  ;;  %v5915_v23 = vpop.f32.mrf.mxu3  ;;  %v7874_v26 = vpop.f32.mrf.mxu1 }
 0xaa8   : > { %v6048_v33 = vadd.f32 %v5915_v23, %v4090_v18 }
 0xaa9   : > { %v9001_v24 = vmax.f32 %v8999_v3, %v9000_v16  ;;  %v9004_v0 = vmax.f32 %v9002_v61, %v9003_v49  ;;  %v9646_v39 = vsel %vm9430_vm13, %v9645_v21, %v9644_v42  ;;  %v4095_v42 = vadd.f32 %v16774_v15, %v16773_v1 }
 0xaaa   : > { %v8002_v12 = vadd.f32 %v7869_v4, %v6048_v33 }
 0xaab   : > { %v9157_v40 = vadd.f32 %v16198_v43, %v9001_v24  ;;  %v9005_v54 = vrot.slane %v9004_v0, 2 }
 0xaac   : > { %v8131_v35 = vadd.f32 %v16167_v47, %v8002_v12 }
 0xaad   : > { %v9285_v8 = vmax.f32 %v9157_v40, 0.0  ;;  %v9006_v29 = vmax.f32 %v9004_v0, %v9005_v54 }
 0xaae   : > { %v9009_v62 = vsel %vm3042_vm6, %v8131_v35, -inf }
 0xaaf   : > { %v9647_v50 = vrot.slane %v9285_v8, 5  ;;  %v9007_v59 = vrot.slane %v9006_v29, 1  ;;  %v9010_v25 = vrot.slane %v9009_v62, 4  ;;  %v5918_v38 = vpop.f32.mrf.mxu3 }
 0xab0   : > { %v6049_v55 = vadd.f32 %v5918_v38, %v16772_v37 }
 0xab1   : > { %v9008_v51 = vmax.f32 %v9006_v29, %v9007_v59  ;;  %v9011_v31 = vmax.f32 %v9009_v62, %v9010_v25  ;;  %v9648_v60 = vsel %vm9433_vm15, %v9647_v50, %v9646_v39 }
 0xab2   : > { %v8003_v27 = vadd.f32 %v7872_v57, %v6049_v55 }
 0xab3   : > { %v9158_v32 = vadd.f32 %v16198_v43, %v9008_v51  ;;  %v9012_v58 = vrot.slane %v9011_v31, 2 }
 0xab4   : > { %v8132_v53 = vadd.f32 %v16167_v47, %v8003_v27 }
 0xab5   : > { %v9286_v6 = vmax.f32 %v9158_v32, 0.0  ;;  %v9013_v28 = vmax.f32 %v9011_v31, %v9012_v58 }
 0xab6   : > { %v9016_v44 = vsel %vm3042_vm6, %v8132_v53, -inf }
 0xab7   : > { %v9649_v11 = vrot.slane %v9286_v6, 4  ;;  %v9014_v19 = vrot.slane %v9013_v28, 1  ;;  %v9017_v41 = vrot.slane %v9016_v44, 4  ;;  %v5920_v9 = vpop.f32.mrf.mxu3 }
 0xab8   : > { %v6050_v30 = vadd.f32 %v5920_v9, %v4095_v42 }
 0xab9   : > { %v9015_v3 = vmax.f32 %v9013_v28, %v9014_v19  ;;  %v9018_v45 = vmax.f32 %v9016_v44, %v9017_v41  ;;  %v9650_v5 = vsel %vm9436_vm3, %v9649_v11, %v9648_v60 }
 0xaba   : > { %v8004_v18 = vadd.f32 %v7874_v26, %v6050_v30 }
 0xabb   : > { %v9159_v61 = vadd.f32 %v16198_v43, %v9015_v3  ;;  %v9019_v4 = vrot.slane %v9018_v45, 2 }
 0xabc   : > { %v8133_v21 = vadd.f32 %v16167_v47, %v8004_v18 }
 0xabd   : > { %v9287_v16 = vmax.f32 %v9159_v61, 0.0  ;;  %v9020_v49 = vmax.f32 %v9018_v45, %v9019_v4 }
 0xabe   : > { %v9023_v23 = vsel %vm3042_vm6, %v8133_v21, -inf }
 0xabf   : > { %v9651_v33 = vrot.slane %v9287_v16, 3  ;;  %v9021_v24 = vrot.slane %v9020_v49, 1  ;;  %v9024_v0 = vrot.slane %v9023_v23, 4 }
 0xac1   : > { %v9022_v39 = vmax.f32 %v9020_v49, %v9021_v24  ;;  %v9025_v12 = vmax.f32 %v9023_v23, %v9024_v0  ;;  %v9652_v40 = vsel %vm9439_vm7, %v9651_v33, %v9650_v5 }
 0xac3   : > { %v9026_v54 = vrot.slane %v9025_v12, 2  ;;  %v9160_v35 = vadd.f32 %v16198_v43, %v9022_v39 }
 0xac5   : > { %v9027_v8 = vmax.f32 %v9025_v12, %v9026_v54  ;;  %v9288_v29 = vmax.f32 %v9160_v35, 0.0 }
 0xac7   : > { %v9028_v62 = vrot.slane %v9027_v8, 1  ;;  %v9653_v57 = vrot.slane %v9288_v29, 2 }
 0xac9   : > { %v9029_v50 = vmax.f32 %v9027_v8, %v9028_v62  ;;  %v9654_v47 = vsel %vm9442_vm12, %v9653_v57, %v9652_v40 }
 0xacb   : > { %v9161_v59 = vadd.f32 %v16198_v43, %v9029_v50  ;;  %v9291_v43 = vld [vmem:[#allocation2] sm:$0x1] }
 0xacc   : > { %9294 = vperm.xlu1 %10673, %v9291_v43  }
 0xacd   : > { %v9289_v25 = vmax.f32 %v9161_v59, 0.0 }
 0xacf   : > { %v9655_v38 = vrot.slane %v9289_v25, 1 }
 0xad1   : > { %v9656_v37 = vsel %vm9445_vm0, %v9655_v38, %v9654_v47 }
 0xad2   : > { %10366 = vmatpush.xpose.msk.msra.mxu2 %vm3042_vm6, %v9656_v37 }
 0xad6   : > { %10367 = vmatpush.xpose.msk.msra.mxu2 %vm3042_vm6, %v16211_v52 }
 0xada   : > { %10368 = vmatpush.xpose.msk.msra.mxu2 %vm3042_vm6, %v16156_v17 }
 0xade   : > { %10369 = vmatpush.xpose.msk.msra.mxu2 %vm3042_vm6, %v16098_v7 }
 0xae2   : > { %10370 = vmatpush.xpose.msk.msra.mxu2 %vm3042_vm6, %v16028_v56 }
 0xae6   : > { %10371 = vmatpush.xpose.msk.msra.mxu2 %vm3042_vm6, %v15948_v36 }
 0xaea   : > { %10372 = vmatpush.xpose.msk.msra.mxu2 %vm3042_vm6, %v15838_v10 }
 0xaee   : > { %10373 = vmatpush.xpose.msk.msra.mxu2 %vm3042_vm6, %v15699_v63 }
 0xaf2   : > { %10374 = vmatpush.xpose.msk.msra.mxu2 %vm3042_vm6, %v15541_v22 }
 0xaf6   : > { %10375 = vmatpush.xpose.msk.msra.mxu2 %vm3042_vm6, %v15393_v2 }
 0xafa   : > { %10376 = vmatpush.xpose.msk.msra.mxu2 %vm3042_vm6, %v15235_v48  ;;  %v9290_v48 = vld [vmem:[%s16320_s5] sm:$0x1] }
 0xafe   : > { %10377 = vmatpush.xpose.msk.msra.mxu2 %vm3042_vm6, %v15079_v34 }
 0xb02   : > { %10378 = vmatpush.xpose.msk.msra.mxu2 %vm3042_vm6, %v14909_v46 }
 0xb06   : > { %10379 = vmatpush.xpose.msk.msra.mxu2 %vm3042_vm6, %v14733_v13 }
 0xb0a   : > { %10380 = vmatpush.xpose.msk.msra.mxu2 %vm3042_vm6, %v14560_v14 }
 0xb0e   : > { %10381 = vmatpush.xpose.msk.msra.mxu2 %vm3042_vm6, %v14391_v20 }
 0xb11   : > { %10382 = vmatmul.msk.f32.vlgmr.msra.gmra.mxu2 %vm3042_vm6, %v9290_v48 }
 0xb3e   : > { %v9295_v34 = vpop.permute.xlu1 %9294 }
 0xb3f   : > { %v9297_v2 = vperm.slane %v9295_v34, 0 }
 0xb94   : > { %v9709_v46 = vpop.f32.mrf.mxu2 }
 0xb95   : > { %v9710_v22 = vadd.f32 %v9709_v46, %v9297_v2 }
 0xb97   : > { %v10383_v63 = vmul.f32 -1.442695, %v9710_v22 }
 0xb99   : > { %10676 = vpow2.f32 %v10383_v63 }
 0xb9f   : > { %v10677_v13 = vpop.eup %10676 }
 0xba0   : > { %v9715_v10 = vadd.f32 1.0, %v10677_v13 }
 0xba2   : > { %10678 = vrcp.f32 %v9715_v10  ;;  %v9727_v56 = vand.u32 2147483648, %v9715_v10  ;;  %v9725_v17 = vand.u32 2147483647, %v9715_v10  ;;  %vm9721_vm6 = vweird.f32 %v9715_v10 }
 0xba4   : > { %v9728_v55 = vor.u32 1.1754944e-38, %v9727_v56  ;;  %vm9726_vm13 = vcmp.eq.f32.partialorder %v9725_v17, 8.507059e+37 }
 0xba8   : > { %v10679_v14 = vpop.eup %10678 }
 0xba9   : > { %v9717_v36 = vmul.f32 %v10679_v14, %v9715_v10  ;;  %vm9722_vm2 = vweird.f32 %v10679_v14 }
 0xbaa   : > { %vm9723_vm9 = vmor %vm9721_vm6, %vm9722_vm2 }
 0xbab   : > { %v9718_v20 = vsub.f32 1.0, %v9717_v36 }
 0xbad   : > { %v9719_v7 = vmul.f32 %v10679_v14, %v9718_v20 }
 0xbaf   : > { %v9720_v52 = vadd.f32 %v10679_v14, %v9719_v7 }
 0xbb1   : > { %v9724_v51 = vsel %vm9723_vm9, %v10679_v14, %v9720_v52 }
 0xbb2   : > { %v9729_v31 = vsel %vm9726_vm13, %v9728_v55, %v9724_v51 }
 0xbb3   : > { %9731 = vst [vmem:[%s273_s19] sm:$0x1] %v9729_v31 }
 0xbb4   : > { %10885 = shalt.err (!%p10882_p3)
}
 0xbb5   : > { %10398 = dma.vmem_to_hbm [thread:$0]  (%p11008_p5), %s9744_s20, 16, %s9746_s21, %s9733_s22  }
 0xbb6 PF: > { %p10404_p4 = scmp.ge.s32.totalorder %s10920_s29, 2  ;;  %s9757_s10 = sand.u32 1, %s10908_s26  }
 0xbb7   : > { %s9758_s14 = scalar_lea.sflag [#allocation4], %s9757_s10 }
 0xbb8   : > { %p10401_p7 = pnand %p10404_p4, %p11012_p6 }
 0xbba   : > { %p10402_p8 = pneg %p10401_p7 }
 0xbbc   : > { %10903 = dma.done.wait (%p10402_p8), %s9758_s14, 16  }
 0xbbd   : > { %10905 = vsyncadd (%p10402_p8), %s9758_s14, 4294967280  ;;  %p19_p9 = scmp.ge.s32.totalorder %s10995_s8, 4   ;;  %s16775_s26 = smov %s10912_s27 }
 0xbbe   : > { %s16776_s27 = smov %s10916_s28  ;;  %s16777_s28 = smov %s11006_s11 }
 0xbbf   : > { %s16778_s29 = smov %s10995_s8  ;;  %21 = sbr.rel (!%p19_p9) target bundleno = 6 (0x6), region = 83 }
 0xbc4   :  { %9763 = vsyncpa [#allocation4], 1 }
 0xbc5   :  { %9765 = vsyncpa [#allocation4 + $0x1], 1 }

</bundles_post_ra>
